<compile_context>
chip_gen: v6e
topology: v6e:2x2x1
jax: 0.10.0
libtpu: 0.0.40
codegen_flags: <defaults>
</compile_context>

<pallas_src>
import functools

import jax
import jax.numpy as jnp
from jax.experimental import pallas as pl
from jax.experimental.pallas import tpu as pltpu


def _round_up(x, m):
    return ((x + m - 1) // m) * m


class _Geom:
    """Static geometry: conv(1->32,k5,s2) -> conv(32->32,k3) -> maxpool(2)."""

    def __init__(self, input_shape):
        D, H, W = input_shape
        self.o1 = ((D - 5) // 2 + 1, (H - 5) // 2 + 1, (W - 5) // 2 + 1)
        assert all(o >= 3 for o in self.o1), "input too small for conv1+conv2"
        self.n1 = self.o1[0] * self.o1[1] * self.o1[2]   # conv1 output rows (valid)
        self.S1D = self.o1[1] * self.o1[2]               # row strides on the o1 grid
        self.S1H = self.o1[2]
        self.o2 = tuple(o - 2 for o in self.o1)          # conv2 output extent
        self.po = tuple(o // 2 for o in self.o2)         # pool output extent
        assert all(p >= 1 for p in self.po), "input too small for maxpool(2)"
        self.npool = self.po[0] * self.po[1] * self.po[2]
        self.dim_feat = 32 * self.npool                  # fc1 input features
        # conv2 tap shifts live on the o1 row grid (row = d*S1D + h*S1H + w)
        self.max_shift = 2 * self.S1D + 2 * self.S1H + 2
        # conv2 rows actually read by the pool
        self.pool_bases = [2 * pd * self.S1D + 2 * ph * self.S1H + 2 * pw
                           for pd in range(self.po[0])
                           for ph in range(self.po[1])
                           for pw in range(self.po[2])]
        r_max = self.pool_bases[-1] + self.S1D + self.S1H + 1
        self.R2 = _round_up(r_max + 1, 8)                # conv2 rows computed (trimmed)
        # conv1 activation rows incl. zero padding so every shifted im2col read stays
        # in bounds; rows >= n1 are zeros and only feed conv2 rows the pool never reads.
        self.R1p = _round_up(max(self.n1, self.R2 + self.max_shift), 8)
        # Guard the "garbage rows never consumed / never OOB" invariants so a future
        # input_shape change cannot silently read junk:
        assert max(self.pool_bases) + self.S1D + self.S1H + 1 < self.R2
        assert self.R2 - 1 + self.max_shift < self.R1p
        assert self.R1p >= self.n1


# ---------------------------------------------------------------------------
# Fused kernel: conv1 + relu + conv2 + relu + maxpool + fc1 + relu + fc2
# ---------------------------------------------------------------------------
def _voxnet_kernel(xp_ref, w1_ref, b1_ref, w2_ref, b2_ref,
                   wf1_ref, bf1_ref, wf2_ref, bf2_ref,
                   out_ref, a1_ref, lhs2_ref, a2_ref, *, g, b_tile):
    f32, bf16 = jnp.float32, jnp.bfloat16

    # ---- conv1 (5x5x5, stride 2) + bias + ReLU: ONE lane-dense matmul ----------
    xp = xp_ref[...].reshape(b_tile * g.n1, 128)          # host-side im2col, bf16
    h1 = jnp.dot(xp, w1_ref[...], preferred_element_type=f32)
    h1 = jnp.maximum(h1 + b1_ref[...], 0.0)
    a1_ref[:, pl.ds(0, g.n1), :] = h1.reshape(b_tile, g.n1, 32).astype(bf16)
    if g.R1p > g.n1:                                      # zero the pad rows
        a1_ref[:, pl.ds(g.n1, g.R1p - g.n1), :] = jnp.zeros(
            (b_tile, g.R1p - g.n1, 32), bf16)

    # ---- conv2 (3x3x3) + bias + ReLU: big-K im2col (K = 27*32 = 864) + ONE dot --
    for t in range(27):                                   # static tap unroll
        qd, qh, qw = t // 9, (t // 3) % 3, t % 3
        shift = qd * g.S1D + qh * g.S1H + qw
        lhs2_ref[:, :, t * 32:(t + 1) * 32] = a1_ref[:, pl.ds(shift, g.R2), :]
    h2 = jnp.dot(lhs2_ref[...].reshape(b_tile * g.R2, 27 * 32), w2_ref[...],
                 preferred_element_type=f32)
    h2 = jnp.maximum(h2 + b2_ref[...], 0.0)
    a2_ref[...] = h2.reshape(b_tile, g.R2, 32).astype(bf16)

    # ---- MaxPool3d(2): pure-VPU pairwise maxima, gathered into (B, 32*npool) ----
    feats = []
    for base in g.pool_bases:
        v = a2_ref[:, pl.ds(base, 1), :]                  # (B, 1, 32)
        for (i, j, k) in ((0, 0, 1), (0, 1, 0), (0, 1, 1),
                          (1, 0, 0), (1, 0, 1), (1, 1, 0), (1, 1, 1)):
            v = jnp.maximum(
                v, a2_ref[:, pl.ds(base + i * g.S1D + j * g.S1H + k, 1), :])
        feats.append(v)
    pooled = jnp.concatenate(feats, axis=-1).reshape(b_tile, g.dim_feat)

    # ---- fc1 + ReLU + fc2 (single lane-dense matmuls, 128-padded fc2) -----------
    y1 = jnp.dot(pooled, wf1_ref[...], preferred_element_type=f32) + bf1_ref[...]
    y1 = jnp.maximum(y1, 0.0)
    y2 = jnp.dot(y1.astype(bf16), wf2_ref[...],
                 preferred_element_type=f32) + bf2_ref[...]
    out_ref[0] = y2


# ---------------------------------------------------------------------------
# Parameter construction / one-time layout preparation
# ---------------------------------------------------------------------------
def init_voxnet_params(key, n_classes=2, input_shape=(16, 16, 16)):
    """PyTorch-layout parameters (Conv3d: (Cout,Cin,kd,kh,kw); Linear: (out,in))."""
    g = _Geom(input_shape)
    ks = jax.random.split(key, 8)
    s = 0.05
    return {
        "w1": s * jax.random.normal(ks[0], (32, 1, 5, 5, 5), jnp.float32),
        "b1": s * jax.random.normal(ks[1], (32,), jnp.float32),
        "w2": s * jax.random.normal(ks[2], (32, 32, 3, 3, 3), jnp.float32),
        "b2": s * jax.random.normal(ks[3], (32,), jnp.float32),
        "wf1": s * jax.random.normal(ks[4], (128, g.dim_feat), jnp.float32),
        "bf1": s * jax.random.normal(ks[5], (128,), jnp.float32),
        "wf2": s * jax.random.normal(ks[6], (n_classes, 128), jnp.float32),
        "bf2": s * jax.random.normal(ks[7], (n_classes,), jnp.float32),
    }


def prepare_voxnet_params(params, *, input_shape=(16, 16, 16), n_classes=2):
    """One-time conversion of PyTorch-layout params into kernel-ready layouts."""
    g = _Geom(input_shape)
    assert n_classes <= 128
    # conv1: (32,1,5,5,5) -> (125, 32) with K flattened as kd*25+kh*5+kw -> pad K to 128
    w1 = params["w1"].reshape(32, 125).T
    w1 = jnp.pad(w1, ((0, 3), (0, 0)))
    # conv2: (32,32,3,3,3) -> (qd,qh,qw,cin,cout) -> (864, 32), K index = t*32 + cin
    w2 = jnp.transpose(params["w2"], (2, 3, 4, 1, 0)).reshape(27 * 32, 32)
    # fc1: PyTorch flatten order c*npool + m  ->  rows ordered m*32 + c -> (dim_feat,128)
    wf1 = params["wf1"].reshape(128, 32, g.npool)
    wf1 = jnp.transpose(wf1, (2, 1, 0)).reshape(g.dim_feat, 128)
    # fc2: (n_classes, 128) -> lane-dense padded (128, 128)
    wf2 = jnp.zeros((128, 128), jnp.float32).at[:, :n_classes].set(params["wf2"].T)
    bf2 = jnp.zeros((1, 128), jnp.float32).at[0, :n_classes].set(params["bf2"])
    return {
        "w1": w1.astype(jnp.bfloat16),
        "b1": params["b1"].reshape(1, 32).astype(jnp.float32),
        "w2": w2.astype(jnp.bfloat16),
        "b2": params["b2"].reshape(1, 32).astype(jnp.float32),
        "wf1": wf1.astype(jnp.bfloat16),
        "bf1": params["bf1"].reshape(1, 128).astype(jnp.float32),
        "wf2": wf2.astype(jnp.bfloat16),
        "bf2": bf2,
    }


# ---------------------------------------------------------------------------
# Forward
# ---------------------------------------------------------------------------
def voxnet_forward(x_ncdhw, kparams, *, input_shape, n_classes, b_tile=None):
    g = _Geom(input_shape)
    N = x_ncdhw.shape[0]
    D, H, W = input_shape
    assert x_ncdhw.shape == (N, 1) + tuple(input_shape)
    assert n_classes <= 128

    # Host-side im2col for conv1 (stride 2, k=5): lane-dense (N, n1, 125->128) bf16.
    # Row index = od*S1D + oh*S1H + ow, patch flattened as kd*25 + kh*5 + kw.
    xs = x_ncdhw.reshape(N, D, H, W).astype(jnp.float32)
    cols = []
    for kd in range(5):
        for kh in range(5):
            for kw in range(5):
                cols.append(xs[:, kd:kd + 2 * g.o1[0] - 1:2,
                                  kh:kh + 2 * g.o1[1] - 1:2,
                                  kw:kw + 2 * g.o1[2] - 1:2])
    patches = jnp.stack(cols, axis=-1).reshape(N, g.n1, 125)
    patches = jnp.pad(patches, ((0, 0), (0, 0), (0, 3))).astype(jnp.bfloat16)

    # Batch tiling: fold B_T examples into the matmul M dim; keep the grid >= 2 steps.
    if b_tile is None:
        b_tile = max(1, min(8, N // 2))
    num_tiles = -(-N // b_tile)
    padded_n = num_tiles * b_tile
    if padded_n != N:
        patches = jnp.pad(patches, ((0, padded_n - N), (0, 0), (0, 0)))

    kernel = functools.partial(_voxnet_kernel, g=g, b_tile=b_tile)
    flops = 2 * padded_n * (g.n1 * 128 * 32 + g.R2 * 864 * 32
                            + g.dim_feat * 128 + 128 * 128)
    bytes_accessed = int(patches.size * 2 + padded_n * 128 * 4
                         + sum(int(v.size) * v.dtype.itemsize
                               for v in kparams.values()))

    out = pl.pallas_call(
        kernel,
        out_shape=jax.ShapeDtypeStruct((num_tiles, b_tile, 128), jnp.float32),
        grid_spec=pltpu.PrefetchScalarGridSpec(
            num_scalar_prefetch=0,
            grid=(num_tiles,),
            in_specs=[
                pl.BlockSpec((b_tile, g.n1, 128), lambda i: (i, 0, 0)),   # im2col input
                pl.BlockSpec((128, 32), lambda i: (0, 0)),                # conv1 W
                pl.BlockSpec((1, 32), lambda i: (0, 0)),                  # conv1 b
                pl.BlockSpec((27 * 32, 32), lambda i: (0, 0)),            # conv2 W
                pl.BlockSpec((1, 32), lambda i: (0, 0)),                  # conv2 b
                pl.BlockSpec((g.dim_feat, 128), lambda i: (0, 0)),        # fc1 W
                pl.BlockSpec((1, 128), lambda i: (0, 0)),                 # fc1 b
                pl.BlockSpec((128, 128), lambda i: (0, 0)),               # fc2 W (pad)
                pl.BlockSpec((1, 128), lambda i: (0, 0)),                 # fc2 b (pad)
            ],
            out_specs=pl.BlockSpec((1, b_tile, 128), lambda i: (i, 0, 0)),
            scratch_shapes=[
                pltpu.VMEM((b_tile, g.R1p, 32), jnp.bfloat16),            # conv1 act
                pltpu.VMEM((b_tile, g.R2, 27 * 32), jnp.bfloat16),        # conv2 im2col
                pltpu.VMEM((b_tile, g.R2, 32), jnp.bfloat16),             # conv2 act
            ],
        ),
        compiler_params=pltpu.CompilerParams(
            dimension_semantics=("parallel",),
        ),
        cost_estimate=pl.CostEstimate(flops=flops, transcendentals=0,
                                      bytes_accessed=bytes_accessed),
    )(patches, kparams["w1"], kparams["b1"], kparams["w2"], kparams["b2"],
      kparams["wf1"], kparams["bf1"], kparams["wf2"], kparams["bf2"])

    return out.reshape(padded_n, 128)[:N, :n_classes]


# ---------------------------------------------------------------------------
# Pure-XLA f32 reference (eval mode) for a loose correctness check
# ---------------------------------------------------------------------------
def voxnet_reference(x, params):
    hp = jax.lax.Precision.HIGHEST
    h = jax.lax.conv_general_dilated(
        x, params["w1"], window_strides=(2, 2, 2), padding="VALID",
        dimension_numbers=("NCDHW", "OIDHW", "NCDHW"), precision=hp)
    h = jax.nn.relu(h + params["b1"].reshape(1, -1, 1, 1, 1))
    h = jax.lax.conv_general_dilated(
        h, params["w2"], window_strides=(1, 1, 1), padding="VALID",
        dimension_numbers=("NCDHW", "OIDHW", "NCDHW"), precision=hp)
    h = jax.nn.relu(h + params["b2"].reshape(1, -1, 1, 1, 1))
    h = jax.lax.reduce_window(h, -jnp.inf, jax.lax.max,
                              (1, 1, 2, 2, 2), (1, 1, 2, 2, 2), "VALID")
    h = h.reshape(x.shape[0], -1)
    h = jax.nn.relu(jnp.dot(h, params["wf1"].T, precision=hp) + params["bf1"])
    return jnp.dot(h, params["wf2"].T, precision=hp) + params["bf2"]


if __name__ == "__main__":
    key = jax.random.PRNGKey(0)
    k_param, k_in = jax.random.split(key)

    input_shape = (16, 16, 16)   # small spatial size consistent with the module
    n_classes = 2
    batch = 2

    params = init_voxnet_params(k_param, n_classes=n_classes, input_shape=input_shape)
    kparams = prepare_voxnet_params(params, input_shape=input_shape,
                                    n_classes=n_classes)
    x = jax.random.normal(k_in, (batch, 1) + input_shape, jnp.float32)

    fwd = jax.jit(functools.partial(voxnet_forward, input_shape=input_shape,
                                    n_classes=n_classes))
    out = jax.block_until_ready(fwd(x, kparams))

    assert out.shape == (batch, n_classes), out.shape
    assert bool(jnp.all(jnp.isfinite(out)))

    # Loose check vs the f32 XLA reference (kernel uses bf16 weights/activations).
    ref = voxnet_reference(x, params)
    err = float(jnp.max(jnp.abs(out - ref)))
    scale = float(jnp.max(jnp.abs(ref))) + 1e-6
    assert err <= 5e-2 + 0.1 * scale, (err, scale)
    print("KERNEL_OK")
</pallas_src>

<mosaic_0001>
module attributes {stable_mosaic.version = 11 : i64} {
  func.func @_voxnet_kernel(%arg0: i32, %arg1: memref<1x216x128xbf16, #tpu.memory_space<vmem>>, %arg2: memref<128x32xbf16, #tpu.memory_space<vmem>>, %arg3: memref<1x32xf32, #tpu.memory_space<vmem>>, %arg4: memref<864x32xbf16, #tpu.memory_space<vmem>>, %arg5: memref<1x32xf32, #tpu.memory_space<vmem>>, %arg6: memref<256x128xbf16, #tpu.memory_space<vmem>>, %arg7: memref<1x128xf32, #tpu.memory_space<vmem>>, %arg8: memref<128x128xbf16, #tpu.memory_space<vmem>>, %arg9: memref<1x128xf32, #tpu.memory_space<vmem>>, %arg10: memref<1x1x128xf32, #tpu.memory_space<vmem>>, %arg11: memref<1x224x32xbf16, #tpu.memory_space<vmem>>, %arg12: memref<1x136x864xbf16, #tpu.memory_space<vmem>>, %arg13: memref<1x136x32xbf16, #tpu.memory_space<vmem>>) attributes {dimension_semantics = [#tpu.dimension_semantics<parallel>], iteration_bounds = array<i64: 2>, scalar_prefetch = 0 : i64, scratch_operands = 3 : i64, tpu.core_type = #tpu.core_type<tc>, window_params = [{transform_indices = @transform_0, window_bounds = array<i64: 1, 216, 128>}, {pipeline_mode = #tpu.pipeline_mode<synchronous>, transform_indices = @transform_1, window_bounds = array<i64: 128, 32>}, {pipeline_mode = #tpu.pipeline_mode<synchronous>, transform_indices = @transform_2, window_bounds = array<i64: 1, 32>}, {pipeline_mode = #tpu.pipeline_mode<synchronous>, transform_indices = @transform_3, window_bounds = array<i64: 864, 32>}, {pipeline_mode = #tpu.pipeline_mode<synchronous>, transform_indices = @transform_4, window_bounds = array<i64: 1, 32>}, {pipeline_mode = #tpu.pipeline_mode<synchronous>, transform_indices = @transform_5, window_bounds = array<i64: 256, 128>}, {pipeline_mode = #tpu.pipeline_mode<synchronous>, transform_indices = @transform_6, window_bounds = array<i64: 1, 128>}, {pipeline_mode = #tpu.pipeline_mode<synchronous>, transform_indices = @transform_7, window_bounds = array<i64: 128, 128>}, {pipeline_mode = #tpu.pipeline_mode<synchronous>, transform_indices = @transform_8, window_bounds = array<i64: 1, 128>}, {transform_indices = @transform_9, window_bounds = array<i64: 1, 1, 128>}]} {
    %c0 = arith.constant 0 : index
    %c0_0 = arith.constant 0 : index
    %c0_1 = arith.constant 0 : index
    %0 = vector.load %arg1[%c0, %c0_0, %c0_1] : memref<1x216x128xbf16, #tpu.memory_space<vmem>>, vector<1x216x128xbf16>
    %1 = vector.shape_cast %0 : vector<1x216x128xbf16> to vector<216x128xbf16>
    %c0_2 = arith.constant 0 : index
    %c0_3 = arith.constant 0 : index
    %2 = vector.load %arg2[%c0_2, %c0_3] : memref<128x32xbf16, #tpu.memory_space<vmem>>, vector<128x32xbf16>
    %cst = arith.constant dense<0.000000e+00> : vector<216x32xf32>
    %3 = tpu.matmul %1, %2, %cst {dimension_numbers = #tpu.dot_dimension_numbers<[1], [0], [0], [1], [0, 0, 1, 1], [], []>} : vector<216x128xbf16>, vector<128x32xbf16>, vector<216x32xf32> -> vector<216x32xf32>
    %c0_4 = arith.constant 0 : index
    %c0_5 = arith.constant 0 : index
    %4 = vector.load %arg3[%c0_4, %c0_5] : memref<1x32xf32, #tpu.memory_space<vmem>>, vector<1x32xf32>
    %5 = vector.broadcast %4 : vector<1x32xf32> to vector<216x32xf32>
    %6 = arith.addf %3, %5 : vector<216x32xf32>
    %cst_6 = arith.constant 0.000000e+00 : f32
    %7 = vector.broadcast %cst_6 : f32 to vector<216x32xf32>
    %8 = arith.maximumf %6, %7 : vector<216x32xf32>
    %9 = vector.shape_cast %8 : vector<216x32xf32> to vector<1x216x32xf32>
    %10 = arith.truncf %9 : vector<1x216x32xf32> to vector<1x216x32xbf16>
    %c0_7 = arith.constant 0 : index
    %c0_8 = arith.constant 0 : index
    %c0_9 = arith.constant 0 : index
    %11 = vector.load %arg11[%c0_7, %c0_8, %c0_9] : memref<1x224x32xbf16, #tpu.memory_space<vmem>>, vector<1x216x32xbf16>
    tpu.vector_store %arg11[%c0_7, %c0_8, %c0_9], %10 {strides = array<i32>} : memref<1x224x32xbf16, #tpu.memory_space<vmem>>, vector<1x216x32xbf16>,
    %cst_10 = arith.constant 0.000000e+00 : bf16
    %12 = vector.broadcast %cst_10 : bf16 to vector<1x8x32xbf16>
    %c0_11 = arith.constant 0 : index
    %c216 = arith.constant 216 : index
    %c0_12 = arith.constant 0 : index
    %13 = vector.load %arg11[%c0_11, %c216, %c0_12] : memref<1x224x32xbf16, #tpu.memory_space<vmem>>, vector<1x8x32xbf16>
    tpu.vector_store %arg11[%c0_11, %c216, %c0_12], %12 {strides = array<i32>} : memref<1x224x32xbf16, #tpu.memory_space<vmem>>, vector<1x8x32xbf16>,
    %c0_13 = arith.constant 0 : index
    %c0_14 = arith.constant 0 : index
    %c0_15 = arith.constant 0 : index
    %14 = vector.load %arg11[%c0_13, %c0_14, %c0_15] : memref<1x224x32xbf16, #tpu.memory_space<vmem>>, vector<1x136x32xbf16>
    %c0_16 = arith.constant 0 : index
    %c0_17 = arith.constant 0 : index
    %c0_18 = arith.constant 0 : index
    %15 = vector.load %arg12[%c0_16, %c0_17, %c0_18] : memref<1x136x864xbf16, #tpu.memory_space<vmem>>, vector<1x136x32xbf16>
    tpu.vector_store %arg12[%c0_16, %c0_17, %c0_18], %14 {strides = array<i32>} : memref<1x136x864xbf16, #tpu.memory_space<vmem>>, vector<1x136x32xbf16>,
    %c0_19 = arith.constant 0 : index
    %c1 = arith.constant 1 : index
    %c0_20 = arith.constant 0 : index
    %16 = vector.load %arg11[%c0_19, %c1, %c0_20] : memref<1x224x32xbf16, #tpu.memory_space<vmem>>, vector<1x136x32xbf16>
    %c0_21 = arith.constant 0 : index
    %c0_22 = arith.constant 0 : index
    %c32 = arith.constant 32 : index
    %17 = vector.load %arg12[%c0_21, %c0_22, %c32] : memref<1x136x864xbf16, #tpu.memory_space<vmem>>, vector<1x136x32xbf16>
    tpu.vector_store %arg12[%c0_21, %c0_22, %c32], %16 {strides = array<i32>} : memref<1x136x864xbf16, #tpu.memory_space<vmem>>, vector<1x136x32xbf16>,
    %c0_23 = arith.constant 0 : index
    %c2 = arith.constant 2 : index
    %c0_24 = arith.constant 0 : index
    %18 = vector.load %arg11[%c0_23, %c2, %c0_24] : memref<1x224x32xbf16, #tpu.memory_space<vmem>>, vector<1x136x32xbf16>
    %c0_25 = arith.constant 0 : index
    %c0_26 = arith.constant 0 : index
    %c64 = arith.constant 64 : index
    %19 = vector.load %arg12[%c0_25, %c0_26, %c64] : memref<1x136x864xbf16, #tpu.memory_space<vmem>>, vector<1x136x32xbf16>
    tpu.vector_store %arg12[%c0_25, %c0_26, %c64], %18 {strides = array<i32>} : memref<1x136x864xbf16, #tpu.memory_space<vmem>>, vector<1x136x32xbf16>,
    %c0_27 = arith.constant 0 : index
    %c6 = arith.constant 6 : index
    %c0_28 = arith.constant 0 : index
    %20 = vector.load %arg11[%c0_27, %c6, %c0_28] : memref<1x224x32xbf16, #tpu.memory_space<vmem>>, vector<1x136x32xbf16>
    %c0_29 = arith.constant 0 : index
    %c0_30 = arith.constant 0 : index
    %c96 = arith.constant 96 : index
    %21 = vector.load %arg12[%c0_29, %c0_30, %c96] : memref<1x136x864xbf16, #tpu.memory_space<vmem>>, vector<1x136x32xbf16>
    tpu.vector_store %arg12[%c0_29, %c0_30, %c96], %20 {strides = array<i32>} : memref<1x136x864xbf16, #tpu.memory_space<vmem>>, vector<1x136x32xbf16>,
    %c0_31 = arith.constant 0 : index
    %c7 = arith.constant 7 : index
    %c0_32 = arith.constant 0 : index
    %22 = vector.load %arg11[%c0_31, %c7, %c0_32] : memref<1x224x32xbf16, #tpu.memory_space<vmem>>, vector<1x136x32xbf16>
    %c0_33 = arith.constant 0 : index
    %c0_34 = arith.constant 0 : index
    %c128 = arith.constant 128 : index
    %23 = vector.load %arg12[%c0_33, %c0_34, %c128] : memref<1x136x864xbf16, #tpu.memory_space<vmem>>, vector<1x136x32xbf16>
    tpu.vector_store %arg12[%c0_33, %c0_34, %c128], %22 {strides = array<i32>} : memref<1x136x864xbf16, #tpu.memory_space<vmem>>, vector<1x136x32xbf16>,
    %c0_35 = arith.constant 0 : index
    %c8 = arith.constant 8 : index
    %c0_36 = arith.constant 0 : index
    %24 = vector.load %arg11[%c0_35, %c8, %c0_36] : memref<1x224x32xbf16, #tpu.memory_space<vmem>>, vector<1x136x32xbf16>
    %c0_37 = arith.constant 0 : index
    %c0_38 = arith.constant 0 : index
    %c160 = arith.constant 160 : index
    %25 = vector.load %arg12[%c0_37, %c0_38, %c160] : memref<1x136x864xbf16, #tpu.memory_space<vmem>>, vector<1x136x32xbf16>
    tpu.vector_store %arg12[%c0_37, %c0_38, %c160], %24 {strides = array<i32>} : memref<1x136x864xbf16, #tpu.memory_space<vmem>>, vector<1x136x32xbf16>,
    %c0_39 = arith.constant 0 : index
    %c12 = arith.constant 12 : index
    %c0_40 = arith.constant 0 : index
    %26 = vector.load %arg11[%c0_39, %c12, %c0_40] : memref<1x224x32xbf16, #tpu.memory_space<vmem>>, vector<1x136x32xbf16>
    %c0_41 = arith.constant 0 : index
    %c0_42 = arith.constant 0 : index
    %c192 = arith.constant 192 : index
    %27 = vector.load %arg12[%c0_41, %c0_42, %c192] : memref<1x136x864xbf16, #tpu.memory_space<vmem>>, vector<1x136x32xbf16>
    tpu.vector_store %arg12[%c0_41, %c0_42, %c192], %26 {strides = array<i32>} : memref<1x136x864xbf16, #tpu.memory_space<vmem>>, vector<1x136x32xbf16>,
    %c0_43 = arith.constant 0 : index
    %c13 = arith.constant 13 : index
    %c0_44 = arith.constant 0 : index
    %28 = vector.load %arg11[%c0_43, %c13, %c0_44] : memref<1x224x32xbf16, #tpu.memory_space<vmem>>, vector<1x136x32xbf16>
    %c0_45 = arith.constant 0 : index
    %c0_46 = arith.constant 0 : index
    %c224 = arith.constant 224 : index
    %29 = vector.load %arg12[%c0_45, %c0_46, %c224] : memref<1x136x864xbf16, #tpu.memory_space<vmem>>, vector<1x136x32xbf16>
    tpu.vector_store %arg12[%c0_45, %c0_46, %c224], %28 {strides = array<i32>} : memref<1x136x864xbf16, #tpu.memory_space<vmem>>, vector<1x136x32xbf16>,
    %c0_47 = arith.constant 0 : index
    %c14 = arith.constant 14 : index
    %c0_48 = arith.constant 0 : index
    %30 = vector.load %arg11[%c0_47, %c14, %c0_48] : memref<1x224x32xbf16, #tpu.memory_space<vmem>>, vector<1x136x32xbf16>
    %c0_49 = arith.constant 0 : index
    %c0_50 = arith.constant 0 : index
    %c256 = arith.constant 256 : index
    %31 = vector.load %arg12[%c0_49, %c0_50, %c256] : memref<1x136x864xbf16, #tpu.memory_space<vmem>>, vector<1x136x32xbf16>
    tpu.vector_store %arg12[%c0_49, %c0_50, %c256], %30 {strides = array<i32>} : memref<1x136x864xbf16, #tpu.memory_space<vmem>>, vector<1x136x32xbf16>,
    %c0_51 = arith.constant 0 : index
    %c36 = arith.constant 36 : index
    %c0_52 = arith.constant 0 : index
    %32 = vector.load %arg11[%c0_51, %c36, %c0_52] : memref<1x224x32xbf16, #tpu.memory_space<vmem>>, vector<1x136x32xbf16>
    %c0_53 = arith.constant 0 : index
    %c0_54 = arith.constant 0 : index
    %c288 = arith.constant 288 : index
    %33 = vector.load %arg12[%c0_53, %c0_54, %c288] : memref<1x136x864xbf16, #tpu.memory_space<vmem>>, vector<1x136x32xbf16>
    tpu.vector_store %arg12[%c0_53, %c0_54, %c288], %32 {strides = array<i32>} : memref<1x136x864xbf16, #tpu.memory_space<vmem>>, vector<1x136x32xbf16>,
    %c0_55 = arith.constant 0 : index
    %c37 = arith.constant 37 : index
    %c0_56 = arith.constant 0 : index
    %34 = vector.load %arg11[%c0_55, %c37, %c0_56] : memref<1x224x32xbf16, #tpu.memory_space<vmem>>, vector<1x136x32xbf16>
    %c0_57 = arith.constant 0 : index
    %c0_58 = arith.constant 0 : index
    %c320 = arith.constant 320 : index
    %35 = vector.load %arg12[%c0_57, %c0_58, %c320] : memref<1x136x864xbf16, #tpu.memory_space<vmem>>, vector<1x136x32xbf16>
    tpu.vector_store %arg12[%c0_57, %c0_58, %c320], %34 {strides = array<i32>} : memref<1x136x864xbf16, #tpu.memory_space<vmem>>, vector<1x136x32xbf16>,
    %c0_59 = arith.constant 0 : index
    %c38 = arith.constant 38 : index
    %c0_60 = arith.constant 0 : index
    %36 = vector.load %arg11[%c0_59, %c38, %c0_60] : memref<1x224x32xbf16, #tpu.memory_space<vmem>>, vector<1x136x32xbf16>
    %c0_61 = arith.constant 0 : index
    %c0_62 = arith.constant 0 : index
    %c352 = arith.constant 352 : index
    %37 = vector.load %arg12[%c0_61, %c0_62, %c352] : memref<1x136x864xbf16, #tpu.memory_space<vmem>>, vector<1x136x32xbf16>
    tpu.vector_store %arg12[%c0_61, %c0_62, %c352], %36 {strides = array<i32>} : memref<1x136x864xbf16, #tpu.memory_space<vmem>>, vector<1x136x32xbf16>,
    %c0_63 = arith.constant 0 : index
    %c42 = arith.constant 42 : index
    %c0_64 = arith.constant 0 : index
    %38 = vector.load %arg11[%c0_63, %c42, %c0_64] : memref<1x224x32xbf16, #tpu.memory_space<vmem>>, vector<1x136x32xbf16>
    %c0_65 = arith.constant 0 : index
    %c0_66 = arith.constant 0 : index
    %c384 = arith.constant 384 : index
    %39 = vector.load %arg12[%c0_65, %c0_66, %c384] : memref<1x136x864xbf16, #tpu.memory_space<vmem>>, vector<1x136x32xbf16>
    tpu.vector_store %arg12[%c0_65, %c0_66, %c384], %38 {strides = array<i32>} : memref<1x136x864xbf16, #tpu.memory_space<vmem>>, vector<1x136x32xbf16>,
    %c0_67 = arith.constant 0 : index
    %c43 = arith.constant 43 : index
    %c0_68 = arith.constant 0 : index
    %40 = vector.load %arg11[%c0_67, %c43, %c0_68] : memref<1x224x32xbf16, #tpu.memory_space<vmem>>, vector<1x136x32xbf16>
    %c0_69 = arith.constant 0 : index
    %c0_70 = arith.constant 0 : index
    %c416 = arith.constant 416 : index
    %41 = vector.load %arg12[%c0_69, %c0_70, %c416] : memref<1x136x864xbf16, #tpu.memory_space<vmem>>, vector<1x136x32xbf16>
    tpu.vector_store %arg12[%c0_69, %c0_70, %c416], %40 {strides = array<i32>} : memref<1x136x864xbf16, #tpu.memory_space<vmem>>, vector<1x136x32xbf16>,
    %c0_71 = arith.constant 0 : index
    %c44 = arith.constant 44 : index
    %c0_72 = arith.constant 0 : index
    %42 = vector.load %arg11[%c0_71, %c44, %c0_72] : memref<1x224x32xbf16, #tpu.memory_space<vmem>>, vector<1x136x32xbf16>
    %c0_73 = arith.constant 0 : index
    %c0_74 = arith.constant 0 : index
    %c448 = arith.constant 448 : index
    %43 = vector.load %arg12[%c0_73, %c0_74, %c448] : memref<1x136x864xbf16, #tpu.memory_space<vmem>>, vector<1x136x32xbf16>
    tpu.vector_store %arg12[%c0_73, %c0_74, %c448], %42 {strides = array<i32>} : memref<1x136x864xbf16, #tpu.memory_space<vmem>>, vector<1x136x32xbf16>,
    %c0_75 = arith.constant 0 : index
    %c48 = arith.constant 48 : index
    %c0_76 = arith.constant 0 : index
    %44 = vector.load %arg11[%c0_75, %c48, %c0_76] : memref<1x224x32xbf16, #tpu.memory_space<vmem>>, vector<1x136x32xbf16>
    %c0_77 = arith.constant 0 : index
    %c0_78 = arith.constant 0 : index
    %c480 = arith.constant 480 : index
    %45 = vector.load %arg12[%c0_77, %c0_78, %c480] : memref<1x136x864xbf16, #tpu.memory_space<vmem>>, vector<1x136x32xbf16>
    tpu.vector_store %arg12[%c0_77, %c0_78, %c480], %44 {strides = array<i32>} : memref<1x136x864xbf16, #tpu.memory_space<vmem>>, vector<1x136x32xbf16>,
    %c0_79 = arith.constant 0 : index
    %c49 = arith.constant 49 : index
    %c0_80 = arith.constant 0 : index
    %46 = vector.load %arg11[%c0_79, %c49, %c0_80] : memref<1x224x32xbf16, #tpu.memory_space<vmem>>, vector<1x136x32xbf16>
    %c0_81 = arith.constant 0 : index
    %c0_82 = arith.constant 0 : index
    %c512 = arith.constant 512 : index
    %47 = vector.load %arg12[%c0_81, %c0_82, %c512] : memref<1x136x864xbf16, #tpu.memory_space<vmem>>, vector<1x136x32xbf16>
    tpu.vector_store %arg12[%c0_81, %c0_82, %c512], %46 {strides = array<i32>} : memref<1x136x864xbf16, #tpu.memory_space<vmem>>, vector<1x136x32xbf16>,
    %c0_83 = arith.constant 0 : index
    %c50 = arith.constant 50 : index
    %c0_84 = arith.constant 0 : index
    %48 = vector.load %arg11[%c0_83, %c50, %c0_84] : memref<1x224x32xbf16, #tpu.memory_space<vmem>>, vector<1x136x32xbf16>
    %c0_85 = arith.constant 0 : index
    %c0_86 = arith.constant 0 : index
    %c544 = arith.constant 544 : index
    %49 = vector.load %arg12[%c0_85, %c0_86, %c544] : memref<1x136x864xbf16, #tpu.memory_space<vmem>>, vector<1x136x32xbf16>
    tpu.vector_store %arg12[%c0_85, %c0_86, %c544], %48 {strides = array<i32>} : memref<1x136x864xbf16, #tpu.memory_space<vmem>>, vector<1x136x32xbf16>,
    %c0_87 = arith.constant 0 : index
    %c72 = arith.constant 72 : index
    %c0_88 = arith.constant 0 : index
    %50 = vector.load %arg11[%c0_87, %c72, %c0_88] : memref<1x224x32xbf16, #tpu.memory_space<vmem>>, vector<1x136x32xbf16>
    %c0_89 = arith.constant 0 : index
    %c0_90 = arith.constant 0 : index
    %c576 = arith.constant 576 : index
    %51 = vector.load %arg12[%c0_89, %c0_90, %c576] : memref<1x136x864xbf16, #tpu.memory_space<vmem>>, vector<1x136x32xbf16>
    tpu.vector_store %arg12[%c0_89, %c0_90, %c576], %50 {strides = array<i32>} : memref<1x136x864xbf16, #tpu.memory_space<vmem>>, vector<1x136x32xbf16>,
    %c0_91 = arith.constant 0 : index
    %c73 = arith.constant 73 : index
    %c0_92 = arith.constant 0 : index
    %52 = vector.load %arg11[%c0_91, %c73, %c0_92] : memref<1x224x32xbf16, #tpu.memory_space<vmem>>, vector<1x136x32xbf16>
    %c0_93 = arith.constant 0 : index
    %c0_94 = arith.constant 0 : index
    %c608 = arith.constant 608 : index
    %53 = vector.load %arg12[%c0_93, %c0_94, %c608] : memref<1x136x864xbf16, #tpu.memory_space<vmem>>, vector<1x136x32xbf16>
    tpu.vector_store %arg12[%c0_93, %c0_94, %c608], %52 {strides = array<i32>} : memref<1x136x864xbf16, #tpu.memory_space<vmem>>, vector<1x136x32xbf16>,
    %c0_95 = arith.constant 0 : index
    %c74 = arith.constant 74 : index
    %c0_96 = arith.constant 0 : index
    %54 = vector.load %arg11[%c0_95, %c74, %c0_96] : memref<1x224x32xbf16, #tpu.memory_space<vmem>>, vector<1x136x32xbf16>
    %c0_97 = arith.constant 0 : index
    %c0_98 = arith.constant 0 : index
    %c640 = arith.constant 640 : index
    %55 = vector.load %arg12[%c0_97, %c0_98, %c640] : memref<1x136x864xbf16, #tpu.memory_space<vmem>>, vector<1x136x32xbf16>
    tpu.vector_store %arg12[%c0_97, %c0_98, %c640], %54 {strides = array<i32>} : memref<1x136x864xbf16, #tpu.memory_space<vmem>>, vector<1x136x32xbf16>,
    %c0_99 = arith.constant 0 : index
    %c78 = arith.constant 78 : index
    %c0_100 = arith.constant 0 : index
    %56 = vector.load %arg11[%c0_99, %c78, %c0_100] : memref<1x224x32xbf16, #tpu.memory_space<vmem>>, vector<1x136x32xbf16>
    %c0_101 = arith.constant 0 : index
    %c0_102 = arith.constant 0 : index
    %c672 = arith.constant 672 : index
    %57 = vector.load %arg12[%c0_101, %c0_102, %c672] : memref<1x136x864xbf16, #tpu.memory_space<vmem>>, vector<1x136x32xbf16>
    tpu.vector_store %arg12[%c0_101, %c0_102, %c672], %56 {strides = array<i32>} : memref<1x136x864xbf16, #tpu.memory_space<vmem>>, vector<1x136x32xbf16>,
    %c0_103 = arith.constant 0 : index
    %c79 = arith.constant 79 : index
    %c0_104 = arith.constant 0 : index
    %58 = vector.load %arg11[%c0_103, %c79, %c0_104] : memref<1x224x32xbf16, #tpu.memory_space<vmem>>, vector<1x136x32xbf16>
    %c0_105 = arith.constant 0 : index
    %c0_106 = arith.constant 0 : index
    %c704 = arith.constant 704 : index
    %59 = vector.load %arg12[%c0_105, %c0_106, %c704] : memref<1x136x864xbf16, #tpu.memory_space<vmem>>, vector<1x136x32xbf16>
    tpu.vector_store %arg12[%c0_105, %c0_106, %c704], %58 {strides = array<i32>} : memref<1x136x864xbf16, #tpu.memory_space<vmem>>, vector<1x136x32xbf16>,
    %c0_107 = arith.constant 0 : index
    %c80 = arith.constant 80 : index
    %c0_108 = arith.constant 0 : index
    %60 = vector.load %arg11[%c0_107, %c80, %c0_108] : memref<1x224x32xbf16, #tpu.memory_space<vmem>>, vector<1x136x32xbf16>
    %c0_109 = arith.constant 0 : index
    %c0_110 = arith.constant 0 : index
    %c736 = arith.constant 736 : index
    %61 = vector.load %arg12[%c0_109, %c0_110, %c736] : memref<1x136x864xbf16, #tpu.memory_space<vmem>>, vector<1x136x32xbf16>
    tpu.vector_store %arg12[%c0_109, %c0_110, %c736], %60 {strides = array<i32>} : memref<1x136x864xbf16, #tpu.memory_space<vmem>>, vector<1x136x32xbf16>,
    %c0_111 = arith.constant 0 : index
    %c84 = arith.constant 84 : index
    %c0_112 = arith.constant 0 : index
    %62 = vector.load %arg11[%c0_111, %c84, %c0_112] : memref<1x224x32xbf16, #tpu.memory_space<vmem>>, vector<1x136x32xbf16>
    %c0_113 = arith.constant 0 : index
    %c0_114 = arith.constant 0 : index
    %c768 = arith.constant 768 : index
    %63 = vector.load %arg12[%c0_113, %c0_114, %c768] : memref<1x136x864xbf16, #tpu.memory_space<vmem>>, vector<1x136x32xbf16>
    tpu.vector_store %arg12[%c0_113, %c0_114, %c768], %62 {strides = array<i32>} : memref<1x136x864xbf16, #tpu.memory_space<vmem>>, vector<1x136x32xbf16>,
    %c0_115 = arith.constant 0 : index
    %c85 = arith.constant 85 : index
    %c0_116 = arith.constant 0 : index
    %64 = vector.load %arg11[%c0_115, %c85, %c0_116] : memref<1x224x32xbf16, #tpu.memory_space<vmem>>, vector<1x136x32xbf16>
    %c0_117 = arith.constant 0 : index
    %c0_118 = arith.constant 0 : index
    %c800 = arith.constant 800 : index
    %65 = vector.load %arg12[%c0_117, %c0_118, %c800] : memref<1x136x864xbf16, #tpu.memory_space<vmem>>, vector<1x136x32xbf16>
    tpu.vector_store %arg12[%c0_117, %c0_118, %c800], %64 {strides = array<i32>} : memref<1x136x864xbf16, #tpu.memory_space<vmem>>, vector<1x136x32xbf16>,
    %c0_119 = arith.constant 0 : index
    %c86 = arith.constant 86 : index
    %c0_120 = arith.constant 0 : index
    %66 = vector.load %arg11[%c0_119, %c86, %c0_120] : memref<1x224x32xbf16, #tpu.memory_space<vmem>>, vector<1x136x32xbf16>
    %c0_121 = arith.constant 0 : index
    %c0_122 = arith.constant 0 : index
    %c832 = arith.constant 832 : index
    %67 = vector.load %arg12[%c0_121, %c0_122, %c832] : memref<1x136x864xbf16, #tpu.memory_space<vmem>>, vector<1x136x32xbf16>
    tpu.vector_store %arg12[%c0_121, %c0_122, %c832], %66 {strides = array<i32>} : memref<1x136x864xbf16, #tpu.memory_space<vmem>>, vector<1x136x32xbf16>,
    %c0_123 = arith.constant 0 : index
    %c0_124 = arith.constant 0 : index
    %c0_125 = arith.constant 0 : index
    %68 = vector.load %arg12[%c0_123, %c0_124, %c0_125] : memref<1x136x864xbf16, #tpu.memory_space<vmem>>, vector<1x136x864xbf16>
    %69 = vector.shape_cast %68 : vector<1x136x864xbf16> to vector<136x864xbf16>
    %c0_126 = arith.constant 0 : index
    %c0_127 = arith.constant 0 : index
    %70 = vector.load %arg4[%c0_126, %c0_127] : memref<864x32xbf16, #tpu.memory_space<vmem>>, vector<864x32xbf16>
    %cst_128 = arith.constant dense<0.000000e+00> : vector<136x32xf32>
    %71 = tpu.matmul %69, %70, %cst_128 {dimension_numbers = #tpu.dot_dimension_numbers<[1], [0], [0], [1], [0, 0, 1, 1], [], []>} : vector<136x864xbf16>, vector<864x32xbf16>, vector<136x32xf32> -> vector<136x32xf32>
    %c0_129 = arith.constant 0 : index
    %c0_130 = arith.constant 0 : index
    %72 = vector.load %arg5[%c0_129, %c0_130] : memref<1x32xf32, #tpu.memory_space<vmem>>, vector<1x32xf32>
    %73 = vector.broadcast %72 : vector<1x32xf32> to vector<136x32xf32>
    %74 = arith.addf %71, %73 : vector<136x32xf32>
    %cst_131 = arith.constant 0.000000e+00 : f32
    %75 = vector.broadcast %cst_131 : f32 to vector<136x32xf32>
    %76 = arith.maximumf %74, %75 : vector<136x32xf32>
    %77 = vector.shape_cast %76 : vector<136x32xf32> to vector<1x136x32xf32>
    %78 = arith.truncf %77 : vector<1x136x32xf32> to vector<1x136x32xbf16>
    %c0_132 = arith.constant 0 : index
    %c0_133 = arith.constant 0 : index
    %c0_134 = arith.constant 0 : index
    %79 = vector.load %arg13[%c0_132, %c0_133, %c0_134] : memref<1x136x32xbf16, #tpu.memory_space<vmem>>, vector<1x136x32xbf16>
    tpu.vector_store %arg13[%c0_132, %c0_133, %c0_134], %78 {strides = array<i32>} : memref<1x136x32xbf16, #tpu.memory_space<vmem>>, vector<1x136x32xbf16>,
    %c0_135 = arith.constant 0 : index
    %c0_136 = arith.constant 0 : index
    %c0_137 = arith.constant 0 : index
    %80 = vector.load %arg13[%c0_135, %c0_136, %c0_137] : memref<1x136x32xbf16, #tpu.memory_space<vmem>>, vector<1x1x32xbf16>
    %c0_138 = arith.constant 0 : index
    %c1_139 = arith.constant 1 : index
    %c0_140 = arith.constant 0 : index
    %81 = vector.load %arg13[%c0_138, %c1_139, %c0_140] : memref<1x136x32xbf16, #tpu.memory_space<vmem>>, vector<1x1x32xbf16>
    %82 = arith.maximumf %80, %81 : vector<1x1x32xbf16>
    %c0_141 = arith.constant 0 : index
    %c6_142 = arith.constant 6 : index
    %c0_143 = arith.constant 0 : index
    %83 = vector.load %arg13[%c0_141, %c6_142, %c0_143] : memref<1x136x32xbf16, #tpu.memory_space<vmem>>, vector<1x1x32xbf16>
    %84 = arith.maximumf %82, %83 : vector<1x1x32xbf16>
    %c0_144 = arith.constant 0 : index
    %c7_145 = arith.constant 7 : index
    %c0_146 = arith.constant 0 : index
    %85 = vector.load %arg13[%c0_144, %c7_145, %c0_146] : memref<1x136x32xbf16, #tpu.memory_space<vmem>>, vector<1x1x32xbf16>
    %86 = arith.maximumf %84, %85 : vector<1x1x32xbf16>
    %c0_147 = arith.constant 0 : index
    %c36_148 = arith.constant 36 : index
    %c0_149 = arith.constant 0 : index
    %87 = vector.load %arg13[%c0_147, %c36_148, %c0_149] : memref<1x136x32xbf16, #tpu.memory_space<vmem>>, vector<1x1x32xbf16>
    %88 = arith.maximumf %86, %87 : vector<1x1x32xbf16>
    %c0_150 = arith.constant 0 : index
    %c37_151 = arith.constant 37 : index
    %c0_152 = arith.constant 0 : index
    %89 = vector.load %arg13[%c0_150, %c37_151, %c0_152] : memref<1x136x32xbf16, #tpu.memory_space<vmem>>, vector<1x1x32xbf16>
    %90 = arith.maximumf %88, %89 : vector<1x1x32xbf16>
    %c0_153 = arith.constant 0 : index
    %c42_154 = arith.constant 42 : index
    %c0_155 = arith.constant 0 : index
    %91 = vector.load %arg13[%c0_153, %c42_154, %c0_155] : memref<1x136x32xbf16, #tpu.memory_space<vmem>>, vector<1x1x32xbf16>
    %92 = arith.maximumf %90, %91 : vector<1x1x32xbf16>
    %c0_156 = arith.constant 0 : index
    %c43_157 = arith.constant 43 : index
    %c0_158 = arith.constant 0 : index
    %93 = vector.load %arg13[%c0_156, %c43_157, %c0_158] : memref<1x136x32xbf16, #tpu.memory_space<vmem>>, vector<1x1x32xbf16>
    %94 = arith.maximumf %92, %93 : vector<1x1x32xbf16>
    %c0_159 = arith.constant 0 : index
    %c2_160 = arith.constant 2 : index
    %c0_161 = arith.constant 0 : index
    %95 = vector.load %arg13[%c0_159, %c2_160, %c0_161] : memref<1x136x32xbf16, #tpu.memory_space<vmem>>, vector<1x1x32xbf16>
    %c0_162 = arith.constant 0 : index
    %c3 = arith.constant 3 : index
    %c0_163 = arith.constant 0 : index
    %96 = vector.load %arg13[%c0_162, %c3, %c0_163] : memref<1x136x32xbf16, #tpu.memory_space<vmem>>, vector<1x1x32xbf16>
    %97 = arith.maximumf %95, %96 : vector<1x1x32xbf16>
    %c0_164 = arith.constant 0 : index
    %c8_165 = arith.constant 8 : index
    %c0_166 = arith.constant 0 : index
    %98 = vector.load %arg13[%c0_164, %c8_165, %c0_166] : memref<1x136x32xbf16, #tpu.memory_space<vmem>>, vector<1x1x32xbf16>
    %99 = arith.maximumf %97, %98 : vector<1x1x32xbf16>
    %c0_167 = arith.constant 0 : index
    %c9 = arith.constant 9 : index
    %c0_168 = arith.constant 0 : index
    %100 = vector.load %arg13[%c0_167, %c9, %c0_168] : memref<1x136x32xbf16, #tpu.memory_space<vmem>>, vector<1x1x32xbf16>
    %101 = arith.maximumf %99, %100 : vector<1x1x32xbf16>
    %c0_169 = arith.constant 0 : index
    %c38_170 = arith.constant 38 : index
    %c0_171 = arith.constant 0 : index
    %102 = vector.load %arg13[%c0_169, %c38_170, %c0_171] : memref<1x136x32xbf16, #tpu.memory_space<vmem>>, vector<1x1x32xbf16>
    %103 = arith.maximumf %101, %102 : vector<1x1x32xbf16>
    %c0_172 = arith.constant 0 : index
    %c39 = arith.constant 39 : index
    %c0_173 = arith.constant 0 : index
    %104 = vector.load %arg13[%c0_172, %c39, %c0_173] : memref<1x136x32xbf16, #tpu.memory_space<vmem>>, vector<1x1x32xbf16>
    %105 = arith.maximumf %103, %104 : vector<1x1x32xbf16>
    %c0_174 = arith.constant 0 : index
    %c44_175 = arith.constant 44 : index
    %c0_176 = arith.constant 0 : index
    %106 = vector.load %arg13[%c0_174, %c44_175, %c0_176] : memref<1x136x32xbf16, #tpu.memory_space<vmem>>, vector<1x1x32xbf16>
    %107 = arith.maximumf %105, %106 : vector<1x1x32xbf16>
    %c0_177 = arith.constant 0 : index
    %c45 = arith.constant 45 : index
    %c0_178 = arith.constant 0 : index
    %108 = vector.load %arg13[%c0_177, %c45, %c0_178] : memref<1x136x32xbf16, #tpu.memory_space<vmem>>, vector<1x1x32xbf16>
    %109 = arith.maximumf %107, %108 : vector<1x1x32xbf16>
    %c0_179 = arith.constant 0 : index
    %c12_180 = arith.constant 12 : index
    %c0_181 = arith.constant 0 : index
    %110 = vector.load %arg13[%c0_179, %c12_180, %c0_181] : memref<1x136x32xbf16, #tpu.memory_space<vmem>>, vector<1x1x32xbf16>
    %c0_182 = arith.constant 0 : index
    %c13_183 = arith.constant 13 : index
    %c0_184 = arith.constant 0 : index
    %111 = vector.load %arg13[%c0_182, %c13_183, %c0_184] : memref<1x136x32xbf16, #tpu.memory_space<vmem>>, vector<1x1x32xbf16>
    %112 = arith.maximumf %110, %111 : vector<1x1x32xbf16>
    %c0_185 = arith.constant 0 : index
    %c18 = arith.constant 18 : index
    %c0_186 = arith.constant 0 : index
    %113 = vector.load %arg13[%c0_185, %c18, %c0_186] : memref<1x136x32xbf16, #tpu.memory_space<vmem>>, vector<1x1x32xbf16>
    %114 = arith.maximumf %112, %113 : vector<1x1x32xbf16>
    %c0_187 = arith.constant 0 : index
    %c19 = arith.constant 19 : index
    %c0_188 = arith.constant 0 : index
    %115 = vector.load %arg13[%c0_187, %c19, %c0_188] : memref<1x136x32xbf16, #tpu.memory_space<vmem>>, vector<1x1x32xbf16>
    %116 = arith.maximumf %114, %115 : vector<1x1x32xbf16>
    %c0_189 = arith.constant 0 : index
    %c48_190 = arith.constant 48 : index
    %c0_191 = arith.constant 0 : index
    %117 = vector.load %arg13[%c0_189, %c48_190, %c0_191] : memref<1x136x32xbf16, #tpu.memory_space<vmem>>, vector<1x1x32xbf16>
    %118 = arith.maximumf %116, %117 : vector<1x1x32xbf16>
    %c0_192 = arith.constant 0 : index
    %c49_193 = arith.constant 49 : index
    %c0_194 = arith.constant 0 : index
    %119 = vector.load %arg13[%c0_192, %c49_193, %c0_194] : memref<1x136x32xbf16, #tpu.memory_space<vmem>>, vector<1x1x32xbf16>
    %120 = arith.maximumf %118, %119 : vector<1x1x32xbf16>
    %c0_195 = arith.constant 0 : index
    %c54 = arith.constant 54 : index
    %c0_196 = arith.constant 0 : index
    %121 = vector.load %arg13[%c0_195, %c54, %c0_196] : memref<1x136x32xbf16, #tpu.memory_space<vmem>>, vector<1x1x32xbf16>
    %122 = arith.maximumf %120, %121 : vector<1x1x32xbf16>
    %c0_197 = arith.constant 0 : index
    %c55 = arith.constant 55 : index
    %c0_198 = arith.constant 0 : index
    %123 = vector.load %arg13[%c0_197, %c55, %c0_198] : memref<1x136x32xbf16, #tpu.memory_space<vmem>>, vector<1x1x32xbf16>
    %124 = arith.maximumf %122, %123 : vector<1x1x32xbf16>
    %c0_199 = arith.constant 0 : index
    %c14_200 = arith.constant 14 : index
    %c0_201 = arith.constant 0 : index
    %125 = vector.load %arg13[%c0_199, %c14_200, %c0_201] : memref<1x136x32xbf16, #tpu.memory_space<vmem>>, vector<1x1x32xbf16>
    %c0_202 = arith.constant 0 : index
    %c15 = arith.constant 15 : index
    %c0_203 = arith.constant 0 : index
    %126 = vector.load %arg13[%c0_202, %c15, %c0_203] : memref<1x136x32xbf16, #tpu.memory_space<vmem>>, vector<1x1x32xbf16>
    %127 = arith.maximumf %125, %126 : vector<1x1x32xbf16>
    %c0_204 = arith.constant 0 : index
    %c20 = arith.constant 20 : index
    %c0_205 = arith.constant 0 : index
    %128 = vector.load %arg13[%c0_204, %c20, %c0_205] : memref<1x136x32xbf16, #tpu.memory_space<vmem>>, vector<1x1x32xbf16>
    %129 = arith.maximumf %127, %128 : vector<1x1x32xbf16>
    %c0_206 = arith.constant 0 : index
    %c21 = arith.constant 21 : index
    %c0_207 = arith.constant 0 : index
    %130 = vector.load %arg13[%c0_206, %c21, %c0_207] : memref<1x136x32xbf16, #tpu.memory_space<vmem>>, vector<1x1x32xbf16>
    %131 = arith.maximumf %129, %130 : vector<1x1x32xbf16>
    %c0_208 = arith.constant 0 : index
    %c50_209 = arith.constant 50 : index
    %c0_210 = arith.constant 0 : index
    %132 = vector.load %arg13[%c0_208, %c50_209, %c0_210] : memref<1x136x32xbf16, #tpu.memory_space<vmem>>, vector<1x1x32xbf16>
    %133 = arith.maximumf %131, %132 : vector<1x1x32xbf16>
    %c0_211 = arith.constant 0 : index
    %c51 = arith.constant 51 : index
    %c0_212 = arith.constant 0 : index
    %134 = vector.load %arg13[%c0_211, %c51, %c0_212] : memref<1x136x32xbf16, #tpu.memory_space<vmem>>, vector<1x1x32xbf16>
    %135 = arith.maximumf %133, %134 : vector<1x1x32xbf16>
    %c0_213 = arith.constant 0 : index
    %c56 = arith.constant 56 : index
    %c0_214 = arith.constant 0 : index
    %136 = vector.load %arg13[%c0_213, %c56, %c0_214] : memref<1x136x32xbf16, #tpu.memory_space<vmem>>, vector<1x1x32xbf16>
    %137 = arith.maximumf %135, %136 : vector<1x1x32xbf16>
    %c0_215 = arith.constant 0 : index
    %c57 = arith.constant 57 : index
    %c0_216 = arith.constant 0 : index
    %138 = vector.load %arg13[%c0_215, %c57, %c0_216] : memref<1x136x32xbf16, #tpu.memory_space<vmem>>, vector<1x1x32xbf16>
    %139 = arith.maximumf %137, %138 : vector<1x1x32xbf16>
    %c0_217 = arith.constant 0 : index
    %c72_218 = arith.constant 72 : index
    %c0_219 = arith.constant 0 : index
    %140 = vector.load %arg13[%c0_217, %c72_218, %c0_219] : memref<1x136x32xbf16, #tpu.memory_space<vmem>>, vector<1x1x32xbf16>
    %c0_220 = arith.constant 0 : index
    %c73_221 = arith.constant 73 : index
    %c0_222 = arith.constant 0 : index
    %141 = vector.load %arg13[%c0_220, %c73_221, %c0_222] : memref<1x136x32xbf16, #tpu.memory_space<vmem>>, vector<1x1x32xbf16>
    %142 = arith.maximumf %140, %141 : vector<1x1x32xbf16>
    %c0_223 = arith.constant 0 : index
    %c78_224 = arith.constant 78 : index
    %c0_225 = arith.constant 0 : index
    %143 = vector.load %arg13[%c0_223, %c78_224, %c0_225] : memref<1x136x32xbf16, #tpu.memory_space<vmem>>, vector<1x1x32xbf16>
    %144 = arith.maximumf %142, %143 : vector<1x1x32xbf16>
    %c0_226 = arith.constant 0 : index
    %c79_227 = arith.constant 79 : index
    %c0_228 = arith.constant 0 : index
    %145 = vector.load %arg13[%c0_226, %c79_227, %c0_228] : memref<1x136x32xbf16, #tpu.memory_space<vmem>>, vector<1x1x32xbf16>
    %146 = arith.maximumf %144, %145 : vector<1x1x32xbf16>
    %c0_229 = arith.constant 0 : index
    %c108 = arith.constant 108 : index
    %c0_230 = arith.constant 0 : index
    %147 = vector.load %arg13[%c0_229, %c108, %c0_230] : memref<1x136x32xbf16, #tpu.memory_space<vmem>>, vector<1x1x32xbf16>
    %148 = arith.maximumf %146, %147 : vector<1x1x32xbf16>
    %c0_231 = arith.constant 0 : index
    %c109 = arith.constant 109 : index
    %c0_232 = arith.constant 0 : index
    %149 = vector.load %arg13[%c0_231, %c109, %c0_232] : memref<1x136x32xbf16, #tpu.memory_space<vmem>>, vector<1x1x32xbf16>
    %150 = arith.maximumf %148, %149 : vector<1x1x32xbf16>
    %c0_233 = arith.constant 0 : index
    %c114 = arith.constant 114 : index
    %c0_234 = arith.constant 0 : index
    %151 = vector.load %arg13[%c0_233, %c114, %c0_234] : memref<1x136x32xbf16, #tpu.memory_space<vmem>>, vector<1x1x32xbf16>
    %152 = arith.maximumf %150, %151 : vector<1x1x32xbf16>
    %c0_235 = arith.constant 0 : index
    %c115 = arith.constant 115 : index
    %c0_236 = arith.constant 0 : index
    %153 = vector.load %arg13[%c0_235, %c115, %c0_236] : memref<1x136x32xbf16, #tpu.memory_space<vmem>>, vector<1x1x32xbf16>
    %154 = arith.maximumf %152, %153 : vector<1x1x32xbf16>
    %c0_237 = arith.constant 0 : index
    %c74_238 = arith.constant 74 : index
    %c0_239 = arith.constant 0 : index
    %155 = vector.load %arg13[%c0_237, %c74_238, %c0_239] : memref<1x136x32xbf16, #tpu.memory_space<vmem>>, vector<1x1x32xbf16>
    %c0_240 = arith.constant 0 : index
    %c75 = arith.constant 75 : index
    %c0_241 = arith.constant 0 : index
    %156 = vector.load %arg13[%c0_240, %c75, %c0_241] : memref<1x136x32xbf16, #tpu.memory_space<vmem>>, vector<1x1x32xbf16>
    %157 = arith.maximumf %155, %156 : vector<1x1x32xbf16>
    %c0_242 = arith.constant 0 : index
    %c80_243 = arith.constant 80 : index
    %c0_244 = arith.constant 0 : index
    %158 = vector.load %arg13[%c0_242, %c80_243, %c0_244] : memref<1x136x32xbf16, #tpu.memory_space<vmem>>, vector<1x1x32xbf16>
    %159 = arith.maximumf %157, %158 : vector<1x1x32xbf16>
    %c0_245 = arith.constant 0 : index
    %c81 = arith.constant 81 : index
    %c0_246 = arith.constant 0 : index
    %160 = vector.load %arg13[%c0_245, %c81, %c0_246] : memref<1x136x32xbf16, #tpu.memory_space<vmem>>, vector<1x1x32xbf16>
    %161 = arith.maximumf %159, %160 : vector<1x1x32xbf16>
    %c0_247 = arith.constant 0 : index
    %c110 = arith.constant 110 : index
    %c0_248 = arith.constant 0 : index
    %162 = vector.load %arg13[%c0_247, %c110, %c0_248] : memref<1x136x32xbf16, #tpu.memory_space<vmem>>, vector<1x1x32xbf16>
    %163 = arith.maximumf %161, %162 : vector<1x1x32xbf16>
    %c0_249 = arith.constant 0 : index
    %c111 = arith.constant 111 : index
    %c0_250 = arith.constant 0 : index
    %164 = vector.load %arg13[%c0_249, %c111, %c0_250] : memref<1x136x32xbf16, #tpu.memory_space<vmem>>, vector<1x1x32xbf16>
    %165 = arith.maximumf %163, %164 : vector<1x1x32xbf16>
    %c0_251 = arith.constant 0 : index
    %c116 = arith.constant 116 : index
    %c0_252 = arith.constant 0 : index
    %166 = vector.load %arg13[%c0_251, %c116, %c0_252] : memref<1x136x32xbf16, #tpu.memory_space<vmem>>, vector<1x1x32xbf16>
    %167 = arith.maximumf %165, %166 : vector<1x1x32xbf16>
    %c0_253 = arith.constant 0 : index
    %c117 = arith.constant 117 : index
    %c0_254 = arith.constant 0 : index
    %168 = vector.load %arg13[%c0_253, %c117, %c0_254] : memref<1x136x32xbf16, #tpu.memory_space<vmem>>, vector<1x1x32xbf16>
    %169 = arith.maximumf %167, %168 : vector<1x1x32xbf16>
    %c0_255 = arith.constant 0 : index
    %c84_256 = arith.constant 84 : index
    %c0_257 = arith.constant 0 : index
    %170 = vector.load %arg13[%c0_255, %c84_256, %c0_257] : memref<1x136x32xbf16, #tpu.memory_space<vmem>>, vector<1x1x32xbf16>
    %c0_258 = arith.constant 0 : index
    %c85_259 = arith.constant 85 : index
    %c0_260 = arith.constant 0 : index
    %171 = vector.load %arg13[%c0_258, %c85_259, %c0_260] : memref<1x136x32xbf16, #tpu.memory_space<vmem>>, vector<1x1x32xbf16>
    %172 = arith.maximumf %170, %171 : vector<1x1x32xbf16>
    %c0_261 = arith.constant 0 : index
    %c90 = arith.constant 90 : index
    %c0_262 = arith.constant 0 : index
    %173 = vector.load %arg13[%c0_261, %c90, %c0_262] : memref<1x136x32xbf16, #tpu.memory_space<vmem>>, vector<1x1x32xbf16>
    %174 = arith.maximumf %172, %173 : vector<1x1x32xbf16>
    %c0_263 = arith.constant 0 : index
    %c91 = arith.constant 91 : index
    %c0_264 = arith.constant 0 : index
    %175 = vector.load %arg13[%c0_263, %c91, %c0_264] : memref<1x136x32xbf16, #tpu.memory_space<vmem>>, vector<1x1x32xbf16>
    %176 = arith.maximumf %174, %175 : vector<1x1x32xbf16>
    %c0_265 = arith.constant 0 : index
    %c120 = arith.constant 120 : index
    %c0_266 = arith.constant 0 : index
    %177 = vector.load %arg13[%c0_265, %c120, %c0_266] : memref<1x136x32xbf16, #tpu.memory_space<vmem>>, vector<1x1x32xbf16>
    %178 = arith.maximumf %176, %177 : vector<1x1x32xbf16>
    %c0_267 = arith.constant 0 : index
    %c121 = arith.constant 121 : index
    %c0_268 = arith.constant 0 : index
    %179 = vector.load %arg13[%c0_267, %c121, %c0_268] : memref<1x136x32xbf16, #tpu.memory_space<vmem>>, vector<1x1x32xbf16>
    %180 = arith.maximumf %178, %179 : vector<1x1x32xbf16>
    %c0_269 = arith.constant 0 : index
    %c126 = arith.constant 126 : index
    %c0_270 = arith.constant 0 : index
    %181 = vector.load %arg13[%c0_269, %c126, %c0_270] : memref<1x136x32xbf16, #tpu.memory_space<vmem>>, vector<1x1x32xbf16>
    %182 = arith.maximumf %180, %181 : vector<1x1x32xbf16>
    %c0_271 = arith.constant 0 : index
    %c127 = arith.constant 127 : index
    %c0_272 = arith.constant 0 : index
    %183 = vector.load %arg13[%c0_271, %c127, %c0_272] : memref<1x136x32xbf16, #tpu.memory_space<vmem>>, vector<1x1x32xbf16>
    %184 = arith.maximumf %182, %183 : vector<1x1x32xbf16>
    %c0_273 = arith.constant 0 : index
    %c86_274 = arith.constant 86 : index
    %c0_275 = arith.constant 0 : index
    %185 = vector.load %arg13[%c0_273, %c86_274, %c0_275] : memref<1x136x32xbf16, #tpu.memory_space<vmem>>, vector<1x1x32xbf16>
    %c0_276 = arith.constant 0 : index
    %c87 = arith.constant 87 : index
    %c0_277 = arith.constant 0 : index
    %186 = vector.load %arg13[%c0_276, %c87, %c0_277] : memref<1x136x32xbf16, #tpu.memory_space<vmem>>, vector<1x1x32xbf16>
    %187 = arith.maximumf %185, %186 : vector<1x1x32xbf16>
    %c0_278 = arith.constant 0 : index
    %c92 = arith.constant 92 : index
    %c0_279 = arith.constant 0 : index
    %188 = vector.load %arg13[%c0_278, %c92, %c0_279] : memref<1x136x32xbf16, #tpu.memory_space<vmem>>, vector<1x1x32xbf16>
    %189 = arith.maximumf %187, %188 : vector<1x1x32xbf16>
    %c0_280 = arith.constant 0 : index
    %c93 = arith.constant 93 : index
    %c0_281 = arith.constant 0 : index
    %190 = vector.load %arg13[%c0_280, %c93, %c0_281] : memref<1x136x32xbf16, #tpu.memory_space<vmem>>, vector<1x1x32xbf16>
    %191 = arith.maximumf %189, %190 : vector<1x1x32xbf16>
    %c0_282 = arith.constant 0 : index
    %c122 = arith.constant 122 : index
    %c0_283 = arith.constant 0 : index
    %192 = vector.load %arg13[%c0_282, %c122, %c0_283] : memref<1x136x32xbf16, #tpu.memory_space<vmem>>, vector<1x1x32xbf16>
    %193 = arith.maximumf %191, %192 : vector<1x1x32xbf16>
    %c0_284 = arith.constant 0 : index
    %c123 = arith.constant 123 : index
    %c0_285 = arith.constant 0 : index
    %194 = vector.load %arg13[%c0_284, %c123, %c0_285] : memref<1x136x32xbf16, #tpu.memory_space<vmem>>, vector<1x1x32xbf16>
    %195 = arith.maximumf %193, %194 : vector<1x1x32xbf16>
    %c0_286 = arith.constant 0 : index
    %c128_287 = arith.constant 128 : index
    %c0_288 = arith.constant 0 : index
    %196 = vector.load %arg13[%c0_286, %c128_287, %c0_288] : memref<1x136x32xbf16, #tpu.memory_space<vmem>>, vector<1x1x32xbf16>
    %197 = arith.maximumf %195, %196 : vector<1x1x32xbf16>
    %c0_289 = arith.constant 0 : index
    %c129 = arith.constant 129 : index
    %c0_290 = arith.constant 0 : index
    %198 = vector.load %arg13[%c0_289, %c129, %c0_290] : memref<1x136x32xbf16, #tpu.memory_space<vmem>>, vector<1x1x32xbf16>
    %199 = arith.maximumf %197, %198 : vector<1x1x32xbf16>
    %200 = tpu.concatenate %94, %109, %124, %139, %154, %169, %184, %199 in 2 : vector<1x1x32xbf16>, vector<1x1x32xbf16>, vector<1x1x32xbf16>, vector<1x1x32xbf16>, vector<1x1x32xbf16>, vector<1x1x32xbf16>, vector<1x1x32xbf16>, vector<1x1x32xbf16> -> vector<1x1x256xbf16>
    %201 = vector.shape_cast %200 : vector<1x1x256xbf16> to vector<1x256xbf16>
    %c0_291 = arith.constant 0 : index
    %c0_292 = arith.constant 0 : index
    %202 = vector.load %arg6[%c0_291, %c0_292] : memref<256x128xbf16, #tpu.memory_space<vmem>>, vector<256x128xbf16>
    %cst_293 = arith.constant dense<0.000000e+00> : vector<1x128xf32>
    %203 = tpu.matmul %201, %202, %cst_293 {dimension_numbers = #tpu.dot_dimension_numbers<[1], [0], [0], [1], [0, 0, 1, 1], [], []>} : vector<1x256xbf16>, vector<256x128xbf16>, vector<1x128xf32> -> vector<1x128xf32>
    %c0_294 = arith.constant 0 : index
    %c0_295 = arith.constant 0 : index
    %204 = vector.load %arg7[%c0_294, %c0_295] : memref<1x128xf32, #tpu.memory_space<vmem>>, vector<1x128xf32>
    %205 = arith.addf %203, %204 : vector<1x128xf32>
    %cst_296 = arith.constant 0.000000e+00 : f32
    %206 = vector.broadcast %cst_296 : f32 to vector<1x128xf32>
    %207 = arith.maximumf %205, %206 : vector<1x128xf32>
    %208 = arith.truncf %207 : vector<1x128xf32> to vector<1x128xbf16>
    %c0_297 = arith.constant 0 : index
    %c0_298 = arith.constant 0 : index
    %209 = vector.load %arg8[%c0_297, %c0_298] : memref<128x128xbf16, #tpu.memory_space<vmem>>, vector<128x128xbf16>
    %cst_299 = arith.constant dense<0.000000e+00> : vector<1x128xf32>
    %210 = tpu.matmul %208, %209, %cst_299 {dimension_numbers = #tpu.dot_dimension_numbers<[1], [0], [0], [1], [0, 0, 1, 1], [], []>} : vector<1x128xbf16>, vector<128x128xbf16>, vector<1x128xf32> -> vector<1x128xf32>
    %c0_300 = arith.constant 0 : index
    %c0_301 = arith.constant 0 : index
    %211 = vector.load %arg9[%c0_300, %c0_301] : memref<1x128xf32, #tpu.memory_space<vmem>>, vector<1x128xf32>
    %212 = arith.addf %210, %211 : vector<1x128xf32>
    %c0_302 = arith.constant 0 : index
    %c0_303 = arith.constant 0 : index
    %c0_304 = arith.constant 0 : index
    %213 = vector.load %arg10[%c0_302, %c0_303, %c0_304] : memref<1x1x128xf32, #tpu.memory_space<vmem>>, vector<1x1x128xf32>
    %214 = vector.shape_cast %213 : vector<1x1x128xf32> to vector<1x128xf32>
    %215 = vector.shape_cast %212 : vector<1x128xf32> to vector<1x1x128xf32>
    tpu.vector_store %arg10[%c0_302, %c0_303, %c0_304], %215 {strides = array<i32>} : memref<1x1x128xf32, #tpu.memory_space<vmem>>, vector<1x1x128xf32>,
    return
  }
  func.func @transform_0(%arg0: i32) -> (i32, i32, i32) {
    %c0_i32 = arith.constant 0 : i32
    %c0_i32_0 = arith.constant 0 : i32
    %c0_i32_1 = arith.constant 0 : i32
    return %arg0, %c0_i32, %c0_i32_0 : i32, i32, i32
  }
  func.func @transform_1(%arg0: i32) -> (i32, i32) {
    %c0_i32 = arith.constant 0 : i32
    %c0_i32_0 = arith.constant 0 : i32
    %c0_i32_1 = arith.constant 0 : i32
    return %c0_i32, %c0_i32_0 : i32, i32
  }
  func.func @transform_2(%arg0: i32) -> (i32, i32) {
    %c0_i32 = arith.constant 0 : i32
    %c0_i32_0 = arith.constant 0 : i32
    %c0_i32_1 = arith.constant 0 : i32
    return %c0_i32, %c0_i32_0 : i32, i32
  }
  func.func @transform_3(%arg0: i32) -> (i32, i32) {
    %c0_i32 = arith.constant 0 : i32
    %c0_i32_0 = arith.constant 0 : i32
    %c0_i32_1 = arith.constant 0 : i32
    return %c0_i32, %c0_i32_0 : i32, i32
  }
  func.func @transform_4(%arg0: i32) -> (i32, i32) {
    %c0_i32 = arith.constant 0 : i32
    %c0_i32_0 = arith.constant 0 : i32
    %c0_i32_1 = arith.constant 0 : i32
    return %c0_i32, %c0_i32_0 : i32, i32
  }
  func.func @transform_5(%arg0: i32) -> (i32, i32) {
    %c0_i32 = arith.constant 0 : i32
    %c0_i32_0 = arith.constant 0 : i32
    %c0_i32_1 = arith.constant 0 : i32
    return %c0_i32, %c0_i32_0 : i32, i32
  }
  func.func @transform_6(%arg0: i32) -> (i32, i32) {
    %c0_i32 = arith.constant 0 : i32
    %c0_i32_0 = arith.constant 0 : i32
    %c0_i32_1 = arith.constant 0 : i32
    return %c0_i32, %c0_i32_0 : i32, i32
  }
  func.func @transform_7(%arg0: i32) -> (i32, i32) {
    %c0_i32 = arith.constant 0 : i32
    %c0_i32_0 = arith.constant 0 : i32
    %c0_i32_1 = arith.constant 0 : i32
    return %c0_i32, %c0_i32_0 : i32, i32
  }
  func.func @transform_8(%arg0: i32) -> (i32, i32) {
    %c0_i32 = arith.constant 0 : i32
    %c0_i32_0 = arith.constant 0 : i32
    %c0_i32_1 = arith.constant 0 : i32
    return %c0_i32, %c0_i32_0 : i32, i32
  }
  func.func @transform_9(%arg0: i32) -> (i32, i32, i32) {
    %c0_i32 = arith.constant 0 : i32
    %c0_i32_0 = arith.constant 0 : i32
    %c0_i32_1 = arith.constant 0 : i32
    return %arg0, %c0_i32, %c0_i32_0 : i32, i32, i32
  }
}

</mosaic_0001>

<bundles_post_ra>
// kernel: voxnet_forward.1
= control target key start
LH: loop header
LB: loop body
LE: loop exit
PB: predicated region body
PF: predicated region fallthrough
CT: control target
= control target key end

     0   :  { %14 = vsyncpa [#allocation6], 0  ;;  %s12684_s0 = inlined_call_operand.vmem [shape: bf16[2,216,128], index: 0, kind: input, shape index: {}]   ;;  %s12685_s1 = inlined_call_operand.vmem [shape: bf16[128,32], index: 1, kind: input, shape index: {}]   ;;  %s12686_s2 = inlined_call_operand.vmem [shape: f32[1,32], index: 2, kind: input, shape index: {}]   ;;  %s12687_s3 = inlined_call_operand.vmem [shape: bf16[864,32], index: 3, kind: input, shape index: {}]   ;;  %s12688_s4 = inlined_call_operand.vmem [shape: f32[1,32], index: 4, kind: input, shape index: {}]   ;;  %s12689_s5 = inlined_call_operand.vmem [shape: bf16[256,128], index: 5, kind: input, shape index: {}]   ;;  %s12690_s6 = inlined_call_operand.vmem [shape: f32[1,128], index: 6, kind: input, shape index: {}]   ;;  %s12691_s7 = inlined_call_operand.vmem [shape: bf16[128,128], index: 7, kind: input, shape index: {}]   ;;  %s12692_s8 = inlined_call_operand.vmem [shape: f32[1,128], index: 8, kind: input, shape index: {}]   ;;  %s12693_s9 = inlined_call_operand.hbm [shape: f32[2,1,128], index: 9, kind: output, shape index: {}]  }
   0x1   :  { %16 = vsyncpa [#allocation6 + $0x1], 0  ;;  %s8597_s30 = smov 0   ;;  %s8599_s10 = smov 0  }
   0x2   :  { %s8601_s11 = smov 0   ;;  %s8603_s12 = smov 0  }
   0x3 LB: > { %s8618_s13 = sadd.s32 4294967295, %s8538_s12   ;;  %s7541_s14 = sadd.s32 4294967294, %s8538_s12   ;;  %s8538_s12 = sphi %s8603_s12, %s12913_s12   ;;  %s8534_s11 = sphi %s8601_s11, %s12912_s11   ;;  %s8530_s10 = sphi %s8599_s10, %s12911_s10   ;;  %s8526_s30 = sphi %s8597_s30, %s12910_s30  }
   0x4   : > { %s8622_s15 = sadd.s32 1, %s8538_s12   ;;  %s223_s16 = sadd.s32 1, %s8534_s11 }
   0x5   : > { %s220_s17 = ssub.s32 %s8538_s12, %s8622_s15  ;;  %p233_p0 = scmp.ne.s32.totalorder %s8534_s11, %s8530_s10 }
   0x6   : > { %p221_p1 = scmp.eq.s32.totalorder %s220_s17, 0  ;;  %p234_p2 = scmp.eq.s32.totalorder %s8618_s13, 1 }
   0x7   : > { %p239_p3 = scmp.ne.s32.totalorder %s8530_s10, %s8526_s30  ;;  %p240_p4 = scmp.eq.s32.totalorder %s7541_s14, 1 }
   0x8   : > { %s8633_s18 = scalar_select %p221_p1, %s8534_s11, %s223_s16  }
   0x9   : > { %p8635_p5 = por %p234_p2, %p233_p0  ;;  %p8639_p6 = por %p240_p4, %p239_p3 }
   0xa   : > { %p7544_p7 = scmp.ge.s32.totalorder %s8538_s12, 1  ;;  %p290_p8 = scmp.lt.s32.totalorder %s8538_s12, 3 }
   0xc   : > { %p291_p9 = pnand %p7544_p7, %p290_p8 }
   0xe   : > { %294 = sbr.rel (%p291_p9) target bundleno = 1826 (0x722), region = 56 }
  0x13   : > { %v8300_v0 = vld [vmem:[%s12685_s1 + $0x38] sm:$0xff]   ;;  %p325_p10 = scmp.lt.s32.totalorder %s8618_s13, 1  ;;  %v8301_v1 = vld [vmem:[%s12685_s1 + $0x30] sm:$0xff]   ;;  %v8302_v2 = vld [vmem:[%s12685_s1 + $0x28] sm:$0xff]   ;;  %vm791_vm0 = vcmask 257024   ;;  %vm1154_vm1 = vcmask 1042432  }
  0x14   : > { %8142 = vmatprep.subr.bf16.mxu0 %v8300_v0  ;;  %v8303_v3 = vld [vmem:[%s12685_s1 + $0x20] sm:$0xff]   ;;  %v8304_v5 = vld [vmem:[%s12685_s1 + $0x18] sm:$0xff]   ;;  %v8305_v6 = vld [vmem:[%s12685_s1 + $0x10] sm:$0xff]   ;;  %vm1155_vm2 = vcmask 1046532   ;;  %s8540_s21 = smov 32   ;;  %vm1788_vm3 = vcmask 1041408  }
  0x15   : > { %s326_s25 = scalar_select %p325_p10, %s8618_s13, 1  ;;  %8143 = vmatpush3.bf16.msra.mxu0 %v8300_v0  ;;  %v8306_v7 = vld [vmem:[%s12685_s1 + $0x8] sm:$0xff]   ;;  %v8307_v8 = vld [vmem:[%s12685_s1] sm:$0xff]   ;;  %vm1789_vm4 = vcmask 1045508   ;;  %vm8717_vm5 = vmor %vm1154_vm1, %vm1155_vm2  ;;  %vm1314_vm6 = vcmask 1040384   ;;  %vm1315_vm7 = vcmask 1044484  }
  0x16   : > { %8144 = vmatprep.subr.bf16.mxu0 %v8301_v1  ;;  %v8691_v20 = vld [vmem:[%s12686_s2] ss:$0 sm:$0xff]  ;;  %vm8745_vm8 = vmor %vm1788_vm3, %vm1789_vm4  ;;  %s8541_s22 = smov 64   ;;  %s8542_s23 = smov 96   ;;  %vm1929_vm10 = vsmask.f32 1280 }
  0x17   : > { %s8254_s28 = smul.u32 108, %s326_s25  ;;  %vm8756_vm9 = vmor %vm1314_vm6, %vm1315_vm7  ;;  %vm1930_vm11 = vsmask.f32 5392  ;;  %vm872_vm12 = vsmask.f32 3328  ;;  %s323_s27 = sand.u32 1, %s8530_s10  }
  0x18   : > { %vm873_vm13 = vsmask.f32 7440  ;;  %vm8825_vm14 = vmor %vm1929_vm10, %vm1930_vm11  ;;  %vm1456_vm1 = vsmask.f32 256  ;;  %vm1457_vm2 = vsmask.f32 4368 }
  0x19   : > { %s8659_s16 = scalar_lea.vmem %s12684_s0, %s8254_s28  ;;  %8145 = vmatpush3.bf16.msra.mxu0 %v8301_v1  ;;  %vm8838_vm15 = vmor %vm872_vm12, %vm873_vm13  ;;  %vm3016_vm3 = vsmask.f32 2304  ;;  %vm3017_vm4 = vsmask.f32 6416  ;;  %vm1100_vm10 = vcmask 519424   ;;  %vm1260_vm11 = vcmask 781824  }
  0x1a   : > { %8146 = vmatprep.subr.bf16.mxu0 %v8302_v2  ;;  %v8308_v4 = vld [vmem:[%s8659_s16] sm:$0xff]   ;;  %v8309_v9 = vld [vmem:[%s8659_s16 + $0x8] sm:$0xff]   ;;  %v8310_v10 = vld [vmem:[%s8659_s16 + $0x10] sm:$0xff]   ;;  %vm1420_vm12 = vcmask 1044224   ;;  %vm8544_vm13 = vmmov 0   ;;  %s7817_s14 = sshll.u32 %s8618_s13, 4 }
  0x1b   : > { %8158 = vmatprep.mubr.bf16.mxu0 %v8308_v4  ;;  %v8311_v11 = vld [vmem:[%s8659_s16 + $0x18] sm:$0xff]   ;;  %v8312_v12 = vld [vmem:[%s8659_s16 + $0x20] sm:$0xff]   ;;  %v8313_v13 = vld [vmem:[%s8659_s16 + $0x28] sm:$0xff]   ;;  %s324_s17 = scalar_lea.vmem [#allocation5], %s323_s27  ;;  %s7474_s24 = scalar_lea.sflag [#allocation6], %s323_s27 }
  0x1c   : > { %v8314_v14 = vld [vmem:[%s8659_s16 + $0x30] sm:$0xff]   ;;  %v8315_v15 = vld [vmem:[%s8659_s16 + $0x38] sm:$0xff]   ;;  %v8316_v16 = vld [vmem:[%s8659_s16 + $0x40] sm:$0xff]   ;;  %s8546_s13 = smov [#allocation5]  }
  0x1d   : > { %8147 = vmatpush3.bf16.msra.mxu0 %v8302_v2  ;;  %v8317_v17 = vld [vmem:[%s8659_s16 + $0x48] sm:$0xff]   ;;  %v8318_v18 = vld [vmem:[%s8659_s16 + $0x50] sm:$0xff]   ;;  %v8319_v19 = vld [vmem:[%s8659_s16 + $0x58] sm:$0xff]   ;;  %s8482_s26 = sshll.u32 %s8546_s13, 4  ;;  %s8483_s26 = int_to_ptr.vmem [resolvable:$false] %s8482_s26 }
  0x1e   : > { %8148 = vmatprep.subr.bf16.mxu0 %v8303_v3  ;;  %vm9025_vm6 = vmor %vm1456_vm1, %vm1457_vm2  ;;  %vm6243_vm1 = vcmask 785408   ;;  %s8484_s28 = scalar_lea.vmem %s8483_s26, 32 }
  0x1f   : > { %vm9089_vm7 = vmor %vm3016_vm3, %vm3017_vm4 }
  0x21   : > { %8149 = vmatpush3.bf16.msra.mxu0 %v8303_v3 }
  0x22   : > { %8150 = vmatprep.subr.bf16.mxu0 %v8304_v5 }
  0x25   : > { %8151 = vmatpush3.bf16.msra.mxu0 %v8304_v5 }
  0x26   : > { %8152 = vmatprep.subr.bf16.mxu0 %v8305_v6 }
  0x29   : > { %8153 = vmatpush3.bf16.msra.mxu0 %v8305_v6 }
  0x2a   : > { %8154 = vmatprep.subr.bf16.mxu0 %v8306_v7 }
  0x2d   : > { %8155 = vmatpush3.bf16.msra.mxu0 %v8306_v7 }
  0x2e   : > { %8156 = vmatprep.subr.bf16.mxu0 %v8307_v8 }
  0x31   : > { %8157 = vmatpush3.bf16.msra.mxu0 %v8307_v8 }
  0x34   : > { %8159 = vmatmul.mubr.bf16.vlgmr.msra.gmra.mxu0 %v8309_v9 }
  0x35   : > { %8162 = vmatprep.mubr.bf16.mxu0 %v8310_v10 }
  0x3c   : > { %8163 = vmatmul.mubr.bf16.gmra.mxu0 %v8311_v11 }
  0x3d   : > { %8166 = vmatprep.mubr.bf16.mxu0 %v8312_v12 }
  0x44   : > { %8167 = vmatmul.mubr.bf16.gmra.mxu0 %v8313_v13 }
  0x45   : > { %8170 = vmatprep.mubr.bf16.mxu0 %v8314_v14 }
  0x4c   : > { %8171 = vmatmul.mubr.bf16.gmra.mxu0 %v8315_v15 }
  0x4d   : > { %8174 = vmatprep.mubr.bf16.mxu0 %v8316_v16 }
  0x54   : > { %8175 = vmatmul.mubr.bf16.gmra.mxu0 %v8317_v17 }
  0x55   : > { %8178 = vmatprep.mubr.bf16.mxu0 %v8318_v18 }
  0x5c   : > { %8179 = vmatmul.mubr.bf16.gmra.mxu0 %v8319_v19 }
  0xf4   : > { %v8160_v21 = vpop.f32.mrf.mxu0 }
  0xf5   : > { %v554_v22 = vadd.f32 %v8160_v21, %v8691_v20 }
  0xf6   : > { %v545_v23 = vpop.f32.mrf.mxu0 }
  0xf7   : > { %v657_v24 = vmax.f32 %v554_v22, 0.0  ;;  %v546_v25 = vadd.f32 %v8691_v20, %v545_v23 }
  0xf8   : > { %v8161_v26 = vpop.f32.mrf.mxu0 }
  0xf9   : > { %v7822_v27 = vpack.c.bf16 %v657_v24, %v657_v24  ;;  %v655_v28 = vmax.f32 %v546_v25, 0.0  ;;  %v557_v29 = vadd.f32 %v8161_v26, %v8691_v20 }
  0xfa   : > { %v548_v30 = vpop.f32.mrf.mxu0 }
  0xfb   : > { %794 = vst.msk [vmem:[#allocation2 + $0x8] sm:$0xf] %vm791_vm0, %v7822_v27  ;;  %v7820_v31 = vpack.c.bf16 %v655_v28, %v655_v28  ;;  %v658_v32 = vmax.f32 %v557_v29, 0.0  ;;  %v549_v33 = vadd.f32 %v8691_v20, %v548_v30 }
  0xfc   : > { %v8164_v34 = vpop.f32.mrf.mxu0 }
  0xfd   : > { %792 = vst.msk [vmem:[#allocation2] sm:$0xf] %vm791_vm0, %v7820_v31  ;;  %v7823_v35 = vpack.c.bf16 %v658_v32, %v658_v32  ;;  %v656_v36 = vmax.f32 %v549_v33, 0.0  ;;  %v570_v37 = vadd.f32 %v8164_v34, %v8691_v20 }
  0xfe   : > { %v561_v38 = vpop.f32.mrf.mxu0 }
  0xff   : > { %795 = vst.msk [vmem:[#allocation2 + $0xc] sm:$0xf] %vm791_vm0, %v7823_v35  ;;  %v7821_v39 = vpack.c.bf16 %v656_v36, %v656_v36  ;;  %v661_v40 = vmax.f32 %v570_v37, 0.0  ;;  %v562_v41 = vadd.f32 %v8691_v20, %v561_v38 }
 0x100   : > { %v8165_v42 = vpop.f32.mrf.mxu0 }
 0x101   : > { %793 = vst.msk [vmem:[#allocation2 + $0x4] sm:$0xf] %vm791_vm0, %v7821_v39  ;;  %v7826_v43 = vpack.c.bf16 %v661_v40, %v661_v40  ;;  %v659_v44 = vmax.f32 %v562_v41, 0.0  ;;  %v573_v45 = vadd.f32 %v8165_v42, %v8691_v20 }
 0x102   : > { %v564_v46 = vpop.f32.mrf.mxu0  ;;  %v1651_v47 = vld [vmem:[#allocation2 + $0x8] sm:$0xf] }
 0x103   : > { %v8704_v48 = vld [vmem:[#allocation2 + $0x8] sm:$0xf]  ;;  %798 = vst.msk [vmem:[#allocation2 + $0x18] sm:$0xf] %vm791_vm0, %v7826_v43  ;;  %v7824_v50 = vpack.c.bf16 %v659_v44, %v659_v44  ;;  %v662_v51 = vmax.f32 %v573_v45, 0.0  ;;  %v565_v52 = vadd.f32 %v8691_v20, %v564_v46  ;;  %1686 = vrot.lane.b32.xlu1 %v1651_v47, %s8540_s21 }
 0x104   : > { %v8706_v49 = vld [vmem:[#allocation2 + $0x8] sm:$0xf]  ;;  %v1162_v53 = vrot.slane %v8704_v48, 5  ;;  %v8168_v54 = vpop.f32.mrf.mxu0  ;;  %v1118_v26 = vld [vmem:[#allocation2] sm:$0xe] }
 0x105   : > { %v1793_v55 = vrot.slane %v8706_v49, 6  ;;  %796 = vst.msk [vmem:[#allocation2 + $0x10] sm:$0xf] %vm791_vm0, %v7824_v50  ;;  %v7827_v56 = vpack.c.bf16 %v662_v51, %v662_v51  ;;  %v660_v57 = vmax.f32 %v565_v52, 0.0  ;;  %v586_v58 = vadd.f32 %v8168_v54, %v8691_v20  ;;  %v8723_v61 = vld [vmem:[#allocation2 + $0x8] sm:$0xf] }
 0x106   : > { %v1164_v60 = vrot.slane %v1162_v53, 4  ;;  %v577_v62 = vpop.f32.mrf.mxu0  ;;  %v1652_v63 = vld [vmem:[#allocation2 + $0xc] sm:$0xf]  ;;  %v1322_v9 = vrot.slane %v8723_v61, 7  ;;  %v1912_v23 = vld [vmem:[#allocation2 + $0x8] sm:$0xf] }
 0x107   : > { %v8725_v0 = vld [vmem:[#allocation2 + $0xc] sm:$0xf]  ;;  %799 = vst.msk [vmem:[#allocation2 + $0x1c] sm:$0xf] %vm791_vm0, %v7827_v56  ;;  %v7825_v2 = vpack.c.bf16 %v660_v57, %v660_v57  ;;  %v665_v3 = vmax.f32 %v586_v58, 0.0  ;;  %v578_v4 = vadd.f32 %v8691_v20, %v577_v62  ;;  %1688 = vrot.lane.b32.xlu0 %v1652_v63, %s8540_s21  ;;  %v1795_v14 = vrot.slane %v1793_v55, 4 }
 0x108   : > { %v8727_v1 = vld [vmem:[#allocation2 + $0xc] sm:$0xf]  ;;  %v1165_v5 = vrot.slane %v8725_v0, 5  ;;  %v1650_v7 = vld [vmem:[#allocation2 + $0x4] sm:$0xf]  ;;  %v8169_v16 = vpop.f32.mrf.mxu0  ;;  %v1324_v21 = vrot.slane %v1322_v9, 4 }
 0x109   : > { %v8733_v6 = vld [vmem:[#allocation2 + $0xc] sm:$0xf]  ;;  %v1796_v8 = vrot.slane %v8727_v1, 6  ;;  %797 = vst.msk [vmem:[#allocation2 + $0x14] sm:$0xf] %vm791_vm0, %v7825_v2  ;;  %v7830_v10 = vpack.c.bf16 %v665_v3, %v665_v3  ;;  %v663_v11 = vmax.f32 %v578_v4, 0.0  ;;  %1684 = vrot.lane.b32.xlu1 %v1650_v7, %s8540_s21  ;;  %v589_v51 = vadd.f32 %v8169_v16, %v8691_v20 }
 0x10a   : > { %v1166_v12 = vsel %vm8717_vm5, %v1164_v60, %v1165_v5  ;;  %v1325_v15 = vrot.slane %v8733_v6, 7  ;;  %v1119_v22 = vld [vmem:[#allocation2 + $0x4] sm:$0xf]  ;;  %v1655_v25 = vld [vmem:[#allocation2 + $0x18] sm:$0xf]  ;;  %v580_v28 = vpop.f32.mrf.mxu0  ;;  %v1942_v33 = vshrl.u32 %v1912_v23, 16 }
 0x10b   : > { %802 = vst.msk [vmem:[#allocation2 + $0x28] sm:$0xf] %vm791_vm0, %v7830_v10  ;;  %v7828_v17 = vpack.c.bf16 %v663_v11, %v663_v11  ;;  %1213 = vrot.lane.b32.xlu0 %v1166_v12, %s8541_s22  ;;  %v1797_v19 = vsel %vm8745_vm8, %v1795_v14, %v1796_v8  ;;  %v856_v27 = vld [vmem:[#allocation2 + $0x8] sm:$0xf]  ;;  %v1159_v29 = vrot.slane %v1119_v22, 5  ;;  %v7596_v34 = vrot.slane %v1118_v26, 9 }
 0x10c   : > { %v1326_v24 = vsel %vm8756_vm9, %v1324_v21, %v1325_v15  ;;  %v1752_v30 = vld [vmem:[#allocation2 + $0x4] sm:$0xc]  ;;  %v3421_v31 = vld [vmem:[#allocation2 + $0x18] sm:$0xf]  ;;  %v1913_v35 = vld [vmem:[#allocation2 + $0xc] sm:$0xf]  ;;  %v8172_v39 = vpop.f32.mrf.mxu0  ;;  %v581_v58 = vadd.f32 %v8691_v20, %v580_v28 }
 0x10d   : > { %800 = vst.msk [vmem:[#allocation2 + $0x20] sm:$0xf] %vm791_vm0, %v7828_v17  ;;  %1845 = vrot.lane.b32.xlu1 %v1797_v19, %s8541_s22  ;;  %v8773_v32 = vld [vmem:[#allocation2 + $0x4] sm:$0xf]  ;;  %v1945_v36 = vshll.u32 %v1912_v23, 16  ;;  %v895_v37 = vshll.u32 %v856_v27, 16  ;;  %v1160_v40 = vsel %vm8717_vm5, %v7596_v34, %v1159_v29  ;;  %v602_v3 = vadd.f32 %v8172_v39, %v8691_v20 }
 0x10e   : > { %v899_v38 = vshrl.u32 %v856_v27, 16  ;;  %v1161_v41 = vrot.slane %v1159_v29, 4  ;;  %v7599_v42 = vrot.slane %v1752_v30, 10  ;;  %v1319_v43 = vrot.slane %v8773_v32, 7  ;;  %v854_v44 = vld [vmem:[#allocation2] sm:$0xf]  ;;  %v593_v4 = vpop.f32.mrf.mxu0 }
 0x10f   : > { %1373 = vrot.lane.b32.xlu0 %v1326_v24, %s8542_s23  ;;  %v1653_v45 = vld [vmem:[#allocation2 + $0x10] sm:$0xf]  ;;  %v1944_v46 = vrot.slane %v1942_v33, 6  ;;  %v1952_v47 = vshrl.u32 %v1913_v35, 16  ;;  %v1955_v50 = vshll.u32 %v1913_v35, 16  ;;  %v8320_v52 = vld [vmem:[%s8659_s16 + $0x60] sm:$0xff]  }
 0x110   : > { %v1947_v54 = vrot.slane %v1945_v36, 7  ;;  %v8783_v56 = vrot.slane %v895_v37, 5  ;;  %v901_v57 = vrot.slane %v899_v38, 4  ;;  %v8786_v60 = vld [vmem:[#allocation2 + $0xc] sm:$0xf]  ;;  %v876_v62 = vshrl.u32 %v854_v44, 16  ;;  %8182 = vmatprep.mubr.bf16.mxu0 %v8320_v52 }
 0x111   : > { %1694 = vrot.lane.b32.xlu1 %v1655_v25, %s8540_s21  ;;  %v879_v63 = vshll.u32 %v854_v44, 16  ;;  %v666_v2 = vmax.f32 %v589_v51, 0.0  ;;  %v1163_v7 = vsel %vm8717_vm5, %v1161_v41, %v1162_v53  ;;  %v1794_v10 = vsel %vm8745_vm8, %v7599_v42, %v1793_v55  ;;  %v1278_v14 = vld [vmem:[#allocation2] sm:$0x8]  ;;  %v8322_v22 = vld [vmem:[%s12687_s3 + $0x78] sm:$0xff]   ;;  %v8324_v39 = vld [vmem:[%s12687_s3 + $0x70] sm:$0xff]  }
 0x112   : > { %v1321_v11 = vrot.slane %v1319_v43, 4  ;;  %v664_v12 = vmax.f32 %v581_v58, 0.0  ;;  %v1954_v16 = vrot.slane %v1952_v47, 6  ;;  %v1957_v17 = vrot.slane %v1955_v50, 7  ;;  %7886 = vmatprep.subr.bf16.mxu1 %v8322_v22  ;;  %v855_v28 = vld [vmem:[#allocation2 + $0x4] sm:$0xf] }
 0x113   : > { %3455 = vrot.lane.b32.xlu0 %v3421_v31, %s8542_s23  ;;  %v7831_v19 = vpack.c.bf16 %v666_v2, %v666_v2  ;;  %v669_v21 = vmax.f32 %v602_v3, 0.0  ;;  %v8802_v48 = vor.u32 %v1947_v54, %v1944_v46  ;;  %v905_v49 = vshll.u32 %v8786_v60, 16  ;;  %v8323_v32 = vld [vmem:[%s12687_s3 + $0x38] sm:$0xff]   ;;  %v8847_v42 = vld [vmem:[#allocation2 + $0x10] sm:$0xf]  ;;  %v8326_v3 = vld [vmem:[%s12687_s3 + $0x68] sm:$0xff]  }
 0x114   : > { %v7829_v53 = vpack.c.bf16 %v664_v12, %v664_v12  ;;  %v594_v55 = vadd.f32 %v8691_v20, %v593_v4  ;;  %v902_v23 = vor.u32 %v901_v57, %v8783_v56  ;;  %v878_v24 = vrot.slane %v876_v62, 4  ;;  %7887 = vmatpush3.bf16.msra.mxu1 %v8323_v32  ;;  %v3422_v46 = vld [vmem:[#allocation2 + $0x1c] sm:$0xf]  ;;  %v8855_v50 = vld [vmem:[#allocation2 + $0x10] sm:$0xf] }
 0x115   : > { %1690 = vrot.lane.b32.xlu1 %v1653_v45, %s8540_s21  ;;  %v881_v25 = vrot.slane %v879_v63, 5  ;;  %803 = vst.msk [vmem:[#allocation2 + $0x2c] sm:$0xf] %vm791_vm0, %v7831_v19  ;;  %v7834_v26 = vpack.c.bf16 %v669_v21, %v669_v21  ;;  %v7597_v27 = vrot.slane %v1278_v14, 11  ;;  %v1323_v30 = vsel %vm8756_vm9, %v1321_v11, %v1322_v9  ;;  %7888 = vmatprep.subr.bf16.mxu1 %v8324_v39  ;;  %v8857_v51 = vld [vmem:[#allocation2 + $0x18] sm:$0xf] }
 0x116   : > { %801 = vst.msk [vmem:[#allocation2 + $0x24] sm:$0xf] %vm791_vm0, %v7829_v53  ;;  %v667_v29 = vmax.f32 %v594_v55, 0.0  ;;  %v8814_v31 = vor.u32 %v1957_v17, %v1954_v16  ;;  %v12774_v61 = vmov 0  ;;  %v1950_v9 = vrot.slane %v8802_v48, 4  ;;  %v8325_v52 = vld [vmem:[%s12687_s3 + $0x30] sm:$0xff]  }
 0x117   : > { %1209 = vrot.lane.b32.xlu0 %v1160_v40, %s8541_s22  ;;  %806 = vst.msk [vmem:[#allocation2 + $0x38] sm:$0xf] %vm791_vm0, %v7834_v26  ;;  %v1320_v33 = vsel %vm8756_vm9, %v7597_v27, %v1319_v43  ;;  %v12775_v61 = vsel %vm8825_vm14, 4294967295, %v12774_v61  ;;  %v903_v35 = vrot.slane %v902_v23, 4  ;;  %v8830_v36 = vrot.slane %v905_v49, 5  ;;  %v8328_v14 = vld [vmem:[%s12687_s3 + $0x60] sm:$0xff]  }
 0x118   : > { %12776 = vst [vmem:[#allocation8_spill] sm:$0xff] %v12775_v61  ;;  %v7832_v34 = vpack.c.bf16 %v667_v29, %v667_v29  ;;  %v882_v37 = vor.u32 %v881_v25, %v878_v24  ;;  %v885_v38 = vshll.u32 %v855_v28, 16  ;;  %v1959_v41 = vsel %vm8825_vm14, %v1950_v9, %v8814_v31  ;;  %v8867_v63 = vld [vmem:[#allocation2 + $0x10] sm:$0xf]  ;;  %v1911_v2 = vld [vmem:[#allocation2 + $0x4] sm:$0xc]  ;;  %7889 = vmatpush3.bf16.msra.mxu1 %v8325_v52 }
 0x119   : > { %1211 = vrot.lane.b32.xlu1 %v1163_v7, %s8541_s22  ;;  %v908_v43 = vsel %vm8838_vm15, %v903_v35, %v8830_v36  ;;  %v12702_v47 = vrot.slane %v8847_v42, 5  ;;  %v909_v54 = vshrl.u32 %v8786_v60, 16  ;;  %v889_v58 = vshrl.u32 %v855_v28, 16  ;;  %v8878_v7 = vld [vmem:[#allocation2 + $0x1c] sm:$0xf]  ;;  %7890 = vmatprep.subr.bf16.mxu1 %v8326_v3 }
 0x11a   : > { %804 = vst.msk [vmem:[#allocation2 + $0x30] sm:$0xf] %vm791_vm0, %v7832_v34  ;;  %v883_v44 = vrot.slane %v882_v37, 4  ;;  %v887_v45 = vrot.slane %v885_v38, 5  ;;  %v1167_v62 = vrot.slane %v1165_v5, 4  ;;  %v12701_v4 = vrot.slane %v8855_v50, 7 }
 0x11b   : > { %1843 = vrot.lane.b32.xlu0 %v1794_v10, %s8541_s22  ;;  %v12707_v0 = vrot.slane %v8857_v51, 6  ;;  %v8327_v5 = vld [vmem:[%s12687_s3 + $0x28] sm:$0xff]   ;;  %v1327_v10 = vrot.slane %v1325_v15, 4  ;;  %v1799_v11 = vrot.slane %v8867_v63, 6  ;;  %v8888_v12 = vld [vmem:[#allocation2 + $0x10] sm:$0xf] }
 0x11c   : > { %v888_v57 = vsel %vm8838_vm15, %v883_v44, %v887_v45  ;;  %v1169_v60 = vsel %vm8717_vm5, %v1167_v62, %v12702_v47  ;;  %v1656_v16 = vld [vmem:[#allocation2 + $0x1c] sm:$0xf]  ;;  %v911_v17 = vrot.slane %v909_v54, 4  ;;  %v891_v19 = vrot.slane %v889_v58, 4  ;;  %7891 = vmatpush3.bf16.msra.mxu1 %v8327_v5  ;;  %v8329_v15 = vld [vmem:[%s12687_s3 + $0x20] sm:$0xff]   ;;  %v8332_v44 = vld [vmem:[%s12687_s3 + $0x50] sm:$0xff]  }
 0x11d   : > { %1371 = vrot.lane.b32.xlu1 %v1323_v30, %s8542_s23  ;;  %v1933_v21 = vshrl.u32 %v1911_v2, 16  ;;  %v1936_v22 = vshll.u32 %v1911_v2, 16  ;;  %v1798_v6 = vrot.slane %v1796_v8, 4  ;;  %v1329_v49 = vsel %vm8756_vm9, %v1327_v10, %v12701_v4  ;;  %7892 = vmatprep.subr.bf16.mxu1 %v8328_v14  ;;  %v8912_v8 = vld [vmem:[#allocation2 + $0x18] sm:$0xf]  ;;  %v8333_v62 = vld [vmem:[%s12687_s3 + $0x10] sm:$0xff]  }
 0x11e   : > { %v3305_v53 = vrot.slane %v12707_v0, 4  ;;  %v12695_v55 = vrot.slane %v8878_v7, 6  ;;  %v915_v23 = vshll.u32 %v8888_v12, 16  ;;  %v912_v24 = vor.u32 %v911_v17, %v8830_v36  ;;  %v8330_v28 = vld [vmem:[%s12687_s3 + $0x58] sm:$0xff]   ;;  %v1654_v34 = vld [vmem:[#allocation2 + $0x14] sm:$0xf] }
 0x11f   : > { %1369 = vrot.lane.b32.xlu0 %v1320_v33, %s8542_s23  ;;  %v1800_v1 = vsel %vm8745_vm8, %v1798_v6, %v1799_v11  ;;  %v892_v25 = vor.u32 %v891_v19, %v887_v45  ;;  %v1935_v26 = vrot.slane %v1933_v21, 6  ;;  %v1938_v27 = vrot.slane %v1936_v22, 7  ;;  %v8927_v33 = vld [vmem:[#allocation2 + $0x1c] sm:$0xf]  ;;  %v8932_v38 = vld [vmem:[#allocation2 + $0x18] sm:$0xf] }
 0x120   : > { %7893 = vmatpush3.bf16.msra.mxu1 %v8329_v15  ;;  %v3307_v29 = vsel %vm8745_vm8, %v3305_v53, %v12695_v55  ;;  %v8923_v30 = vrot.slane %v915_v23, 5  ;;  %v12696_v32 = vrot.slane %v8912_v8, 6  ;;  %v8331_v9 = vld [vmem:[%s12687_s3 + $0x18] sm:$0xff]   ;;  %v913_v35 = vrot.slane %v912_v24, 4  ;;  %v1659_v10 = vld [vmem:[#allocation2 + $0x28] sm:$0xf] }
 0x121   : > { %2112 = vrot.lane.b32.xlu1 %v1959_v41, %s8542_s23  ;;  %7894 = vmatprep.subr.bf16.mxu1 %v8330_v28  ;;  %v893_v36 = vrot.slane %v892_v25, 4  ;;  %v1939_v37 = vor.u32 %v1938_v27, %v1935_v26  ;;  %v8945_v45 = vld [vmem:[#allocation2 + $0x1c] sm:$0xf]  ;;  %v8953_v58 = vld [vmem:[#allocation2 + $0x18] sm:$0xf]  ;;  %v8335_v17 = vld [vmem:[%s12687_s3 + $0x8] sm:$0xff]  }
 0x122   : > { %v918_v39 = vsel %vm8838_vm15, %v913_v35, %v8923_v30  ;;  %v1807_v41 = vrot.slane %v12696_v32, 4  ;;  %v8959_v2 = vld [vmem:[#allocation2 + $0x1c] sm:$0xf]  ;;  %v8961_v3 = vld [vmem:[#allocation2 + $0x18] sm:$0xf]  ;;  %v12699_v21 = vrot.slane %v8945_v45, 6 }
 0x123   : > { %1053 = vrot.lane.b32.xlu0 %v908_v43, %s8540_s21  ;;  %v12694_v43 = vrot.slane %v8927_v33, 6  ;;  %v898_v52 = vsel %vm8838_vm15, %v893_v36, %v8783_v56  ;;  %v1940_v54 = vrot.slane %v1939_v37, 4  ;;  %v8334_v56 = vld [vmem:[%s12687_s3 + $0x48] sm:$0xff]   ;;  %v8972_v14 = vld [vmem:[#allocation2 + $0x1c] sm:$0xf]  ;;  %v8336_v15 = vld [vmem:[%s12687_s3 + $0x40] sm:$0xff]  }
 0x124   : > { %7895 = vmatpush3.bf16.msra.mxu1 %v8331_v9  ;;  %v8981_v22 = vld [vmem:[#allocation2 + $0x14] sm:$0xf]  ;;  %v2999_v6 = vld [vmem:[#allocation2 + $0x18] sm:$0xf]  ;;  %v1801_v53 = vrot.slane %v1799_v11, 4  ;;  %v2761_v23 = vrot.slane %v8953_v58, 7 }
 0x125   : > { %3457 = vrot.lane.b32.xlu1 %v3422_v46, %s8542_s23  ;;  %v2341_v46 = vrot.slane %v8932_v38, 6  ;;  %7896 = vmatprep.subr.bf16.mxu1 %v8332_v44  ;;  %v1809_v5 = vsel %vm8745_vm8, %v1807_v41, %v12694_v43  ;;  %v12708_v26 = vrot.slane %v8961_v3, 5  ;;  %v3000_v27 = vld [vmem:[#allocation2 + $0x1c] sm:$0xf]  ;;  %v3029_v63 = vshrl.u32 %v2999_v6, 16 }
 0x126   : > { %v3032_v11 = vshll.u32 %v2999_v6, 16  ;;  %v12700_v36 = vrot.slane %v8972_v14, 5  ;;  %v1441_v41 = vld [vmem:[#allocation2 + $0xc] sm:$0xf]  ;;  %v9044_v32 = vld [vmem:[#allocation2 + $0x14] sm:$0xf] }
 0x127   : > { %1049 = vrot.lane.b32.xlu0 %v888_v57, %s8540_s21  ;;  %v8951_v57 = vld [vmem:[#allocation2 + $0x14] sm:$0xf]  ;;  %v2343_v19 = vrot.slane %v2341_v46, 4  ;;  %v821_v58 = vld [vmem:[#allocation2 + $0x4] sm:$0xf] }
 0x128   : > { %7897 = vmatpush3.bf16.msra.mxu1 %v8333_v62  ;;  %v12697_v25 = vrot.slane %v8951_v57, 6  ;;  %v3034_v6 = vrot.slane %v3032_v11, 6  ;;  %838 = vst.msk [vmem:[#allocation3 + $0x1c] sm:$0xf] %vm791_vm0, %v821_v58 }
 0x129   : > { %1215 = vrot.lane.b32.xlu1 %v1169_v60, %s8541_s22  ;;  %v8963_v60 = vld [vmem:[#allocation2 + $0x4] sm:$0xf]  ;;  %7898 = vmatprep.subr.bf16.mxu1 %v8334_v56  ;;  %v2345_v35 = vsel %vm8745_vm8, %v2343_v19, %v12699_v21  ;;  %v1438_v56 = vld [vmem:[#allocation2] sm:$0x8]  ;;  %v3031_v19 = vrot.slane %v3029_v63, 5 }
 0x12a   : > { %v1465_v24 = vshrl.u32 %v8963_v60, 16  ;;  %v1803_v44 = vsel %vm8745_vm8, %v1801_v53, %v12697_v25  ;;  %v12779_v53 = vmov 0  ;;  %v1460_v11 = vshrl.u32 %v1438_v56, 16  ;;  %v1657_v25 = vld [vmem:[#allocation2 + $0x20] sm:$0xf] }
 0x12b   : > { %1696 = vrot.lane.b32.xlu0 %v1656_v16, %s8540_s21  ;;  %v1440_v16 = vld [vmem:[#allocation2 + $0x8] sm:$0xf]  ;;  %v12780_v53 = vsel %vm9025_vm6, 4294967295, %v12779_v53 }
 0x12c   : > { %v1474_v28 = vshrl.u32 %v1440_v16, 16  ;;  %v1467_v9 = vrot.slane %v1465_v24, 7  ;;  %7899 = vmatpush3.bf16.msra.mxu1 %v8335_v17  ;;  %12781 = vst [vmem:[#allocation9_spill] sm:$0xff] %v12780_v53  ;;  %v1483_v24 = vshrl.u32 %v1441_v41, 16 }
 0x12d   : > { %1375 = vrot.lane.b32.xlu1 %v1329_v49, %s8542_s23  ;;  %v1949_v49 = vsel %vm8825_vm14, %v1940_v54, %v8802_v48  ;;  %v8999_v48 = vld [vmem:[#allocation2 + $0x1c] sm:$0xf]  ;;  %7900 = vmatprep.subr.bf16.mxu1 %v8336_v15  ;;  %v2338_v54 = vrot.slane %v8981_v22, 6  ;;  %v3042_v15 = vshll.u32 %v3000_v27, 16 }
 0x12e   : > { %v1476_v37 = vrot.slane %v1474_v28, 7  ;;  %v1472_v62 = vrot.slane %v1467_v9, 4  ;;  %v8321_v28 = vld [vmem:[%s8659_s16 + $0x68] ss:$0 sps:$4 sm:$0xff]   ;;  %s7486_s16 = sshll.u32 %s324_s17, 4  ;;  %s12645_s16 = int_to_ptr.vmem [resolvable:$true] %s7486_s16 }
 0x12f   : > { %1847 = vrot.lane.b32.xlu0 %v1800_v1, %s8541_s22  ;;  %v8992_v1 = vld [vmem:[#allocation2 + $0x18] sm:$0xf]  ;;  %v2340_v55 = vrot.slane %v2338_v54, 4  ;;  %8183 = vmatmul.mubr.bf16.gmra.mxu0 %v8321_v28  ;;  %v3044_v21 = vrot.slane %v3042_v15, 6  ;;  %v9065_v15 = vld [vmem:[#allocation2 + $0x10] sm:$0xc]  ;;  %p8485_p0 = scmp.lt.s32.totalorder %s12645_s16, %s8483_s26 }
 0x130   : > { %s8478_s25 = scalar_lea.vmem %s12645_s16, 16 }
 0x131   : > { %3355 = vrot.lane.b32.xlu1 %v3307_v29, %s8541_s22  ;;  %v12698_v29 = vrot.slane %v8959_v2, 7  ;;  %p8479_p11 = scmp.ne.s32.totalorder %s12645_s16, %s8478_s25  ;;  %p8486_p1 = scmp.lt.s32.totalorder %s8484_s28, %s8478_s25 }
 0x133   : > { %1692 = vrot.lane.b32.xlu0 %v1654_v34, %s8540_s21  ;;  %v8337_v34 = vld [vmem:[%s12687_s3] sm:$0xff]   ;;  %p8480_p12 = pnand %p8479_p11, %p8635_p5  ;;  %p8487_p2 = por %p8486_p1, %p8485_p0 }
 0x134   : > { %7901 = vmatpush3.bf16.msra.mxu1 %v8337_v34  ;;  %v9042_v34 = vrot.slane %v1483_v24, 7 }
 0x135   : > { %1055 = vrot.lane.b32.xlu1 %v918_v39, %s8540_s21  ;;  %v1477_v39 = vshll.u32 %v1440_v16, 16  ;;  %v3039_v16 = vshrl.u32 %v3000_v27, 16  ;;  %v1468_v27 = vshll.u32 %v8963_v60, 16  ;;  %p8481_p13 = pneg %p8480_p12 }
 0x137   : > { %1051 = vrot.lane.b32.xlu0 %v898_v52, %s8540_s21  ;;  %v2763_v52 = vrot.slane %v2761_v23, 4  ;;  %v1479_v17 = vor.u32 %v1477_v39, %v1476_v37  ;;  %v822_v39 = vld [vmem:[#allocation2 + $0x8] sm:$0xf]  ;;  %v3041_v60 = vrot.slane %v3039_v16, 5  ;;  %v1470_v56 = vor.u32 %v1468_v27, %v1467_v9  ;;  %v9058_v16 = vld [vmem:[#allocation2 + $0x14] sm:$0xf]  ;;  %p8488_p3 = pnand %p8487_p2, %p8481_p13 }
 0x138   : > { %839 = vst.msk [vmem:[#allocation3 + $0x38] sm:$0xf] %vm791_vm0, %v822_v39  ;;  %v9075_v27 = vld [vmem:[#allocation2 + $0x14] sm:$0xf] }
 0x139   : > { %1853 = vrot.lane.b32.xlu1 %v1809_v5, %s8541_s22  ;;  %v1176_v5 = vrot.slane %v12708_v26, 4  ;;  %v1480_v63 = vsel %vm9025_vm6, %v1472_v62, %v1479_v17  ;;  %v2765_v43 = vsel %vm8756_vm9, %v2763_v52, %v12698_v29  ;;  %v7598_v62 = vrot.slane %v1460_v11, 11  ;;  %v1444_v17 = vld [vmem:[#allocation2 + $0x18] sm:$0xf]  ;;  %v820_v52 = vld [vmem:[#allocation2] sm:$0xf] }
 0x13a   : > { %1634 = vst.msk [vmem:[#allocation3 + $0x20] sm:$0xf] %vm791_vm0, %v1480_v63  ;;  %v9048_v29 = vor.u32 %v3034_v6, %v3031_v19  ;;  %v1481_v63 = vrot.slane %v1476_v37, 4  ;;  %837 = vst.msk [vmem:[#allocation3] sm:$0xf] %vm791_vm0, %v820_v52  ;;  %v1501_v37 = vshrl.u32 %v9044_v32, 16  ;;  %v2342_v11 = vsel %vm8745_vm8, %v2340_v55, %v2341_v46 }
 0x13b   : > { %2110 = vrot.lane.b32.xlu0 %v1949_v49, %s8542_s23  ;;  %v9021_v49 = vld [vmem:[#allocation2 + $0x14] sm:$0xf]  ;;  %v1471_v19 = vsel %vm9025_vm6, %v7598_v62, %v1470_v56  ;;  %v1513_v28 = vshll.u32 %v1444_v17, 16  ;;  %v9081_v56 = vor.u32 %v3044_v21, %v3041_v60  ;;  %v1916_v52 = vld [vmem:[#allocation2 + $0x18] sm:$0xf]  ;;  %v12782_v55 = vmov 0 }
 0x13c   : > { %v12704_v9 = vrot.slane %v9021_v49, 7  ;;  %1633 = vst.msk [vmem:[#allocation3 + $0x4] sm:$0xf] %vm791_vm0, %v1471_v19  ;;  %v9078_v39 = vrot.slane %v1501_v37, 7  ;;  %v3037_v62 = vrot.slane %v9048_v29, 4  ;;  %v12783_v55 = vsel %vm9089_vm7, 4294967295, %v12782_v55 }
 0x13d   : > { %1702 = vrot.lane.b32.xlu1 %v1659_v10, %s8540_s21  ;;  %v12706_v10 = vrot.slane %v8992_v1, 7  ;;  %12784 = vst [vmem:[#allocation10_spill] sm:$0xff] %v12783_v55  ;;  %v10695_v55 = vld [vmem:[#allocation2 + $0x28] sm:$0xf] }
 0x13e   : > { %v2760_v46 = vrot.slane %v12704_v9, 4  ;;  %v1508_v21 = vrot.slane %v9078_v39, 4  ;;  %v3046_v47 = vsel %vm9089_vm7, %v3037_v62, %v9081_v56  ;;  %v823_v9 = vld [vmem:[#allocation2 + $0xc] sm:$0xf] }
 0x13f   : > { %2392 = vrot.lane.b32.xlu0 %v2345_v35, %s8540_s21  ;;  %v12703_v35 = vrot.slane %v8999_v48, 7  ;;  %v1336_v6 = vrot.slane %v12706_v10, 4  ;;  %840 = vst.msk [vmem:[#allocation3 + $0x54] sm:$0xf] %vm791_vm0, %v823_v9 }
 0x141   : > { %1849 = vrot.lane.b32.xlu1 %v1803_v44, %s8541_s22  ;;  %v1486_v44 = vshll.u32 %v1441_v41, 16  ;;  %v8173_v41 = vpop.f32.mrf.mxu0  ;;  %v1338_v60 = vsel %vm8756_vm9, %v1336_v6, %v12703_v35 }
 0x142   : > { %v605_v62 = vadd.f32 %v8173_v41, %v8691_v20 }
 0x143   : > { %2812 = vrot.lane.b32.xlu0 %v2765_v43, %s8542_s23  ;;  %v1488_v24 = vor.u32 %v1486_v44, %v9042_v34  ;;  %v1178_v43 = vsel %vm8717_vm5, %v1176_v5, %v12700_v36  ;;  %v1510_v5 = vshrl.u32 %v1444_v17, 16  ;;  %v1442_v44 = vld [vmem:[#allocation2 + $0x10] sm:$0xf]  ;;  %v12705_v17 = vrot.slane %v9058_v16, 5  ;;  %v596_v38 = vpop.f32.mrf.mxu0 }
 0x144   : > { %v1492_v37 = vshrl.u32 %v1442_v44, 16  ;;  %v1985_v36 = vshll.u32 %v1916_v52, 16  ;;  %v1495_v4 = vshll.u32 %v1442_v44, 16  ;;  %v2762_v44 = vsel %vm8756_vm9, %v2760_v46, %v2761_v23 }
 0x145   : > { %1698 = vrot.lane.b32.xlu1 %v1657_v25, %s8540_s21  ;;  %v1489_v25 = vsel %vm9025_vm6, %v1481_v63, %v1488_v24  ;;  %v9084_v63 = vrot.slane %v1510_v5, 7  ;;  %v7601_v24 = vrot.slane %v9065_v15, 10  ;;  %v1331_v5 = vrot.slane %v9075_v27, 7  ;;  %v8176_v35 = vpop.f32.mrf.mxu0 }
 0x146   : > { %1635 = vst.msk [vmem:[#allocation3 + $0x3c] sm:$0xf] %vm791_vm0, %v1489_v25  ;;  %v862_v25 = vld [vmem:[#allocation2 + $0x20] sm:$0xf]  ;;  %v1173_v6 = vrot.slane %v12705_v17, 4  ;;  %v597_v10 = vadd.f32 %v8691_v20, %v596_v38  ;;  %v1987_v46 = vrot.slane %v1985_v36, 7 }
 0x147   : > { %1221 = vrot.lane.b32.xlu0 %v1178_v43, %s8541_s22  ;;  %v1917_v43 = vld [vmem:[#allocation2 + $0x1c] sm:$0xf]  ;;  %v1515_v19 = vor.u32 %v1513_v28, %v9084_v63  ;;  %v9111_v28 = vrot.slane %v1492_v37, 7  ;;  %v955_v17 = vshll.u32 %v862_v25, 16  ;;  %v670_v26 = vmax.f32 %v605_v62, 0.0 }
 0x148   : > { %v1995_v0 = vshll.u32 %v1917_v43, 16  ;;  %v2339_v36 = vsel %vm8745_vm8, %v7601_v24, %v2338_v54  ;;  %v1333_v22 = vrot.slane %v1331_v5, 4  ;;  %v12793_v27 = vrot.slane %v8959_v2, 7 }
 0x149   : > { %2390 = vrot.lane.b32.xlu1 %v2342_v11, %s8540_s21  ;;  %v1982_v11 = vshrl.u32 %v1916_v52, 16  ;;  %v1516_v15 = vsel %vm9025_vm6, %v1508_v21, %v1515_v19  ;;  %v1992_v52 = vshrl.u32 %v1917_v43, 16  ;;  %v3265_v21 = vld [vmem:[#allocation2 + $0x14] sm:$0xc]  ;;  %v1490_v19 = vrot.slane %v9042_v34, 4 }
 0x14a   : > { %1638 = vst.msk [vmem:[#allocation3 + $0x90] sm:$0xf] %vm791_vm0, %v1516_v15  ;;  %v1497_v37 = vor.u32 %v1495_v4, %v9111_v28  ;;  %v1914_v15 = vld [vmem:[#allocation2 + $0x10] sm:$0xf]  ;;  %v9128_v9 = vrot.slane %v955_v17, 5  ;;  %v668_v4 = vmax.f32 %v597_v10, 0.0  ;;  %v7835_v43 = vpack.c.bf16 %v670_v26, %v670_v26 }
 0x14b   : > { %1381 = vrot.lane.b32.xlu0 %v1338_v60, %s8542_s23  ;;  %v3425_v60 = vld [vmem:[#allocation2 + $0x28] sm:$0xf]  ;;  %v1984_v23 = vrot.slane %v1982_v11, 6  ;;  %v7604_v38 = vrot.slane %v3265_v21, 10  ;;  %v618_v11 = vadd.f32 %v8176_v35, %v8691_v20  ;;  %v1965_v17 = vshll.u32 %v1914_v15, 16 }
 0x14c   : > { %v1498_v41 = vsel %vm9025_vm6, %v1490_v19, %v1497_v37  ;;  %v7833_v10 = vpack.c.bf16 %v668_v4, %v668_v4  ;;  %807 = vst.msk [vmem:[#allocation2 + $0x3c] sm:$0xf] %vm791_vm0, %v7835_v43  ;;  %v12785_v26 = vrot.slane %v8961_v3, 5  ;;  %v1994_v19 = vrot.slane %v1992_v52, 6  ;;  %v1445_v43 = vld [vmem:[#allocation2 + $0x1c] sm:$0xf] }
 0x14d   : > { %3199 = vrot.lane.b32.xlu1 %v3046_v47, %s8540_s21  ;;  %v959_v47 = vshrl.u32 %v862_v25, 16  ;;  %v609_v25 = vpop.f32.mrf.mxu0  ;;  %1636 = vst.msk [vmem:[#allocation3 + $0x58] sm:$0xf] %vm791_vm0, %v1498_v41  ;;  %v673_v54 = vmax.f32 %v618_v11, 0.0  ;;  %v9150_v21 = vor.u32 %v1987_v46, %v1984_v23  ;;  %v1997_v37 = vrot.slane %v1995_v0, 7 }
 0x14e   : > { %v610_v24 = vadd.f32 %v8691_v20, %v609_v25  ;;  %v1175_v35 = vsel %vm8717_vm5, %v1173_v6, %v12785_v26  ;;  %805 = vst.msk [vmem:[#allocation2 + $0x34] sm:$0xf] %vm791_vm0, %v7833_v10  ;;  %v12786_v41 = vrot.slane %v8857_v51, 6  ;;  %v1967_v25 = vrot.slane %v1965_v17, 7  ;;  %v860_v6 = vld [vmem:[#allocation2 + $0x18] sm:$0xf] }
 0x14f   : > { %3463 = vrot.lane.b32.xlu0 %v3425_v60, %s8542_s23  ;;  %v9130_v34 = vrot.slane %v959_v47, 4  ;;  %v1962_v60 = vshrl.u32 %v1914_v15, 16  ;;  %v1915_v47 = vld [vmem:[#allocation2 + $0x14] sm:$0xf]  ;;  %v7838_v58 = vpack.c.bf16 %v673_v54, %v673_v54  ;;  %v12787_v0 = vrot.slane %v8992_v1, 7 }
 0x150   : > { %v671_v15 = vmax.f32 %v610_v24, 0.0  ;;  %v3304_v20 = vsel %vm8745_vm8, %v7604_v38, %v12786_v41  ;;  %v1990_v46 = vrot.slane %v9150_v21, 4  ;;  %v9165_v51 = vor.u32 %v1997_v37, %v1994_v19  ;;  %v2458_v37 = vld [vmem:[#allocation2 + $0x18] sm:$0xf] }
 0x151   : > { %2810 = vrot.lane.b32.xlu1 %v2762_v44, %s8542_s23  ;;  %v2720_v44 = vld [vmem:[#allocation2 + $0x10] sm:$0x8]  ;;  %v1964_v4 = vrot.slane %v1962_v60, 6  ;;  %v1335_v52 = vsel %vm8756_vm9, %v1333_v22, %v12787_v0  ;;  %810 = vst.msk [vmem:[#allocation2 + $0x48] sm:$0xf] %vm791_vm0, %v7838_v58  ;;  %v1975_v38 = vshll.u32 %v1915_v47, 16 }
 0x152   : > { %v7602_v3 = vrot.slane %v2720_v44, 11  ;;  %v7836_v23 = vpack.c.bf16 %v671_v15, %v671_v15  ;;  %v935_v11 = vshll.u32 %v860_v6, 16  ;;  %v939_v60 = vshrl.u32 %v860_v6, 16 }
 0x153   : > { %2388 = vrot.lane.b32.xlu0 %v2339_v36, %s8540_s21  ;;  %v1972_v36 = vshrl.u32 %v1915_v47, 16  ;;  %v12788_v1 = vrot.slane %v9021_v49, 7  ;;  %v1968_v10 = vor.u32 %v1967_v25, %v1964_v4  ;;  %v1519_v22 = vshrl.u32 %v1445_v43, 16  ;;  %v9191_v25 = vld [vmem:[#allocation2 + $0x20] sm:$0xf] }
 0x154   : > { %808 = vst.msk [vmem:[#allocation2 + $0x40] sm:$0xf] %vm791_vm0, %v7836_v23  ;;  %v1522_v44 = vshll.u32 %v1445_v43, 16  ;;  %v1999_v54 = vsel %vm8825_vm14, %v1990_v46, %v9165_v51  ;;  %v1960_v24 = vrot.slane %v8814_v31, 4  ;;  %v9179_v19 = vrot.slane %v935_v11, 5 }
 0x155   : > { %1219 = vrot.lane.b32.xlu1 %v1175_v35, %s8541_s22  ;;  %v2759_v17 = vsel %vm8756_vm9, %v7602_v3, %v12788_v1  ;;  %v1974_v26 = vrot.slane %v1972_v36, 6  ;;  %v1977_v35 = vrot.slane %v1975_v38, 7  ;;  %v941_v49 = vrot.slane %v939_v60, 4  ;;  %v9188_v3 = vld [vmem:[#allocation2 + $0x1c] sm:$0xf] }
 0x156   : > { %v1517_v47 = vrot.slane %v9084_v63, 4  ;;  %v9182_v58 = vrot.slane %v1519_v22, 7  ;;  %v1969_v15 = vsel %vm8825_vm14, %v1960_v24, %v1968_v10  ;;  %v12789_v41 = vrot.slane %v8847_v42, 5  ;;  %v3426_v31 = vld [vmem:[#allocation2 + $0x2c] sm:$0xf] }
 0x157   : > { %3353 = vrot.lane.b32.xlu0 %v3304_v20, %s8541_s22  ;;  %v1970_v4 = vrot.slane %v1968_v10, 4  ;;  %v12790_v63 = vrot.slane %v8855_v50, 7  ;;  %v2494_v23 = vshrl.u32 %v2458_v37, 16  ;;  %v2497_v46 = vshll.u32 %v2458_v37, 16  ;;  %v9203_v11 = vld [vmem:[#allocation2 + $0x24] sm:$0xf] }
 0x158   : > { %v1170_v20 = vrot.slane %v12789_v41, 4  ;;  %v1524_v6 = vor.u32 %v1522_v44, %v9182_v58  ;;  %v9197_v42 = vor.u32 %v1977_v35, %v1974_v26  ;;  %v942_v36 = vor.u32 %v941_v49, %v9179_v19  ;;  %v1448_v44 = vld [vmem:[#allocation2 + $0x28] sm:$0xf]  ;;  %v9219_v35 = vld [vmem:[#allocation2 + $0x20] sm:$0xf] }
 0x159   : > { %1379 = vrot.lane.b32.xlu1 %v1335_v52, %s8542_s23  ;;  %v1330_v0 = vrot.slane %v12790_v63, 4  ;;  %v2459_v52 = vld [vmem:[#allocation2 + $0x1c] sm:$0xf]  ;;  %v945_v38 = vshll.u32 %v9188_v3, 16  ;;  %v12791_v60 = vrot.slane %v9058_v16, 5  ;;  %v12792_v1 = vrot.slane %v8945_v45, 6 }
 0x15a   : > { %v1525_v43 = vsel %vm9025_vm6, %v1517_v47, %v1524_v6  ;;  %v1499_v10 = vrot.slane %v9111_v28, 4  ;;  %v1504_v22 = vshll.u32 %v9044_v32, 16  ;;  %v12718_v16 = vrot.slane %v9191_v25, 6  ;;  %v826_v63 = vld [vmem:[#allocation2 + $0x18] sm:$0xf] }
 0x15b   : > { %2808 = vrot.lane.b32.xlu0 %v2759_v17, %s8542_s23  ;;  %v1172_v50 = vsel %vm8717_vm5, %v1170_v20, %v12791_v60  ;;  %v2346_v17 = vrot.slane %v12792_v1, 4  ;;  %1639 = vst.msk [vmem:[#allocation3 + $0xac] sm:$0xf] %vm791_vm0, %v1525_v43  ;;  %v2504_v24 = vshrl.u32 %v2459_v52, 16  ;;  %v2507_v26 = vshll.u32 %v2459_v52, 16 }
 0x15c   : > { %v2496_v45 = vrot.slane %v2494_v23, 6  ;;  %v2499_v49 = vrot.slane %v2497_v46, 7  ;;  %v1506_v37 = vor.u32 %v1504_v22, %v9078_v39  ;;  %v1537_v28 = vshrl.u32 %v9203_v11, 16  ;;  %v9227_v20 = vld [vmem:[#allocation2 + $0xc] sm:$0xf] }
 0x15d   : > { %2120 = vrot.lane.b32.xlu1 %v1999_v54, %s8542_s23  ;;  %v1979_v54 = vsel %vm8825_vm14, %v1970_v4, %v9197_v42  ;;  %v919_v32 = vshrl.u32 %v8888_v12, 16  ;;  %v943_v47 = vrot.slane %v942_v36, 4  ;;  %v1546_v41 = vshrl.u32 %v1448_v44, 16  ;;  %v9237_v12 = vld [vmem:[#allocation2 + $0x10] sm:$0xf] }
 0x15e   : > { %v1507_v39 = vsel %vm9025_vm6, %v1499_v10, %v1506_v37  ;;  %v9235_v4 = vrot.slane %v1537_v28, 7  ;;  %v1549_v6 = vshll.u32 %v1448_v44, 16  ;;  %v2348_v52 = vsel %vm8745_vm8, %v2346_v17, %v12718_v16  ;;  %843 = vst.msk [vmem:[#allocation3 + $0xa8] sm:$0xf] %vm791_vm0, %v826_v63  ;;  %v2457_v43 = vld [vmem:[#allocation2 + $0x14] sm:$0xf] }
 0x15f   : > { %2114 = vrot.lane.b32.xlu0 %v1969_v15, %s8542_s23  ;;  %v9225_v15 = vrot.slane %v945_v38, 5  ;;  %v2766_v23 = vrot.slane %v12793_v27, 4  ;;  %1637 = vst.msk [vmem:[#allocation3 + $0x74] sm:$0xf] %vm791_vm0, %v1507_v39  ;;  %v9251_v46 = vor.u32 %v2499_v49, %v2496_v45  ;;  %v2506_v36 = vrot.slane %v2504_v24, 6 }
 0x160   : > { %v2509_v38 = vrot.slane %v2507_v26, 7  ;;  %v1544_v60 = vrot.slane %v9235_v4, 4  ;;  %v921_v2 = vrot.slane %v919_v32, 4  ;;  %v2219_v17 = vrot.slane %v9227_v20, 7  ;;  %v9263_v44 = vld [vmem:[#allocation2 + $0x20] sm:$0xf] }
 0x161   : > { %3465 = vrot.lane.b32.xlu1 %v3426_v31, %s8542_s23  ;;  %v1332_v31 = vsel %vm8756_vm9, %v1330_v0, %v1331_v5  ;;  %v12716_v5 = vrot.slane %v9219_v35, 7  ;;  %v9248_v0 = vrot.slane %v1546_v41, 7  ;;  %v2222_v10 = vrot.slane %v9237_v12, 7  ;;  %v1446_v37 = vld [vmem:[#allocation2 + $0x20] sm:$0xf]  ;;  %v8353_v12 = vld [vmem:[%s12687_s3 + $0x98] sm:$0xff]  }
 0x162   : > { %v948_v22 = vsel %vm8838_vm15, %v943_v47, %v9225_v15  ;;  %v2484_v24 = vshrl.u32 %v2457_v43, 16  ;;  %v2487_v26 = vshll.u32 %v2457_v43, 16  ;;  %v2221_v49 = vrot.slane %v2219_v17, 4  ;;  %v3423_v32 = vld [vmem:[#allocation2 + $0x20] sm:$0xf] }
 0x163   : > { %1217 = vrot.lane.b32.xlu0 %v1172_v50, %s8541_s22  ;;  %v9255_v50 = vld [vmem:[#allocation2 + $0x20] sm:$0xf]  ;;  %v1551_v1 = vor.u32 %v1549_v6, %v9248_v0  ;;  %v2768_v28 = vsel %vm8756_vm9, %v2766_v23, %v12716_v5  ;;  %v12794_v47 = vrot.slane %v8972_v14, 5  ;;  %v2502_v39 = vrot.slane %v9251_v46, 4  ;;  %v9285_v14 = vld [vmem:[#allocation2 + $0x8] sm:$0xf] }
 0x164   : > { %v12714_v20 = vrot.slane %v9255_v50, 5  ;;  %v9278_v6 = vor.u32 %v2509_v38, %v2506_v36  ;;  %v922_v63 = vor.u32 %v921_v2, %v8923_v30  ;;  %v825_v27 = vld [vmem:[#allocation2 + $0x14] sm:$0xf]  ;;  %v12795_v23 = vrot.slane %v8999_v48, 7  ;;  %v2456_v36 = vld [vmem:[#allocation2 + $0x10] sm:$0xc] }
 0x165   : > { %2116 = vrot.lane.b32.xlu1 %v1979_v54, %s8542_s23  ;;  %v859_v54 = vld [vmem:[#allocation2 + $0x14] sm:$0xf]  ;;  %v1552_v45 = vsel %vm9025_vm6, %v1544_v60, %v1551_v1  ;;  %v1179_v41 = vrot.slane %v12794_v47, 4  ;;  %v12710_v60 = vrot.slane %v9263_v44, 7  ;;  %v1528_v30 = vshrl.u32 %v1446_v37, 16 }
 0x166   : > { %1642 = vst.msk [vmem:[#allocation3 + $0x100] sm:$0xf] %vm791_vm0, %v1552_v45  ;;  %v1339_v43 = vrot.slane %v12795_v23, 4  ;;  %v925_v1 = vshll.u32 %v859_v54, 16  ;;  %842 = vst.msk [vmem:[#allocation3 + $0x8c] sm:$0xf] %vm791_vm0, %v825_v27 }
 0x167   : > { %1377 = vrot.lane.b32.xlu0 %v1332_v31, %s8542_s23  ;;  %v824_v31 = vld [vmem:[#allocation2 + $0x10] sm:$0xf]  ;;  %v929_v38 = vshrl.u32 %v859_v54, 16  ;;  %v2486_v2 = vrot.slane %v2484_v24, 6  ;;  %v1531_v45 = vshll.u32 %v1446_v37, 16  ;;  %v1181_v48 = vsel %vm8717_vm5, %v1179_v41, %v12714_v20  ;;  %v8344_v27 = vld [vmem:[%s12687_s3 + $0xf8] sm:$0xff]  }
 0x168   : > { %841 = vst.msk [vmem:[#allocation3 + $0x70] sm:$0xf] %vm791_vm0, %v824_v31  ;;  %v2216_v47 = vrot.slane %v9285_v14, 7  ;;  %v2511_v54 = vsel %vm8825_vm14, %v2502_v39, %v9278_v6  ;;  %v923_v24 = vrot.slane %v922_v63, 4  ;;  %v9306_v37 = vld [vmem:[#allocation2 + $0x18] sm:$0xf]  ;;  %v1341_v39 = vsel %vm8756_vm9, %v1339_v43, %v12710_v60  ;;  %7956 = vmatprep.subr.bf16.mxu0 %v8344_v27 }
 0x169   : > { %2394 = vrot.lane.b32.xlu1 %v2348_v52, %s8540_s21  ;;  %v2223_v52 = vsel %vm8756_vm9, %v2221_v49, %v2222_v10  ;;  %v827_v49 = vld [vmem:[#allocation2 + $0x1c] sm:$0xf]  ;;  %v2478_v41 = vshll.u32 %v2456_v36, 16  ;;  %v1526_v31 = vrot.slane %v9182_v58, 4  ;;  %v927_v63 = vrot.slane %v925_v1, 5 }
 0x16a   : > { %2285 = vst.msk [vmem:[#allocation3 + $0x40] sm:$0xf] %vm791_vm0, %v2223_v52  ;;  %844 = vst.msk [vmem:[#allocation3 + $0xc4] sm:$0xf] %vm791_vm0, %v827_v49  ;;  %v2218_v14 = vrot.slane %v2216_v47, 4  ;;  %v12796_v43 = vrot.slane %v8951_v57, 6 }
 0x16b   : > { %1061 = vrot.lane.b32.xlu0 %v948_v22, %s8540_s21  ;;  %v2489_v22 = vrot.slane %v2487_v26, 7  ;;  %v2475_v26 = vshrl.u32 %v2456_v36, 16  ;;  %v931_v36 = vrot.slane %v929_v38, 4  ;;  %v8345_v57 = vld [vmem:[%s12687_s3 + $0xb8] sm:$0xff]   ;;  %v9539_v16 = vld [vmem:[#allocation2 + $0x24] sm:$0xf] }
 0x16c   : > { %v1804_v1 = vrot.slane %v12796_v43, 4  ;;  %7957 = vmatpush3.bf16.msra.mxu0 %v8345_v57  ;;  %v9380_v57 = vld [vmem:[#allocation2 + $0x20] sm:$0xf] }
 0x16d   : > { %2814 = vrot.lane.b32.xlu1 %v2768_v28, %s8542_s23  ;;  %v9298_v28 = vrot.slane %v1528_v30, 7  ;;  %v9320_v23 = vor.u32 %v2489_v22, %v2486_v2  ;;  %v2220_v30 = vsel %vm8756_vm9, %v2218_v14, %v2219_v17  ;;  %v928_v17 = vsel %vm8838_vm15, %v923_v24, %v927_v63 }
 0x16e   : > { %2284 = vst.msk [vmem:[#allocation3 + $0x24] sm:$0xf] %vm791_vm0, %v2220_v30  ;;  %v2477_v38 = vrot.slane %v2475_v26, 6  ;;  %v2480_v2 = vrot.slane %v2478_v41, 7  ;;  %v932_v27 = vor.u32 %v931_v36, %v927_v63  ;;  %v8347_v63 = vld [vmem:[%s12687_s3 + $0xb0] sm:$0xff]   ;;  %v12797_v36 = vrot.slane %v8912_v8, 6 }
 0x16f   : > { %3459 = vrot.lane.b32.xlu0 %v3423_v32, %s8542_s23  ;;  %v9308_v32 = vld [vmem:[#allocation2 + $0x1c] sm:$0xf]  ;;  %v1533_v52 = vor.u32 %v1531_v45, %v9298_v28  ;;  %v12719_v45 = vrot.slane %v9306_v37, 5  ;;  %v2492_v14 = vrot.slane %v9320_v23, 4 }
 0x170   : > { %v12715_v49 = vrot.slane %v9308_v32, 5  ;;  %v2481_v30 = vor.u32 %v2480_v2, %v2477_v38  ;;  %v9374_v38 = vld [vmem:[#allocation2 + $0x2c] sm:$0xf] }
 0x171   : > { %1223 = vrot.lane.b32.xlu1 %v1181_v48, %s8541_s22  ;;  %v1534_v58 = vsel %vm9025_vm6, %v1526_v31, %v1533_v52  ;;  %v2916_v22 = vrot.slane %v12719_v45, 4  ;;  %v949_v31 = vshrl.u32 %v9188_v3, 16  ;;  %v3424_v52 = vld [vmem:[#allocation2 + $0x24] sm:$0xf]  ;;  %v8346_v3 = vld [vmem:[%s12687_s3 + $0xf0] sm:$0xff]   ;;  %v2501_v8 = vsel %vm8825_vm14, %v2492_v14, %v9251_v46  ;;  %v8349_v46 = vld [vmem:[%s12687_s3 + $0xa8] sm:$0xff]  }
 0x172   : > { %1640 = vst.msk [vmem:[#allocation3 + $0xc8] sm:$0xf] %vm791_vm0, %v1534_v58  ;;  %v1806_v58 = vsel %vm8745_vm8, %v1804_v1, %v12797_v36  ;;  %7958 = vmatprep.subr.bf16.mxu0 %v8346_v3  ;;  %v933_v1 = vrot.slane %v932_v27, 4  ;;  %v9382_v3 = vld [vmem:[#allocation2 + $0x24] sm:$0xf] }
 0x173   : > { %2656 = vrot.lane.b32.xlu0 %v2511_v54, %s8541_s22  ;;  %v2178_v54 = vld [vmem:[#allocation2 + $0x4] sm:$0x8]  ;;  %v2918_v24 = vsel %vm8717_vm5, %v2916_v22, %v12715_v49  ;;  %v951_v22 = vrot.slane %v949_v31, 4  ;;  %v1660_v31 = vld [vmem:[#allocation2 + $0x2c] sm:$0xf]  ;;  %7959 = vmatpush3.bf16.msra.mxu0 %v8347_v63 }
 0x174   : > { %2982 = vst.msk [vmem:[#allocation3 + $0x28] sm:$0xf] %vm791_vm0, %v2918_v24  ;;  %v7600_v41 = vrot.slane %v2178_v54, 11  ;;  %v2998_v24 = vld [vmem:[#allocation2 + $0x14] sm:$0xe]  ;;  %v8350_v63 = vld [vmem:[%s12687_s3 + $0xe0] sm:$0xff]  }
 0x175   : > { %v1687_v48 = vpop.permute.xlu1 %1686  ;;  %1383 = vrot.lane.b32.xlu1 %v1341_v39, %s8542_s23  ;;  %v9344_v39 = vld [vmem:[#allocation2 + $0x28] sm:$0xf]  ;;  %v828_v36 = vld [vmem:[#allocation2 + $0x20] sm:$0xf] }
 0x176   : > { %1736 = vst.msk [vmem:[#allocation3 + $0x20] sm:$0xf] %vm1100_vm10, %v1687_v48  ;;  %v8348_v48 = vld [vmem:[%s12687_s3 + $0xe8] sm:$0xff]   ;;  %v2217_v54 = vsel %vm8756_vm9, %v7600_v41, %v2216_v47  ;;  %v952_v41 = vor.u32 %v951_v22, %v9225_v15  ;;  %v1814_v22 = vrot.slane %v9382_v3, 6 }
 0x177   : > { %1057 = vrot.lane.b32.xlu0 %v928_v17, %s8540_s21  ;;  %v12709_v17 = vrot.slane %v9344_v39, 6  ;;  %2283 = vst.msk [vmem:[#allocation3 + $0x8] sm:$0xf] %vm791_vm0, %v2217_v54  ;;  %v830_v47 = vld [vmem:[#allocation2 + $0x28] sm:$0xf]  ;;  %7960 = vmatprep.subr.bf16.mxu0 %v8348_v48 }
 0x178   : > { %847 = vst.msk [vmem:[#allocation3 + $0x118] sm:$0xf] %vm791_vm0, %v830_v47  ;;  %v1761_v54 = vld [vmem:[#allocation2 + $0x28] sm:$0xf]  ;;  %845 = vst.msk [vmem:[#allocation3 + $0xe0] sm:$0xf] %vm791_vm0, %v828_v36  ;;  %7961 = vmatpush3.bf16.msra.mxu0 %v8349_v46 }
 0x179   : > { %v1689_v26 = vpop.permute.xlu0 %1688  ;;  %3461 = vrot.lane.b32.xlu1 %v3424_v52, %s8542_s23  ;;  %v2482_v52 = vrot.slane %v2481_v30, 4  ;;  %v3317_v27 = vrot.slane %v12709_v17, 4  ;;  %v12798_v30 = vrot.slane %v8878_v7, 6  ;;  %v8351_v7 = vld [vmem:[%s12687_s3 + $0xa0] sm:$0xff]   ;;  %v3020_v47 = vshrl.u32 %v2998_v24, 16  ;;  %7962 = vmatprep.subr.bf16.mxu0 %v8350_v63  ;;  %v8352_v36 = vld [vmem:[%s12687_s3 + $0xd8] sm:$0xff]  }
 0x17a   : > { %1737 = vst.msk [vmem:[#allocation3 + $0x3c] sm:$0xf] %vm1100_vm10, %v1689_v26  ;;  %v12712_v26 = vrot.slane %v9374_v38, 6  ;;  %v953_v62 = vrot.slane %v952_v41, 4  ;;  %v12800_v41 = vrot.slane %v8927_v33, 6 }
 0x17b   : > { %v1685_v43 = vpop.permute.xlu1 %1684  ;;  %1851 = vrot.lane.b32.xlu0 %v1806_v58, %s8541_s22  ;;  %v938_v58 = vsel %vm8838_vm15, %v933_v1, %v9179_v19  ;;  %v3308_v48 = vrot.slane %v12798_v30, 4  ;;  %v829_v19 = vld [vmem:[#allocation2 + $0x24] sm:$0xf]  ;;  %v2491_v1 = vsel %vm8825_vm14, %v2482_v52, %v9320_v23  ;;  %v9425_v23 = vld [vmem:[#allocation2 + $0x20] sm:$0xf]  ;;  %v1817_v52 = vrot.slane %v1761_v54, 6 }
 0x17c   : > { %1735 = vst.msk [vmem:[#allocation3 + $0x4] sm:$0xf] %vm1100_vm10, %v1685_v43  ;;  %v3309_v43 = vrot.slane %v9380_v57, 6  ;;  %v3319_v30 = vsel %vm8745_vm8, %v3317_v27, %v12712_v26  ;;  %v1810_v54 = vrot.slane %v12800_v41, 4  ;;  %7963 = vmatpush3.bf16.msra.mxu0 %v8351_v7  ;;  %v3003_v26 = vld [vmem:[#allocation2 + $0x28] sm:$0xf] }
 0x17d   : > { %v9377_v2 = vpop.permute.xlu0 %1213  ;;  %2654 = vrot.lane.b32.xlu1 %v2501_v8, %s8541_s22  ;;  %v2460_v8 = vld [vmem:[#allocation2 + $0x20] sm:$0xf]  ;;  %846 = vst.msk [vmem:[#allocation3 + $0xfc] sm:$0xf] %vm791_vm0, %v829_v19  ;;  %7964 = vmatprep.subr.bf16.mxu0 %v8352_v36  ;;  %v9559_v3 = vld [vmem:[#allocation2 + $0x28] sm:$0xf] }
 0x17e   : > { %v2514_v63 = vshrl.u32 %v2460_v8, 16  ;;  %v2517_v19 = vshll.u32 %v2460_v8, 16  ;;  %v3310_v27 = vsel %vm8745_vm8, %v3308_v48, %v3309_v43  ;;  %v1816_v8 = vrot.slane %v1814_v22, 4 }
 0x17f   : > { %v1846_v14 = vpop.permute.xlu1 %1845  ;;  %1704 = vrot.lane.b32.xlu0 %v1660_v31, %s8540_s21  ;;  %v9408_v31 = vld [vmem:[#allocation2 + $0x14] sm:$0xf] }
 0x180   : > { %1895 = vst.msk [vmem:[#allocation3 + $0x20] sm:$0xf] %vm1260_vm11, %v1846_v14  ;;  %v3023_v14 = vshll.u32 %v2998_v24, 16  ;;  %v9429_v24 = vld [vmem:[#allocation2 + $0x2c] sm:$0xf]  ;;  %v12713_v17 = vrot.slane %v9408_v31, 7  ;;  %v9458_v41 = vsel %vm8745_vm8, %v1816_v8, %v1817_v52  ;;  %7965 = vmatpush3.bf16.msra.mxu0 %v8353_v12 }
 0x181   : > { %v9404_v15 = vpop.permute.xlu0 %1373  ;;  %1059 = vrot.lane.b32.xlu1 %v938_v58, %s8540_s21  ;;  %v831_v58 = vld [vmem:[#allocation2 + $0x2c] sm:$0xf]  ;;  %v12711_v7 = vrot.slane %v9429_v24, 6  ;;  %v2519_v36 = vrot.slane %v2517_v19, 7  ;;  %v8355_v8 = vld [vmem:[%s12687_s3 + $0x90] sm:$0xff]  }
 0x182   : > { %848 = vst.msk [vmem:[#allocation3 + $0x134] sm:$0xf] %vm791_vm0, %v831_v58  ;;  %v3022_v58 = vrot.slane %v3020_v47, 5  ;;  %v958_v47 = vsel %vm8838_vm15, %v953_v62, %v9128_v9 }
 0x183   : > { %v1695_v46 = vpop.permute.xlu1 %1694  ;;  %2652 = vrot.lane.b32.xlu0 %v2491_v1, %s8541_s22  ;;  %v2224_v1 = vrot.slane %v2222_v10, 4  ;;  %v1811_v10 = vrot.slane %v9425_v23, 6  ;;  %v2516_v23 = vrot.slane %v2514_v63, 6  ;;  %v8356_v63 = vld [vmem:[%s12687_s3 + $0xc8] sm:$0xff]  }
 0x184   : > { %1740 = vst.msk [vmem:[#allocation3 + $0x90] sm:$0xf] %vm1100_vm10, %v1695_v46  ;;  %v3025_v46 = vrot.slane %v3023_v14, 6  ;;  %v1819_v14 = vrot.slane %v1817_v52, 4 }
 0x185   : > { %v9434_v60 = vpop.permute.xlu0 %3455  ;;  %3363 = vrot.lane.b32.xlu1 %v3319_v30, %s8541_s22  ;;  %v2226_v48 = vsel %vm8756_vm9, %v2224_v1, %v12713_v17  ;;  %v8177_v30 = vpop.f32.mrf.mxu0  ;;  %v8354_v1 = vld [vmem:[%s12687_s3 + $0xd0] sm:$0xff]  }
 0x186   : > { %12799 = vst [vmem:[#allocation11_spill] sm:$0xff] %v9434_v60  ;;  %2286 = vst.msk [vmem:[#allocation3 + $0x5c] sm:$0xf] %vm791_vm0, %v2226_v48  ;;  %v1812_v48 = vsel %vm8745_vm8, %v1810_v54, %v1811_v10  ;;  %v3026_v62 = vor.u32 %v3025_v46, %v3022_v58  ;;  %7966 = vmatprep.subr.bf16.mxu0 %v8354_v1  ;;  %v1821_v12 = vsel %vm8745_vm8, %v1819_v14, %v12711_v7  ;;  %v9488_v54 = vld [vmem:[#allocation2 + $0x24] sm:$0xf]  ;;  %v8357_v1 = vld [vmem:[%s12687_s3 + $0x88] sm:$0xff]  }
 0x187   : > { %v1691_v33 = vpop.permute.xlu1 %1690  ;;  %3357 = vrot.lane.b32.xlu0 %v3310_v27, %s8541_s22  ;;  %v612_v52 = vpop.f32.mrf.mxu0  ;;  %v3311_v46 = vrot.slane %v3309_v43, 4  ;;  %7967 = vmatpush3.bf16.msra.mxu0 %v8355_v8  ;;  %v1658_v14 = vld [vmem:[#allocation2 + $0x24] sm:$0xf]  ;;  %v12717_v57 = vrot.slane %v9488_v54, 6  ;;  %v1980_v43 = vrot.slane %v9197_v42, 4  ;;  %v1813_v7 = vrot.slane %v1811_v10, 4 }
 0x188   : > { %1738 = vst.msk [vmem:[#allocation3 + $0x58] sm:$0xf] %vm1100_vm10, %v1691_v33  ;;  %v2512_v33 = vrot.slane %v9278_v6, 4  ;;  %v1449_v6 = vld [vmem:[#allocation2 + $0x2c] sm:$0xf]  ;;  %7968 = vmatprep.subr.bf16.mxu0 %v8356_v63 }
 0x189   : > { %1063 = vrot.lane.b32.xlu1 %v958_v47, %s8540_s21  ;;  %v9468_v27 = vpop.permute.xlu0 %1209  ;;  %v9486_v47 = vor.u32 %v2519_v36, %v2516_v23  ;;  %v8180_v23 = vpop.f32.mrf.mxu0  ;;  %v8358_v36 = vld [vmem:[%s12687_s3 + $0xc0] sm:$0xff]   ;;  %v9505_v8 = vld [vmem:[#allocation2 + $0x28] sm:$0xf]  ;;  %v3313_v42 = vsel %vm8745_vm8, %v3311_v46, %v12717_v57  ;;  %v1555_v20 = vshrl.u32 %v1449_v6, 16  ;;  %v1558_v5 = vshll.u32 %v1449_v6, 16 }
 0x18a   : > { %v9537_v57 = vld [vmem:[#allocation2 + $0x28] sm:$0xf]  ;;  %v3069_v6 = vshrl.u32 %v3003_v26, 16 }
 0x18b   : > { %v9478_v19 = vpop.permute.xlu1 %1211  ;;  %1855 = vrot.lane.b32.xlu0 %v1812_v48, %s8541_s22  ;;  %v3027_v48 = vrot.slane %v3026_v62, 4  ;;  %v9510_v62 = vld [vmem:[%s12686_s2] ss:$0 sm:$0xff]  ;;  %7969 = vmatpush3.bf16.msra.mxu0 %v8357_v1  ;;  %v625_v10 = vpop.f32.mrf.mxu0  ;;  %v1989_v1 = vsel %vm8825_vm14, %v1980_v43, %v9150_v21  ;;  %v9542_v45 = vrot.slane %v1555_v20, 7 }
 0x18c   : > { %v621_v63 = vadd.f32 %v9510_v62, %v8177_v30  ;;  %v8359_v30 = vld [vmem:[%s12687_s3 + $0x80] sm:$0xff]   ;;  %v613_v46 = vadd.f32 %v9510_v62, %v612_v52  ;;  %7970 = vmatprep.subr.bf16.mxu0 %v8358_v36  ;;  %v3004_v52 = vld [vmem:[#allocation2 + $0x2c] sm:$0xf]  ;;  %v3072_v36 = vshll.u32 %v3003_v26, 16  ;;  %v626_v43 = vadd.f32 %v9510_v62, %v625_v10 }
 0x18d   : > { %1861 = vrot.lane.b32.xlu1 %v1821_v12, %s8541_s22  ;;  %v1844_v58 = vpop.permute.xlu0 %1843  ;;  %v1560_v20 = vor.u32 %v1558_v5, %v9542_v45  ;;  %v12801_v26 = vrot.slane %v9505_v8, 6  ;;  %v9566_v5 = vld [vmem:[#allocation2 + $0x2c] sm:$0xf]  ;;  %v3079_v10 = vshrl.u32 %v3004_v52, 16 }
 0x18e   : > { %1894 = vst.msk [vmem:[#allocation3 + $0x4] sm:$0xf] %vm1260_vm11, %v1844_v58  ;;  %v2521_v58 = vsel %vm8825_vm14, %v2512_v33, %v9486_v47  ;;  %v674_v17 = vmax.f32 %v621_v63, 0.0  ;;  %v3036_v33 = vsel %vm9089_vm7, %v3027_v48, %v9048_v29  ;;  %v1553_v48 = vrot.slane %v9248_v0, 4 }
 0x18f   : > { %v9500_v12 = vpop.permute.xlu1 %1371  ;;  %1700 = vrot.lane.b32.xlu0 %v1658_v14, %s8540_s21  ;;  %v672_v49 = vmax.f32 %v613_v46, 0.0  ;;  %7971 = vmatpush3.bf16.msra.mxu0 %v8359_v30 }
 0x190   : > { %v7839_v29 = vpack.c.bf16 %v674_v17, %v674_v17  ;;  %v1815_v17 = vsel %vm8745_vm8, %v1813_v7, %v1814_v22 }
 0x191   : > { %2658 = vrot.lane.b32.xlu1 %v2521_v58, %s8541_s22  ;;  %v9517_v14 = vpop.permute.xlu0 %1369  ;;  %v9529_v58 = vld [vmem:[#allocation2 + $0x2c] sm:$0xf]  ;;  %v7837_v46 = vpack.c.bf16 %v672_v49, %v672_v49  ;;  %v3071_v49 = vrot.slane %v3069_v6, 5  ;;  %v12720_v6 = vrot.slane %v9566_v5, 7 }
 0x192   : > { %v12721_v0 = vrot.slane %v9529_v58, 6  ;;  %811 = vst.msk [vmem:[#allocation2 + $0x4c] sm:$0xf] %vm791_vm0, %v7839_v29  ;;  %v675_v29 = vmax.f32 %v626_v43, 0.0  ;;  %v12802_v43 = vrot.slane %v9539_v16, 6 }
 0x193   : > { %v2113_v63 = vpop.permute.xlu1 %2112  ;;  %3197 = vrot.lane.b32.xlu0 %v3036_v33, %s8540_s21  ;;  %v634_v33 = vadd.f32 %v9510_v62, %v8180_v23  ;;  %v2355_v23 = vrot.slane %v12801_v26, 4  ;;  %809 = vst.msk [vmem:[#allocation2 + $0x44] sm:$0xf] %vm791_vm0, %v7837_v46  ;;  %v12722_v26 = vrot.slane %v9559_v3, 5 }
 0x194   : > { %2162 = vst.msk [vmem:[#allocation3 + $0x20] sm:$0xf] %vm1420_vm12, %v2113_v63  ;;  %v1561_v63 = vsel %vm9025_vm6, %v1553_v48, %v1560_v20  ;;  %v7840_v30 = vpack.c.bf16 %v675_v29, %v675_v29  ;;  %v1661_v48 = vld [vmem:[#allocation2 + $0x30] sm:$0xf]  ;;  %v9593_v20 = vld [vmem:[#allocation2 + $0x28] sm:$0xf] }
 0x195   : > { %3359 = vrot.lane.b32.xlu1 %v3313_v42, %s8541_s22  ;;  %v1054_v21 = vpop.permute.xlu0 %1053  ;;  %v12723_v42 = vrot.slane %v9537_v57, 7  ;;  %v677_v22 = vmax.f32 %v634_v33, 0.0  ;;  %v3074_v33 = vrot.slane %v3072_v36, 6  ;;  %1643 = vst.msk [vmem:[#allocation3 + $0x11c] sm:$0xf] %vm791_vm0, %v1561_v63  ;;  %v1188_v29 = vrot.slane %v12722_v26, 4 }
 0x196   : > { %1103 = vst.msk [vmem:[#allocation3 + $0x38] sm:$0xf] %vm1100_vm10, %v1054_v21  ;;  %v3082_v21 = vshll.u32 %v3004_v52, 16  ;;  %v9585_v36 = vld [vmem:[#allocation2 + $0x2c] sm:$0xf] }
 0x197   : > { %1263 = vst.msk [vmem:[#allocation3 + $0x38] sm:$0xf] %vm1260_vm11, %v9377_v2  ;;  %v9563_v7 = vpop.permute.xlu1 %3457  ;;  %2118 = vrot.lane.b32.xlu0 %v1989_v1, %s8542_s23  ;;  %v7842_v2 = vpack.c.bf16 %v677_v22, %v677_v22  ;;  %v2775_v52 = vrot.slane %v12723_v42, 4  ;;  %v9600_v46 = vor.u32 %v3074_v33, %v3071_v49  ;;  %v3081_v22 = vrot.slane %v3079_v10, 5  ;;  %v9614_v10 = vld [vmem:[#allocation2 + $0x24] sm:$0xf] }
 0x198   : > { %1423 = vst.msk [vmem:[#allocation3 + $0x38] sm:$0xf] %vm1420_vm12, %v9404_v15  ;;  %v2357_v15 = vsel %vm8745_vm8, %v2355_v23, %v12721_v0  ;;  %v2352_v23 = vrot.slane %v12802_v43, 4  ;;  %v3084_v63 = vrot.slane %v3082_v21, 6  ;;  %v2876_v49 = vld [vmem:[#allocation2 + $0x14] sm:$0xe] }
 0x199   : > { %1857 = vrot.lane.b32.xlu1 %v1815_v17, %s8541_s22  ;;  %v1050_v1 = vpop.permute.xlu0 %1049  ;;  %814 = vst.msk [vmem:[#allocation2 + $0x58] sm:$0xf] %vm791_vm0, %v7842_v2  ;;  %812 = vst.msk [vmem:[#allocation2 + $0x50] sm:$0xf] %vm791_vm0, %v7840_v30  ;;  %v12724_v2 = vrot.slane %v9585_v36, 5  ;;  %v12725_v30 = vrot.slane %v9593_v20, 7 }
 0x19a   : > { %1101 = vst.msk [vmem:[#allocation3] sm:$0xf] %vm1100_vm10, %v1050_v1  ;;  %v9606_v1 = vld [vmem:[#allocation2 + $0x24] sm:$0xf]  ;;  %v9617_v21 = vld [vmem:[#allocation2 + $0x2c] sm:$0xf]  ;;  %v9626_v0 = vor.u32 %v3084_v63, %v3081_v22 }
 0x19b   : > { %1261 = vst.msk [vmem:[#allocation3] sm:$0xf] %vm1260_vm11, %v9468_v27  ;;  %v9590_v17 = vpop.permute.xlu1 %1215  ;;  %2400 = vrot.lane.b32.xlu0 %v2357_v15, %s8540_s21  ;;  %v3001_v15 = vld [vmem:[#allocation2 + $0x20] sm:$0xf]  ;;  %v1540_v43 = vshll.u32 %v9203_v11, 16  ;;  %v1190_v11 = vsel %vm8717_vm5, %v1188_v29, %v12724_v2  ;;  %v1348_v22 = vrot.slane %v12725_v30, 4 }
 0x19c   : > { %1421 = vst.msk [vmem:[#allocation3] sm:$0xf] %vm1420_vm12, %v9517_v14  ;;  %v2777_v14 = vsel %vm8756_vm9, %v2775_v52, %v12720_v6  ;;  %v3077_v6 = vrot.slane %v9600_v46, 4  ;;  %v1920_v42 = vld [vmem:[#allocation2 + $0x28] sm:$0xf] }
 0x19d   : > { %1706 = vrot.lane.b32.xlu1 %v1661_v48, %s8540_s21  ;;  %v1697_v27 = vpop.permute.xlu0 %1696  ;;  %v1535_v48 = vrot.slane %v9298_v28, 4  ;;  %v12726_v28 = vrot.slane %v9614_v10, 5  ;;  %v9640_v26 = vld [vmem:[#allocation2 + $0x24] sm:$0xf]  ;;  %v2022_v29 = vshrl.u32 %v1920_v42, 16  ;;  %v2025_v2 = vshll.u32 %v1920_v42, 16 }
 0x19e   : > { %1741 = vst.msk [vmem:[#allocation3 + $0xac] sm:$0xf] %vm1100_vm10, %v1697_v27  ;;  %v12803_v27 = vrot.slane %v9505_v8, 6  ;;  %v1542_v8 = vor.u32 %v1540_v43, %v9235_v4  ;;  %v1921_v63 = vld [vmem:[#allocation2 + $0x2c] sm:$0xf] }
 0x19f   : > { %v1376_v33 = vpop.permute.xlu1 %1375  ;;  %2820 = vrot.lane.b32.xlu0 %v2777_v14, %s8542_s23 }
 0x1a0   : > { %v2354_v52 = vsel %vm8745_vm8, %v2352_v23, %v12803_v27  ;;  %v7603_v23 = vrot.slane %v2876_v49, 9  ;;  %v3049_v27 = vshrl.u32 %v3001_v15, 16  ;;  %v1543_v4 = vsel %vm9025_vm6, %v1535_v48, %v1542_v8  ;;  %v1450_v48 = vld [vmem:[#allocation2 + $0x30] sm:$0xf] }
 0x1a1   : > { %2398 = vrot.lane.b32.xlu1 %v2354_v52, %s8540_s21  ;;  %v1848_v14 = vpop.permute.xlu0 %1847  ;;  %v3052_v52 = vshll.u32 %v3001_v15, 16  ;;  %v12804_v49 = vrot.slane %v9306_v37, 5  ;;  %v3086_v15 = vsel %vm9089_vm7, %v3077_v6, %v9626_v0  ;;  %1641 = vst.msk [vmem:[#allocation3 + $0xe4] sm:$0xf] %vm791_vm0, %v1543_v4  ;;  %v1185_v37 = vrot.slane %v12726_v28, 4 }
 0x1a2   : > { %1896 = vst.msk [vmem:[#allocation3 + $0x3c] sm:$0xf] %vm1260_vm11, %v1848_v14  ;;  %v12805_v14 = vrot.slane %v9606_v1, 7  ;;  %v12806_v6 = vrot.slane %v9617_v21, 7  ;;  %v3051_v8 = vrot.slane %v3049_v27, 5  ;;  %v2032_v28 = vshrl.u32 %v1921_v63, 16 }
 0x1a3   : > { %v9642_v60 = vpop.permute.xlu1 %3355  ;;  %1229 = vrot.lane.b32.xlu0 %v1190_v11, %s8541_s22  ;;  %v2915_v43 = vsel %vm8717_vm5, %v7603_v23, %v12804_v49  ;;  %v3054_v23 = vrot.slane %v3052_v52, 6  ;;  %v9667_v4 = vld [vmem:[#allocation2 + $0x1c] sm:$0xf]  ;;  %v9669_v49 = vld [vmem:[#allocation2 + $0x20] sm:$0xf]  ;;  %v2035_v27 = vshll.u32 %v1921_v63, 16 }
 0x1a4   : > { %v2772_v30 = vrot.slane %v12805_v14, 4  ;;  %2981 = vst.msk [vmem:[#allocation3 + $0xc] sm:$0xf] %vm791_vm0, %v2915_v43  ;;  %v1350_v11 = vsel %vm8756_vm9, %v1348_v22, %v12806_v6  ;;  %v2027_v14 = vrot.slane %v2025_v2, 7  ;;  %v12808_v6 = vrot.slane %v9559_v3, 5 }
 0x1a5   : > { %3207 = vrot.lane.b32.xlu1 %v3086_v15, %s8540_s21  ;;  %v1693_v42 = vpop.permute.xlu0 %1692  ;;  %v2024_v15 = vrot.slane %v2022_v29, 6  ;;  %v1918_v29 = vld [vmem:[#allocation2 + $0x20] sm:$0xf]  ;;  %v9689_v63 = vor.u32 %v3054_v23, %v3051_v8  ;;  %v1562_v23 = vrot.slane %v9542_v45, 4  ;;  %v12810_v45 = vrot.slane %v9191_v25, 6 }
 0x1a6   : > { %1739 = vst.msk [vmem:[#allocation3 + $0x74] sm:$0xf] %vm1100_vm10, %v1693_v42  ;;  %v12807_v42 = vrot.slane %v9537_v57, 7  ;;  %v1187_v2 = vsel %vm8717_vm5, %v1185_v37, %v12808_v6  ;;  %v12728_v57 = vrot.slane %v9669_v49, 7  ;;  %v2002_v8 = vshrl.u32 %v1918_v29, 16 }
 0x1a7   : > { %v1056_v43 = vpop.permute.xlu1 %1055  ;;  %1389 = vrot.lane.b32.xlu0 %v1350_v11, %s8542_s23  ;;  %v2231_v11 = vrot.slane %v9667_v4, 7  ;;  %v9696_v4 = vor.u32 %v2027_v14, %v2024_v15  ;;  %v2005_v14 = vshll.u32 %v1918_v29, 16  ;;  %v9721_v29 = vld [vmem:[#allocation2 + $0x2c] sm:$0xf] }
 0x1a8   : > { %1104 = vst.msk [vmem:[#allocation3 + $0x54] sm:$0xf] %vm1100_vm10, %v1056_v43  ;;  %v2774_v22 = vsel %vm8756_vm9, %v2772_v30, %v12807_v42  ;;  %v3429_v30 = vld [vmem:[#allocation2 + $0x38] sm:$0xf]  ;;  %v12809_v43 = vrot.slane %v9640_v26, 7  ;;  %v1564_v42 = vshrl.u32 %v1450_v48, 16 }
 0x1a9   : > { %1264 = vst.msk [vmem:[#allocation3 + $0x54] sm:$0xf] %vm1260_vm11, %v9590_v17  ;;  %2818 = vrot.lane.b32.xlu1 %v2774_v22, %s8542_s23  ;;  %v1052_v52 = vpop.permute.xlu0 %1051  ;;  %v3047_v17 = vrot.slane %v9081_v56, 4  ;;  %v2233_v22 = vrot.slane %v2231_v11, 4  ;;  %v2037_v56 = vrot.slane %v2035_v27, 7 }
 0x1aa   : > { %1424 = vst.msk [vmem:[#allocation3 + $0x54] sm:$0xf] %vm1420_vm12, %v1376_v33  ;;  %v1345_v3 = vrot.slane %v12809_v43, 4  ;;  %v2034_v33 = vrot.slane %v2032_v28, 6  ;;  %v9702_v6 = vrot.slane %v1564_v42, 7  ;;  %v12811_v43 = vrot.slane %v9593_v20, 7 }
 0x1ab   : > { %1102 = vst.msk [vmem:[#allocation3 + $0x1c] sm:$0xf] %vm1100_vm10, %v1052_v52  ;;  %v1854_v37 = vpop.permute.xlu1 %1853  ;;  %3471 = vrot.lane.b32.xlu0 %v3429_v30, %s8542_s23  ;;  %v1567_v52 = vshll.u32 %v1450_v48, 16  ;;  %v2235_v28 = vsel %vm8756_vm9, %v2233_v22, %v12728_v57  ;;  %v2349_v48 = vrot.slane %v12810_v45, 4  ;;  %v1919_v45 = vld [vmem:[#allocation2 + $0x24] sm:$0xf] }
 0x1ac   : > { %1262 = vst.msk [vmem:[#allocation3 + $0x1c] sm:$0xf] %vm1260_vm11, %v9478_v19  ;;  %1899 = vst.msk [vmem:[#allocation3 + $0x90] sm:$0xf] %vm1260_vm11, %v1854_v37  ;;  %v9704_v19 = vld [vmem:[#allocation2 + $0x18] sm:$0xf]  ;;  %v1347_v42 = vsel %vm8756_vm9, %v1345_v3, %v12811_v43 }
 0x1ad   : > { %1422 = vst.msk [vmem:[#allocation3 + $0x1c] sm:$0xf] %vm1420_vm12, %v9500_v12  ;;  %1227 = vrot.lane.b32.xlu1 %v1187_v2, %s8541_s22  ;;  %v2111_v15 = vpop.permute.xlu0 %2110  ;;  %v3056_v12 = vsel %vm9089_vm7, %v3047_v17, %v9689_v63  ;;  %v1569_v27 = vor.u32 %v1567_v52, %v9702_v6  ;;  %v9719_v2 = vld [vmem:[#allocation2 + $0x28] sm:$0xf]  ;;  %v12812_v17 = vrot.slane %v9219_v35, 7  ;;  %v2228_v22 = vrot.slane %v9704_v19, 7 }
 0x1ae   : > { %2161 = vst.msk [vmem:[#allocation3 + $0x4] sm:$0xf] %vm1420_vm12, %v2111_v15  ;;  %v3002_v37 = vld [vmem:[#allocation2 + $0x24] sm:$0xf]  ;;  %v2030_v52 = vrot.slane %v9696_v4, 4  ;;  %v9733_v15 = vor.u32 %v2037_v56, %v2034_v33  ;;  %v2007_v3 = vrot.slane %v2005_v14, 7 }
 0x1af   : > { %2289 = vst.msk [vmem:[#allocation3 + $0xb0] sm:$0xf] %vm791_vm0, %v2235_v28  ;;  %v1703_v30 = vpop.permute.xlu1 %1702  ;;  %3201 = vrot.lane.b32.xlu0 %v3056_v12, %s8540_s21  ;;  %v2769_v25 = vrot.slane %v12812_v17, 4  ;;  %v2004_v28 = vrot.slane %v2002_v8, 6  ;;  %v1570_v12 = vsel %vm9025_vm6, %v1562_v23, %v1569_v27  ;;  %v2230_v35 = vrot.slane %v2228_v22, 4 }
 0x1b0   : > { %1744 = vst.msk [vmem:[#allocation3 + $0x100] sm:$0xf] %vm1100_vm10, %v1703_v30  ;;  %v12727_v30 = vrot.slane %v9719_v2, 5  ;;  %v12732_v43 = vrot.slane %v9721_v29, 5  ;;  %v12813_v33 = vrot.slane %v9539_v16, 6  ;;  %v3059_v8 = vshrl.u32 %v3002_v37, 16 }
 0x1b1   : > { %1387 = vrot.lane.b32.xlu1 %v1347_v42, %s8542_s23  ;;  %v2393_v20 = vpop.permute.xlu0 %2392  ;;  %1644 = vst.msk [vmem:[#allocation3 + $0x138] sm:$0xf] %vm791_vm0, %v1570_v12  ;;  %v3062_v23 = vshll.u32 %v3002_v37, 16  ;;  %v864_v27 = vld [vmem:[#allocation2 + $0x28] sm:$0xf]  ;;  %v2232_v42 = vsel %vm8756_vm9, %v2230_v35, %v2231_v11  ;;  %v2039_v16 = vsel %vm8825_vm14, %v2030_v52, %v9733_v15  ;;  %v2012_v12 = vshrl.u32 %v1919_v45, 16 }
 0x1b2   : > { %2441 = vst.msk [vmem:[#allocation3 + $0x40] sm:$0xf] %vm1100_vm10, %v2393_v20  ;;  %v2351_v56 = vsel %vm8745_vm8, %v2349_v48, %v12813_v33  ;;  %v2928_v17 = vrot.slane %v12727_v30, 4  ;;  %v2000_v48 = vrot.slane %v9165_v51, 4  ;;  %v12814_v11 = vrot.slane %v9606_v1, 7 }
 0x1b3   : > { %v1850_v14 = vpop.permute.xlu1 %1849  ;;  %2396 = vrot.lane.b32.xlu0 %v2351_v56, %s8540_s21  ;;  %2288 = vst.msk [vmem:[#allocation3 + $0x94] sm:$0xf] %vm791_vm0, %v2232_v42  ;;  %v2008_v56 = vor.u32 %v2007_v3, %v2004_v28  ;;  %v3061_v52 = vrot.slane %v3059_v8, 5  ;;  %v3064_v42 = vrot.slane %v3062_v23, 6  ;;  %v975_v30 = vshll.u32 %v864_v27, 16 }
 0x1b4   : > { %1897 = vst.msk [vmem:[#allocation3 + $0x58] sm:$0xf] %vm1260_vm11, %v1850_v14  ;;  %v2771_v20 = vsel %vm8756_vm9, %v2769_v25, %v12814_v11  ;;  %v8338_v35 = vld [vmem:[#allocation3] ss:$28 sps:$4 sm:$0xff]   ;;  %v2015_v14 = vshll.u32 %v1919_v45, 16  ;;  %v2930_v51 = vsel %vm8717_vm5, %v2928_v17, %v12732_v43  ;;  %v3057_v28 = vrot.slane %v9689_v63, 4 }
 0x1b5   : > { %2128 = vrot.lane.b32.xlu1 %v2039_v16, %s8542_s23  ;;  %v9760_v37 = vpop.permute.xlu0 %2812  ;;  %v8340_v33 = vld [vmem:[#allocation3 + $0x4] ss:$28 sps:$4 sm:$0xff]   ;;  %v979_v16 = vshrl.u32 %v864_v27, 16  ;;  %2986 = vst.msk [vmem:[#allocation3 + $0x98] sm:$0xf] %vm791_vm0, %v2930_v51  ;;  %v12815_v3 = vrot.slane %v9308_v32, 5  ;;  %v9783_v51 = vor.u32 %v3064_v42, %v3061_v52 }
 0x1b6   : > { %v2879_v57 = vld [vmem:[#allocation2 + $0x20] sm:$0xf]  ;;  %6303 = vmatprep.mubr.bf16.mxu1 %v8340_v33  ;;  %v3430_v25 = vld [vmem:[#allocation2 + $0x3c] sm:$0xf]  ;;  %v12816_v23 = vrot.slane %v9255_v50, 5  ;;  %v2014_v17 = vrot.slane %v2012_v12, 6  ;;  %v2009_v33 = vsel %vm8825_vm14, %v2000_v48, %v2008_v56 }
 0x1b7   : > { %v1699_v1 = vpop.permute.xlu1 %1698  ;;  %2816 = vrot.lane.b32.xlu0 %v2771_v20, %s8542_s23  ;;  %6304 = vmatmul.mubr.bf16.vlgmr.msra.gmra.mxu1 %v8338_v35  ;;  %v2919_v45 = vrot.slane %v12815_v3, 4  ;;  %v2017_v11 = vrot.slane %v2015_v14, 7  ;;  %v2920_v20 = vrot.slane %v2879_v57, 5  ;;  %v9785_v35 = vrot.slane %v975_v30, 5  ;;  %v9794_v57 = vld [vmem:[#allocation2 + $0x24] sm:$0xf] }
 0x1b8   : > { %1742 = vst.msk [vmem:[#allocation3 + $0xc8] sm:$0xf] %vm1100_vm10, %v1699_v1  ;;  %v1182_v27 = vrot.slane %v12816_v23, 4  ;;  %v981_v63 = vrot.slane %v979_v16, 4  ;;  %v9788_v1 = vld [vmem:[#allocation2 + $0x2c] sm:$0xf]  ;;  %v3066_v30 = vsel %vm9089_vm7, %v3057_v28, %v9783_v51 }
 0x1b9   : > { %3473 = vrot.lane.b32.xlu1 %v3430_v25, %s8542_s23  ;;  %v9777_v8 = vpop.permute.xlu0 %1221  ;;  %v2921_v50 = vsel %vm8717_vm5, %v2919_v45, %v2920_v20  ;;  %v12817_v12 = vrot.slane %v9408_v31, 7  ;;  %v2010_v48 = vrot.slane %v2008_v56, 4  ;;  %v12818_v42 = vrot.slane %v9614_v10, 5  ;;  %v9812_v45 = vld [vmem:[#allocation2 + $0x30] sm:$0xf] }
 0x1ba   : > { %2983 = vst.msk [vmem:[#allocation3 + $0x44] sm:$0xf] %vm791_vm0, %v2921_v50  ;;  %v9808_v16 = vor.u32 %v2017_v11, %v2014_v17  ;;  %v12819_v25 = vrot.slane %v9263_v44, 7  ;;  %v982_v28 = vor.u32 %v981_v63, %v9785_v35  ;;  %v985_v23 = vshll.u32 %v9788_v1, 16  ;;  %v2462_v10 = vld [vmem:[#allocation2 + $0x28] sm:$0xf] }
 0x1bb   : > { %v2391_v32 = vpop.permute.xlu1 %2390  ;;  %2122 = vrot.lane.b32.xlu0 %v2009_v33, %s8542_s23  ;;  %v2227_v14 = vrot.slane %v12817_v12, 4  ;;  %v1184_v31 = vsel %vm8717_vm5, %v1182_v27, %v12818_v42  ;;  %v2922_v27 = vrot.slane %v2920_v20, 4  ;;  %v2923_v17 = vrot.slane %v9794_v57, 5  ;;  %v9823_v44 = vld [vmem:[#allocation2 + $0x24] sm:$0xf] }
 0x1bc   : > { %2440 = vst.msk [vmem:[#allocation3 + $0x24] sm:$0xf] %vm1100_vm10, %v2391_v32  ;;  %v1342_v3 = vrot.slane %v12819_v25, 4  ;;  %v2019_v19 = vsel %vm8825_vm14, %v2010_v48, %v9808_v16  ;;  %v12729_v63 = vrot.slane %v9812_v45, 6  ;;  %v12821_v50 = vrot.slane %v9640_v26, 7 }
 0x1bd   : > { %3203 = vrot.lane.b32.xlu1 %v3066_v30, %s8540_s21  ;;  %v9802_v52 = vpop.permute.xlu0 %1381  ;;  %v2229_v56 = vsel %vm8756_vm9, %v2227_v14, %v2228_v22  ;;  %v12820_v22 = vrot.slane %v9529_v58, 6  ;;  %v2924_v20 = vsel %vm8717_vm5, %v2922_v27, %v2923_v17  ;;  %v9845_v12 = vld [vmem:[#allocation2 + $0x30] sm:$0xf]  ;;  %v2534_v14 = vshrl.u32 %v2462_v10, 16 }
 0x1be   : > { %2287 = vst.msk [vmem:[#allocation3 + $0x78] sm:$0xf] %vm791_vm0, %v2229_v56  ;;  %v1344_v58 = vsel %vm8756_vm9, %v1342_v3, %v12821_v50  ;;  %2984 = vst.msk [vmem:[#allocation3 + $0x60] sm:$0xf] %vm791_vm0, %v2924_v20  ;;  %v12822_v30 = vrot.slane %v9669_v49, 7  ;;  %v9852_v42 = vrot.slane %v985_v23, 5 }
 0x1bf   : > { %v3200_v11 = vpop.permute.xlu1 %3199  ;;  %1225 = vrot.lane.b32.xlu0 %v1184_v31, %s8541_s22  ;;  %v2358_v33 = vrot.slane %v12820_v22, 4  ;;  %v2537_v31 = vshll.u32 %v2462_v10, 16  ;;  %v12731_v26 = vrot.slane %v9823_v44, 7  ;;  %v2463_v3 = vld [vmem:[#allocation2 + $0x2c] sm:$0xf]  ;;  %v12823_v56 = vrot.slane %v9566_v5, 7 }
 0x1c0   : > { %3249 = vst.msk [vmem:[#allocation3 + $0x28] sm:$0xf] %vm1100_vm10, %v3200_v11  ;;  %v2236_v48 = vrot.slane %v12822_v30, 4  ;;  %v9870_v10 = vld [vmem:[#allocation2 + $0x30] sm:$0xf]  ;;  %v2536_v11 = vrot.slane %v2534_v14, 6 }
 0x1c1   : > { %3405 = vst.msk [vmem:[#allocation3 + $0x28] sm:$0xf] %vm1260_vm11, %v9642_v60  ;;  %2124 = vrot.lane.b32.xlu1 %v2019_v19, %s8542_s23  ;;  %v9839_v32 = vpop.permute.xlu0 %3463  ;;  %v983_v60 = vrot.slane %v982_v28, 4  ;;  %v2360_v49 = vsel %vm8745_vm8, %v2358_v33, %v12729_v63  ;;  %v2778_v27 = vrot.slane %v12823_v56, 4  ;;  %v2461_v19 = vld [vmem:[#allocation2 + $0x24] sm:$0xf] }
 0x1c2   : > { %3507 = vst.msk [vmem:[#allocation3 + $0x28] sm:$0xf] %vm1420_vm12, %v9563_v7  ;;  %v12730_v7 = vrot.slane %v9845_v12, 7  ;;  %v2238_v28 = vsel %vm8756_vm9, %v2236_v48, %v12731_v26  ;;  %v2539_v22 = vrot.slane %v2537_v31, 7  ;;  %v2544_v33 = vshrl.u32 %v2463_v3, 16 }
 0x1c3   : > { %v9855_v25 = vpop.permute.xlu1 %2810  ;;  %1385 = vrot.lane.b32.xlu0 %v1344_v58, %s8542_s23  ;;  %2290 = vst.msk [vmem:[#allocation3 + $0xcc] sm:$0xf] %vm791_vm0, %v2238_v28  ;;  %v988_v5 = vsel %vm8838_vm15, %v983_v60, %v9852_v42  ;;  %v2547_v20 = vshll.u32 %v2463_v3, 16  ;;  %v12824_v58 = vrot.slane %v9585_v36, 5  ;;  %v12734_v48 = vrot.slane %v9870_v10, 5 }
 0x1c4   : > { %v2780_v14 = vsel %vm8756_vm9, %v2778_v27, %v12730_v7  ;;  %v2524_v56 = vshrl.u32 %v2461_v19, 16  ;;  %v2527_v60 = vshll.u32 %v2461_v19, 16  ;;  %v9890_v3 = vld [vmem:[#allocation2 + $0x30] sm:$0xf]  ;;  %v12825_v36 = vrot.slane %v9488_v54, 6 }
 0x1c5   : > { %2402 = vrot.lane.b32.xlu1 %v2360_v49, %s8540_s21  ;;  %v2389_v23 = vpop.permute.xlu0 %2388  ;;  %v1191_v30 = vrot.slane %v12824_v58, 4  ;;  %v863_v49 = vld [vmem:[#allocation2 + $0x24] sm:$0xf]  ;;  %v3427_v28 = vld [vmem:[#allocation2 + $0x30] sm:$0xf]  ;;  %v2546_v58 = vrot.slane %v2544_v33, 6 }
 0x1c6   : > { %2439 = vst.msk [vmem:[#allocation3 + $0x8] sm:$0xf] %vm1100_vm10, %v2389_v23  ;;  %v3314_v23 = vrot.slane %v12825_v36, 4  ;;  %v2549_v63 = vrot.slane %v2547_v20, 7  ;;  %v12826_v19 = vrot.slane %v9617_v21, 7  ;;  %v969_v26 = vshrl.u32 %v863_v49, 16 }
 0x1c7   : > { %v9877_v50 = vpop.permute.xlu1 %1219  ;;  %1069 = vrot.lane.b32.xlu0 %v988_v5, %s8540_s21  ;;  %v9894_v5 = vor.u32 %v2539_v22, %v2536_v11  ;;  %v1193_v43 = vsel %vm8717_vm5, %v1191_v30, %v12734_v48  ;;  %v12733_v54 = vrot.slane %v9890_v3, 7  ;;  %v2526_v11 = vrot.slane %v2524_v56, 6 }
 0x1c8   : > { %v1351_v7 = vrot.slane %v12826_v19, 4  ;;  %v2529_v22 = vrot.slane %v2527_v60, 7  ;;  %v12827_v20 = vrot.slane %v9344_v39, 6  ;;  %v989_v36 = vshrl.u32 %v9788_v1, 16  ;;  %v832_v19 = vld [vmem:[#allocation2 + $0x30] sm:$0xf] }
 0x1c9   : > { %2822 = vrot.lane.b32.xlu1 %v2780_v14, %s8542_s23  ;;  %v9888_v31 = vpop.permute.xlu0 %3353  ;;  %v965_v14 = vshll.u32 %v863_v49, 16  ;;  %v2542_v49 = vrot.slane %v9894_v5, 4  ;;  %v971_v60 = vrot.slane %v969_v26, 4  ;;  %849 = vst.msk [vmem:[#allocation3 + $0x150] sm:$0xf] %vm791_vm0, %v832_v19 }
 0x1ca   : > { %v3316_v21 = vsel %vm8745_vm8, %v3314_v23, %v12827_v20  ;;  %v1353_v39 = vsel %vm8756_vm9, %v1351_v7, %v12733_v54  ;;  %v12828_v23 = vor.u32 %v9130_v34, %v9128_v9  ;;  %v9938_v20 = vld [vmem:[#allocation2 + $0x38] sm:$0xf]  ;;  %v2464_v9 = vld [vmem:[#allocation2 + $0x30] sm:$0xf] }
 0x1cb   : > { %v9896_v27 = vpop.permute.xlu1 %1379  ;;  %3467 = vrot.lane.b32.xlu0 %v3427_v28, %s8542_s23  ;;  %v9914_v28 = vor.u32 %v2549_v63, %v2546_v58  ;;  %v967_v56 = vrot.slane %v965_v14, 5  ;;  %v833_v63 = vld [vmem:[#allocation2 + $0x34] sm:$0xf]  ;;  %v8181_v58 = vpop.f32.mrf.mxu0  ;;  %v991_v14 = vrot.slane %v989_v36, 4  ;;  %v9957_v54 = vld [vmem:[#allocation2 + $0x30] sm:$0xf] }
 0x1cc   : > { %850 = vst.msk [vmem:[#allocation3 + $0x16c] sm:$0xf] %vm791_vm0, %v833_v63  ;;  %v963_v7 = vrot.slane %v12828_v23, 4  ;;  %v2925_v23 = vrot.slane %v2923_v17, 4  ;;  %v2554_v48 = vshrl.u32 %v2464_v9, 16  ;;  %v2557_v57 = vshll.u32 %v2464_v9, 16 }
 0x1cd   : > { %1231 = vrot.lane.b32.xlu1 %v1193_v43, %s8541_s22  ;;  %v9907_v33 = vpop.permute.xlu0 %2808  ;;  %v9923_v43 = vor.u32 %v2529_v22, %v2526_v11  ;;  %v2551_v26 = vsel %vm8825_vm14, %v2542_v49, %v9914_v28  ;;  %v972_v22 = vor.u32 %v971_v60, %v967_v56  ;;  %v9948_v60 = vld [vmem:[#allocation2 + $0x3c] sm:$0xf]  ;;  %v12829_v17 = vrot.slane %v9719_v2, 5 }
 0x1ce   : > { %v968_v63 = vsel %vm8838_vm15, %v963_v7, %v967_v56  ;;  %v2188_v56 = vld [vmem:[#allocation2 + $0x2c] sm:$0xf] }
 0x1cf   : > { %v2121_v30 = vpop.permute.xlu1 %2120  ;;  %3361 = vrot.lane.b32.xlu0 %v3316_v21, %s8541_s22  ;;  %v637_v21 = vadd.f32 %v9510_v62, %v8181_v58  ;;  %v2532_v19 = vrot.slane %v9923_v43, 4  ;;  %v992_v58 = vor.u32 %v991_v14, %v9852_v42  ;;  %v2927_v42 = vsel %vm8717_vm5, %v2925_v23, %v12829_v17  ;;  %v9967_v14 = vld [vmem:[#allocation2 + $0x30] sm:$0xf] }
 0x1d0   : > { %2166 = vst.msk [vmem:[#allocation3 + $0x90] sm:$0xf] %vm1420_vm12, %v2121_v30  ;;  %v3428_v30 = vld [vmem:[#allocation2 + $0x34] sm:$0xf] }
 0x1d1   : > { %1391 = vrot.lane.b32.xlu1 %v1353_v39, %s8542_s23  ;;  %v2115_v1 = vpop.permute.xlu0 %2114  ;;  %v628_v39 = vpop.f32.mrf.mxu0  ;;  %v678_v34 = vmax.f32 %v637_v21, 0.0  ;;  %v973_v21 = vrot.slane %v972_v22, 4  ;;  %v2541_v7 = vsel %vm8825_vm14, %v2532_v19, %v9894_v5  ;;  %v9969_v22 = vld [vmem:[#allocation2 + $0x28] sm:$0xf]  ;;  %v12830_v5 = vrot.slane %v9374_v38, 6 }
 0x1d2   : > { %2163 = vst.msk [vmem:[#allocation3 + $0x3c] sm:$0xf] %vm1420_vm12, %v2115_v1  ;;  %v629_v36 = vadd.f32 %v9510_v62, %v628_v39  ;;  %v12735_v1 = vrot.slane %v9938_v20, 6  ;;  %v9988_v38 = vrot.slane %v992_v58, 4 }
 0x1d3   : > { %v9935_v11 = vpop.permute.xlu1 %3465  ;;  %2664 = vrot.lane.b32.xlu0 %v2551_v26, %s8541_s22  ;;  %v9951_v26 = vld [vmem:[#allocation2 + $0x30] sm:$0xf]  ;;  %v7843_v62 = vpack.c.bf16 %v678_v34, %v678_v34  ;;  %v3320_v19 = vrot.slane %v12830_v5, 4  ;;  %2985 = vst.msk [vmem:[#allocation3 + $0x7c] sm:$0xf] %vm791_vm0, %v2927_v42  ;;  %v2246_v42 = vrot.slane %v9967_v14, 7 }
 0x1d4   : > { %v676_v39 = vmax.f32 %v629_v36, 0.0  ;;  %v2522_v36 = vrot.slane %v9486_v47, 4  ;;  %v3329_v9 = vrot.slane %v12735_v1, 4  ;;  %v3321_v23 = vrot.slane %v9951_v26, 6  ;;  %v2883_v5 = vld [vmem:[#allocation2 + $0x30] sm:$0xf] }
 0x1d5   : > { %3469 = vrot.lane.b32.xlu1 %v3428_v30, %s8542_s23  ;;  %v9943_v49 = vpop.permute.xlu0 %1217  ;;  %815 = vst.msk [vmem:[#allocation2 + $0x5c] sm:$0xf] %vm791_vm0, %v7843_v62  ;;  %v2243_v47 = vrot.slane %v2188_v56, 7  ;;  %v12831_v62 = vrot.slane %v9429_v24, 6  ;;  %v2240_v26 = vrot.slane %v9969_v22, 7  ;;  %v978_v56 = vsel %vm8838_vm15, %v973_v21, %v9785_v35 }
 0x1d6   : > { %v7841_v2 = vpack.c.bf16 %v676_v39, %v676_v39  ;;  %v2556_v1 = vrot.slane %v2554_v48, 6  ;;  %v12832_v22 = vrot.slane %v9721_v29, 5  ;;  %v12833_v29 = vrot.slane %v9948_v60, 6 }
 0x1d7   : > { %v2117_v30 = vpop.permute.xlu1 %2116  ;;  %1065 = vrot.lane.b32.xlu0 %v968_v63, %s8540_s21  ;;  %v1822_v39 = vrot.slane %v12831_v62, 4  ;;  %v2245_v58 = vrot.slane %v2243_v47, 4  ;;  %v2242_v14 = vrot.slane %v2240_v26, 4  ;;  %v10005_v63 = vld [vmem:[#allocation2 + $0x38] sm:$0xf]  ;;  %v2248_v48 = vrot.slane %v2246_v42, 4 }
 0x1d8   : > { %2164 = vst.msk [vmem:[#allocation3 + $0x58] sm:$0xf] %vm1420_vm12, %v2117_v30  ;;  %v995_v30 = vshll.u32 %v9957_v54, 16  ;;  %v2931_v62 = vrot.slane %v12832_v22, 4  ;;  %v2552_v22 = vrot.slane %v9914_v28, 4 }
 0x1d9   : > { %2662 = vrot.lane.b32.xlu1 %v2541_v7, %s8541_s22  ;;  %v9972_v34 = vpop.permute.xlu0 %1377  ;;  %v9984_v7 = vld [vmem:[#allocation2 + $0x30] sm:$0xf]  ;;  %813 = vst.msk [vmem:[#allocation2 + $0x54] sm:$0xf] %vm791_vm0, %v7841_v2  ;;  %v2531_v2 = vsel %vm8825_vm14, %v2522_v36, %v9923_v43  ;;  %v2247_v21 = vsel %vm8756_vm9, %v2245_v58, %v2246_v42  ;;  %v3331_v36 = vsel %vm8745_vm8, %v3329_v9, %v12833_v29  ;;  %v2938_v9 = vrot.slane %v10005_v63, 5 }
 0x1da   : > { %v10008_v35 = vrot.slane %v995_v30, 5  ;;  %2293 = vst.msk [vmem:[#allocation3 + $0x120] sm:$0xf] %vm791_vm0, %v2247_v21  ;;  %v10033_v29 = vld [vmem:[#allocation2 + $0x34] sm:$0xf] }
 0x1db   : > { %v2395_v17 = vpop.permute.xlu1 %2394  ;;  %1859 = vrot.lane.b32.xlu0 %v9458_v41, %s8541_s22  ;;  %v2559_v41 = vrot.slane %v2557_v57, 7  ;;  %v2932_v57 = vrot.slane %v2883_v5, 5  ;;  %v2244_v5 = vsel %vm8756_vm9, %v2242_v14, %v2243_v47  ;;  %v10042_v14 = vrot.slane %v3321_v23, 4  ;;  %v1452_v21 = vld [vmem:[#allocation2 + $0x38] sm:$0xf] }
 0x1dc   : > { %2442 = vst.msk [vmem:[#allocation3 + $0x5c] sm:$0xf] %vm1100_vm10, %v2395_v17  ;;  %v2886_v17 = vld [vmem:[#allocation2 + $0x3c] sm:$0xf]  ;;  %v10061_v42 = vld [vmem:[#allocation2 + $0x40] sm:$0xf] }
 0x1dd   : > { %1067 = vrot.lane.b32.xlu1 %v978_v56, %s8540_s21  ;;  %v1062_v24 = vpop.permute.xlu0 %1061  ;;  %v2884_v56 = vld [vmem:[#allocation2 + $0x34] sm:$0xf]  ;;  %2292 = vst.msk [vmem:[#allocation3 + $0x104] sm:$0xf] %vm791_vm0, %v2244_v5  ;;  %v2933_v58 = vsel %vm8717_vm5, %v2931_v62, %v2932_v57  ;;  %v10040_v47 = vor.u32 %v2559_v41, %v2556_v1  ;;  %v12834_v62 = vrot.slane %v9823_v44, 7  ;;  %v2940_v5 = vrot.slane %v2938_v9, 4 }
 0x1de   : > { %1107 = vst.msk [vmem:[#allocation3 + $0xa8] sm:$0xf] %vm1100_vm10, %v1062_v24  ;;  %v8343_v24 = vld [vmem:[#allocation3 + $0x38] ss:$28 sps:$4 sm:$0xff]   ;;  %v998_v1 = vsel %vm8838_vm15, %v9988_v38, %v10008_v35  ;;  %v2249_v41 = vrot.slane %v10033_v29, 7 }
 0x1df   : > { %1267 = vst.msk [vmem:[#allocation3 + $0xa8] sm:$0xf] %vm1260_vm11, %v9777_v8  ;;  %v10015_v43 = vpop.permute.xlu1 %2814  ;;  %2660 = vrot.lane.b32.xlu0 %v2531_v2, %s8541_s22  ;;  %v8341_v30 = vld [vmem:[#allocation3 + $0x3c] ss:$28 sps:$4 sm:$0xff]   ;;  %v2941_v2 = vrot.slane %v2886_v17, 5  ;;  %v2239_v63 = vrot.slane %v12834_v62, 4 }
 0x1e0   : > { %1427 = vst.msk [vmem:[#allocation3 + $0xa8] sm:$0xf] %vm1420_vm12, %v9802_v52  ;;  %6311 = vmatprep.mubr.bf16.mxu1 %v8341_v30  ;;  %v3322_v52 = vsel %vm8745_vm8, %v3320_v19, %v3321_v23  ;;  %v1451_v17 = vld [vmem:[#allocation2 + $0x34] sm:$0xf]  ;;  %v2935_v8 = vrot.slane %v2884_v56, 5  ;;  %v12835_v19 = vrot.slane %v9984_v7, 6 }
 0x1e1   : > { %3371 = vrot.lane.b32.xlu1 %v3331_v36, %s8541_s22  ;;  %v10036_v28 = vpop.permute.xlu0 %3459  ;;  %2987 = vst.msk [vmem:[#allocation3 + $0xb4] sm:$0xf] %vm791_vm0, %v2933_v58  ;;  %6312 = vmatmul.mubr.bf16.gmra.mxu1 %v8343_v24  ;;  %v2934_v36 = vrot.slane %v2932_v57, 4  ;;  %v2241_v23 = vsel %vm8756_vm9, %v2239_v63, %v2240_v26  ;;  %v3007_v57 = vld [vmem:[#allocation2 + $0x38] sm:$0xf]  ;;  %v2942_v56 = vsel %vm8717_vm5, %v2940_v5, %v2941_v2  ;;  %v1573_v24 = vshrl.u32 %v1451_v17, 16 }
 0x1e2   : > { %v1824_v44 = vsel %vm8745_vm8, %v1822_v39, %v12835_v19  ;;  %2291 = vst.msk [vmem:[#allocation3 + $0xe8] sm:$0xf] %vm791_vm0, %v2241_v23  ;;  %v1582_v58 = vshrl.u32 %v1452_v21, 16  ;;  %2990 = vst.msk [vmem:[#allocation3 + $0x108] sm:$0xf] %vm791_vm0, %v2942_v56  ;;  %v2250_v26 = vsel %vm8756_vm9, %v2248_v48, %v2249_v41  ;;  %v1585_v62 = vshll.u32 %v1452_v21, 16 }
 0x1e3   : > { %v10047_v30 = vpop.permute.xlu1 %1223  ;;  %3365 = vrot.lane.b32.xlu0 %v3322_v52, %s8541_s22  ;;  %v2936_v38 = vsel %vm8717_vm5, %v2934_v36, %v2935_v8  ;;  %v10069_v52 = vld [vmem:[#allocation2 + $0x34] sm:$0xf]  ;;  %v2937_v63 = vrot.slane %v2935_v8, 4  ;;  %v2943_v5 = vrot.slane %v2941_v2, 4  ;;  %v2561_v36 = vsel %vm8825_vm14, %v2552_v22, %v10040_v47  ;;  %2294 = vst.msk [vmem:[#allocation3 + $0x13c] sm:$0xf] %vm791_vm0, %v2250_v26 }
 0x1e4   : > { %2988 = vst.msk [vmem:[#allocation3 + $0xd0] sm:$0xf] %vm791_vm0, %v2936_v38  ;;  %v1575_v19 = vrot.slane %v1573_v24, 7  ;;  %v10082_v23 = vrot.slane %v1582_v58, 7  ;;  %v12736_v56 = vrot.slane %v10061_v42, 5  ;;  %v3109_v2 = vshrl.u32 %v3007_v57, 16 }
 0x1e5   : > { %1071 = vrot.lane.b32.xlu1 %v998_v1, %s8540_s21  ;;  %v2657_v39 = vpop.permute.xlu0 %2656  ;;  %v3005_v1 = vld [vmem:[#allocation2 + $0x30] sm:$0xf]  ;;  %v10090_v8 = vld [vmem:[#allocation2 + $0x38] sm:$0xf]  ;;  %v2939_v22 = vsel %vm8717_vm5, %v2937_v63, %v2938_v9  ;;  %v1571_v21 = vrot.slane %v9702_v6, 4  ;;  %v1576_v38 = vshll.u32 %v1451_v17, 16 }
 0x1e6   : > { %2705 = vst.msk [vmem:[#allocation3 + $0x40] sm:$0xf] %vm1260_vm11, %v2657_v39  ;;  %v10095_v24 = vld [vmem:[#allocation2 + $0x34] sm:$0xf]  ;;  %v3112_v58 = vshll.u32 %v3007_v57, 16  ;;  %v1580_v39 = vrot.slane %v1575_v19, 4  ;;  %v1587_v26 = vor.u32 %v1585_v62, %v10082_v23 }
 0x1e7   : > { %2861 = vst.msk [vmem:[#allocation3 + $0x40] sm:$0xf] %vm1420_vm12, %v9760_v37  ;;  %v10087_v48 = vpop.permute.xlu1 %1383  ;;  %1863 = vrot.lane.b32.xlu0 %v1824_v44, %s8541_s22  ;;  %v2945_v37 = vsel %vm8717_vm5, %v2943_v5, %v12736_v56  ;;  %v12836_v6 = vrot.slane %v9783_v51, 4  ;;  %v3324_v17 = vrot.slane %v10069_v52, 6  ;;  %v2020_v57 = vrot.slane %v9808_v16, 4 }
 0x1e8   : > { %2989 = vst.msk [vmem:[#allocation3 + $0xec] sm:$0xf] %vm791_vm0, %v2939_v22  ;;  %v3008_v62 = vld [vmem:[#allocation2 + $0x3c] sm:$0xf]  ;;  %2991 = vst.msk [vmem:[#allocation3 + $0x124] sm:$0xf] %vm791_vm0, %v2945_v37  ;;  %v1578_v63 = vor.u32 %v1576_v38, %v1575_v19  ;;  %v1588_v51 = vsel %vm9025_vm6, %v1580_v39, %v1587_v26 }
 0x1e9   : > { %2666 = vrot.lane.b32.xlu1 %v2561_v36, %s8541_s22  ;;  %v1058_v44 = vpop.permute.xlu0 %1057  ;;  %v3076_v9 = vsel %vm9089_vm7, %v12836_v6, %v9600_v46  ;;  %v10113_v5 = vld [vmem:[#allocation2 + $0x34] sm:$0xf]  ;;  %v2365_v36 = vrot.slane %v10090_v8, 6  ;;  %v3089_v22 = vshrl.u32 %v3005_v1, 16  ;;  %v3092_v56 = vshll.u32 %v3005_v1, 16 }
 0x1ea   : > { %1105 = vst.msk [vmem:[#allocation3 + $0x70] sm:$0xf] %vm1100_vm10, %v1058_v44  ;;  %v3325_v16 = vsel %vm8745_vm8, %v10042_v14, %v3324_v17  ;;  %v12837_v19 = vrot.slane %v9984_v7, 6  ;;  %v10130_v1 = vld [vmem:[#allocation2 + $0x3c] sm:$0xf]  ;;  %v2362_v38 = vrot.slane %v10095_v24, 6  ;;  %v2029_v14 = vsel %vm8825_vm14, %v2020_v57, %v9696_v4 }
 0x1eb   : > { %1265 = vst.msk [vmem:[#allocation3 + $0x70] sm:$0xf] %vm1260_vm11, %v9943_v49  ;;  %v10120_v46 = vpop.permute.xlu1 %3461  ;;  %3205 = vrot.lane.b32.xlu0 %v3076_v9, %s8540_s21  ;;  %v1579_v49 = vsel %vm9025_vm6, %v1571_v21, %v1578_v63  ;;  %v3111_v39 = vrot.slane %v3109_v2, 5  ;;  %v3114_v26 = vrot.slane %v3112_v58, 6  ;;  %v3119_v37 = vshrl.u32 %v3008_v62, 16 }
 0x1ec   : > { %v1825_v8 = vrot.slane %v12837_v19, 4  ;;  %1646 = vst.msk [vmem:[#allocation3 + $0x170] sm:$0xf] %vm791_vm0, %v1588_v51  ;;  %v3122_v44 = vshll.u32 %v3008_v62, 16  ;;  %1645 = vst.msk [vmem:[#allocation3 + $0x154] sm:$0xf] %vm791_vm0, %v1579_v49 }
 0x1ed   : > { %1425 = vst.msk [vmem:[#allocation3 + $0x70] sm:$0xf] %vm1420_vm12, %v9972_v34  ;;  %3367 = vrot.lane.b32.xlu1 %v3325_v16, %s8541_s22  ;;  %v1852_v7 = vpop.permute.xlu0 %1851  ;;  %v12737_v6 = vrot.slane %v10113_v5, 6  ;;  %v2367_v21 = vrot.slane %v2365_v36, 4  ;;  %v12738_v34 = vrot.slane %v10130_v1, 6  ;;  %v3091_v2 = vrot.slane %v3089_v22, 5 }
 0x1ee   : > { %1898 = vst.msk [vmem:[#allocation3 + $0x74] sm:$0xf] %vm1260_vm11, %v1852_v7  ;;  %v3094_v58 = vrot.slane %v3092_v56, 6  ;;  %v2364_v62 = vrot.slane %v2362_v38, 4  ;;  %v10154_v57 = vor.u32 %v3114_v26, %v3111_v39  ;;  %v3121_v63 = vrot.slane %v3119_v37, 5 }
 0x1ef   : > { %v2655_v9 = vpop.permute.xlu1 %2654  ;;  %2126 = vrot.lane.b32.xlu0 %v2029_v14, %s8542_s23  ;;  %v1827_v4 = vsel %vm8745_vm8, %v1825_v8, %v12737_v6  ;;  %v3124_v51 = vrot.slane %v3122_v44, 6  ;;  %v10156_v16 = vld [vmem:[#allocation2 + $0x34] sm:$0xf]  ;;  %v2369_v19 = vsel %vm8745_vm8, %v2367_v21, %v12738_v34  ;;  %v3087_v8 = vrot.slane %v9626_v0, 4  ;;  %v1922_v39 = vld [vmem:[#allocation2 + $0x30] sm:$0xf] }
 0x1f0   : > { %2704 = vst.msk [vmem:[#allocation3 + $0x24] sm:$0xf] %vm1260_vm11, %v2655_v9  ;;  %v3006_v22 = vld [vmem:[#allocation2 + $0x34] sm:$0xf]  ;;  %v10167_v49 = vor.u32 %v3094_v58, %v3091_v2  ;;  %v2782_v37 = vrot.slane %v10156_v16, 7  ;;  %v3117_v7 = vrot.slane %v10154_v57, 4 }
 0x1f1   : > { %2860 = vst.msk [vmem:[#allocation3 + $0x24] sm:$0xf] %vm1420_vm12, %v9855_v25  ;;  %1865 = vrot.lane.b32.xlu1 %v1827_v4, %s8541_s22  ;;  %v1705_v56 = vpop.permute.xlu0 %1704  ;;  %v2366_v25 = vsel %vm8745_vm8, %v2364_v62, %v2365_v36  ;;  %v835_v44 = vld [vmem:[#allocation2 + $0x3c] sm:$0xf]  ;;  %v10175_v14 = vor.u32 %v3124_v51, %v3121_v63  ;;  %v3099_v21 = vshrl.u32 %v3006_v22, 16  ;;  %v3102_v0 = vshll.u32 %v3006_v22, 16 }
 0x1f2   : > { %1745 = vst.msk [vmem:[#allocation3 + $0x11c] sm:$0xf] %vm1100_vm10, %v1705_v56  ;;  %v834_v2 = vld [vmem:[#allocation2 + $0x38] sm:$0xf]  ;;  %v2042_v9 = vshrl.u32 %v1922_v39, 16  ;;  %v2045_v62 = vshll.u32 %v1922_v39, 16 }
 0x1f3   : > { %v1060_v26 = vpop.permute.xlu1 %1059  ;;  %2408 = vrot.lane.b32.xlu0 %v2369_v19, %s8540_s21  ;;  %852 = vst.msk [vmem:[#allocation3 + $0x1a4] sm:$0xf] %vm791_vm0, %v835_v44  ;;  %v10181_v58 = vld [vmem:[#allocation2 + $0x38] sm:$0xf]  ;;  %851 = vst.msk [vmem:[#allocation3 + $0x188] sm:$0xf] %vm791_vm0, %v834_v2 }
 0x1f4   : > { %1106 = vst.msk [vmem:[#allocation3 + $0x8c] sm:$0xf] %vm1100_vm10, %v1060_v26  ;;  %v999_v4 = vshrl.u32 %v9957_v54, 16  ;;  %v12838_v63 = vrot.slane %v9812_v45, 6  ;;  %v1923_v16 = vld [vmem:[#allocation2 + $0x34] sm:$0xf] }
 0x1f5   : > { %1266 = vst.msk [vmem:[#allocation3 + $0x8c] sm:$0xf] %vm1260_vm11, %v9877_v50  ;;  %2406 = vrot.lane.b32.xlu1 %v2366_v25, %s8540_s21  ;;  %v2653_v36 = vpop.permute.xlu0 %2652  ;;  %v3096_v50 = vsel %vm9089_vm7, %v3087_v8, %v10167_v49  ;;  %v2784_v22 = vrot.slane %v2782_v37, 4  ;;  %v2466_v39 = vld [vmem:[#allocation2 + $0x38] sm:$0xf]  ;;  %v3126_v8 = vsel %vm9089_vm7, %v3117_v7, %v10175_v14  ;;  %v12739_v45 = vrot.slane %v10181_v58, 7 }
 0x1f6   : > { %1426 = vst.msk [vmem:[#allocation3 + $0x8c] sm:$0xf] %vm1420_vm12, %v9896_v27  ;;  %v2361_v51 = vrot.slane %v12838_v63, 4  ;;  %v12839_v27 = vrot.slane %v9845_v12, 7  ;;  %v2465_v26 = vld [vmem:[#allocation2 + $0x34] sm:$0xf] }
 0x1f7   : > { %2703 = vst.msk [vmem:[#allocation3 + $0x8] sm:$0xf] %vm1260_vm11, %v2653_v36  ;;  %v10195_v56 = vpop.permute.xlu1 %3363  ;;  %3209 = vrot.lane.b32.xlu0 %v3096_v50, %s8540_s21  ;;  %v3101_v25 = vrot.slane %v3099_v21, 5  ;;  %v3104_v44 = vrot.slane %v3102_v0, 6  ;;  %v2191_v2 = vld [vmem:[#allocation2 + $0x38] sm:$0xf] }
 0x1f8   : > { %2859 = vst.msk [vmem:[#allocation3 + $0x8] sm:$0xf] %vm1420_vm12, %v9907_v33  ;;  %v2781_v19 = vrot.slane %v12839_v27, 4  ;;  %v2044_v36 = vrot.slane %v2042_v9, 6  ;;  %v2047_v50 = vrot.slane %v2045_v62, 7  ;;  %v2052_v63 = vshrl.u32 %v1923_v16, 16 }
 0x1f9   : > { %3215 = vrot.lane.b32.xlu1 %v3126_v8, %s8540_s21  ;;  %v10205_v33 = vpop.permute.xlu0 %3357  ;;  %v2055_v12 = vshll.u32 %v1923_v16, 16  ;;  %v10207_v27 = vld [vmem:[#allocation2 + $0x3c] sm:$0xf]  ;;  %v2363_v7 = vsel %vm8745_vm8, %v2361_v51, %v2362_v38  ;;  %v3097_v6 = vrot.slane %v10167_v49, 4  ;;  %v2574_v21 = vshrl.u32 %v2466_v39, 16 }
 0x1fa   : > { %v2577_v0 = vshll.u32 %v2466_v39, 16  ;;  %v2786_v9 = vsel %vm8756_vm9, %v2784_v22, %v12739_v45  ;;  %v2783_v62 = vsel %vm8756_vm9, %v2781_v19, %v2782_v37  ;;  %v2040_v24 = vrot.slane %v9733_v15, 4  ;;  %v2467_v16 = vld [vmem:[#allocation2 + $0x3c] sm:$0xf]  ;;  %v867_v15 = vld [vmem:[#allocation2 + $0x34] sm:$0xf] }
 0x1fb   : > { %v1064_v34 = vpop.permute.xlu1 %1063  ;;  %2404 = vrot.lane.b32.xlu0 %v2363_v7, %s8540_s21  ;;  %v2252_v8 = vrot.slane %v2191_v2, 7  ;;  %v10223_v38 = vor.u32 %v3104_v44, %v3101_v25  ;;  %v2564_v49 = vshrl.u32 %v2465_v26, 16  ;;  %v2567_v51 = vshll.u32 %v2465_v26, 16 }
 0x1fc   : > { %1108 = vst.msk [vmem:[#allocation3 + $0xc4] sm:$0xf] %vm1100_vm10, %v1064_v34  ;;  %v2255_v39 = vrot.slane %v10207_v27, 7  ;;  %v2048_v7 = vor.u32 %v2047_v50, %v2044_v36  ;;  %v2054_v37 = vrot.slane %v2052_v63, 6  ;;  %v2057_v19 = vrot.slane %v2055_v12, 7 }
 0x1fd   : > { %1268 = vst.msk [vmem:[#allocation3 + $0xc4] sm:$0xf] %vm1260_vm11, %v10047_v30  ;;  %2826 = vrot.lane.b32.xlu1 %v2786_v9, %s8542_s23  ;;  %v1856_v22 = vpop.permute.xlu0 %1855  ;;  %v2254_v45 = vrot.slane %v2252_v8, 4  ;;  %v2576_v34 = vrot.slane %v2574_v21, 6  ;;  %v2579_v26 = vrot.slane %v2577_v0, 7  ;;  %v2584_v25 = vshrl.u32 %v2467_v16, 16 }
 0x1fe   : > { %1428 = vst.msk [vmem:[#allocation3 + $0xc4] sm:$0xf] %vm1420_vm12, %v10087_v48  ;;  %v2587_v44 = vshll.u32 %v2467_v16, 16  ;;  %v3106_v30 = vsel %vm9089_vm7, %v3097_v6, %v10223_v38  ;;  %v2050_v36 = vrot.slane %v2048_v7, 4  ;;  %v2251_v48 = vrot.slane %v2249_v41, 4 }
 0x1ff   : > { %1900 = vst.msk [vmem:[#allocation3 + $0xac] sm:$0xf] %vm1260_vm11, %v1856_v22  ;;  %v1862_v2 = vpop.permute.xlu1 %1861  ;;  %2824 = vrot.lane.b32.xlu0 %v2783_v62, %s8542_s23  ;;  %v2256_v50 = vsel %vm8756_vm9, %v2254_v45, %v2255_v39  ;;  %v10243_v63 = vld [vmem:[#allocation2 + $0x40] sm:$0xf]  ;;  %v2566_v12 = vrot.slane %v2564_v49, 6  ;;  %v2569_v21 = vrot.slane %v2567_v51, 7  ;;  %v2049_v62 = vsel %vm8825_vm14, %v2040_v24, %v2048_v7 }
 0x200   : > { %1903 = vst.msk [vmem:[#allocation3 + $0x100] sm:$0xf] %vm1260_vm11, %v1862_v2  ;;  %v1005_v0 = vshll.u32 %v867_v15, 16  ;;  %v1009_v9 = vshrl.u32 %v867_v15, 16  ;;  %v10249_v45 = vor.u32 %v2057_v19, %v2054_v37  ;;  %v3326_v29 = vrot.slane %v3324_v17, 4  ;;  %v8184_v15 = vpop.f32.mrf.mxu0 }
 0x201   : > { %2296 = vst.msk [vmem:[#allocation3 + $0x174] sm:$0xf] %vm791_vm0, %v2256_v50  ;;  %3211 = vrot.lane.b32.xlu1 %v3106_v30, %s8540_s21  ;;  %v1701_v6 = vpop.permute.xlu0 %1700  ;;  %v2253_v41 = vsel %vm8756_vm9, %v2251_v48, %v2252_v8  ;;  %v2580_v16 = vor.u32 %v2579_v26, %v2576_v34  ;;  %v2586_v49 = vrot.slane %v2584_v25, 6  ;;  %v2589_v51 = vrot.slane %v2587_v44, 7  ;;  %v10266_v8 = vld [vmem:[%s12686_s2] ss:$0 sm:$0xff] }
 0x202   : > { %1743 = vst.msk [vmem:[#allocation3 + $0xe4] sm:$0xf] %vm1100_vm10, %v1701_v6  ;;  %v1001_v22 = vrot.slane %v999_v4, 4  ;;  %v12840_v52 = vrot.slane %v10130_v1, 6  ;;  %v12743_v7 = vrot.slane %v10243_v63, 6  ;;  %v650_v37 = vadd.f32 %v10266_v8, %v8184_v15  ;;  %v641_v34 = vpop.f32.mrf.mxu0 }
 0x203   : > { %2295 = vst.msk [vmem:[#allocation3 + $0x158] sm:$0xf] %vm791_vm0, %v2253_v41  ;;  %v2659_v24 = vpop.permute.xlu1 %2658  ;;  %2130 = vrot.lane.b32.xlu0 %v2049_v62, %s8542_s23  ;;  %v2059_v54 = vsel %vm8825_vm14, %v2050_v36, %v10249_v45  ;;  %v10273_v4 = vor.u32 %v2569_v21, %v2566_v12  ;;  %v1007_v19 = vrot.slane %v1005_v0, 5  ;;  %v1011_v1 = vrot.slane %v1009_v9, 4  ;;  %v10292_v21 = vld [vmem:[#allocation2 + $0x38] sm:$0xf] }
 0x204   : > { %v2370_v17 = vrot.slane %v12840_v52, 4  ;;  %2706 = vst.msk [vmem:[#allocation3 + $0x5c] sm:$0xf] %vm1260_vm11, %v2659_v24  ;;  %v681_v25 = vmax.f32 %v650_v37, 0.0  ;;  %v642_v44 = vadd.f32 %v10266_v8, %v641_v34  ;;  %v12841_v2 = vrot.slane %v9938_v20, 6  ;;  %v8185_v12 = vpop.f32.mrf.mxu0  ;;  %v12842_v9 = vld [vmem:[#allocation11_spill] sm:$0xff] }
 0x205   : > { %2862 = vst.msk [vmem:[#allocation3 + $0x5c] sm:$0xf] %vm1420_vm12, %v10015_v43  ;;  %2132 = vrot.lane.b32.xlu1 %v2059_v54, %s8542_s23  ;;  %v3198_v26 = vpop.permute.xlu0 %3197  ;;  %v2582_v36 = vrot.slane %v2580_v16, 4  ;;  %v10284_v50 = vor.u32 %v2589_v51, %v2586_v49  ;;  %v1002_v48 = vor.u32 %v1001_v22, %v10008_v35  ;;  %v2572_v6 = vrot.slane %v10273_v4, 4 }
 0x206   : > { %3248 = vst.msk [vmem:[#allocation3 + $0xc] sm:$0xf] %vm1100_vm10, %v3198_v26  ;;  %v3328_v30 = vsel %vm8745_vm8, %v3326_v29, %v12841_v2  ;;  %v7846_v0 = vpack.c.bf16 %v681_v25, %v681_v25  ;;  %v679_v20 = vmax.f32 %v642_v44, 0.0  ;;  %v2372_v35 = vsel %vm8745_vm8, %v2370_v17, %v12743_v7  ;;  %v2468_v29 = vld [vmem:[#allocation2 + $0x40] sm:$0xf] }
 0x207   : > { %3404 = vst.msk [vmem:[#allocation3 + $0xc] sm:$0xf] %vm1260_vm11, %v9888_v31  ;;  %v10289_v43 = vpop.permute.xlu1 %3359  ;;  %3369 = vrot.lane.b32.xlu0 %v3328_v30, %s8541_s22  ;;  %v1012_v62 = vor.u32 %v1011_v1, %v1007_v19  ;;  %v2591_v49 = vsel %vm8825_vm14, %v2582_v36, %v10284_v50  ;;  %v1003_v51 = vrot.slane %v1002_v48, 4  ;;  %v1015_v22 = vshll.u32 %v10292_v21, 16  ;;  %v3276_v25 = vld [vmem:[#allocation2 + $0x40] sm:$0xf] }
 0x208   : > { %3506 = vst.msk [vmem:[#allocation3 + $0xc] sm:$0xf] %vm1420_vm12, %v12842_v9  ;;  %v7844_v41 = vpack.c.bf16 %v679_v20, %v679_v20  ;;  %v2581_v24 = vsel %vm8825_vm14, %v2572_v6, %v2580_v16  ;;  %v2594_v17 = vshrl.u32 %v2468_v29, 16  ;;  %v2597_v37 = vshll.u32 %v2468_v29, 16  ;;  %v3009_v44 = vld [vmem:[#allocation2 + $0x40] sm:$0xf] }
 0x209   : > { %2410 = vrot.lane.b32.xlu1 %v2372_v35, %s8540_s21  ;;  %v2119_v31 = vpop.permute.xlu0 %2118  ;;  %818 = vst.msk [vmem:[#allocation2 + $0x68] sm:$0xf] %vm791_vm0, %v7846_v0  ;;  %v1013_v52 = vrot.slane %v1012_v62, 4  ;;  %v1008_v1 = vsel %vm8838_vm15, %v1003_v51, %v1007_v19  ;;  %v10317_v34 = vrot.slane %v1015_v22, 5  ;;  %v2562_v26 = vrot.slane %v10040_v47, 4 }
 0x20a   : > { %2165 = vst.msk [vmem:[#allocation3 + $0x74] sm:$0xf] %vm1420_vm12, %v2119_v31  ;;  %v8360_v16 = vld [vmem:[#allocation3 + $0x8] ss:$28 sps:$4 sm:$0xff]   ;;  %v12843_v48 = vrot.slane %v9948_v60, 6  ;;  %v2596_v12 = vrot.slane %v2594_v17, 6 }
 0x20b   : > { %v1858_v15 = vpop.permute.xlu1 %1857  ;;  %2672 = vrot.lane.b32.xlu0 %v2591_v49, %s8541_s22  ;;  %816 = vst.msk [vmem:[#allocation2 + $0x60] sm:$0xf] %vm791_vm0, %v7844_v41  ;;  %v1018_v36 = vsel %vm8838_vm15, %v1013_v52, %v10317_v34  ;;  %v2599_v0 = vrot.slane %v2597_v37, 7  ;;  %v8365_v9 = vld [vmem:[#allocation3 + $0x70] ss:$28 sps:$4 sm:$0xff]   ;;  %v3333_v35 = vrot.slane %v3276_v25, 6  ;;  %v2571_v6 = vsel %vm8825_vm14, %v2562_v26, %v10273_v4 }
 0x20c   : > { %1901 = vst.msk [vmem:[#allocation3 + $0xc8] sm:$0xf] %vm1260_vm11, %v1858_v15  ;;  %v3332_v19 = vrot.slane %v12843_v48, 4  ;;  %v3129_v62 = vshrl.u32 %v3009_v44, 16  ;;  %v3132_v31 = vshll.u32 %v3009_v44, 16  ;;  %v12844_v51 = vrot.slane %v10061_v42, 5 }
 0x20d   : > { %2670 = vrot.lane.b32.xlu1 %v2581_v24, %s8541_s22  ;;  %v2401_v54 = vpop.permute.xlu0 %2400  ;;  %v3010_v29 = vld [vmem:[#allocation2 + $0x44] sm:$0xf]  ;;  %v1663_v41 = vld [vmem:[#allocation2 + $0x38] sm:$0xf]  ;;  %v2592_v15 = vrot.slane %v10284_v50, 4  ;;  %v10340_v4 = vor.u32 %v2599_v0, %v2596_v12  ;;  %v3107_v42 = vrot.slane %v10223_v38, 4 }
 0x20e   : > { %2445 = vst.msk [vmem:[#allocation3 + $0xb0] sm:$0xf] %vm1100_vm10, %v2401_v54  ;;  %v10334_v49 = vld [vmem:[#allocation2 + $0x44] sm:$0xf]  ;;  %v2946_v22 = vrot.slane %v12844_v51, 4  ;;  %v3334_v54 = vsel %vm8745_vm8, %v3332_v19, %v3333_v35  ;;  %v3131_v25 = vrot.slane %v3129_v62, 5 }
 0x20f   : > { %v1707_v2 = vpop.permute.xlu1 %1706  ;;  %1073 = vrot.lane.b32.xlu0 %v1008_v1, %s8540_s21  ;;  %v8362_v30 = vld [vmem:[#allocation3 + $0xc] ss:$28 sps:$4 sm:$0xff]   ;;  %v12742_v24 = vrot.slane %v10334_v49, 5  ;;  %v1454_v17 = vld [vmem:[#allocation2 + $0x40] sm:$0xf]  ;;  %v3139_v1 = vshrl.u32 %v3010_v29, 16  ;;  %v2601_v38 = vsel %vm8825_vm14, %v2592_v15, %v10340_v4  ;;  %v3116_v0 = vsel %vm9089_vm7, %v3107_v42, %v10154_v57 }
 0x210   : > { %1746 = vst.msk [vmem:[#allocation3 + $0x138] sm:$0xf] %vm1100_vm10, %v1707_v2  ;;  %6407 = vmatprep.mubr.bf16.mxu0 %v8362_v30  ;;  %v1453_v52 = vld [vmem:[#allocation2 + $0x3c] sm:$0xf]  ;;  %v10349_v26 = vld [vmem:[#allocation2 + $0x44] sm:$0xf] }
 0x211   : > { %1075 = vrot.lane.b32.xlu1 %v1018_v36, %s8540_s21  ;;  %v10328_v47 = vpop.permute.xlu0 %2820  ;;  %v8363_v20 = vld [vmem:[#allocation3 + $0x74] ss:$28 sps:$4 sm:$0xff]   ;;  %6408 = vmatmul.mubr.bf16.vlgmr.msra.gmra.mxu0 %v8360_v16  ;;  %v3134_v50 = vrot.slane %v3132_v31, 6  ;;  %v3142_v44 = vshll.u32 %v3010_v29, 16  ;;  %v2948_v2 = vsel %vm8717_vm5, %v2946_v22, %v12742_v24  ;;  %v1591_v30 = vshrl.u32 %v1453_v52, 16 }
 0x212   : > { %6319 = vmatprep.mubr.bf16.mxu1 %v8363_v20  ;;  %2992 = vst.msk [vmem:[#allocation3 + $0x140] sm:$0xf] %vm791_vm0, %v2948_v2  ;;  %v1600_v36 = vshrl.u32 %v1454_v17, 16  ;;  %v3335_v48 = vrot.slane %v3333_v35, 4  ;;  %v1603_v19 = vshll.u32 %v1454_v17, 16  ;;  %v12741_v20 = vrot.slane %v10349_v26, 6 }
 0x213   : > { %v2399_v60 = vpop.permute.xlu1 %2398  ;;  %2668 = vrot.lane.b32.xlu0 %v2571_v6, %s8541_s22  ;;  %6320 = vmatmul.mubr.bf16.gmra.mxu1 %v8365_v9  ;;  %v3127_v9 = vrot.slane %v10175_v14, 4  ;;  %v2731_v6 = vld [vmem:[#allocation2 + $0x3c] sm:$0xf]  ;;  %v1593_v62 = vrot.slane %v1591_v30, 7  ;;  %v3135_v35 = vor.u32 %v3134_v50, %v3131_v25  ;;  %v3141_v31 = vrot.slane %v3139_v1, 5 }
 0x214   : > { %2444 = vst.msk [vmem:[#allocation3 + $0x94] sm:$0xf] %vm1100_vm10, %v2399_v60  ;;  %v10373_v29 = vrot.slane %v1600_v36, 7  ;;  %v3337_v57 = vsel %vm8745_vm8, %v3335_v48, %v12741_v20  ;;  %v2788_v51 = vrot.slane %v2731_v6, 7  ;;  %v10386_v15 = vld [vmem:[#allocation2 + $0x40] sm:$0xf] }
 0x215   : > { %1710 = vrot.lane.b32.xlu1 %v1663_v41, %s8540_s21  ;;  %v10344_v37 = vpop.permute.xlu0 %1229  ;;  %v1598_v41 = vrot.slane %v1593_v62, 4  ;;  %v3137_v14 = vrot.slane %v3135_v35, 4  ;;  %v1589_v17 = vrot.slane %v10082_v23, 4  ;;  %v3136_v42 = vsel %vm9089_vm7, %v3127_v9, %v3135_v35  ;;  %v1131_v25 = vld [vmem:[#allocation2 + $0x34] sm:$0xf] }
 0x216   : > { %12845 = vst [vmem:[#allocation11_spill] sm:$0xff] %v10373_v29  ;;  %v1605_v22 = vor.u32 %v1603_v19, %v10373_v29  ;;  %v1924_v30 = vld [vmem:[#allocation2 + $0x38] sm:$0xf]  ;;  %v1662_v19 = vld [vmem:[#allocation2 + $0x34] sm:$0xf] }
 0x217   : > { %v3208_v16 = vpop.permute.xlu1 %3207  ;;  %3373 = vrot.lane.b32.xlu0 %v3334_v54, %s8541_s22  ;;  %v1594_v54 = vshll.u32 %v1453_v52, 16  ;;  %v2790_v52 = vrot.slane %v2788_v51, 4  ;;  %v1765_v6 = vld [vmem:[#allocation2 + $0x38] sm:$0xf]  ;;  %v1925_v35 = vld [vmem:[#allocation2 + $0x3c] sm:$0xf] }
 0x218   : > { %3253 = vst.msk [vmem:[#allocation3 + $0x98] sm:$0xf] %vm1100_vm10, %v3208_v16  ;;  %v1606_v50 = vsel %vm9025_vm6, %v1598_v41, %v1605_v22  ;;  %v12740_v16 = vrot.slane %v10386_v15, 7  ;;  %v10421_v41 = vld [vmem:[#allocation2 + $0x38] sm:$0xf] }
 0x219   : > { %3409 = vst.msk [vmem:[#allocation3 + $0x98] sm:$0xf] %vm1260_vm11, %v10195_v56  ;;  %2674 = vrot.lane.b32.xlu1 %v2601_v38, %s8541_s22  ;;  %v10364_v12 = vpop.permute.xlu0 %1389  ;;  %v3144_v56 = vrot.slane %v3142_v44, 6  ;;  %v1596_v2 = vor.u32 %v1594_v54, %v1593_v62  ;;  %v1195_v38 = vrot.slane %v1131_v25, 5 }
 0x21a   : > { %3511 = vst.msk [vmem:[#allocation3 + $0x98] sm:$0xf] %vm1420_vm12, %v9935_v11 }
 0x21b   : > { %v10375_v60 = vpop.permute.xlu1 %2818  ;;  %3213 = vrot.lane.b32.xlu0 %v3116_v0, %s8540_s21  ;;  %v10391_v1 = vor.u32 %v3144_v56, %v3141_v31  ;;  %1648 = vst.msk [vmem:[#allocation3 + $0x1a8] sm:$0xf] %vm791_vm0, %v1606_v50  ;;  %v1597_v48 = vsel %vm9025_vm6, %v1589_v17, %v1596_v2  ;;  %v12847_v0 = vrot.slane %v10181_v58, 7  ;;  %v2062_v31 = vshrl.u32 %v1924_v30, 16  ;;  %v3432_v50 = vld [vmem:[#allocation2 + $0x44] sm:$0xf] }
 0x21c   : > { %1647 = vst.msk [vmem:[#allocation3 + $0x18c] sm:$0xf] %vm791_vm0, %v1597_v48  ;;  %v2065_v56 = vshll.u32 %v1924_v30, 16  ;;  %v2792_v58 = vsel %vm8756_vm9, %v2790_v52, %v12740_v16  ;;  %v1197_v22 = vrot.slane %v1195_v38, 4  ;;  %v12848_v17 = vrot.slane %v9870_v10, 5 }
 0x21d   : > { %3375 = vrot.lane.b32.xlu1 %v3337_v57, %s8541_s22  ;;  %v10384_v11 = vpop.permute.xlu0 %3471  ;;  %v3146_v23 = vsel %vm9089_vm7, %v3137_v14, %v10391_v1  ;;  %v2787_v9 = vrot.slane %v12847_v0, 4  ;;  %v10423_v57 = vld [vmem:[#allocation2 + $0x3c] sm:$0xf]  ;;  %v10433_v2 = vld [vmem:[#allocation2 + $0x38] sm:$0xf]  ;;  %v2075_v52 = vshll.u32 %v1925_v35, 16 }
 0x21e   : > { %12846 = vst [vmem:[#allocation12_spill] sm:$0xff] %v10384_v11  ;;  %v1194_v54 = vrot.slane %v12848_v17, 4  ;;  %v12744_v10 = vrot.slane %v10421_v41, 5  ;;  %v2064_v48 = vrot.slane %v2062_v31, 6  ;;  %v10438_v0 = vld [vmem:[#allocation2 + $0x40] sm:$0xf] }
 0x21f   : > { %v10395_v44 = vpop.permute.xlu1 %1227  ;;  %3217 = vrot.lane.b32.xlu0 %v3136_v42, %s8540_s21  ;;  %v1829_v42 = vrot.slane %v1765_v6, 6  ;;  %v2789_v25 = vsel %vm8756_vm9, %v2787_v9, %v2788_v51  ;;  %v12849_v9 = vrot.slane %v10113_v5, 6  ;;  %v10454_v5 = vld [vmem:[#allocation2 + $0x44] sm:$0xf]  ;;  %v2077_v30 = vrot.slane %v2075_v52, 7 }
 0x220   : > { %v1199_v31 = vsel %vm8717_vm5, %v1197_v22, %v12744_v10  ;;  %v10463_v22 = vld [vmem:[#allocation2 + $0x48] sm:$0xf]  ;;  %v869_v11 = vld [vmem:[#allocation2 + $0x3c] sm:$0xf] }
 0x221   : > { %3219 = vrot.lane.b32.xlu1 %v3146_v23, %s8540_s21  ;;  %v3202_v36 = vpop.permute.xlu0 %3201  ;;  %v2072_v23 = vshrl.u32 %v1925_v35, 16  ;;  %v1828_v6 = vrot.slane %v12849_v9, 4  ;;  %12851 = vst [vmem:[#allocation14_spill] sm:$0xff] %v10463_v22  ;;  %v2470_v10 = vld [vmem:[#allocation2 + $0x48] sm:$0xf] }
 0x222   : > { %3250 = vst.msk [vmem:[#allocation3 + $0x44] sm:$0xf] %vm1100_vm10, %v3202_v36 }
 0x223   : > { %3406 = vst.msk [vmem:[#allocation3 + $0x44] sm:$0xf] %vm1260_vm11, %v10205_v33  ;;  %v10412_v62 = vpop.permute.xlu1 %1387  ;;  %1708 = vrot.lane.b32.xlu0 %v1662_v19, %s8540_s21  ;;  %v10425_v33 = vld [vmem:[#allocation2 + $0x34] sm:$0xf]  ;;  %v2067_v19 = vrot.slane %v2065_v56, 7  ;;  %v1196_v56 = vsel %vm8717_vm5, %v1194_v54, %v1195_v38  ;;  %v2074_v20 = vrot.slane %v2072_v23, 6  ;;  %v1830_v23 = vsel %vm8745_vm8, %v1828_v6, %v1829_v42 }
 0x224   : > { %3508 = vst.msk [vmem:[#allocation3 + $0x44] sm:$0xf] %vm1420_vm12, %v10036_v28  ;;  %v3011_v28 = vld [vmem:[#allocation2 + $0x48] sm:$0xf]  ;;  %v12745_v35 = vrot.slane %v10425_v33, 7  ;;  %v12854_v6 = vrot.slane %v9890_v3, 7 }
 0x225   : > { %2830 = vrot.lane.b32.xlu1 %v2792_v58, %s8542_s23  ;;  %v2397_v14 = vpop.permute.xlu0 %2396  ;;  %v3012_v58 = vld [vmem:[#allocation2 + $0x4c] sm:$0xf]  ;;  %v3152_v9 = vshll.u32 %v3011_v28, 16  ;;  %v10461_v51 = vor.u32 %v2067_v19, %v2064_v48  ;;  %v12856_v3 = vrot.slane %v10454_v5, 6 }
 0x226   : > { %2443 = vst.msk [vmem:[#allocation3 + $0x78] sm:$0xf] %vm1100_vm10, %v2397_v14  ;;  %v3149_v14 = vshrl.u32 %v3011_v28, 16  ;;  %v3159_v38 = vshrl.u32 %v3012_v58, 16  ;;  %v3162_v54 = vshll.u32 %v3012_v58, 16  ;;  %v2257_v28 = vrot.slane %v2255_v39, 4 }
 0x227   : > { %v2129_v36 = vpop.permute.xlu1 %2128  ;;  %2828 = vrot.lane.b32.xlu0 %v2789_v25, %s8542_s23  ;;  %v3431_v25 = vld [vmem:[#allocation2 + $0x40] sm:$0xf]  ;;  %v1357_v52 = vrot.slane %v12745_v35, 4  ;;  %v3154_v19 = vrot.slane %v3152_v9, 6  ;;  %v12852_v58 = vrot.slane %v10438_v0, 7  ;;  %v12853_v39 = vrot.slane %v10423_v57, 6 }
 0x228   : > { %2170 = vst.msk [vmem:[#allocation3 + $0x100] sm:$0xf] %vm1420_vm12, %v2129_v36  ;;  %v1831_v36 = vrot.slane %v1829_v42, 4  ;;  %v3151_v16 = vrot.slane %v3149_v14, 5  ;;  %v1354_v14 = vrot.slane %v12854_v6, 4  ;;  %v3164_v35 = vrot.slane %v3162_v54, 6 }
 0x229   : > { %3477 = vrot.lane.b32.xlu1 %v3432_v50, %s8542_s23  ;;  %v10446_v17 = vpop.permute.xlu0 %2816  ;;  %v2469_v50 = vld [vmem:[#allocation2 + $0x44] sm:$0xf]  ;;  %v2259_v27 = vsel %vm8756_vm9, %v2257_v28, %v12852_v58  ;;  %v2070_v28 = vrot.slane %v10461_v51, 4  ;;  %v3161_v58 = vrot.slane %v3159_v38, 5  ;;  %v1029_v9 = vshrl.u32 %v869_v11, 16 }
 0x22a   : > { %v2607_v24 = vshll.u32 %v2469_v50, 16  ;;  %v1833_v42 = vsel %vm8745_vm8, %v1831_v36, %v12853_v39  ;;  %2297 = vst.msk [vmem:[#allocation3 + $0x190] sm:$0xf] %vm791_vm0, %v2259_v27  ;;  %v10494_v36 = vrot.slane %v12856_v3, 4  ;;  %v12857_v39 = vrot.slane %v10243_v63, 6 }
 0x22b   : > { %v10458_v7 = vpop.permute.xlu1 %3473  ;;  %3475 = vrot.lane.b32.xlu0 %v3431_v25, %s8542_s23  ;;  %v2604_v25 = vshrl.u32 %v2469_v50, 16  ;;  %v1025_v27 = vshll.u32 %v869_v11, 16  ;;  %v12858_v63 = vrot.slane %v10433_v2, 7  ;;  %v12859_v11 = vrot.slane %v10425_v33, 7  ;;  %v10530_v33 = vld [vmem:[#allocation2 + $0x3c] sm:$0xf] }
 0x22c   : > { %12850 = vst [vmem:[#allocation13_spill] sm:$0xff] %v10458_v7  ;;  %v10498_v6 = vrot.slane %v12857_v39, 4  ;;  %v2609_v54 = vrot.slane %v2607_v24, 7  ;;  %v10526_v3 = vor.u32 %v3164_v35, %v3161_v58  ;;  %v12864_v7 = vshrl.u32 %v10292_v21, 16 }
 0x22d   : > { %1235 = vrot.lane.b32.xlu1 %v1199_v31, %s8541_s22  ;;  %v2123_v48 = vpop.permute.xlu0 %2122  ;;  %v2606_v38 = vrot.slane %v2604_v25, 6  ;;  %v10520_v25 = vld [vmem:[#allocation2 + $0x4c] sm:$0xf]  ;;  %v10544_v31 = vld [vmem:[#allocation2 + $0x44] sm:$0xf] }
 0x22e   : > { %2167 = vst.msk [vmem:[#allocation3 + $0xac] sm:$0xf] %vm1420_vm12, %v2123_v48  ;;  %v10489_v48 = vor.u32 %v2077_v30, %v2074_v20  ;;  %v10505_v30 = vor.u32 %v3154_v19, %v3151_v16  ;;  %v1356_v16 = vsel %vm8756_vm9, %v1354_v14, %v12859_v11  ;;  %v2614_v19 = vshrl.u32 %v2470_v10, 16  ;;  %12860 = vst [vmem:[#allocation16_spill] sm:$0xff] %v10526_v3 }
 0x22f   : > { %v3204_v50 = vpop.permute.xlu1 %3203  ;;  %1233 = vrot.lane.b32.xlu0 %v1196_v56, %s8541_s22  ;;  %v3147_v56 = vrot.slane %v10391_v1, 4  ;;  %v2889_v1 = vld [vmem:[#allocation2 + $0x48] sm:$0xf]  ;;  %v10538_v11 = vrot.slane %v1025_v27, 5  ;;  %v1021_v27 = vrot.slane %v12864_v7, 4 }
 0x230   : > { %12855 = vst [vmem:[#allocation15_spill] sm:$0xff] %v10489_v48  ;;  %3251 = vst.msk [vmem:[#allocation3 + $0x60] sm:$0xf] %vm1100_vm10, %v3204_v50  ;;  %v10508_v50 = vld [vmem:[#allocation2 + $0x48] sm:$0xf]  ;;  %v2950_v39 = vrot.slane %v2889_v1, 5  ;;  %v2610_v1 = vor.u32 %v2609_v54, %v2606_v38 }
 0x231   : > { %3407 = vst.msk [vmem:[#allocation3 + $0x60] sm:$0xf] %vm1260_vm11, %v10289_v43  ;;  %1869 = vrot.lane.b32.xlu1 %v1833_v42, %s8541_s22  ;;  %v10503_v20 = vpop.permute.xlu0 %1225  ;;  %v1359_v43 = vsel %vm8756_vm9, %v1357_v52, %v12858_v63  ;;  %v2617_v42 = vshll.u32 %v2470_v10, 16  ;;  %v10528_v52 = vld [vmem:[#allocation2 + $0x4c] sm:$0xf]  ;;  %v2602_v10 = vrot.slane %v10340_v4, 4 }
 0x232   : > { %3509 = vst.msk [vmem:[#allocation3 + $0x60] sm:$0xf] %vm1420_vm12, %v10120_v46  ;;  %v2079_v46 = vsel %vm8825_vm14, %v2070_v28, %v10489_v48  ;;  %12861 = vst [vmem:[#allocation17_spill] sm:$0xff] %v10528_v52  ;;  %v3339_v63 = vrot.slane %v10508_v50, 6  ;;  %v1031_v28 = vrot.slane %v1029_v9, 4  ;;  %v3157_v58 = vrot.slane %v10505_v30, 4 }
 0x233   : > { %v2125_v24 = vpop.permute.xlu1 %2124  ;;  %1867 = vrot.lane.b32.xlu0 %v1830_v23, %s8541_s22  ;;  %v10536_v23 = vld [vmem:[#allocation2 + $0x40] sm:$0xf]  ;;  %v2952_v14 = vrot.slane %v2950_v39, 4  ;;  %v2616_v53 = vrot.slane %v2614_v19, 6  ;;  %v2619_v50 = vrot.slane %v2617_v42, 7  ;;  %v12753_v9 = vrot.slane %v10530_v33, 5 }
 0x234   : > { %2168 = vst.msk [vmem:[#allocation3 + $0xc8] sm:$0xf] %vm1420_vm12, %v2125_v24  ;;  %12862 = vst [vmem:[#allocation18_spill] sm:$0xff] %v10536_v23  ;;  %v12863_v24 = vrot.slane %v10334_v49, 5  ;;  %v12865_v38 = vrot.slane %v10349_v26, 6  ;;  %v12867_v49 = vrot.slane %v10520_v25, 5 }
 0x235   : > { %1395 = vrot.lane.b32.xlu1 %v1359_v43, %s8542_s23  ;;  %v10541_v35 = vpop.permute.xlu0 %1385  ;;  %v12750_v43 = vrot.slane %v10528_v52, 6  ;;  %v10555_v48 = vld [vmem:[#allocation2 + $0x40] sm:$0xf]  ;;  %v3341_v21 = vrot.slane %v3339_v63, 4  ;;  %v1035_v42 = vshll.u32 %v10536_v23, 16  ;;  %v12752_v26 = vrot.slane %v10544_v31, 7 }
 0x236   : > { %v2949_v4 = vrot.slane %v12863_v24, 4  ;;  %v3338_v54 = vrot.slane %v12865_v38, 4  ;;  %12866 = vst [vmem:[#allocation19_spill] sm:$0xff] %v10555_v48  ;;  %v2954_v19 = vsel %vm8717_vm5, %v2952_v14, %v12867_v49  ;;  %v12868_v14 = vrot.slane %v10249_v45, 4  ;;  %v8368_v38 = vld [vmem:[#allocation3 + $0x40] ss:$28 sps:$4 sm:$0xff]  }
 0x237   : > { %v2403_v29 = vpop.permute.xlu1 %2402  ;;  %1393 = vrot.lane.b32.xlu0 %v1356_v16, %s8542_s23  ;;  %v1032_v16 = vor.u32 %v1031_v28, %v10538_v11  ;;  %2994 = vst.msk [vmem:[#allocation3 + $0x178] sm:$0xf] %vm791_vm0, %v2954_v19  ;;  %v12869_v28 = vrot.slane %v10463_v22, 6  ;;  %v12870_v49 = vrot.slane %v10454_v5, 6  ;;  %v2612_v19 = vrot.slane %v2610_v1, 4 }
 0x238   : > { %v2951_v7 = vsel %vm8717_vm5, %v2949_v4, %v2950_v39  ;;  %2446 = vst.msk [vmem:[#allocation3 + $0xcc] sm:$0xf] %vm1100_vm10, %v2403_v29  ;;  %v2069_v29 = vsel %vm8825_vm14, %v12868_v14, %v10461_v51  ;;  %v10591_v45 = vsel %vm9089_vm7, %v3147_v56, %v10505_v30  ;;  %v1022_v51 = vor.u32 %v1021_v27, %v10317_v34  ;;  %v8371_v34 = vld [vmem:[#allocation3 + $0xa8] ss:$28 sps:$4 sm:$0xff]  }
 0x239   : > { %2993 = vst.msk [vmem:[#allocation3 + $0x15c] sm:$0xf] %vm791_vm0, %v2951_v7  ;;  %2136 = vrot.lane.b32.xlu1 %v2079_v46, %s8542_s23  ;;  %v1070_v24 = vpop.permute.xlu0 %1069  ;;  %v8366_v39 = vld [vmem:[#allocation3 + $0x44] ss:$28 sps:$4 sm:$0xff]   ;;  %v2378_v4 = vsel %vm8745_vm8, %v10494_v36, %v12869_v28  ;;  %v2375_v46 = vsel %vm8745_vm8, %v10498_v6, %v12870_v49  ;;  %v10585_v7 = vld [vmem:[#allocation2 + $0x40] sm:$0xf]  ;;  %v3166_v56 = vsel %vm9089_vm7, %v3157_v58, %v10526_v3 }
 0x23a   : > { %1111 = vst.msk [vmem:[#allocation3 + $0x118] sm:$0xf] %vm1100_vm10, %v1070_v24  ;;  %v10594_v36 = vld [vmem:[#allocation2 + $0x48] sm:$0xf]  ;;  %v1203_v5 = vrot.slane %v12753_v9, 4  ;;  %v12751_v14 = vrot.slane %v10555_v48, 5  ;;  %6415 = vmatprep.mubr.bf16.mxu0 %v8366_v39  ;;  %v10609_v27 = vor.u32 %v2619_v50, %v2616_v53  ;;  %v10613_v49 = vsel %vm8825_vm14, %v2602_v10, %v2610_v1 }
 0x23b   : > { %12871 = vst [vmem:[#allocation20_spill] sm:$0xff] %v10594_v36  ;;  %v10599_v6 = vld [vmem:[#allocation2 + $0x3c] sm:$0xf]  ;;  %1271 = vst.msk [vmem:[#allocation3 + $0x118] sm:$0xf] %vm1260_vm11, %v10344_v37  ;;  %v10603_v24 = vpop.permute.xlu1 %2822  ;;  %2134 = vrot.lane.b32.xlu0 %v2069_v29, %s8542_s23  ;;  %6416 = vmatmul.mubr.bf16.gmra.mxu0 %v8368_v38  ;;  %v10619_v37 = vsel %vm8745_vm8, %v3338_v54, %v3339_v63  ;;  %v10621_v29 = vrot.slane %v1032_v16, 4  ;;  %v10639_v63 = vsel %vm8745_vm8, %v3341_v21, %v12750_v43 }
 0x23c   : > { %v3524_v28 = vld [vmem:[#allocation2 + $0x1c] sm:$0xf]  ;;  %12872 = vst [vmem:[#allocation21_spill] sm:$0xff] %v10609_v27  ;;  %1431 = vst.msk [vmem:[#allocation3 + $0x118] sm:$0xf] %vm1420_vm12, %v10364_v12  ;;  %v10623_v39 = vrot.slane %v1035_v42, 5  ;;  %v2621_v12 = vsel %vm8825_vm14, %v2612_v19, %v10609_v27  ;;  %v10654_v38 = vsel %vm8717_vm5, %v1203_v5, %v12751_v14 }
 0x23d   : > { %v8369_v30 = vld [vmem:[#allocation3 + $0xac] ss:$28 sps:$4 sm:$0xff]   ;;  %v2796_v53 = vrot.slane %v12752_v26, 4  ;;  %v10627_v58 = vld [vmem:[#allocation2 + $0x40] sm:$0xf]  ;;  %2414 = vrot.lane.b32.xlu1 %v2378_v4, %s8540_s21  ;;  %v10630_v10 = vpop.permute.xlu0 %3467  ;;  %v12756_v1 = vrot.slane %v10594_v36, 7 }
 0x23e   : > { %12873 = vst [vmem:[#allocation22_spill] sm:$0xff] %v10630_v10  ;;  %6327 = vmatprep.mubr.bf16.mxu1 %v8369_v30  ;;  %v12874_v50 = vrot.slane %v10421_v41, 5  ;;  %v10646_v16 = vld [vmem:[#allocation2 + $0x20] sm:$0xf]  ;;  %v3523_v42 = vld [vmem:[#allocation2 + $0x18] sm:$0xf] }
 0x23f   : > { %6328 = vmatmul.mubr.bf16.gmra.mxu1 %v8371_v34  ;;  %v10648_v4 = vrot.slane %v1022_v51, 4  ;;  %v12875_v19 = vrot.slane %v10423_v57, 6  ;;  %v10661_v41 = vld [vmem:[#allocation2 + $0x40] sm:$0xf]  ;;  %2412 = vrot.lane.b32.xlu0 %v2375_v46, %s8540_s21  ;;  %v12876_v51 = vrot.slane %v10386_v15, 7  ;;  %v3551_v14 = vshll.u32 %v3524_v28, 16 }
 0x240   : > { %v10644_v54 = vrot.slane %v12874_v50, 4  ;;  %v10663_v50 = vpop.permute.xlu1 %1231  ;;  %v4268_v26 = vld [vmem:[#allocation2 + $0x28] sm:$0xf]  ;;  %v10680_v46 = vsel %vm8756_vm9, %v2796_v53, %v12756_v1  ;;  %v3555_v15 = vshrl.u32 %v3524_v28, 16  ;;  %v4267_v21 = vld [vmem:[#allocation2 + $0x24] sm:$0xe] }
 0x241   : > { %v10659_v30 = vrot.slane %v12875_v19, 4  ;;  %v10668_v34 = vrot.slane %v12876_v51, 4  ;;  %v3561_v19 = vshll.u32 %v10646_v16, 16  ;;  %v4269_v51 = vld [vmem:[#allocation2 + $0x2c] sm:$0xf]  ;;  %3223 = vrot.lane.b32.xlu1 %v3166_v56, %s8540_s21  ;;  %v10684_v5 = vpop.permute.xlu0 %3361  ;;  %v12877_v9 = vrot.slane %v10433_v2, 7 }
 0x242   : > { %v10692_v36 = vrot.slane %v3551_v14, 5  ;;  %v3526_v53 = vld [vmem:[#allocation2 + $0x24] sm:$0xf]  ;;  %v3557_v28 = vrot.slane %v3555_v15, 4  ;;  %v3565_v52 = vshrl.u32 %v10646_v16, 16  ;;  %v3542_v27 = vshrl.u32 %v3523_v42, 16 }
 0x243   : > { %v10688_v43 = vrot.slane %v12877_v9, 4  ;;  %v3563_v1 = vrot.slane %v3561_v19, 5  ;;  %3221 = vrot.lane.b32.xlu0 %v10591_v45, %s8540_s21  ;;  %v3545_v2 = vshll.u32 %v3523_v42, 16  ;;  %v4305_v9 = vrot.slane %v4268_v26, 5  ;;  %v10702_v19 = vld [vmem:[#allocation2 + $0x30] sm:$0xf] }
 0x244   : > { %v10697_v56 = vpop.permute.xlu1 %1391  ;;  %v4308_v57 = vrot.slane %v4269_v51, 5  ;;  %v7606_v3 = vrot.slane %v4267_v21, 9  ;;  %v3558_v14 = vor.u32 %v3557_v28, %v10692_v36  ;;  %v3544_v48 = vrot.slane %v3542_v27, 4  ;;  %v4891_v26 = vld [vmem:[#allocation2 + $0x2c] sm:$0xf] }
 0x245   : > { %v3571_v23 = vshll.u32 %v3526_v53, 16  ;;  %v3575_v15 = vshrl.u32 %v3526_v53, 16  ;;  %2678 = vrot.lane.b32.xlu1 %v2621_v12, %s8541_s22  ;;  %v2665_v16 = vpop.permute.xlu0 %2664  ;;  %v3547_v10 = vrot.slane %v3545_v2, 5  ;;  %v4307_v22 = vrot.slane %v4305_v9, 4  ;;  %v10711_v53 = vld [vmem:[#allocation2 + $0x30] sm:$0xf] }
 0x246   : > { %v4306_v61 = vsel %vm8717_vm5, %v7606_v3, %v4305_v9  ;;  %v3581_v45 = vshll.u32 %v10695_v55, 16  ;;  %2709 = vst.msk [vmem:[#allocation3 + $0xb0] sm:$0xf] %vm1260_vm11, %v2665_v16  ;;  %v3559_v42 = vrot.slane %v3558_v14, 4  ;;  %v3585_v51 = vshrl.u32 %v10695_v55, 16 }
 0x247   : > { %4372 = vst.msk [vmem:[#allocation3 + $0x14] sm:$0xf] %vm791_vm0, %v4306_v61  ;;  %v3573_v27 = vrot.slane %v3571_v23, 5  ;;  %v3577_v21 = vrot.slane %v3575_v15, 4  ;;  %2676 = vrot.lane.b32.xlu0 %v10613_v49, %s8541_s22  ;;  %v3548_v3 = vor.u32 %v3547_v10, %v3544_v48  ;;  %v4309_v28 = vsel %vm8717_vm5, %v4307_v22, %v4308_v57  ;;  %v4890_v23 = vld [vmem:[#allocation2 + $0x28] sm:$0xc] }
 0x248   : > { %2865 = vst.msk [vmem:[#allocation3 + $0xb0] sm:$0xf] %vm1420_vm12, %v10328_v47  ;;  %v10715_v12 = vpop.permute.xlu1 %3469  ;;  %v10721_v2 = vrot.slane %v3581_v45, 5  ;;  %v3567_v61 = vrot.slane %v3565_v52, 4  ;;  %v3528_v9 = vld [vmem:[#allocation2 + $0x2c] sm:$0xf]  ;;  %v3564_v55 = vsel %vm8838_vm15, %v3559_v42, %v3563_v1 }
 0x249   : > { %4373 = vst.msk [vmem:[#allocation3 + $0x30] sm:$0xf] %vm791_vm0, %v4309_v28  ;;  %v3578_v47 = vor.u32 %v3577_v21, %v3573_v27  ;;  %v4311_v14 = vrot.slane %v10702_v19, 5  ;;  %v4310_v15 = vrot.slane %v4308_v57, 4  ;;  %3379 = vrot.lane.b32.xlu1 %v10639_v63, %s8541_s22  ;;  %v1066_v48 = vpop.permute.xlu0 %1065  ;;  %3733 = vst.msk [vmem:[#allocation3 + $0x2c] sm:$0xf] %vm791_vm0, %v3564_v55 }
 0x24a   : > { %v3549_v22 = vrot.slane %v3548_v3, 4  ;;  %v3568_v49 = vor.u32 %v3567_v61, %v3563_v1  ;;  %v4928_v52 = vrot.slane %v4891_v26, 6  ;;  %v4931_v10 = vrot.slane %v10711_v53, 6  ;;  %1109 = vst.msk [vmem:[#allocation3 + $0xe0] sm:$0xf] %vm1100_vm10, %v1066_v48 }
 0x24b   : > { %v3579_v16 = vrot.slane %v3578_v47, 4  ;;  %v4312_v45 = vsel %vm8717_vm5, %v4310_v15, %v4311_v14  ;;  %v7609_v57 = vrot.slane %v4890_v23, 10  ;;  %v10736_v42 = vld [vmem:[#allocation2 + $0x30] sm:$0xf]  ;;  %v3591_v63 = vshll.u32 %v3528_v9, 16  ;;  %3377 = vrot.lane.b32.xlu0 %v10619_v37, %s8541_s22 }
 0x24c   : > { %1269 = vst.msk [vmem:[#allocation3 + $0xe0] sm:$0xf] %vm1260_vm11, %v10503_v20  ;;  %v2663_v21 = vpop.permute.xlu1 %2662  ;;  %v3554_v1 = vsel %vm8838_vm15, %v3549_v22, %v10692_v36  ;;  %v3569_v26 = vrot.slane %v3568_v49, 4  ;;  %v4930_v3 = vrot.slane %v4928_v52, 4  ;;  %v3595_v28 = vshrl.u32 %v3528_v9, 16 }
 0x24d   : > { %4374 = vst.msk [vmem:[#allocation3 + $0x4c] sm:$0xf] %vm791_vm0, %v4312_v45  ;;  %v12878_v20 = vrot.slane %v10599_v6, 7  ;;  %3732 = vst.msk [vmem:[#allocation3 + $0x10] sm:$0xf] %vm791_vm0, %v3554_v1  ;;  %v3584_v36 = vsel %vm8838_vm15, %v3579_v16, %v10721_v2  ;;  %v4929_v37 = vsel %vm8745_vm8, %v7609_v57, %v4928_v52  ;;  %v10759_v23 = vrot.slane %v3591_v63, 5  ;;  %v1860_v9 = vpop.permute.xlu0 %1859 }
 0x24e   : > { %1429 = vst.msk [vmem:[#allocation3 + $0xe0] sm:$0xf] %vm1420_vm12, %v10541_v35  ;;  %v12879_v35 = vsel %vm8838_vm15, %v10621_v29, %v10623_v39  ;;  %v10769_v55 = vld [vmem:[#allocation2 + $0x44] sm:$0xf]  ;;  %v3574_v47 = vsel %vm8838_vm15, %v3569_v26, %v3573_v27  ;;  %v3597_v15 = vrot.slane %v3595_v28, 4  ;;  %v3601_v48 = vshll.u32 %v10736_v42, 16 }
 0x24f   : > { %2708 = vst.msk [vmem:[#allocation3 + $0x94] sm:$0xf] %vm1260_vm11, %v2663_v21  ;;  %v10751_v61 = vrot.slane %v12878_v20, 4  ;;  %1079 = vrot.lane.b32.xlu1 %v12879_v35, %s8540_s21  ;;  %1902 = vst.msk [vmem:[#allocation3 + $0xe4] sm:$0xf] %vm1260_vm11, %v1860_v9  ;;  %v1028_v29 = vsel %vm8838_vm15, %v10648_v4, %v10538_v11  ;;  %v12880_v22 = vrot.slane %v10530_v33, 5 }
 0x250   : > { %2864 = vst.msk [vmem:[#allocation3 + $0x94] sm:$0xf] %vm1420_vm12, %v10375_v60  ;;  %v4932_v60 = vsel %vm8745_vm8, %v4930_v3, %v4931_v10  ;;  %v12881_v49 = vshrl.u32 %v10661_v41, 16  ;;  %v4271_v16 = vld [vmem:[#allocation2 + $0x34] sm:$0xf]  ;;  %v3587_v45 = vrot.slane %v3585_v51, 4  ;;  %v1068_v63 = vpop.permute.xlu1 %1067  ;;  %1077 = vrot.lane.b32.xlu0 %v1028_v29, %s8540_s21  ;;  %v3598_v1 = vor.u32 %v3597_v15, %v10759_v23 }
 0x251   : > { %3735 = vst.msk [vmem:[#allocation3 + $0x64] sm:$0xf] %vm791_vm0, %v3584_v36  ;;  %4995 = vst.msk [vmem:[#allocation3 + $0x18] sm:$0xf] %vm791_vm0, %v4929_v37  ;;  %v10790_v27 = vsel %vm8717_vm5, %v10644_v54, %v12880_v22  ;;  %v10796_v57 = vld [vmem:[#allocation2 + $0x38] sm:$0xf]  ;;  %v644_v36 = vpop.f32.mrf.mxu0  ;;  %v2661_v35 = vpop.permute.xlu0 %2660 }
 0x252   : > { %v2084_v52 = vrot.slane %v12881_v49, 6  ;;  %3734 = vst.msk [vmem:[#allocation3 + $0x48] sm:$0xf] %vm791_vm0, %v3574_v47  ;;  %4996 = vst.msk [vmem:[#allocation3 + $0x34] sm:$0xf] %vm791_vm0, %v4932_v60  ;;  %v12882_v33 = vrot.slane %v10585_v7, 6  ;;  %v645_v9 = vadd.f32 %v10266_v8, %v644_v36 }
 0x253   : > { %v10806_v54 = vld [vmem:[#allocation2 + $0x44] sm:$0xf]  ;;  %v12883_v4 = vshll.u32 %v10661_v41, 16  ;;  %v4317_v51 = vrot.slane %v10796_v57, 5  ;;  %v10812_v26 = vld [vmem:[#allocation2 + $0x34] sm:$0xf]  ;;  %v3588_v41 = vor.u32 %v3587_v45, %v10721_v2 }
 0x254   : > { %v10804_v11 = vsel %vm8745_vm8, %v10659_v30, %v12882_v33  ;;  %1110 = vst.msk [vmem:[#allocation3 + $0xfc] sm:$0xf] %vm1100_vm10, %v1068_v63  ;;  %v1665_v3 = vld [vmem:[#allocation2 + $0x40] sm:$0xf]  ;;  %v12884_v28 = vmov %v12882_v33  ;;  %v1838_v30 = vrot.slane %v10769_v55, 6  ;;  %v10820_v37 = vrot.slane %v3601_v48, 5  ;;  %v10838_v8 = vpop.permute.xlu1 %3371 }
 0x255   : > { %v2087_v21 = vrot.slane %v12883_v4, 7  ;;  %v10817_v20 = vrot.slane %v12884_v28, 4  ;;  %1270 = vst.msk [vmem:[#allocation3 + $0xfc] sm:$0xf] %vm1260_vm11, %v10395_v44  ;;  %1714 = vrot.lane.b32.xlu1 %v1665_v3, %s8540_s21  ;;  %v4313_v7 = vrot.slane %v4311_v14, 4  ;;  %v4314_v47 = vrot.slane %v4271_v16, 5 }
 0x256   : > { %v10829_v60 = vld [vmem:[#allocation2 + $0x3c] sm:$0xf]  ;;  %v4934_v15 = vrot.slane %v10812_v26, 6  ;;  %1430 = vst.msk [vmem:[#allocation3 + $0xfc] sm:$0xf] %vm1420_vm12, %v10412_v62  ;;  %v2092_v44 = vshrl.u32 %v10806_v54, 16 }
 0x257   : > { %2707 = vst.msk [vmem:[#allocation3 + $0x78] sm:$0xf] %vm1260_vm11, %v2661_v35  ;;  %v1664_v2 = vld [vmem:[#allocation2 + $0x3c] sm:$0xf]  ;;  %v3599_v48 = vrot.slane %v3598_v1, 4  ;;  %v3589_v29 = vrot.slane %v3588_v41, 4  ;;  %v10846_v14 = vor.u32 %v2087_v21, %v2084_v52 }
 0x258   : > { %v4319_v22 = vrot.slane %v4317_v51, 4  ;;  %2863 = vst.msk [vmem:[#allocation3 + $0x78] sm:$0xf] %vm1420_vm12, %v10446_v17  ;;  %1712 = vrot.lane.b32.xlu0 %v1664_v2, %s8540_s21  ;;  %v12885_v19 = vrot.slane %v10544_v31, 7  ;;  %v680_v49 = vmax.f32 %v645_v9, 0.0  ;;  %v3605_v16 = vshrl.u32 %v10736_v42, 16  ;;  %v10862_v42 = vpop.permute.xlu0 %3365  ;;  %v1072_v41 = vpop.permute.xlu1 %1071 }
 0x259   : > { %v4894_v45 = vld [vmem:[#allocation2 + $0x38] sm:$0xf]  ;;  %v3530_v57 = vld [vmem:[#allocation2 + $0x34] sm:$0xf]  ;;  %v4315_v17 = vsel %vm8717_vm5, %v4313_v7, %v4314_v47  ;;  %v3604_v63 = vsel %vm8838_vm15, %v3599_v48, %v10820_v37  ;;  %v3594_v31 = vsel %vm8838_vm15, %v3589_v29, %v10759_v23  ;;  %2834 = vrot.lane.b32.xlu1 %v10680_v46, %s8542_s23  ;;  %v2095_v33 = vshll.u32 %v10806_v54, 16 }
 0x25a   : > { %v2795_v62 = vsel %vm8756_vm9, %v10668_v34, %v12885_v19  ;;  %v4320_v34 = vrot.slane %v10829_v60, 5  ;;  %v10858_v52 = vld [vmem:[#allocation2 + $0x38] sm:$0xf]  ;;  %v7845_v4 = vpack.c.bf16 %v680_v49, %v680_v49  ;;  %4375 = vst.msk [vmem:[#allocation3 + $0x68] sm:$0xf] %vm791_vm0, %v4315_v17  ;;  %v4316_v21 = vrot.slane %v4314_v47, 4 }
 0x25b   : > { %3737 = vst.msk [vmem:[#allocation3 + $0x9c] sm:$0xf] %vm791_vm0, %v3604_v63  ;;  %3736 = vst.msk [vmem:[#allocation3 + $0x80] sm:$0xf] %vm791_vm0, %v3594_v31  ;;  %v4936_v23 = vrot.slane %v4934_v15, 4  ;;  %v4937_v3 = vrot.slane %v4894_v45, 6 }
 0x25c   : > { %v10868_v1 = vld [vmem:[#allocation2 + $0x40] sm:$0xf]  ;;  %v4321_v26 = vsel %vm8717_vm5, %v4319_v22, %v4320_v34  ;;  %v4933_v46 = vrot.slane %v4931_v10, 4  ;;  %v3611_v28 = vshll.u32 %v3530_v57, 16  ;;  %v4895_v36 = vld [vmem:[#allocation2 + $0x3c] sm:$0xf]  ;;  %2832 = vrot.lane.b32.xlu0 %v2795_v62, %s8542_s23  ;;  %v4318_v35 = vsel %vm8717_vm5, %v4316_v21, %v4317_v51  ;;  %v1864_v22 = vpop.permute.xlu0 %1863  ;;  %v2667_v31 = vpop.permute.xlu1 %2666 }
 0x25d   : > { %817 = vst.msk [vmem:[#allocation2 + $0x64] sm:$0xf] %vm791_vm0, %v7845_v4  ;;  %4377 = vst.msk [vmem:[#allocation3 + $0xa0] sm:$0xf] %vm791_vm0, %v4321_v26  ;;  %v3615_v9 = vshrl.u32 %v3530_v57, 16  ;;  %v3621_v7 = vshll.u32 %v10858_v52, 16  ;;  %v4938_v10 = vsel %vm8745_vm8, %v4936_v23, %v4937_v3 }
 0x25e   : > { %v3625_v47 = vshrl.u32 %v10858_v52, 16  ;;  %v10881_v60 = vld [vmem:[#allocation2 + $0x40] sm:$0xf]  ;;  %1112 = vst.msk [vmem:[#allocation3 + $0x134] sm:$0xf] %vm1100_vm10, %v1072_v41  ;;  %v4935_v2 = vsel %vm8745_vm8, %v4933_v46, %v4934_v15  ;;  %v3613_v48 = vrot.slane %v3611_v28, 5 }
 0x25f   : > { %v3434_v53 = vld [vmem:[#allocation2 + $0x4c] sm:$0xf]  ;;  %4376 = vst.msk [vmem:[#allocation3 + $0x84] sm:$0xf] %vm791_vm0, %v4318_v35  ;;  %v3607_v51 = vrot.slane %v3605_v16, 4  ;;  %v3617_v19 = vrot.slane %v3615_v9, 4 }
 0x260   : > { %v3532_v29 = vld [vmem:[#allocation2 + $0x3c] sm:$0xf]  ;;  %1272 = vst.msk [vmem:[#allocation3 + $0x134] sm:$0xf] %vm1260_vm11, %v10663_v50  ;;  %3481 = vrot.lane.b32.xlu1 %v3434_v53, %s8542_s23  ;;  %v3623_v62 = vrot.slane %v3621_v7, 5  ;;  %v4323_v49 = vrot.slane %v10868_v1, 5 }
 0x261   : > { %4998 = vst.msk [vmem:[#allocation3 + $0x6c] sm:$0xf] %vm791_vm0, %v4938_v10  ;;  %4997 = vst.msk [vmem:[#allocation3 + $0x50] sm:$0xf] %vm791_vm0, %v4935_v2  ;;  %v4322_v45 = vrot.slane %v4320_v34, 4  ;;  %v3608_v50 = vor.u32 %v3607_v51, %v10820_v37  ;;  %v4940_v16 = vrot.slane %v4895_v36, 6  ;;  %v3618_v52 = vor.u32 %v3617_v19, %v3613_v48 }
 0x262   : > { %v3533_v57 = vld [vmem:[#allocation2 + $0x40] sm:$0xf]  ;;  %1432 = vst.msk [vmem:[#allocation3 + $0x134] sm:$0xf] %vm1420_vm12, %v10697_v56  ;;  %v3433_v15 = vld [vmem:[#allocation2 + $0x48] sm:$0xf] }
 0x263   : > { %1904 = vst.msk [vmem:[#allocation3 + $0x11c] sm:$0xf] %vm1260_vm11, %v1864_v22  ;;  %v4943_v17 = vrot.slane %v10881_v60, 6  ;;  %v4939_v63 = vrot.slane %v4937_v3, 4  ;;  %3479 = vrot.lane.b32.xlu0 %v3433_v15, %s8542_s23  ;;  %v4324_v34 = vsel %vm8717_vm5, %v4322_v45, %v4323_v49  ;;  %v3631_v4 = vshll.u32 %v3532_v29, 16  ;;  %v3206_v3 = vpop.permute.xlu0 %3205 }
 0x264   : > { %v3635_v56 = vshrl.u32 %v3532_v29, 16  ;;  %2710 = vst.msk [vmem:[#allocation3 + $0xcc] sm:$0xf] %vm1260_vm11, %v2667_v31  ;;  %v3609_v21 = vrot.slane %v3608_v50, 4  ;;  %v4942_v37 = vrot.slane %v4940_v16, 4  ;;  %v3641_v26 = vshll.u32 %v3533_v57, 16  ;;  %1239 = vrot.lane.b32.xlu1 %v10654_v38, %s8541_s22 }
 0x265   : > { %4378 = vst.msk [vmem:[#allocation3 + $0xbc] sm:$0xf] %vm791_vm0, %v4324_v34  ;;  %v4941_v23 = vsel %vm8745_vm8, %v4939_v63, %v4940_v16  ;;  %v3013_v46 = vld [vmem:[#allocation2 + $0x50] sm:$0xf]  ;;  %v3619_v28 = vrot.slane %v3618_v52, 4  ;;  %v3633_v36 = vrot.slane %v3631_v4, 5 }
 0x266   : > { %2866 = vst.msk [vmem:[#allocation3 + $0xcc] sm:$0xf] %vm1420_vm12, %v10603_v24  ;;  %v3637_v41 = vrot.slane %v3635_v56, 4  ;;  %v3627_v35 = vrot.slane %v3625_v47, 4  ;;  %v10915_v9 = vld [vmem:[#allocation2 + $0x44] sm:$0xf]  ;;  %v3614_v24 = vsel %vm8838_vm15, %v3609_v21, %v3613_v48  ;;  %v4944_v38 = vsel %vm8745_vm8, %v4942_v37, %v4943_v17  ;;  %v10929_v47 = vpop.permute.xlu1 %3367 }
 0x267   : > { %4999 = vst.msk [vmem:[#allocation3 + $0x88] sm:$0xf] %vm791_vm0, %v4941_v23  ;;  %v12886_v7 = vrot.slane %v10438_v0, 7  ;;  %v10925_v10 = vrot.slane %v3641_v26, 5  ;;  %1237 = vrot.lane.b32.xlu0 %v10790_v27, %s8541_s22  ;;  %v10933_v0 = vld [vmem:[#allocation2 + $0x4c] sm:$0xf]  ;;  %v3624_v48 = vsel %vm8838_vm15, %v3619_v28, %v3623_v62 }
 0x268   : > { %3252 = vst.msk [vmem:[#allocation3 + $0x7c] sm:$0xf] %vm1100_vm10, %v3206_v3  ;;  %v2261_v2 = vrot.slane %v10915_v9, 7  ;;  %v3638_v51 = vor.u32 %v3637_v41, %v3633_v36  ;;  %v3628_v29 = vor.u32 %v3627_v35, %v3623_v62  ;;  %v2094_v27 = vrot.slane %v2092_v44, 6  ;;  %v2127_v62 = vpop.permute.xlu0 %2126  ;;  %v12889_v16 = vld [vmem:[#allocation15_spill] sm:$0xff] }
 0x269   : > { %v2260_v53 = vrot.slane %v12886_v7, 4  ;;  %3408 = vst.msk [vmem:[#allocation3 + $0x7c] sm:$0xf] %vm1260_vm11, %v10684_v5  ;;  %v1839_v5 = vsel %vm8745_vm8, %v10817_v20, %v1838_v30  ;;  %v2097_v22 = vrot.slane %v2095_v33, 7  ;;  %v3169_v19 = vshrl.u32 %v3013_v46, 16 }
 0x26a   : > { %3738 = vst.msk [vmem:[#allocation3 + $0xb8] sm:$0xf] %vm791_vm0, %v3614_v24  ;;  %5000 = vst.msk [vmem:[#allocation3 + $0xa4] sm:$0xf] %vm791_vm0, %v4944_v38  ;;  %1873 = vrot.lane.b32.xlu1 %v1839_v5, %s8541_s22  ;;  %v3172_v45 = vshll.u32 %v3013_v46, 16  ;;  %v3639_v20 = vrot.slane %v3638_v51, 4  ;;  %v1866_v4 = vpop.permute.xlu1 %1865 }
 0x26b   : > { %3510 = vst.msk [vmem:[#allocation3 + $0x7c] sm:$0xf] %vm1420_vm12, %v9839_v32  ;;  %v2471_v32 = vld [vmem:[#allocation2 + $0x4c] sm:$0xf]  ;;  %v2262_v57 = vsel %vm8756_vm9, %v2260_v53, %v2261_v2  ;;  %v3629_v15 = vrot.slane %v3628_v29, 4  ;;  %v12887_v54 = vrot.slane %v10627_v58, 7  ;;  %1871 = vrot.lane.b32.xlu0 %v10804_v11, %s8541_s22  ;;  %v10984_v23 = vor.u32 %v2097_v22, %v2094_v27 }
 0x26c   : > { %3739 = vst.msk [vmem:[#allocation3 + $0xd4] sm:$0xf] %vm791_vm0, %v3624_v48  ;;  %v12888_v33 = vrot.slane %v10599_v6, 7  ;;  %v2080_v63 = vrot.slane %v12889_v16, 4  ;;  %v2380_v31 = vrot.slane %v10933_v0, 6  ;;  %v3171_v26 = vrot.slane %v3169_v19, 5  ;;  %v2409_v28 = vpop.permute.xlu0 %2408 }
 0x26d   : > { %2169 = vst.msk [vmem:[#allocation3 + $0xe4] sm:$0xf] %vm1420_vm12, %v2127_v62  ;;  %v1365_v44 = vsel %vm8756_vm9, %v10751_v61, %v12887_v54  ;;  %v2891_v52 = vld [vmem:[#allocation2 + $0x50] sm:$0xf]  ;;  %v10971_v34 = vld [vmem:[#allocation2 + $0x54] sm:$0xf]  ;;  %v3634_v37 = vsel %vm8838_vm15, %v3629_v15, %v3633_v36 }
 0x26e   : > { %v1362_v50 = vsel %vm8756_vm9, %v10688_v43, %v12888_v33  ;;  %2298 = vst.msk [vmem:[#allocation3 + $0x1ac] sm:$0xf] %vm791_vm0, %v2262_v57  ;;  %v2090_v61 = vrot.slane %v10846_v14, 4  ;;  %v10976_v6 = vld [vmem:[#allocation2 + $0x50] sm:$0xf]  ;;  %v2956_v21 = vrot.slane %v2891_v52, 5  ;;  %v3644_v43 = vsel %vm8838_vm15, %v3639_v20, %v10925_v10  ;;  %1399 = vrot.lane.b32.xlu1 %v1365_v44, %s8542_s23  ;;  %v2407_v29 = vpop.permute.xlu1 %2406 }
 0x26f   : > { %v3014_v56 = vld [vmem:[#allocation2 + $0x54] sm:$0xf]  ;;  %1905 = vst.msk [vmem:[#allocation3 + $0x138] sm:$0xf] %vm1260_vm11, %v1866_v4  ;;  %v10986_v3 = vld [vmem:[#allocation2 + $0x50] sm:$0xf]  ;;  %1397 = vrot.lane.b32.xlu0 %v1362_v50, %s8542_s23  ;;  %v2089_v50 = vsel %vm8825_vm14, %v2080_v63, %v10846_v14 }
 0x270   : > { %v2624_v11 = vshrl.u32 %v2471_v32, 16  ;;  %v2627_v46 = vshll.u32 %v2471_v32, 16  ;;  %3741 = vst.msk [vmem:[#allocation3 + $0x10c] sm:$0xf] %vm791_vm0, %v3644_v43  ;;  %3740 = vst.msk [vmem:[#allocation3 + $0xf0] sm:$0xf] %vm791_vm0, %v3634_v37  ;;  %v2099_v27 = vsel %vm8825_vm14, %v2090_v61, %v10984_v23  ;;  %v3210_v33 = vpop.permute.xlu0 %3209 }
 0x271   : > { %v3174_v41 = vrot.slane %v3172_v45, 6  ;;  %v2958_v35 = vrot.slane %v2956_v21, 4  ;;  %v2959_v36 = vrot.slane %v10971_v34, 5  ;;  %v12890_v7 = vrot.slane %v10520_v25, 5  ;;  %2449 = vst.msk [vmem:[#allocation3 + $0x120] sm:$0xf] %vm1100_vm10, %v2409_v28 }
 0x272   : > { %v2382_v24 = vrot.slane %v2380_v31, 4  ;;  %v2383_v38 = vrot.slane %v10976_v6, 6  ;;  %v3179_v48 = vshrl.u32 %v3014_v56, 16  ;;  %v3182_v51 = vshll.u32 %v3014_v56, 16  ;;  %v5449_v22 = vld [vmem:[#allocation3 + $0x78] sm:$0xff]  ;;  %2140 = vrot.lane.b32.xlu1 %v2099_v27, %s8542_s23 }
 0x273   : > { %v2955_v53 = vrot.slane %v12890_v7, 4  ;;  %v5453_v19 = vld [vmem:[#allocation3 + $0x94] sm:$0xff]  ;;  %v2634_v62 = vshrl.u32 %v10986_v3, 16  ;;  %v2960_v45 = vsel %vm8717_vm5, %v2958_v35, %v2959_v36  ;;  %2448 = vst.msk [vmem:[#allocation3 + $0x104] sm:$0xf] %vm1100_vm10, %v2407_v29  ;;  %v2626_v20 = vrot.slane %v2624_v11, 6  ;;  %v3216_v35 = vpop.permute.xlu1 %3215  ;;  %2138 = vrot.lane.b32.xlu0 %v2089_v50, %s8542_s23 }
 0x274   : > { %v8372_v25 = vld [vmem:[#allocation3 + $0x7c] ss:$28 sps:$4 sm:$0xff]   ;;  %v7628_v57 = vcombine.low %v5449_v22, %v5453_v19  ;;  %v2629_v15 = vrot.slane %v2627_v46, 7  ;;  %v2637_v54 = vshll.u32 %v10986_v3, 16  ;;  %2996 = vst.msk [vmem:[#allocation3 + $0x1b0] sm:$0xf] %vm791_vm0, %v2960_v45  ;;  %v3175_v43 = vor.u32 %v3174_v41, %v3171_v26  ;;  %v2405_v19 = vpop.permute.xlu0 %2404 }
 0x275   : > { %v2957_v32 = vsel %vm8717_vm5, %v2955_v53, %v2956_v21  ;;  %v1455_v44 = vld [vmem:[#allocation2 + $0x44] sm:$0xf]  ;;  %6423 = vmatprep.mubr.bf16.mxu0 %v8372_v25  ;;  %v5464_v16 = vld [vmem:[#allocation3 + $0xe0] sm:$0xff]  ;;  %3254 = vst.msk [vmem:[#allocation3 + $0xb4] sm:$0xf] %vm1100_vm10, %v3210_v33  ;;  %v2384_v3 = vsel %vm8745_vm8, %v2382_v24, %v2383_v38  ;;  %v3181_v46 = vrot.slane %v3179_v48, 5 }
 0x276   : > { %2995 = vst.msk [vmem:[#allocation3 + $0x194] sm:$0xf] %vm791_vm0, %v2957_v32  ;;  %v5468_v52 = vld [vmem:[#allocation3 + $0xfc] sm:$0xff]  ;;  %v12892_v61 = vld [vmem:[#allocation14_spill] sm:$0xff]  ;;  %v1609_v37 = vshrl.u32 %v1455_v44, 16  ;;  %6424 = vmatmul.mubr.bf16.gmra.mxu0 %v7628_v57  ;;  %v3184_v28 = vrot.slane %v3182_v51, 6  ;;  %v2630_v24 = vor.u32 %v2629_v15, %v2626_v20  ;;  %2418 = vrot.lane.b32.xlu1 %v2384_v3, %s8540_s21 }
 0x277   : > { %v8374_v4 = vld [vmem:[#allocation3 + $0xe4] ss:$28 sps:$4 sm:$0xff]   ;;  %v12893_v56 = vrot.slane %v12892_v61, 6  ;;  %v7640_v11 = vcombine.low %v5464_v16, %v5468_v52  ;;  %v836_v14 = vld [vmem:[#allocation2 + $0x40] sm:$0xf]  ;;  %v3177_v26 = vrot.slane %v3175_v43, 4  ;;  %v11050_v15 = vpop.permute.xlu1 %2826 }
 0x278   : > { %v2195_v63 = vld [vmem:[#allocation2 + $0x48] sm:$0x7]  ;;  %3410 = vst.msk [vmem:[#allocation3 + $0xb4] sm:$0xf] %vm1260_vm11, %v10862_v42  ;;  %6335 = vmatprep.mubr.bf16.mxu1 %v8374_v4  ;;  %v2636_v41 = vrot.slane %v2634_v62, 6  ;;  %v1611_v7 = vrot.slane %v1609_v37, 7  ;;  %v11063_v52 = vpop.permute.xlu0 %2824 }
 0x279   : > { %v2379_v21 = vrot.slane %v12893_v56, 4  ;;  %v1612_v53 = vshll.u32 %v1455_v44, 16  ;;  %853 = vst.msk [vmem:[#allocation3 + $0x1c0] sm:$0xf] %vm791_vm0, %v836_v14  ;;  %v12894_v29 = vld [vmem:[#allocation22_spill] sm:$0xff]  ;;  %6336 = vmatmul.mubr.bf16.gmra.mxu1 %v7640_v11  ;;  %v2639_v48 = vrot.slane %v2637_v54, 7 }
 0x27a   : > { %3512 = vst.msk [vmem:[#allocation3 + $0xb4] sm:$0xf] %vm1420_vm12, %v12894_v29  ;;  %v2263_v42 = vrot.slane %v2261_v2, 4  ;;  %v2264_v51 = vrot.slane %v2195_v63, 7  ;;  %v12895_v27 = vld [vmem:[#allocation18_spill] sm:$0xff]  ;;  %v12896_v25 = vld [vmem:[#allocation11_spill] sm:$0xff]  ;;  %v11045_v2 = vor.u32 %v3184_v28, %v3181_v46 }
 0x27b   : > { %3257 = vst.msk [vmem:[#allocation3 + $0x108] sm:$0xf] %vm1100_vm10, %v3216_v35  ;;  %v1039_v22 = vshrl.u32 %v12895_v27, 16  ;;  %v1607_v62 = vrot.slane %v12896_v25, 4  ;;  %v1614_v45 = vor.u32 %v1612_v53, %v1611_v7  ;;  %v12897_v32 = vld [vmem:[#allocation13_spill] sm:$0xff]  ;;  %v2381_v9 = vsel %vm8745_vm8, %v2379_v21, %v2380_v31  ;;  %v12898_v57 = vld [vmem:[#allocation16_spill] sm:$0xff]  ;;  %v3212_v11 = vpop.permute.xlu1 %3211 }
 0x27c   : > { %3413 = vst.msk [vmem:[#allocation3 + $0x108] sm:$0xf] %vm1260_vm11, %v10838_v8  ;;  %v3167_v8 = vrot.slane %v12898_v57, 4  ;;  %v2265_v20 = vsel %vm8756_vm9, %v2263_v42, %v2264_v51  ;;  %2416 = vrot.lane.b32.xlu0 %v2381_v9, %s8540_s21  ;;  %v3280_v54 = vld [vmem:[#allocation2 + $0x50] sm:$0xf]  ;;  %v3186_v31 = vsel %vm9089_vm7, %v3177_v26, %v11045_v2  ;;  %v2632_v50 = vrot.slane %v2630_v24, 4  ;;  %v7902_v42 = vpop.f32.mrf.mxu1 }
 0x27d   : > { %3515 = vst.msk [vmem:[#allocation3 + $0x108] sm:$0xf] %vm1420_vm12, %v12897_v32  ;;  %v1615_v33 = vsel %vm9025_vm6, %v1607_v62, %v1614_v45  ;;  %v11059_v16 = vor.u32 %v2639_v48, %v2636_v41  ;;  %3227 = vrot.lane.b32.xlu1 %v3186_v31, %s8540_s21  ;;  %v12901_v61 = vld [vmem:[#allocation21_spill] sm:$0xff]  ;;  %v11068_v21 = vld [vmem:[#allocation2 + $0x54] sm:$0xf]  ;;  %v3345_v37 = vrot.slane %v3280_v54, 6 }
 0x27e   : > { %2447 = vst.msk [vmem:[#allocation3 + $0xe8] sm:$0xf] %vm1100_vm10, %v2405_v19  ;;  %v3176_v4 = vsel %vm9089_vm7, %v3167_v8, %v3175_v43  ;;  %v2622_v56 = vrot.slane %v12901_v61, 4  ;;  %v1041_v3 = vrot.slane %v1039_v22, 4  ;;  %v871_v46 = vld [vmem:[#allocation2 + $0x44] sm:$0x1]  ;;  %v2131_v43 = vpop.permute.xlu0 %2130  ;;  %v7903_v22 = vpop.f32.mrf.mxu1 }
 0x27f   : > { %2299 = vst.msk [vmem:[#allocation3 + $0x1c8] sm:$0xf] %vm791_vm0, %v2265_v20  ;;  %1649 = vst.msk [vmem:[#allocation3 + $0x1c4] sm:$0xf] %vm791_vm0, %v1615_v33  ;;  %v2641_v28 = vsel %vm8825_vm14, %v2632_v50, %v11059_v16  ;;  %v3347_v14 = vrot.slane %v3345_v37, 4  ;;  %v3348_v63 = vrot.slane %v11068_v21, 6  ;;  %v2133_v48 = vpop.permute.xlu1 %2132  ;;  %v11101_v45 = vadd.f32 %v7903_v22, %v7902_v42 }
 0x280   : > { %3225 = vrot.lane.b32.xlu0 %v3176_v4, %s8540_s21  ;;  %3255 = vst.msk [vmem:[#allocation3 + $0xd0] sm:$0xf] %vm1100_vm10, %v3212_v11  ;;  %v2735_v35 = vld [vmem:[#allocation2 + $0x4c] sm:$0xf]  ;;  %v2631_v26 = vsel %vm8825_vm14, %v2622_v56, %v2630_v24  ;;  %v12902_v41 = vld [vmem:[#allocation17_spill] sm:$0xff]  ;;  %v1042_v29 = vor.u32 %v1041_v3, %v10623_v39  ;;  %v7905_v9 = vpop.f32.mrf.mxu1  ;;  %v12904_v61 = vld [vmem:[#allocation20_spill] sm:$0xff] }
 0x281   : > { %3411 = vst.msk [vmem:[#allocation3 + $0xd0] sm:$0xf] %vm1260_vm11, %v10929_v47  ;;  %2682 = vrot.lane.b32.xlu1 %v2641_v28, %s8541_s22  ;;  %v12903_v7 = vrot.slane %v12902_v41, 6  ;;  %v1045_v47 = vshll.u32 %v871_v46, 16  ;;  %v2800_v51 = vrot.slane %v2735_v35, 7  ;;  %v12905_v56 = vrot.slane %v12904_v61, 7 }
 0x282   : > { %3513 = vst.msk [vmem:[#allocation3 + $0xd0] sm:$0xf] %vm1420_vm12, %v10715_v12  ;;  %2171 = vst.msk [vmem:[#allocation3 + $0x11c] sm:$0xf] %vm1420_vm12, %v2131_v43  ;;  %v3349_v12 = vsel %vm8745_vm8, %v3347_v14, %v3348_v63  ;;  %v11094_v24 = vpop.permute.xlu0 %3369  ;;  %v11096_v27 = vld [vmem:[#allocation2 + $0x50] sm:$0xf]  ;;  %v7906_v4 = vpop.f32.mrf.mxu1 }
 0x283   : > { %v3344_v53 = vrot.slane %v12903_v7, 4  ;;  %2172 = vst.msk [vmem:[#allocation3 + $0x138] sm:$0xf] %vm1420_vm12, %v2133_v48  ;;  %v1043_v19 = vrot.slane %v1042_v29, 4  ;;  %v1047_v25 = vrot.slane %v1045_v47, 5  ;;  %v2411_v62 = vpop.permute.xlu1 %2410  ;;  %v2802_v57 = vrot.slane %v2800_v51, 4 }
 0x284   : > { %2680 = vrot.lane.b32.xlu0 %v2631_v26, %s8541_s22  ;;  %2450 = vst.msk [vmem:[#allocation3 + $0x13c] sm:$0xf] %vm1100_vm10, %v2411_v62  ;;  %v1666_v32 = vld [vmem:[#allocation2 + $0x44] sm:$0xf]  ;;  %v2803_v8 = vrot.slane %v11096_v27, 7  ;;  %v11112_v46 = vadd.f32 %v7906_v4, %v7905_v9  ;;  %v1840_v48 = vrot.slane %v1838_v30, 4 }
 0x285   : > { %3383 = vrot.lane.b32.xlu1 %v3349_v12, %s8541_s22  ;;  %v3346_v39 = vsel %vm8745_vm8, %v3344_v53, %v3345_v37  ;;  %v1928_v20 = vld [vmem:[#allocation2 + $0x48] sm:$0x7]  ;;  %v8378_v31 = vld [vmem:[#allocation3 + $0xb0] ss:$28 sps:$4 sm:$0xff]   ;;  %v1048_v50 = vsel %vm8838_vm15, %v1043_v19, %v1047_v25  ;;  %v2799_v37 = vrot.slane %v12905_v56, 4  ;;  %v2961_v19 = vrot.slane %v2959_v36, 4 }
 0x286   : > { %v2673_v54 = vpop.permute.xlu0 %2672  ;;  %v1769_v3 = vld [vmem:[#allocation2 + $0x48] sm:$0x3]  ;;  %v2102_v35 = vshrl.u32 %v1928_v20, 16  ;;  %v2804_v26 = vsel %vm8756_vm9, %v2802_v57, %v2803_v8  ;;  %v2105_v7 = vshll.u32 %v1928_v20, 16  ;;  %v3015_v29 = vld [vmem:[#allocation2 + $0x58] sm:$0x3] }
 0x287   : > { %2713 = vst.msk [vmem:[#allocation3 + $0x120] sm:$0xf] %vm1260_vm11, %v2673_v54  ;;  %v2671_v11 = vpop.permute.xlu1 %2670  ;;  %v2801_v47 = vsel %vm8756_vm9, %v2799_v37, %v2800_v51  ;;  %v1841_v12 = vrot.slane %v1769_v3, 6  ;;  %v2893_v22 = vld [vmem:[#allocation2 + $0x58] sm:$0x1]  ;;  %v3192_v51 = vshll.u32 %v3015_v29, 16 }
 0x288   : > { %3381 = vrot.lane.b32.xlu0 %v3346_v39, %s8541_s22  ;;  %2712 = vst.msk [vmem:[#allocation3 + $0x104] sm:$0xf] %vm1260_vm11, %v2671_v11  ;;  %v1135_v39 = vld [vmem:[#allocation2 + $0x44] sm:$0x1]  ;;  %v3436_v25 = vld [vmem:[#allocation2 + $0x54] sm:$0xf] }
 0x289   : > { %1716 = vrot.lane.b32.xlu1 %v1666_v32, %s8540_s21  ;;  %v8376_v33 = vld [vmem:[#allocation3 + $0xb4] ss:$28 sps:$4 sm:$0xff]   ;;  %v5472_v28 = vld [vmem:[#allocation3 + $0x118] sm:$0xff]  ;;  %2868 = vst.msk [vmem:[#allocation3 + $0x104] sm:$0xf] %vm1420_vm12, %v11050_v15  ;;  %v2104_v15 = vrot.slane %v2102_v35, 6 }
 0x28a   : > { %6431 = vmatprep.mubr.bf16.mxu0 %v8376_v33  ;;  %v5476_v14 = vld [vmem:[#allocation3 + $0x134] sm:$0xff]  ;;  %v1074_v53 = vpop.permute.xlu0 %1073  ;;  %v2107_v62 = vrot.slane %v2105_v7, 7  ;;  %v3189_v32 = vshrl.u32 %v3015_v29, 16  ;;  %v2962_v9 = vrot.slane %v2893_v22, 5  ;;  %v3435_v30 = vld [vmem:[#allocation2 + $0x50] sm:$0xf] }
 0x28b   : > { %v8379_v43 = vld [vmem:[#allocation3 + $0x11c] ss:$28 sps:$4 sm:$0xff]   ;;  %6432 = vmatmul.mubr.bf16.gmra.mxu0 %v8378_v31  ;;  %v7647_v41 = vcombine.low %v5472_v28, %v5476_v14  ;;  %1113 = vst.msk [vmem:[#allocation3 + $0x150] sm:$0xf] %vm1100_vm10, %v1074_v53  ;;  %v1076_v42 = vpop.permute.xlu1 %1075  ;;  %v1207_v33 = vrot.slane %v1135_v39, 5  ;;  %v2100_v61 = vrot.slane %v10984_v23, 4 }
 0x28c   : > { %1081 = vrot.lane.b32.xlu0 %v1048_v50, %s8540_s21  ;;  %6343 = vmatprep.mubr.bf16.mxu1 %v8379_v43  ;;  %1114 = vst.msk [vmem:[#allocation3 + $0x16c] sm:$0xf] %vm1100_vm10, %v1076_v42  ;;  %v12906_v57 = vld [vmem:[#allocation19_spill] sm:$0xff]  ;;  %v1295_v31 = vld [vmem:[#allocation2 + $0x44] sm:$0x7]  ;;  %v2963_v34 = vsel %vm8717_vm5, %v2961_v19, %v2962_v9  ;;  %v1842_v50 = vsel %vm8745_vm8, %v1840_v48, %v1841_v12  ;;  %v3191_v37 = vrot.slane %v3189_v32, 5 }
 0x28d   : > { %2838 = vrot.lane.b32.xlu1 %v2804_v26, %s8542_s23  ;;  %6344 = vmatmul.mubr.bf16.gmra.mxu1 %v7647_v41  ;;  %v12907_v20 = vrot.slane %v12906_v57, 5  ;;  %v2473_v4 = vld [vmem:[#allocation2 + $0x54] sm:$0x7]  ;;  %2997 = vst.msk [vmem:[#allocation3 + $0x1cc] sm:$0xf] %vm791_vm0, %v2963_v34  ;;  %v2108_v56 = vor.u32 %v2107_v62, %v2104_v15  ;;  %v3194_v3 = vrot.slane %v3192_v51, 6 }
 0x28e   : > { %v2669_v55 = vpop.permute.xlu0 %2668  ;;  %v1367_v14 = vrot.slane %v1295_v31, 7  ;;  %v2644_v35 = vshrl.u32 %v2473_v4, 16  ;;  %v2647_v26 = vshll.u32 %v2473_v4, 16  ;;  %v2317_v7 = vld [vmem:[#allocation2 + $0x54] sm:$0x3]  ;;  %v3187_v53 = vrot.slane %v11045_v2, 4 }
 0x28f   : > { %2711 = vst.msk [vmem:[#allocation3 + $0xe8] sm:$0xf] %vm1260_vm11, %v2669_v55  ;;  %v1206_v54 = vrot.slane %v12907_v20, 4  ;;  %v1711_v36 = vpop.permute.xlu1 %1710  ;;  %v2109_v23 = vsel %vm8825_vm14, %v2100_v61, %v2108_v56  ;;  %v3195_v29 = vor.u32 %v3194_v3, %v3191_v37  ;;  %v3282_v48 = vld [vmem:[#allocation2 + $0x58] sm:$0x3]  ;;  %v2385_v12 = vrot.slane %v2383_v38, 4 }
 0x290   : > { %2836 = vrot.lane.b32.xlu0 %v2801_v47, %s8542_s23  ;;  %2867 = vst.msk [vmem:[#allocation3 + $0xe8] sm:$0xf] %vm1420_vm12, %v11063_v52  ;;  %v12908_v52 = vrot.slane %v10627_v58, 7  ;;  %v2386_v42 = vrot.slane %v2317_v7, 6  ;;  %v2646_v39 = vrot.slane %v2644_v35, 6  ;;  %v2649_v15 = vrot.slane %v2647_v26, 7 }
 0x291   : > { %3485 = vrot.lane.b32.xlu1 %v3436_v25, %s8542_s23  ;;  %1748 = vst.msk [vmem:[#allocation3 + $0x170] sm:$0xf] %vm1100_vm10, %v1711_v36  ;;  %v1208_v43 = vsel %vm8717_vm5, %v1206_v54, %v1207_v33  ;;  %v12909_v22 = vld [vmem:[#allocation12_spill] sm:$0xff]  ;;  %v3196_v19 = vsel %vm9089_vm7, %v3187_v53, %v3195_v29  ;;  %v3350_v25 = vrot.slane %v3348_v63, 4  ;;  %v3351_v6 = vrot.slane %v3282_v48, 6  ;;  %v8404_v53 = vld [vmem:[%s12687_s3 + $0x128] sm:$0xff]  }
 0x292   : > { %v3374_v11 = vpop.permute.xlu0 %3373  ;;  %v1366_v28 = vrot.slane %v12908_v52, 4  ;;  %v11170_v38 = vld [vmem:[#allocation2 + $0x1c] sm:$0xf]  ;;  %v2387_v32 = vsel %vm8745_vm8, %v2385_v12, %v2386_v42  ;;  %v2642_v0 = vrot.slane %v11059_v16, 4  ;;  %v2650_v51 = vor.u32 %v2649_v15, %v2646_v39  ;;  %v2737_v9 = vld [vmem:[#allocation2 + $0x54] sm:$0x7] }
 0x293   : > { %v2675_v41 = vpop.permute.xlu1 %2674  ;;  %v8397_v62 = vld [vmem:[%s12687_s3 + $0x178] sm:$0xff]   ;;  %v11185_v55 = vld [vmem:[#allocation2 + $0x20] sm:$0xf]  ;;  %v3352_v16 = vsel %vm8745_vm8, %v3350_v25, %v3351_v6  ;;  %v11191_v57 = vld [vmem:[#allocation2 + $0x28] sm:$0xf]  ;;  %v2805_v31 = vrot.slane %v2803_v8, 4 }
 0x294   : > { %3483 = vrot.lane.b32.xlu0 %v3435_v30, %s8542_s23  ;;  %2714 = vst.msk [vmem:[#allocation3 + $0x13c] sm:$0xf] %vm1260_vm11, %v2675_v41  ;;  %v1368_v47 = vsel %vm8756_vm9, %v1366_v28, %v1367_v14  ;;  %8026 = vmatprep.subr.bf16.mxu1 %v8397_v62  ;;  %v8398_v21 = vld [vmem:[%s12687_s3 + $0x138] sm:$0xff]   ;;  %v3787_v30 = vrot.slane %v11170_v38, 5  ;;  %v2651_v33 = vsel %vm8825_vm14, %v2642_v0, %v2650_v51  ;;  %v2806_v34 = vrot.slane %v2737_v9, 7  ;;  %v8400_v4 = vld [vmem:[%s12687_s3 + $0x130] sm:$0xff]  }
 0x295   : > { %1875 = vrot.lane.b32.xlu1 %v1842_v50, %s8541_s22  ;;  %8027 = vmatpush3.bf16.msra.mxu1 %v8398_v21  ;;  %v3749_v54 = vld [vmem:[#allocation2 + $0x18] sm:$0xe]  ;;  %v3790_v36 = vrot.slane %v11185_v55, 5  ;;  %v8399_v50 = vld [vmem:[%s12687_s3 + $0x170] sm:$0xff]   ;;  %v4427_v27 = vrot.slane %v11191_v57, 7  ;;  %v8406_v0 = vld [vmem:[%s12687_s3 + $0x120] sm:$0xff]  }
 0x296   : > { %v3214_v58 = vpop.permute.xlu0 %3213  ;;  %v5469_v37 = vld [vmem:[#allocation3 + $0x104] sm:$0xff]  ;;  %v11210_v28 = vld [vmem:[#allocation2 + $0x2c] sm:$0xf]  ;;  %8028 = vmatprep.subr.bf16.mxu1 %v8399_v50  ;;  %v4008_v26 = vld [vmem:[#allocation2 + $0x28] sm:$0xf]  ;;  %v2807_v41 = vsel %vm8756_vm9, %v2805_v31, %v2806_v34  ;;  %v7605_v7 = vrot.slane %v3749_v54, 9 }
 0x297   : > { %3256 = vst.msk [vmem:[#allocation3 + $0xec] sm:$0xf] %vm1100_vm10, %v3214_v58  ;;  %v3376_v2 = vpop.permute.xlu1 %3375  ;;  %v3437_v8 = vld [vmem:[#allocation2 + $0x58] sm:$0xf]  ;;  %v11215_v35 = vld [vmem:[#allocation2 + $0x2c] sm:$0xf] }
 0x298   : > { %1241 = vrot.lane.b32.xlu0 %v1208_v43, %s8541_s22  ;;  %3412 = vst.msk [vmem:[#allocation3 + $0xec] sm:$0xf] %vm1260_vm11, %v11094_v24  ;;  %v11213_v43 = vld [vmem:[#allocation2 + $0x28] sm:$0xf]  ;;  %v4430_v48 = vrot.slane %v11210_v28, 7  ;;  %v4578_v15 = vshrl.u32 %v11215_v35, 16  ;;  %v3788_v6 = vsel %vm8717_vm5, %v7605_v7, %v3787_v30 }
 0x299   : > { %2142 = vrot.lane.b32.xlu1 %v2109_v23, %s8542_s23  ;;  %3514 = vst.msk [vmem:[#allocation3 + $0xec] sm:$0xf] %vm1420_vm12, %v12909_v22  ;;  %8029 = vmatpush3.bf16.msra.mxu1 %v8400_v4  ;;  %v8403_v23 = vld [vmem:[%s12687_s3 + $0x168] sm:$0xff]   ;;  %v4389_v12 = vld [vmem:[#allocation2 + $0x24] sm:$0x8]  ;;  %v4569_v39 = vshrl.u32 %v11213_v43, 16 }
 0x29a   : > { %v3218_v24 = vpop.permute.xlu0 %3217  ;;  %v4007_v42 = vld [vmem:[#allocation2 + $0x24] sm:$0xf]  ;;  %v4039_v22 = vshrl.u32 %v4008_v26, 16  ;;  %8030 = vmatprep.subr.bf16.mxu1 %v8403_v23  ;;  %v7607_v38 = vrot.slane %v4389_v12, 11  ;;  %v4572_v50 = vshll.u32 %v11213_v43, 16  ;;  %v8409_v12 = vld [vmem:[%s12687_s3 + $0x150] sm:$0xff]  }
 0x29b   : > { %3258 = vst.msk [vmem:[#allocation3 + $0x124] sm:$0xf] %vm1100_vm10, %v3218_v24  ;;  %v3220_v63 = vpop.permute.xlu1 %3219  ;;  %v4545_v25 = vld [vmem:[#allocation2 + $0x24] sm:$0x8]  ;;  %v4026_v62 = vshrl.u32 %v4007_v42, 16  ;;  %v4029_v24 = vshll.u32 %v4007_v42, 16 }
 0x29c   : > { %1401 = vrot.lane.b32.xlu0 %v1368_v47, %s8542_s23  ;;  %3414 = vst.msk [vmem:[#allocation3 + $0x124] sm:$0xf] %vm1260_vm11, %v3374_v11  ;;  %v3789_v11 = vrot.slane %v3787_v30, 4  ;;  %v4429_v47 = vrot.slane %v4427_v27, 4  ;;  %v4571_v9 = vrot.slane %v4569_v39, 7  ;;  %v11252_v30 = vrot.slane %v4578_v15, 7 }
 0x29d   : > { %3229 = vrot.lane.b32.xlu1 %v3196_v19, %s8540_s21  ;;  %3259 = vst.msk [vmem:[#allocation3 + $0x140] sm:$0xf] %vm1100_vm10, %v3220_v63  ;;  %8031 = vmatpush3.bf16.msra.mxu1 %v8404_v53  ;;  %v4581_v63 = vshll.u32 %v11215_v35, 16  ;;  %v4041_v57 = vrot.slane %v4039_v22, 4  ;;  %v4564_v54 = vshrl.u32 %v4545_v25, 16  ;;  %v4428_v31 = vsel %vm8756_vm9, %v7607_v38, %v4427_v27  ;;  %v8410_v42 = vld [vmem:[%s12687_s3 + $0x110] sm:$0xff]  }
 0x29e   : > { %3415 = vst.msk [vmem:[#allocation3 + $0x140] sm:$0xf] %vm1260_vm11, %v3376_v2  ;;  %v1709_v20 = vpop.permute.xlu0 %1708  ;;  %v3791_v58 = vsel %vm8717_vm5, %v3789_v11, %v3790_v36  ;;  %v4035_v2 = vshll.u32 %v4008_v26, 16  ;;  %v4431_v21 = vsel %vm8756_vm9, %v4429_v47, %v4430_v48  ;;  %v4028_v4 = vrot.slane %v4026_v62, 4  ;;  %v3906_v11 = vld [vmem:[#allocation2 + $0x28] sm:$0xf] }
 0x29f   : > { %1747 = vst.msk [vmem:[#allocation3 + $0x154] sm:$0xf] %vm1100_vm10, %v1709_v20  ;;  %v2831_v61 = vpop.permute.xlu1 %2830  ;;  %v3905_v23 = vld [vmem:[#allocation2 + $0x24] sm:$0xf]  ;;  %v5013_v38 = vld [vmem:[#allocation2 + $0x2c] sm:$0xf] }
 0x2a0   : > { %2420 = vrot.lane.b32.xlu0 %v2387_v32, %s8540_s21  ;;  %v5465_v56 = vld [vmem:[#allocation3 + $0xe8] sm:$0xff]  ;;  %2870 = vst.msk [vmem:[#allocation3 + $0x13c] sm:$0xf] %vm1420_vm12, %v2831_v61  ;;  %v8405_v32 = vld [vmem:[%s12687_s3 + $0x160] sm:$0xff]   ;;  %v4031_v61 = vrot.slane %v4029_v24, 5 }
 0x2a1   : > { %3385 = vrot.lane.b32.xlu1 %v3352_v16, %s8541_s22  ;;  %v8381_v3 = vld [vmem:[#allocation3 + $0xec] ss:$28 sps:$4 sm:$0xff]   ;;  %v7642_v52 = vcombine.low %v5465_v56, %v5469_v37  ;;  %v11254_v16 = vrot.slane %v4035_v2, 5  ;;  %8032 = vmatprep.subr.bf16.mxu1 %v8405_v32  ;;  %v7908_v34 = vpop.f32.mrf.mxu1  ;;  %v11290_v25 = vld [vmem:[#allocation2 + $0x24] sm:$0xf] }
 0x2a2   : > { %v2829_v14 = vpop.permute.xlu0 %2828  ;;  %6439 = vmatprep.mubr.bf16.mxu0 %v8381_v3  ;;  %8033 = vmatpush3.bf16.msra.mxu1 %v8406_v0  ;;  %v8407_v56 = vld [vmem:[%s12687_s3 + $0x158] sm:$0xff]   ;;  %v4032_v47 = vor.u32 %v4031_v61, %v4028_v4  ;;  %v5012_v32 = vld [vmem:[#allocation2 + $0x28] sm:$0xc] }
 0x2a3   : > { %2869 = vst.msk [vmem:[#allocation3 + $0x120] sm:$0xf] %vm1420_vm12, %v2829_v14  ;;  %6440 = vmatmul.mubr.bf16.gmra.mxu0 %v7642_v52  ;;  %v3478_v29 = vpop.permute.xlu1 %3477  ;;  %v8408_v37 = vld [vmem:[%s12687_s3 + $0x118] sm:$0xff]   ;;  %v7909_v27 = vpop.f32.mrf.mxu1  ;;  %v4583_v52 = vor.u32 %v4581_v63, %v11252_v30  ;;  %v4042_v14 = vor.u32 %v4041_v57, %v11254_v16  ;;  %8034 = vmatprep.subr.bf16.mxu1 %v8407_v56  ;;  %v8411_v0 = vld [vmem:[%s12687_s3 + $0x148] sm:$0xff]   ;;  %v3793_v63 = vrot.slane %v11290_v25, 5  ;;  %v5034_v4 = vshll.u32 %v5012_v32, 16 }
 0x2a4   : > { %2684 = vrot.lane.b32.xlu0 %v2651_v33, %s8541_s22  ;;  %3517 = vst.msk [vmem:[#allocation3 + $0x140] sm:$0xf] %vm1420_vm12, %v3478_v29  ;;  %v11257_v33 = vld [vmem:[#allocation2 + $0x2c] sm:$0xf]  ;;  %v11275_v26 = vadd.f32 %v7909_v27, %v7908_v34  ;;  %v7608_v29 = vrot.slane %v4564_v54, 11  ;;  %v4033_v24 = vrot.slane %v4032_v47, 4 }
 0x2a5   : > { %3487 = vrot.lane.b32.xlu1 %v3437_v8, %s8542_s23  ;;  %v4576_v8 = vrot.slane %v4571_v9, 4  ;;  %v4045_v43 = vshll.u32 %v11257_v33, 16  ;;  %v7911_v53 = vpop.f32.mrf.mxu1  ;;  %v4043_v22 = vrot.slane %v4042_v14, 4  ;;  %v11308_v57 = vld [vmem:[#allocation2 + $0x28] sm:$0xf]  ;;  %v5043_v54 = vshll.u32 %v5013_v38, 16 }
 0x2a6   : > { %v3476_v19 = vpop.permute.xlu0 %3475  ;;  %8035 = vmatpush3.bf16.msra.mxu1 %v8408_v37  ;;  %v5014_v34 = vld [vmem:[#allocation2 + $0x30] sm:$0xf]  ;;  %v4038_v61 = vsel %vm8838_vm15, %v4033_v24, %v11254_v16  ;;  %v3795_v37 = vrot.slane %v3793_v63, 4  ;;  %v8413_v27 = vld [vmem:[%s12687_s3 + $0x140] sm:$0xff]   ;;  %v4789_v16 = vld [vmem:[#allocation2 + $0x2c] sm:$0xf] }
 0x2a7   : > { %3516 = vst.msk [vmem:[#allocation3 + $0x124] sm:$0xf] %vm1420_vm12, %v3476_v19  ;;  %v1236_v51 = vpop.permute.xlu1 %1235  ;;  %v4584_v15 = vsel %vm9025_vm6, %v4576_v8, %v4583_v52  ;;  %v7912_v2 = vpop.f32.mrf.mxu1  ;;  %v11288_v19 = vrot.slane %v4045_v43, 5  ;;  %8036 = vmatprep.subr.bf16.mxu1 %v8409_v12  ;;  %v8414_v8 = vld [vmem:[%s12687_s3 + $0x100] sm:$0xff]   ;;  %v5045_v14 = vrot.slane %v5043_v54, 7  ;;  %v5050_v43 = vshrl.u32 %v5014_v34, 16 }
 0x2a8   : > { %2840 = vrot.lane.b32.xlu0 %v2807_v41, %s8542_s23  ;;  %1274 = vst.msk [vmem:[#allocation3 + $0x16c] sm:$0xf] %vm1260_vm11, %v1236_v51  ;;  %v8412_v51 = vld [vmem:[%s12687_s3 + $0x108] sm:$0xff]   ;;  %v5036_v53 = vrot.slane %v5034_v4, 7  ;;  %v8543_v47 = vmov 0.0  }
 0x2a9   : > { %3839 = vrot.lane.b32.xlu1 %v3791_v58, %s8540_s21  ;;  %v4574_v58 = vor.u32 %v4572_v50, %v4571_v9  ;;  %v4048_v9 = vsel %vm8838_vm15, %v4043_v22, %v11288_v19  ;;  %v5031_v50 = vshrl.u32 %v5012_v32, 16  ;;  %8186 = vmatprep.subr.bf16.mxu0 %v8543_v47  ;;  %v5052_v22 = vrot.slane %v5050_v43, 6  ;;  %v11371_v4 = vld [vmem:[#allocation2 + $0x2c] sm:$0xf]  ;;  %v4804_v44 = vld [vmem:[#allocation2 + $0x68] sm:$0xf] }
 0x2aa   : > { %v1234_v20 = vpop.permute.xlu0 %1233  ;;  %v8385_v7 = vld [vmem:[#allocation3 + $0x120] ss:$28 sps:$4 sm:$0xff]   ;;  %8037 = vmatpush3.bf16.msra.mxu1 %v8410_v42  ;;  %v11339_v42 = vld [vmem:[#allocation2 + $0x34] sm:$0xf]  ;;  %v5314_v43 = vrot.slane %v11371_v4, 7 }
 0x2ab   : > { %1273 = vst.msk [vmem:[#allocation3 + $0x150] sm:$0xf] %vm1260_vm11, %v1234_v20  ;;  %v1870_v3 = vpop.permute.xlu1 %1869  ;;  %v4575_v62 = vsel %vm9025_vm6, %v7608_v29, %v4574_v58  ;;  %v5040_v20 = vshrl.u32 %v5013_v38, 16  ;;  %8038 = vmatprep.subr.bf16.mxu1 %v8411_v0  ;;  %v4788_v29 = vld [vmem:[#allocation2 + $0x28] sm:$0xf]  ;;  %v4596_v54 = vshrl.u32 %v11339_v42, 16 }
 0x2ac   : > { %3837 = vrot.lane.b32.xlu0 %v3788_v6, %s8540_s21  ;;  %1907 = vst.msk [vmem:[#allocation3 + $0x170] sm:$0xf] %vm1260_vm11, %v1870_v3  ;;  %v3796_v3 = vrot.slane %v11308_v57, 5 }
 0x2ad   : > { %4479 = vrot.lane.b32.xlu1 %v4431_v21, %s8540_s21  ;;  %v5042_v52 = vrot.slane %v5040_v20, 6  ;;  %v4432_v20 = vrot.slane %v4430_v48, 4 }
 0x2ae   : > { %v1868_v35 = vpop.permute.xlu0 %1867  ;;  %v8383_v41 = vld [vmem:[#allocation3 + $0x124] ss:$28 sps:$4 sm:$0xff]   ;;  %8039 = vmatpush3.bf16.msra.mxu1 %v8412_v51  ;;  %v3797_v55 = vsel %vm8717_vm5, %v3795_v37, %v3796_v3  ;;  %v8420_v37 = vld [vmem:[%s12687_s3 + $0x198] sm:$0xff]  }
 0x2af   : > { %1906 = vst.msk [vmem:[#allocation3 + $0x154] sm:$0xf] %vm1260_vm11, %v1868_v35  ;;  %v1396_v39 = vpop.permute.xlu1 %1395  ;;  %6447 = vmatprep.mubr.bf16.mxu0 %v8383_v41  ;;  %v5053_v35 = vshll.u32 %v5014_v34, 16  ;;  %8040 = vmatprep.subr.bf16.mxu1 %v8413_v27  ;;  %v11345_v2 = vor.u32 %v5045_v14, %v5042_v52  ;;  %v11380_v27 = vrot.slane %v4596_v54, 7  ;;  %v8422_v54 = vld [vmem:[%s12687_s3 + $0x188] sm:$0xff]  }
 0x2b0   : > { %4477 = vrot.lane.b32.xlu0 %v4428_v31, %s8540_s21  ;;  %1434 = vst.msk [vmem:[#allocation3 + $0x16c] sm:$0xf] %vm1420_vm12, %v1396_v39  ;;  %6448 = vmatmul.mubr.bf16.gmra.mxu0 %v8385_v7  ;;  %v3792_v7 = vrot.slane %v3790_v36, 4  ;;  %v11337_v36 = vld [vmem:[#allocation2 + $0x34] sm:$0xf]  ;;  %v8418_v39 = vld [vmem:[%s12687_s3 + $0x1a8] sm:$0xff]  }
 0x2b1   : > { %3941 = vrot.lane.b32.xlu1 %v3906_v11, %s8541_s22  ;;  %v11317_v11 = vld [vmem:[#allocation2 + $0x30] sm:$0xf]  ;;  %v5055_v25 = vrot.slane %v5053_v35, 7  ;;  %8187 = vmatpush3.bf16.msra.mxu0 %v8418_v39  ;;  %v5048_v48 = vrot.slane %v11345_v2, 4 }
 0x2b2   : > { %v1394_v6 = vpop.permute.xlu0 %1393  ;;  %v4433_v58 = vrot.slane %v11317_v11, 7  ;;  %8041 = vmatpush3.bf16.msra.mxu1 %v8414_v8  ;;  %8188 = vmatprep.subr.bf16.mxu0 %v8543_v47  ;;  %v4599_v8 = vshll.u32 %v11339_v42, 16  ;;  %v4010_v35 = vld [vmem:[#allocation2 + $0x30] sm:$0xf] }
 0x2b3   : > { %1433 = vst.msk [vmem:[#allocation3 + $0x150] sm:$0xf] %vm1420_vm12, %v1394_v6  ;;  %v2137_v21 = vpop.permute.xlu1 %2136  ;;  %v11347_v6 = vld [vmem:[#allocation2 + $0x30] sm:$0xf] }
 0x2b4   : > { %3939 = vrot.lane.b32.xlu0 %v3905_v23, %s8541_s22  ;;  %2174 = vst.msk [vmem:[#allocation3 + $0x170] sm:$0xf] %vm1420_vm12, %v2137_v21  ;;  %v5033_v23 = vrot.slane %v5031_v50, 6  ;;  %v4436_v21 = vrot.slane %v11337_v36, 7  ;;  %v4587_v34 = vshrl.u32 %v11347_v6, 16  ;;  %v11369_v50 = vor.u32 %v5055_v25, %v5052_v22  ;;  %v8421_v42 = vld [vmem:[%s12687_s3 + $0x190] sm:$0xff]  }
 0x2b5   : > { %4722 = vrot.lane.b32.xlu1 %v4584_v15, %s8541_s22  ;;  %v4435_v15 = vrot.slane %v4433_v58, 4  ;;  %v4434_v11 = vsel %vm8756_vm9, %v4432_v20, %v4433_v58  ;;  %v4590_v14 = vshll.u32 %v11347_v6, 16  ;;  %v4055_v22 = vshll.u32 %v4010_v35, 16  ;;  %v4275_v25 = vld [vmem:[#allocation2 + $0x44] sm:$0xf] }
 0x2b6   : > { %v2135_v31 = vpop.permute.xlu0 %2134  ;;  %v5037_v51 = vor.u32 %v5036_v53, %v5033_v23  ;;  %v4589_v52 = vrot.slane %v4587_v34, 7  ;;  %v5276_v23 = vld [vmem:[#allocation2 + $0x28] sm:$0x8]  ;;  %v4059_v53 = vshrl.u32 %v4010_v35, 16 }
 0x2b7   : > { %2173 = vst.msk [vmem:[#allocation3 + $0x154] sm:$0xf] %vm1420_vm12, %v2135_v31  ;;  %v2415_v56 = vpop.permute.xlu1 %2414  ;;  %v4437_v28 = vsel %vm8756_vm9, %v4435_v15, %v4436_v21  ;;  %v4601_v15 = vor.u32 %v4599_v8, %v11380_v27  ;;  %v11416_v34 = vrot.slane %v4055_v22, 5  ;;  %v11434_v8 = vld [vmem:[#allocation2 + $0x30] sm:$0xf] }
 0x2b8   : > { %4720 = vrot.lane.b32.xlu0 %v4575_v62, %s8541_s22  ;;  %2452 = vst.msk [vmem:[#allocation3 + $0x174] sm:$0xf] %vm1100_vm10, %v2415_v56  ;;  %v3794_v62 = vsel %vm8717_vm5, %v3792_v7, %v3793_v63  ;;  %v8419_v63 = vld [vmem:[%s12687_s3 + $0x1a0] sm:$0xff]   ;;  %v5038_v56 = vrot.slane %v5037_v51, 4  ;;  %v11391_v7 = vld [vmem:[#allocation2 + $0x30] sm:$0xf] }
 0x2b9   : > { %4201 = vrot.lane.b32.xlu1 %v4048_v9, %s8542_s23  ;;  %8189 = vmatpush3.bf16.msra.mxu0 %v8419_v63  ;;  %v4594_v39 = vrot.slane %v4589_v52, 4  ;;  %v4061_v51 = vrot.slane %v4059_v53, 4  ;;  %v4326_v63 = vrot.slane %v4275_v25, 5  ;;  %v4897_v53 = vld [vmem:[#allocation2 + $0x44] sm:$0xf] }
 0x2ba   : > { %v2413_v41 = vpop.permute.xlu0 %2412  ;;  %8190 = vmatprep.subr.bf16.mxu0 %v8543_v47  ;;  %v11461_v25 = vld [vmem:[#allocation2 + $0x48] sm:$0xf]  ;;  %v4946_v57 = vrot.slane %v4897_v53, 6  ;;  %v11500_v53 = vld [vmem:[#allocation2 + $0x50] sm:$0xf] }
 0x2bb   : > { %2451 = vst.msk [vmem:[#allocation3 + $0x158] sm:$0xf] %vm1100_vm10, %v2413_v41  ;;  %v3224_v12 = vpop.permute.xlu1 %3223  ;;  %v5484_v32 = vld [vmem:[#allocation3 + $0x16c] sm:$0xff]  ;;  %v5057_v41 = vsel %vm8825_vm14, %v5048_v48, %v11369_v50  ;;  %v11421_v48 = vld [vmem:[#allocation2 + $0x4c] sm:$0xf]  ;;  %v4328_v1 = vrot.slane %v4326_v63, 4 }
 0x2bc   : > { %4199 = vrot.lane.b32.xlu0 %v4038_v61, %s8542_s23  ;;  %3261 = vst.msk [vmem:[#allocation3 + $0x178] sm:$0xf] %vm1100_vm10, %v3224_v12  ;;  %v5047_v12 = vsel %vm8825_vm14, %v5038_v56, %v11345_v2  ;;  %v4592_v2 = vor.u32 %v4590_v14, %v4589_v52  ;;  %v11438_v52 = vld [vmem:[#allocation2 + $0x34] sm:$0xf]  ;;  %v4062_v14 = vor.u32 %v4061_v51, %v11416_v34 }
 0x2bd   : > { %4824 = vrot.lane.b32.xlu1 %v4789_v16, %s8542_s23  ;;  %8191 = vmatpush3.bf16.msra.mxu0 %v8420_v37  ;;  %v5060_v51 = vshrl.u32 %v11438_v52, 16  ;;  %v5063_v60 = vshll.u32 %v11438_v52, 16 }
 0x2be   : > { %v3222_v38 = vpop.permute.xlu0 %3221  ;;  %v5480_v24 = vld [vmem:[#allocation3 + $0x150] sm:$0xff]  ;;  %8192 = vmatprep.subr.bf16.mxu0 %v8543_v47 }
 0x2bf   : > { %v8386_v0 = vld [vmem:[#allocation3 + $0x154] ss:$28 sps:$4 sm:$0xff]   ;;  %3260 = vst.msk [vmem:[#allocation3 + $0x15c] sm:$0xf] %vm1100_vm10, %v3222_v38  ;;  %v7654_v9 = vcombine.low %v5480_v24, %v5484_v32  ;;  %v2679_v31 = vpop.permute.xlu1 %2678  ;;  %v5316_v38 = vrot.slane %v5314_v43, 4  ;;  %v7610_v24 = vrot.slane %v5276_v23, 11 }
 0x2c0   : > { %4822 = vrot.lane.b32.xlu0 %v4788_v29, %s8542_s23  ;;  %6351 = vmatprep.mubr.bf16.mxu1 %v8386_v0  ;;  %2716 = vst.msk [vmem:[#allocation3 + $0x174] sm:$0xf] %vm1260_vm11, %v2679_v31  ;;  %v4049_v29 = vshrl.u32 %v11257_v33, 16  ;;  %v4585_v33 = vrot.slane %v11252_v30, 4  ;;  %v3908_v32 = vld [vmem:[#allocation2 + $0x30] sm:$0xf] }
 0x2c1   : > { %3843 = vrot.lane.b32.xlu1 %v3797_v55, %s8540_s21  ;;  %6352 = vmatmul.mubr.bf16.gmra.mxu1 %v7654_v9  ;;  %v11398_v55 = vld [vmem:[#allocation2 + $0x34] sm:$0xf]  ;;  %v3907_v0 = vld [vmem:[#allocation2 + $0x2c] sm:$0xf]  ;;  %v4276_v31 = vld [vmem:[#allocation2 + $0x48] sm:$0xf] }
 0x2c2   : > { %v2677_v61 = vpop.permute.xlu0 %2676  ;;  %v4065_v9 = vshll.u32 %v11398_v55, 16  ;;  %v4051_v20 = vrot.slane %v4049_v29, 4  ;;  %8193 = vmatpush3.bf16.msra.mxu0 %v8421_v42  ;;  %v4593_v56 = vsel %vm9025_vm6, %v4585_v33, %v4592_v2  ;;  %v4329_v23 = vrot.slane %v4276_v31, 5  ;;  %v8423_v42 = vld [vmem:[%s12687_s3 + $0x180] sm:$0xff]  }
 0x2c3   : > { %2715 = vst.msk [vmem:[#allocation3 + $0x158] sm:$0xf] %vm1260_vm11, %v2677_v61  ;;  %v3380_v16 = vpop.permute.xlu1 %3379  ;;  %8194 = vmatprep.subr.bf16.mxu0 %v8543_v47  ;;  %v4602_v61 = vsel %vm9025_vm6, %v4594_v39, %v4601_v15  ;;  %v4332_v39 = vrot.slane %v11421_v48, 5  ;;  %v3798_v15 = vrot.slane %v3796_v3, 4  ;;  %v8475_v33 = vld [vmem:[#allocation2 + $0x40] sm:$0xf] }
 0x2c4   : > { %3841 = vrot.lane.b32.xlu0 %v3794_v62, %s8540_s21  ;;  %3417 = vst.msk [vmem:[#allocation3 + $0x178] sm:$0xf] %vm1260_vm11, %v3380_v16  ;;  %v5317_v62 = vrot.slane %v11391_v7, 7  ;;  %v11436_v16 = vld [vmem:[#allocation2 + $0x38] sm:$0xf]  ;;  %v11442_v35 = vrot.slane %v4065_v9, 5  ;;  %v4052_v29 = vor.u32 %v4051_v20, %v11288_v19 }
 0x2c5   : > { %4483 = vrot.lane.b32.xlu1 %v4437_v28, %s8540_s21  ;;  %v11418_v28 = vld [vmem:[#allocation2 + $0x2c] sm:$0xf]  ;;  %v4439_v19 = vrot.slane %v11436_v16, 7  ;;  %v3645_v22 = vshrl.u32 %v8475_v33, 16  ;;  %v3534_v3 = vld [vmem:[#allocation2 + $0x44] sm:$0xf] }
 0x2c6   : > { %v3378_v58 = vpop.permute.xlu0 %3377  ;;  %v5318_v37 = vsel %vm8756_vm9, %v5316_v38, %v5317_v62  ;;  %8195 = vmatpush3.bf16.msra.mxu0 %v8422_v54  ;;  %v4331_v38 = vrot.slane %v4329_v23, 4  ;;  %v4945_v9 = vrot.slane %v4943_v17, 4  ;;  %v4053_v20 = vrot.slane %v4052_v29, 4 }
 0x2c7   : > { %3416 = vst.msk [vmem:[#allocation3 + $0x15c] sm:$0xf] %vm1260_vm11, %v3378_v58  ;;  %v1080_v6 = vpop.permute.xlu1 %1079  ;;  %v3799_v58 = vrot.slane %v11418_v28, 5  ;;  %8196 = vmatprep.subr.bf16.mxu0 %v8543_v47  ;;  %v4949_v31 = vrot.slane %v11461_v25, 6  ;;  %v11481_v28 = vld [vmem:[#allocation2 + $0x48] sm:$0xf] }
 0x2c8   : > { %4481 = vrot.lane.b32.xlu0 %v4434_v11, %s8540_s21  ;;  %1116 = vst.msk [vmem:[#allocation3 + $0x1a4] sm:$0xf] %vm1100_vm10, %v1080_v6  ;;  %v5315_v11 = vsel %vm8756_vm9, %v7610_v24, %v5314_v43  ;;  %v4330_v24 = vsel %vm8717_vm5, %v4328_v1, %v4329_v23  ;;  %v4333_v54 = vsel %vm8717_vm5, %v4331_v38, %v4332_v39  ;;  %v3647_v52 = vrot.slane %v3645_v22, 4  ;;  %v11508_v1 = vld [vmem:[#allocation2 + $0x50] sm:$0xf] }
 0x2c9   : > { %5210 = vrot.lane.b32.xlu1 %v5057_v41, %s8540_s21  ;;  %v4325_v41 = vrot.slane %v4323_v49, 4  ;;  %v3802_v49 = vrot.slane %v11434_v8, 5  ;;  %4380 = vst.msk [vmem:[#allocation3 + $0xf4] sm:$0xf] %vm791_vm0, %v4330_v24  ;;  %4381 = vst.msk [vmem:[#allocation3 + $0x110] sm:$0xf] %vm791_vm0, %v4333_v54  ;;  %v4947_v17 = vsel %vm8745_vm8, %v4945_v9, %v4946_v57  ;;  %v4058_v33 = vsel %vm8838_vm15, %v4053_v20, %v11416_v34 }
 0x2ca   : > { %v1078_v30 = vpop.permute.xlu0 %1077  ;;  %8197 = vmatpush3.bf16.msra.mxu0 %v8423_v42  ;;  %5001 = vst.msk [vmem:[#allocation3 + $0xc0] sm:$0xf] %vm791_vm0, %v4947_v17  ;;  %v3661_v42 = vshll.u32 %v11481_v28, 16  ;;  %v5062_v22 = vrot.slane %v5060_v51, 6  ;;  %v4335_v24 = vrot.slane %v11500_v53, 5  ;;  %v3665_v34 = vshrl.u32 %v11481_v28, 16 }
 0x2cb   : > { %1115 = vst.msk [vmem:[#allocation3 + $0x188] sm:$0xf] %vm1100_vm10, %v1078_v30  ;;  %v1715_v4 = vpop.permute.xlu1 %1714  ;;  %v4327_v2 = vsel %vm8717_vm5, %v4325_v41, %v4326_v63  ;;  %v4948_v63 = vrot.slane %v4946_v57, 4  ;;  %v11495_v41 = vsel %vm8717_vm5, %v3798_v15, %v3799_v58  ;;  %v4334_v57 = vrot.slane %v4332_v39, 4  ;;  %v4791_v20 = vld [vmem:[#allocation2 + $0x34] sm:$0xf] }
 0x2cc   : > { %5208 = vrot.lane.b32.xlu0 %v5047_v12, %s8540_s21  ;;  %1750 = vst.msk [vmem:[#allocation3 + $0x1a8] sm:$0xf] %vm1100_vm10, %v1715_v4  ;;  %v11449_v12 = vld [vmem:[#allocation2 + $0x3c] sm:$0xf]  ;;  %v11484_v4 = vld [vmem:[#allocation2 + $0x38] sm:$0xf] }
 0x2cd   : > { %3945 = vrot.lane.b32.xlu1 %v3908_v32, %s8541_s22  ;;  %v4063_v32 = vrot.slane %v4062_v14, 4  ;;  %4379 = vst.msk [vmem:[#allocation3 + $0xd8] sm:$0xf] %vm791_vm0, %v4327_v2  ;;  %v11491_v14 = vrot.slane %v3799_v58, 4  ;;  %v4950_v23 = vsel %vm8745_vm8, %v4948_v63, %v4949_v31  ;;  %v5070_v25 = vshrl.u32 %v11484_v4, 16 }
 0x2ce   : > { %v1713_v43 = vpop.permute.xlu0 %1712  ;;  %5002 = vst.msk [vmem:[#allocation3 + $0xdc] sm:$0xf] %vm791_vm0, %v4950_v23  ;;  %v5065_v2 = vrot.slane %v5063_v60, 7  ;;  %v3663_v63 = vrot.slane %v3661_v42, 5  ;;  %v4336_v48 = vsel %vm8717_vm5, %v4334_v57, %v4335_v24  ;;  %v4951_v39 = vrot.slane %v4949_v31, 4 }
 0x2cf   : > { %1749 = vst.msk [vmem:[#allocation3 + $0x18c] sm:$0xf] %vm1100_vm10, %v1713_v43  ;;  %v2835_v6 = vpop.permute.xlu1 %2834  ;;  %v4899_v43 = vld [vmem:[#allocation2 + $0x4c] sm:$0xf]  ;;  %v4790_v31 = vld [vmem:[#allocation2 + $0x30] sm:$0xf]  ;;  %v3803_v57 = vsel %vm8717_vm5, %v11491_v14, %v3802_v49 }
 0x2d0   : > { %3943 = vrot.lane.b32.xlu0 %v3907_v0, %s8541_s22  ;;  %2872 = vst.msk [vmem:[#allocation3 + $0x174] sm:$0xf] %vm1420_vm12, %v2835_v6  ;;  %v4442_v0 = vrot.slane %v11449_v12, 7  ;;  %v3648_v6 = vor.u32 %v3647_v52, %v10925_v10  ;;  %v4952_v9 = vrot.slane %v4899_v43, 6  ;;  %v11523_v10 = vld [vmem:[#allocation2 + $0x50] sm:$0xf] }
 0x2d1   : > { %4726 = vrot.lane.b32.xlu1 %v4602_v61, %s8541_s22  ;;  %v3651_v61 = vshll.u32 %v3534_v3, 16  ;;  %4382 = vst.msk [vmem:[#allocation3 + $0x12c] sm:$0xf] %vm791_vm0, %v4336_v48  ;;  %v7972_v23 = vpop.f32.mrf.mxu0  ;;  %v5073_v52 = vshll.u32 %v11484_v4, 16  ;;  %v11548_v42 = vld [vmem:[#allocation2 + $0x38] sm:$0xf] }
 0x2d2   : > { %v2833_v30 = vpop.permute.xlu0 %2832  ;;  %v3649_v51 = vrot.slane %v3648_v6, 4  ;;  %v4954_v17 = vrot.slane %v4952_v9, 4  ;;  %v11849_v53 = vld [vmem:[#allocation2 + $0x58] sm:$0xf] }
 0x2d3   : > { %2871 = vst.msk [vmem:[#allocation3 + $0x158] sm:$0xf] %vm1420_vm12, %v2833_v30  ;;  %v3653_v29 = vrot.slane %v3651_v61, 5  ;;  %v4955_v30 = vrot.slane %v11508_v1, 6 }
 0x2d4   : > { %4724 = vrot.lane.b32.xlu0 %v4593_v56, %s8541_s22  ;;  %v3655_v56 = vshrl.u32 %v3534_v3, 16  ;;  %v3536_v3 = vld [vmem:[#allocation2 + $0x4c] sm:$0xf] }
 0x2d5   : > { %5366 = vrot.lane.b32.xlu1 %v5318_v37, %s8541_s22  ;;  %v3482_v37 = vpop.permute.xlu1 %3481  ;;  %v3654_v60 = vsel %vm8838_vm15, %v3649_v51, %v3653_v29  ;;  %v3671_v61 = vshll.u32 %v3536_v3, 16  ;;  %v4441_v51 = vrot.slane %v4439_v19, 4 }
 0x2d6   : > { %3519 = vst.msk [vmem:[#allocation3 + $0x178] sm:$0xf] %vm1420_vm12, %v3482_v37  ;;  %v3657_v58 = vrot.slane %v3655_v56, 4  ;;  %v3480_v15 = vpop.permute.xlu0 %3479  ;;  %v3675_v56 = vshrl.u32 %v3536_v3, 16  ;;  %v11537_v37 = vld [vmem:[%s12688_s4] ss:$0 sm:$0xff]  ;;  %v7973_v3 = vpop.f32.mrf.mxu0 }
 0x2d7   : > { %3518 = vst.msk [vmem:[#allocation3 + $0x15c] sm:$0xf] %vm1420_vm12, %v3480_v15  ;;  %v4956_v15 = vsel %vm8745_vm8, %v4954_v17, %v4955_v30  ;;  %v7974_v14 = vadd.f32 %v7973_v3, %v7972_v23  ;;  %v4443_v4 = vsel %vm8756_vm9, %v4441_v51, %v4442_v0 }
 0x2d8   : > { %5364 = vrot.lane.b32.xlu0 %v5315_v11, %s8541_s22  ;;  %v4068_v11 = vsel %vm8838_vm15, %v4063_v32, %v11442_v35  ;;  %v3658_v38 = vor.u32 %v3657_v58, %v3653_v29  ;;  %3742 = vst.msk [vmem:[#allocation3 + $0x128] sm:$0xf] %vm791_vm0, %v3654_v60  ;;  %v3681_v29 = vshll.u32 %v11523_v10, 16  ;;  %v3677_v6 = vrot.slane %v3675_v56, 4  ;;  %5004 = vst.msk [vmem:[#allocation3 + $0x114] sm:$0xf] %vm791_vm0, %v4956_v15  ;;  %v7975_v36 = vpop.f32.mrf.mxu0 }
 0x2d9   : > { %4205 = vrot.lane.b32.xlu1 %v4068_v11, %s8542_s23  ;;  %v1240_v32 = vpop.permute.xlu1 %1239  ;;  %v4953_v11 = vsel %vm8745_vm8, %v4951_v39, %v4952_v9  ;;  %v4438_v9 = vrot.slane %v4436_v21, 4 }
 0x2da   : > { %1276 = vst.msk [vmem:[#allocation3 + $0x1a4] sm:$0xf] %vm1260_vm11, %v1240_v32  ;;  %v3659_v54 = vrot.slane %v3658_v38, 4  ;;  %v1238_v28 = vpop.permute.xlu0 %1237  ;;  %v3667_v38 = vrot.slane %v3665_v34, 4  ;;  %v7914_v32 = vpop.f32.mrf.mxu1  ;;  %v6306_v34 = vadd.f32 %v11101_v45, %v11537_v37  ;;  %v11578_v56 = vrot.slane %v3681_v29, 5 }
 0x2db   : > { %1275 = vst.msk [vmem:[#allocation3 + $0x188] sm:$0xf] %vm1260_vm11, %v1238_v28  ;;  %v8390_v28 = vld [vmem:[#allocation3 + $0x158] ss:$28 sps:$4 sm:$0xff]  }
 0x2dc   : > { %4203 = vrot.lane.b32.xlu0 %v4058_v33, %s8542_s23  ;;  %v3664_v43 = vsel %vm8838_vm15, %v3659_v54, %v3663_v63  ;;  %5003 = vst.msk [vmem:[#allocation3 + $0xf8] sm:$0xf] %vm791_vm0, %v4953_v11  ;;  %v3673_v33 = vrot.slane %v3671_v61, 5  ;;  %v11568_v54 = vld [vmem:[#allocation2 + $0x3c] sm:$0xf]  ;;  %v3668_v17 = vor.u32 %v3667_v38, %v3663_v63  ;;  %v7915_v21 = vpop.f32.mrf.mxu1  ;;  %v4605_v61 = vshrl.u32 %v11548_v42, 16 }
 0x2dd   : > { %4828 = vrot.lane.b32.xlu1 %v4791_v20, %s8542_s23  ;;  %v1874_v58 = vpop.permute.xlu1 %1873  ;;  %3743 = vst.msk [vmem:[#allocation3 + $0x144] sm:$0xf] %vm791_vm0, %v3664_v43  ;;  %v11566_v20 = vor.u32 %v5065_v2, %v5062_v22  ;;  %v5072_v22 = vrot.slane %v5070_v25, 6  ;;  %v5075_v2 = vrot.slane %v5073_v52, 7  ;;  %v11580_v45 = vadd.f32 %v7974_v14, %v6306_v34  ;;  %v7976_v25 = vpop.f32.mrf.mxu0  ;;  %v4012_v38 = vld [vmem:[#allocation2 + $0x38] sm:$0xf] }
 0x2de   : > { %1909 = vst.msk [vmem:[#allocation3 + $0x1a8] sm:$0xf] %vm1260_vm11, %v1874_v58  ;;  %v1872_v48 = vpop.permute.xlu0 %1871  ;;  %v8388_v39 = vld [vmem:[#allocation3 + $0x15c] ss:$28 sps:$4 sm:$0xff]   ;;  %v3678_v60 = vor.u32 %v3677_v6, %v3673_v33  ;;  %v3669_v43 = vrot.slane %v3668_v17, 4  ;;  %v7917_v52 = vpop.f32.mrf.mxu1  ;;  %v4614_v29 = vshrl.u32 %v11568_v54, 16  ;;  %v7977_v58 = vadd.f32 %v7976_v25, %v7975_v36 }
 0x2df   : > { %1908 = vst.msk [vmem:[#allocation3 + $0x18c] sm:$0xf] %vm1260_vm11, %v1872_v48  ;;  %6455 = vmatprep.mubr.bf16.mxu0 %v8388_v39  ;;  %v5068_v11 = vrot.slane %v11566_v20, 4  ;;  %v4440_v6 = vsel %vm8756_vm9, %v4438_v9, %v4439_v19  ;;  %v11601_v3 = vor.u32 %v5075_v2, %v5072_v22  ;;  %v4607_v9 = vrot.slane %v4605_v61, 7  ;;  %v5279_v48 = vld [vmem:[#allocation2 + $0x34] sm:$0xf] }
 0x2e0   : > { %4826 = vrot.lane.b32.xlu0 %v4790_v31, %s8542_s23  ;;  %v11584_v31 = vadd.f32 %v7915_v21, %v7914_v32  ;;  %v3679_v63 = vrot.slane %v3678_v60, 4  ;;  %6456 = vmatmul.mubr.bf16.gmra.mxu0 %v8390_v28  ;;  %v5058_v32 = vrot.slane %v11369_v50, 4  ;;  %v3674_v51 = vsel %vm8838_vm15, %v3669_v43, %v3673_v33  ;;  %v3910_v2 = vld [vmem:[#allocation2 + $0x38] sm:$0xf] }
 0x2e1   : > { %3847 = vrot.lane.b32.xlu1 %v3803_v57, %s8540_s21  ;;  %v1400_v23 = vpop.permute.xlu1 %1399  ;;  %v7918_v57 = vpop.f32.mrf.mxu1  ;;  %v4617_v14 = vshll.u32 %v11568_v54, 16  ;;  %3744 = vst.msk [vmem:[#allocation3 + $0x160] sm:$0xf] %vm791_vm0, %v3674_v51  ;;  %v5077_v50 = vsel %vm8825_vm14, %v5068_v11, %v11601_v3  ;;  %v11621_v33 = vrot.slane %v4614_v29, 7  ;;  %v4075_v39 = vshll.u32 %v4012_v38, 16 }
 0x2e2   : > { %1436 = vst.msk [vmem:[#allocation3 + $0x1a4] sm:$0xf] %vm1420_vm12, %v1400_v23  ;;  %v1398_v15 = vpop.permute.xlu0 %1397  ;;  %v11612_v19 = vadd.f32 %v7918_v57, %v7917_v52  ;;  %v4079_v28 = vshrl.u32 %v4012_v38, 16  ;;  %v4069_v54 = vshrl.u32 %v11398_v55, 16  ;;  %v5067_v17 = vsel %vm8825_vm14, %v5058_v32, %v11566_v20  ;;  %v11638_v52 = vld [vmem:[#allocation2 + $0x38] sm:$0xf] }
 0x2e3   : > { %1435 = vst.msk [vmem:[#allocation3 + $0x188] sm:$0xf] %vm1420_vm12, %v1398_v15  ;;  %v4608_v36 = vshll.u32 %v11548_v42, 16  ;;  %v5320_v22 = vrot.slane %v5279_v48, 7  ;;  %v4612_v61 = vrot.slane %v4607_v9, 4  ;;  %v4619_v23 = vor.u32 %v4617_v14, %v11621_v33 }
 0x2e4   : > { %3845 = vrot.lane.b32.xlu0 %v11495_v41, %s8540_s21  ;;  %v6309_v41 = vadd.f32 %v11112_v46, %v11537_v37  ;;  %v3684_v46 = vsel %vm8838_vm15, %v3679_v63, %v11578_v56  ;;  %v4077_v63 = vrot.slane %v4075_v39, 5  ;;  %v4081_v55 = vrot.slane %v4079_v28, 4  ;;  %v3909_v42 = vld [vmem:[#allocation2 + $0x34] sm:$0xf] }
 0x2e5   : > { %4487 = vrot.lane.b32.xlu1 %v4443_v4, %s8540_s21  ;;  %v2141_v16 = vpop.permute.xlu1 %2140  ;;  %3745 = vst.msk [vmem:[#allocation3 + $0x17c] sm:$0xf] %vm791_vm0, %v3684_v46  ;;  %v11634_v4 = vld [vmem:[#allocation2 + $0x3c] sm:$0xf]  ;;  %v4603_v20 = vrot.slane %v11380_v27, 4  ;;  %v4610_v25 = vor.u32 %v4608_v36, %v4607_v9  ;;  %v4071_v11 = vrot.slane %v4069_v54, 4 }
 0x2e6   : > { %v11609_v34 = vadd.f32 %v7977_v58, %v6309_v41  ;;  %2176 = vst.msk [vmem:[#allocation3 + $0x1a8] sm:$0xf] %vm1420_vm12, %v2141_v16  ;;  %v2139_v60 = vpop.permute.xlu0 %2138  ;;  %v4620_v41 = vsel %vm9025_vm6, %v4612_v61, %v4619_v23  ;;  %v5322_v58 = vrot.slane %v5320_v22, 4  ;;  %v4082_v15 = vor.u32 %v4081_v55, %v4077_v63  ;;  %v5018_v55 = vld [vmem:[#allocation2 + $0x40] sm:$0xf] }
 0x2e7   : > { %2175 = vst.msk [vmem:[#allocation3 + $0x18c] sm:$0xf] %vm1420_vm12, %v2139_v60  ;;  %v5323_v46 = vrot.slane %v11638_v52, 7  ;;  %v4611_v51 = vsel %vm9025_vm6, %v4603_v20, %v4610_v25  ;;  %v5319_v9 = vrot.slane %v5317_v62, 4  ;;  %v4072_v14 = vor.u32 %v4071_v11, %v11442_v35  ;;  %v3756_v60 = vld [vmem:[#allocation2 + $0x34] sm:$0xf] }
 0x2e8   : > { %4485 = vrot.lane.b32.xlu0 %v4440_v6, %s8540_s21  ;;  %v4085_v6 = vshll.u32 %v11634_v4, 16  ;;  %v4083_v39 = vrot.slane %v4082_v15, 4  ;;  %v5017_v62 = vld [vmem:[#allocation2 + $0x3c] sm:$0xf]  ;;  %v3805_v36 = vrot.slane %v3756_v60, 5  ;;  %v5093_v15 = vshll.u32 %v5018_v55, 16 }
 0x2e9   : > { %5214 = vrot.lane.b32.xlu1 %v5077_v50, %s8540_s21  ;;  %v2419_v21 = vpop.permute.xlu1 %2418  ;;  %v5324_v48 = vsel %vm8756_vm9, %v5322_v58, %v5323_v46  ;;  %v5321_v35 = vsel %vm8756_vm9, %v5319_v9, %v5320_v22  ;;  %v4073_v54 = vrot.slane %v4072_v14, 4  ;;  %v5083_v61 = vshll.u32 %v5017_v62, 16  ;;  %v4396_v25 = vld [vmem:[#allocation2 + $0x40] sm:$0xf]  ;;  %v4793_v11 = vld [vmem:[#allocation2 + $0x3c] sm:$0xf] }
 0x2ea   : > { %2454 = vst.msk [vmem:[#allocation3 + $0x1ac] sm:$0xf] %vm1100_vm10, %v2419_v21  ;;  %v11659_v28 = vrot.slane %v4085_v6, 5  ;;  %v3807_v20 = vrot.slane %v3805_v36, 4  ;;  %v5090_v58 = vshrl.u32 %v5018_v55, 16 }
 0x2eb   : > { %v4078_v22 = vsel %vm8838_vm15, %v4073_v54, %v4077_v63  ;;  %v4792_v63 = vld [vmem:[#allocation2 + $0x38] sm:$0xf]  ;;  %v4014_v55 = vld [vmem:[#allocation2 + $0x40] sm:$0xf] }
 0x2ec   : > { %5212 = vrot.lane.b32.xlu0 %v5067_v17, %s8540_s21  ;;  %v4088_v21 = vsel %vm8838_vm15, %v4083_v39, %v11659_v28 }
 0x2ed   : > { %3949 = vrot.lane.b32.xlu1 %v3910_v2, %s8541_s22  ;;  %v5492_v57 = vld [vmem:[#allocation3 + $0x1a4] sm:$0xff]  ;;  %v5080_v2 = vshrl.u32 %v5017_v62, 16 }
 0x2ee   : > { %v2417_v43 = vpop.permute.xlu0 %2416  ;;  %v5488_v27 = vld [vmem:[#allocation3 + $0x188] sm:$0xff] }
 0x2ef   : > { %2453 = vst.msk [vmem:[#allocation3 + $0x190] sm:$0xf] %vm1100_vm10, %v2417_v43  ;;  %v3228_v29 = vpop.permute.xlu1 %3227  ;;  %v8391_v32 = vld [vmem:[#allocation3 + $0x18c] ss:$28 sps:$4 sm:$0xff]   ;;  %v7661_v16 = vcombine.low %v5488_v27, %v5492_v57  ;;  %v3804_v27 = vrot.slane %v3802_v49, 4  ;;  %v4445_v57 = vrot.slane %v4396_v25, 7 }
 0x2f0   : > { %3947 = vrot.lane.b32.xlu0 %v3909_v42, %s8541_s22  ;;  %3263 = vst.msk [vmem:[#allocation3 + $0x1b0] sm:$0xf] %vm1100_vm10, %v3228_v29  ;;  %6359 = vmatprep.mubr.bf16.mxu1 %v8391_v32  ;;  %v11674_v43 = vld [vmem:[#allocation2 + $0x38] sm:$0xf]  ;;  %v5082_v29 = vrot.slane %v5080_v2, 6 }
 0x2f1   : > { %4730 = vrot.lane.b32.xlu1 %v4620_v41, %s8541_s22  ;;  %6360 = vmatmul.mubr.bf16.gmra.mxu1 %v7661_v16  ;;  %v5085_v41 = vrot.slane %v5083_v61, 7  ;;  %v11688_v16 = vld [vmem:[#allocation2 + $0x44] sm:$0xf]  ;;  %v4447_v9 = vrot.slane %v4445_v57, 4  ;;  %v3806_v39 = vsel %vm8717_vm5, %v3804_v27, %v3805_v36 }
 0x2f2   : > { %v3226_v38 = vpop.permute.xlu0 %3225  ;;  %v4553_v49 = vld [vmem:[#allocation2 + $0x44] sm:$0xf]  ;;  %v4448_v60 = vrot.slane %v11688_v16, 7 }
 0x2f3   : > { %3262 = vst.msk [vmem:[#allocation3 + $0x194] sm:$0xf] %vm1100_vm10, %v3226_v38  ;;  %v2683_v50 = vpop.permute.xlu1 %2682  ;;  %v3808_v38 = vrot.slane %v11674_v43, 5  ;;  %v5086_v14 = vor.u32 %v5085_v41, %v5082_v29  ;;  %v4632_v36 = vshrl.u32 %v4553_v49, 16  ;;  %v4635_v25 = vshll.u32 %v4553_v49, 16 }
 0x2f4   : > { %4728 = vrot.lane.b32.xlu0 %v4611_v51, %s8541_s22  ;;  %2718 = vst.msk [vmem:[#allocation3 + $0x1ac] sm:$0xf] %vm1260_vm11, %v2683_v50  ;;  %v5092_v50 = vrot.slane %v5090_v58, 6  ;;  %v4449_v54 = vsel %vm8756_vm9, %v4447_v9, %v4448_v60  ;;  %v4089_v29 = vshrl.u32 %v11634_v4, 16  ;;  %v11720_v41 = vld [vmem:[#allocation2 + $0x3c] sm:$0xf] }
 0x2f5   : > { %5370 = vrot.lane.b32.xlu1 %v5324_v48, %s8541_s22  ;;  %v3809_v51 = vsel %vm8717_vm5, %v3807_v20, %v3808_v38  ;;  %v5095_v48 = vrot.slane %v5093_v15, 7  ;;  %v11716_v20 = vrot.slane %v4632_v36, 7  ;;  %v11728_v9 = vld [vmem:[#allocation2 + $0x40] sm:$0xf] }
 0x2f6   : > { %v2681_v7 = vpop.permute.xlu0 %2680 }
 0x2f7   : > { %2717 = vst.msk [vmem:[#allocation3 + $0x190] sm:$0xf] %vm1260_vm11, %v2681_v7  ;;  %v3384_v17 = vpop.permute.xlu1 %3383  ;;  %v4444_v7 = vrot.slane %v4442_v0, 4  ;;  %v5078_v0 = vrot.slane %v11601_v3, 4 }
 0x2f8   : > { %5368 = vrot.lane.b32.xlu0 %v5321_v35, %s8541_s22  ;;  %3419 = vst.msk [vmem:[#allocation3 + $0x1b0] sm:$0xf] %vm1260_vm11, %v3384_v17  ;;  %v4552_v35 = vld [vmem:[#allocation2 + $0x40] sm:$0xf]  ;;  %v5088_v17 = vrot.slane %v5086_v14, 4 }
 0x2f9   : > { %4209 = vrot.lane.b32.xlu1 %v4088_v21, %s8542_s23  ;;  %v11704_v21 = vor.u32 %v5095_v48, %v5092_v50  ;;  %v4446_v12 = vsel %vm8756_vm9, %v4444_v7, %v4445_v57  ;;  %v4623_v61 = vshrl.u32 %v4552_v35, 16  ;;  %v5087_v15 = vsel %vm8825_vm14, %v5078_v0, %v5086_v14  ;;  %v3912_v50 = vld [vmem:[#allocation2 + $0x40] sm:$0xf] }
 0x2fa   : > { %v3382_v23 = vpop.permute.xlu0 %3381  ;;  %v4626_v27 = vshll.u32 %v4552_v35, 16  ;;  %v4095_v57 = vshll.u32 %v4014_v55, 16  ;;  %v4637_v14 = vor.u32 %v4635_v25, %v11716_v20  ;;  %v4621_v0 = vrot.slane %v11621_v33, 4 }
 0x2fb   : > { %3418 = vst.msk [vmem:[#allocation3 + $0x194] sm:$0xf] %vm1260_vm11, %v3382_v23  ;;  %v1717_v42 = vpop.permute.xlu1 %1716 }
 0x2fc   : > { %4207 = vrot.lane.b32.xlu0 %v4078_v22, %s8542_s23  ;;  %1751 = vst.msk [vmem:[#allocation3 + $0x1c4] sm:$0xf] %vm1100_vm10, %v1717_v42  ;;  %v5097_v22 = vsel %vm8825_vm14, %v5088_v17, %v11704_v21  ;;  %v7978_v42 = vpop.f32.mrf.mxu0 }
 0x2fd   : > { %4832 = vrot.lane.b32.xlu1 %v4793_v11, %s8542_s23  ;;  %v4099_v11 = vshrl.u32 %v4014_v55, 16  ;;  %v4091_v55 = vrot.slane %v4089_v29, 4 }
 0x2fe   : > { %v1082_v6 = vpop.permute.xlu0 %1081  ;;  %v7979_v58 = vpop.f32.mrf.mxu0 }
 0x2ff   : > { %1117 = vst.msk [vmem:[#allocation3 + $0x1c0] sm:$0xf] %vm1100_vm10, %v1082_v6  ;;  %v2839_v32 = vpop.permute.xlu1 %2838  ;;  %v7920_v6 = vpop.f32.mrf.mxu1  ;;  %v7980_v4 = vadd.f32 %v7979_v58, %v7978_v42  ;;  %v4101_v7 = vrot.slane %v4099_v11, 4  ;;  %v11741_v42 = vld [vmem:[#allocation2 + $0x44] sm:$0xf] }
 0x300   : > { %4830 = vrot.lane.b32.xlu0 %v4792_v63, %s8542_s23  ;;  %2874 = vst.msk [vmem:[#allocation3 + $0x1ac] sm:$0xf] %vm1420_vm12, %v2839_v32  ;;  %v4625_v63 = vrot.slane %v4623_v61, 7  ;;  %v6314_v32 = vadd.f32 %v11275_v26, %v11537_v37  ;;  %v7981_v48 = vpop.f32.mrf.mxu0 }
 0x301   : > { %3851 = vrot.lane.b32.xlu1 %v3809_v51, %s8540_s21 }
 0x302   : > { %v2837_v8 = vpop.permute.xlu0 %2836  ;;  %v4630_v49 = vrot.slane %v4625_v63, 4  ;;  %v7982_v36 = vpop.f32.mrf.mxu0  ;;  %v4628_v61 = vor.u32 %v4626_v27, %v4625_v63  ;;  %v4105_v63 = vshll.u32 %v11741_v42, 16  ;;  %v4092_v27 = vor.u32 %v4091_v55, %v11659_v28 }
 0x303   : > { %2873 = vst.msk [vmem:[#allocation3 + $0x190] sm:$0xf] %vm1420_vm12, %v2837_v8  ;;  %v3486_v62 = vpop.permute.xlu1 %3485  ;;  %v7921_v8 = vpop.f32.mrf.mxu1  ;;  %v11774_v36 = vld [vmem:[#allocation2 + $0x40] sm:$0xf] }
 0x304   : > { %3849 = vrot.lane.b32.xlu0 %v3806_v39, %s8540_s21  ;;  %3521 = vst.msk [vmem:[#allocation3 + $0x1b0] sm:$0xf] %vm1420_vm12, %v3486_v62  ;;  %v5326_v39 = vrot.slane %v11720_v41, 7  ;;  %v11733_v62 = vadd.f32 %v7980_v4, %v6314_v32  ;;  %v11736_v35 = vadd.f32 %v7921_v8, %v7920_v6  ;;  %v4638_v25 = vsel %vm9025_vm6, %v4630_v49, %v4637_v14  ;;  %v3758_v32 = vld [vmem:[#allocation2 + $0x3c] sm:$0xf] }
 0x305   : > { %4491 = vrot.lane.b32.xlu1 %v4449_v54, %s8540_s21  ;;  %v5329_v41 = vrot.slane %v11728_v9, 7  ;;  %v4629_v6 = vsel %vm9025_vm6, %v4621_v0, %v4628_v61  ;;  %v11767_v8 = vrot.slane %v4105_v63, 5  ;;  %v4093_v14 = vrot.slane %v4092_v27, 4  ;;  %v5020_v0 = vld [vmem:[#allocation2 + $0x48] sm:$0xf] }
 0x306   : > { %v3484_v2 = vpop.permute.xlu0 %3483  ;;  %v11786_v63 = vld [vmem:[#allocation2 + $0x48] sm:$0xf]  ;;  %v3810_v27 = vrot.slane %v3808_v38, 4 }
 0x307   : > { %3520 = vst.msk [vmem:[#allocation3 + $0x194] sm:$0xf] %vm1420_vm12, %v3484_v2  ;;  %v1876_v23 = vpop.permute.xlu1 %1875  ;;  %v3911_v2 = vld [vmem:[#allocation2 + $0x3c] sm:$0xf] }
 0x308   : > { %4489 = vrot.lane.b32.xlu0 %v4446_v12, %s8540_s21  ;;  %1910 = vst.msk [vmem:[#allocation3 + $0x1c4] sm:$0xf] %vm1260_vm11, %v1876_v23  ;;  %v7923_v12 = vpop.f32.mrf.mxu1  ;;  %v4097_v23 = vrot.slane %v4095_v57, 5 }
 0x309   : > { %5218 = vrot.lane.b32.xlu1 %v5097_v22, %s8540_s21 }
 0x30a   : > { %v1242_v3 = vpop.permute.xlu0 %1241  ;;  %v8395_v17 = vld [vmem:[#allocation3 + $0x190] ss:$28 sps:$4 sm:$0xff]   ;;  %v7924_v11 = vpop.f32.mrf.mxu1  ;;  %v4102_v33 = vor.u32 %v4101_v7, %v4097_v23  ;;  %v4098_v61 = vsel %vm8838_vm15, %v4093_v14, %v4097_v23  ;;  %v4109_v14 = vshrl.u32 %v11741_v42, 16 }
 0x30b   : > { %1277 = vst.msk [vmem:[#allocation3 + $0x1c0] sm:$0xf] %vm1260_vm11, %v1242_v3  ;;  %v2143_v51 = vpop.permute.xlu1 %2142  ;;  %v5328_v3 = vrot.slane %v5326_v39, 4  ;;  %v11748_v58 = vadd.f32 %v7924_v11, %v7923_v12  ;;  %v11777_v12 = vld [vmem:[#allocation2 + $0x48] sm:$0xf]  ;;  %v3814_v11 = vrot.slane %v11774_v36, 5 }
 0x30c   : > { %5216 = vrot.lane.b32.xlu0 %v5087_v15, %s8540_s21  ;;  %2177 = vst.msk [vmem:[#allocation3 + $0x1c4] sm:$0xf] %vm1420_vm12, %v2143_v51  ;;  %v5325_v15 = vrot.slane %v5323_v46, 4  ;;  %v4103_v46 = vrot.slane %v4102_v33, 4  ;;  %v5019_v51 = vld [vmem:[#allocation2 + $0x44] sm:$0xf] }
 0x30d   : > { %3953 = vrot.lane.b32.xlu1 %v3912_v50, %s8541_s22  ;;  %v5330_v52 = vsel %vm8756_vm9, %v5328_v3, %v5329_v41 }
 0x30e   : > { %v1402_v26 = vpop.permute.xlu0 %1401  ;;  %v8393_v54 = vld [vmem:[#allocation3 + $0x194] ss:$28 sps:$4 sm:$0xff]   ;;  %v5327_v50 = vsel %vm8756_vm9, %v5325_v15, %v5326_v39  ;;  %v4108_v39 = vsel %vm8838_vm15, %v4103_v46, %v11767_v8  ;;  %v5110_v15 = vshrl.u32 %v5020_v0, 16  ;;  %v11794_v46 = vld [vmem:[#allocation2 + $0x4c] sm:$0xf] }
 0x30f   : > { %1437 = vst.msk [vmem:[#allocation3 + $0x1c0] sm:$0xf] %vm1420_vm12, %v1402_v26  ;;  %v3230_v22 = vpop.permute.xlu1 %3229  ;;  %6463 = vmatprep.mubr.bf16.mxu0 %v8393_v54  ;;  %v3811_v26 = vrot.slane %v3758_v32, 5  ;;  %v5100_v54 = vshrl.u32 %v5019_v51, 16 }
 0x310   : > { %3951 = vrot.lane.b32.xlu0 %v3911_v2, %s8541_s22  ;;  %3264 = vst.msk [vmem:[#allocation3 + $0x1cc] sm:$0xf] %vm1100_vm10, %v3230_v22  ;;  %6464 = vmatmul.mubr.bf16.gmra.mxu0 %v8395_v17  ;;  %v5103_v17 = vshll.u32 %v5019_v51, 16  ;;  %v4795_v22 = vld [vmem:[#allocation2 + $0x44] sm:$0xf] }
 0x311   : > { %4734 = vrot.lane.b32.xlu1 %v4638_v25, %s8541_s22  ;;  %v3813_v25 = vrot.slane %v3811_v26, 4  ;;  %v5102_v3 = vrot.slane %v5100_v54, 6  ;;  %v3812_v54 = vsel %vm8717_vm5, %v3810_v27, %v3811_v26  ;;  %v4279_v26 = vld [vmem:[#allocation2 + $0x54] sm:$0xf]  ;;  %v4644_v27 = vshll.u32 %v11786_v63, 16 }
 0x312   : > { %v2421_v29 = vpop.permute.xlu0 %2420  ;;  %v5105_v33 = vrot.slane %v5103_v17, 7 }
 0x313   : > { %2455 = vst.msk [vmem:[#allocation3 + $0x1c8] sm:$0xf] %vm1100_vm10, %v2421_v29  ;;  %v3386_v57 = vpop.permute.xlu1 %3385  ;;  %v4451_v29 = vrot.slane %v11777_v12, 7  ;;  %v3815_v51 = vsel %vm8717_vm5, %v3813_v25, %v3814_v11 }
 0x314   : > { %4732 = vrot.lane.b32.xlu0 %v4629_v6, %s8541_s22  ;;  %3420 = vst.msk [vmem:[#allocation3 + $0x1cc] sm:$0xf] %vm1260_vm11, %v3386_v57  ;;  %v5113_v6 = vshll.u32 %v5020_v0, 16  ;;  %v11791_v57 = vld [vmem:[#allocation2 + $0x4c] sm:$0xf]  ;;  %v4450_v0 = vrot.slane %v4448_v60, 4 }
 0x315   : > { %5374 = vrot.lane.b32.xlu1 %v5330_v52, %s8541_s22  ;;  %v4794_v52 = vld [vmem:[#allocation2 + $0x40] sm:$0xf]  ;;  %v4453_v43 = vrot.slane %v4451_v29, 4  ;;  %v4454_v38 = vrot.slane %v11791_v57, 7  ;;  %v4653_v60 = vshll.u32 %v11794_v46, 16 }
 0x316   : > { %v2685_v4 = vpop.permute.xlu0 %2684  ;;  %v5496_v28 = vld [vmem:[#allocation3 + $0x1c0] sm:$0xff] }
 0x317   : > { %2719 = vst.msk [vmem:[#allocation3 + $0x1c8] sm:$0xf] %vm1260_vm11, %v2685_v4  ;;  %v7669_v48 = vcombine.high %v5496_v28, %v5496_v28  ;;  %v7668_v49 = vcombine.low %v5496_v28, %v5496_v28  ;;  %v3488_v7 = vpop.permute.xlu1 %3487  ;;  %v5106_v4 = vor.u32 %v5105_v33, %v5102_v3  ;;  %v5112_v28 = vrot.slane %v5110_v15, 6 }
 0x318   : > { %5372 = vrot.lane.b32.xlu0 %v5327_v50, %s8541_s22  ;;  %3522 = vst.msk [vmem:[#allocation3 + $0x1cc] sm:$0xf] %vm1420_vm12, %v3488_v7  ;;  %v4641_v50 = vshrl.u32 %v11786_v63, 16  ;;  %v4455_v33 = vsel %vm8756_vm9, %v4453_v43, %v4454_v38  ;;  %v11838_v43 = vld [vmem:[#allocation2 + $0x5c] sm:$0xf] }
 0x319   : > { %6367 = vmatprep.mubr.bf16.mxu1 %v7669_v48  ;;  %4213 = vrot.lane.b32.xlu1 %v4108_v39, %s8542_s23  ;;  %v5115_v48 = vrot.slane %v5113_v6, 7  ;;  %v4650_v39 = vshrl.u32 %v11794_v46, 16  ;;  %v4337_v46 = vrot.slane %v4335_v24, 4 }
 0x31a   : > { %v2841_v2 = vpop.permute.xlu0 %2840  ;;  %6368 = vmatmul.mubr.bf16.gmra.mxu1 %v7668_v49  ;;  %v4016_v49 = vld [vmem:[#allocation2 + $0x48] sm:$0xf]  ;;  %v11814_v25 = vrot.slane %v4641_v50, 7  ;;  %v11832_v50 = vld [vmem:[#allocation2 + $0x44] sm:$0xf] }
 0x31b   : > { %2875 = vst.msk [vmem:[#allocation3 + $0x1c8] sm:$0xf] %vm1420_vm12, %v2841_v2  ;;  %v3840_v55 = vpop.permute.xlu1 %3839  ;;  %v4115_v3 = vshll.u32 %v4016_v49, 16  ;;  %v11821_v16 = vor.u32 %v5115_v48, %v5112_v28  ;;  %v11825_v6 = vrot.slane %v4650_v39, 7 }
 0x31c   : > { %4211 = vrot.lane.b32.xlu0 %v4098_v61, %s8542_s23  ;;  %3889 = vst.msk [vmem:[#allocation3 + $0x2c] sm:$0xf] %vm1100_vm10, %v3840_v55  ;;  %v5098_v61 = vrot.slane %v11704_v21, 4  ;;  %v4119_v21 = vshrl.u32 %v4016_v49, 16  ;;  %v4648_v49 = vrot.slane %v11814_v25, 4 }
 0x31d   : > { %4836 = vrot.lane.b32.xlu1 %v4795_v22, %s8542_s23  ;;  %v5108_v22 = vrot.slane %v5106_v4, 4 }
 0x31e   : > { %v3838_v23 = vpop.permute.xlu0 %3837  ;;  %v4121_v24 = vrot.slane %v4119_v21, 4  ;;  %v3685_v21 = vshrl.u32 %v11523_v10, 16  ;;  %v3539_v10 = vld [vmem:[#allocation2 + $0x58] sm:$0xf] }
 0x31f   : > { %3888 = vst.msk [vmem:[#allocation3 + $0x10] sm:$0xf] %vm1100_vm10, %v3838_v23  ;;  %v4480_v32 = vpop.permute.xlu1 %4479  ;;  %v4639_v23 = vrot.slane %v11716_v20, 4  ;;  %v5117_v48 = vsel %vm8825_vm14, %v5108_v22, %v11821_v16 }
 0x320   : > { %4834 = vrot.lane.b32.xlu0 %v4794_v52, %s8542_s23  ;;  %4529 = vst.msk [vmem:[#allocation3 + $0x30] sm:$0xf] %vm1100_vm10, %v4480_v32  ;;  %v4338_v52 = vrot.slane %v4279_v26, 5  ;;  %v4280_v32 = vld [vmem:[#allocation2 + $0x58] sm:$0xf]  ;;  %v4646_v26 = vor.u32 %v4644_v27, %v11814_v25  ;;  %v4957_v27 = vrot.slane %v4955_v30, 4 }
 0x321   : > { %3855 = vrot.lane.b32.xlu1 %v3815_v51, %s8540_s21  ;;  %v4452_v51 = vsel %vm8756_vm9, %v4450_v0, %v4451_v29  ;;  %v4341_v28 = vrot.slane %v4280_v32, 5  ;;  %v5107_v29 = vsel %vm8825_vm14, %v5098_v61, %v5106_v4  ;;  %v4655_v0 = vor.u32 %v4653_v60, %v11825_v6  ;;  %v3913_v30 = vld [vmem:[#allocation2 + $0x44] sm:$0xf] }
 0x322   : > { %v4478_v7 = vpop.permute.xlu0 %4477  ;;  %v5497_v17 = vld [vmem:[#allocation3 + $0x1c8] sm:$0xff]  ;;  %v5332_v61 = vrot.slane %v11832_v50, 7  ;;  %v4340_v22 = vrot.slane %v4338_v52, 4 }
 0x323   : > { %4528 = vst.msk [vmem:[#allocation3 + $0x14] sm:$0xf] %vm1100_vm10, %v4478_v7  ;;  %v7671_v2 = vcombine.high %v5497_v17, %v5497_v17  ;;  %v7670_v12 = vcombine.low %v5497_v17, %v5497_v17  ;;  %v3942_v55 = vpop.permute.xlu1 %3941  ;;  %v11847_v7 = vrot.slane %v4115_v3, 5  ;;  %v4339_v17 = vsel %vm8717_vm5, %v4337_v46, %v4338_v52  ;;  %v3914_v46 = vld [vmem:[#allocation2 + $0x48] sm:$0xf] }
 0x324   : > { %3853 = vrot.lane.b32.xlu0 %v3812_v54, %s8540_s21  ;;  %3991 = vst.msk [vmem:[#allocation3 + $0x2c] sm:$0xf] %vm1260_vm11, %v3942_v55  ;;  %v4901_v54 = vld [vmem:[#allocation2 + $0x54] sm:$0xf]  ;;  %v4343_v39 = vrot.slane %v4341_v28, 4  ;;  %v4342_v52 = vsel %vm8717_vm5, %v4340_v22, %v4341_v28 }
 0x325   : > { %6471 = vmatprep.mubr.bf16.mxu0 %v7671_v2  ;;  %4495 = vrot.lane.b32.xlu1 %v4455_v33, %s8540_s21  ;;  %v4344_v2 = vrot.slane %v11838_v43, 5  ;;  %v11858_v55 = vld [vmem:[#allocation2 + $0x4c] sm:$0xf]  ;;  %4383 = vst.msk [vmem:[#allocation3 + $0x148] sm:$0xf] %vm791_vm0, %v4339_v17  ;;  %v4958_v3 = vrot.slane %v4901_v54, 6  ;;  %v4656_v17 = vsel %vm9025_vm6, %v4648_v49, %v4655_v0 }
 0x326   : > { %6472 = vmatmul.mubr.bf16.gmra.mxu0 %v7670_v12  ;;  %v3940_v15 = vpop.permute.xlu0 %3939  ;;  %v3538_v12 = vld [vmem:[#allocation2 + $0x54] sm:$0xf]  ;;  %v11863_v33 = vld [vmem:[#allocation2 + $0x48] sm:$0xf]  ;;  %4384 = vst.msk [vmem:[#allocation3 + $0x164] sm:$0xf] %vm791_vm0, %v4342_v52 }
 0x327   : > { %3990 = vst.msk [vmem:[#allocation3 + $0x10] sm:$0xf] %vm1260_vm11, %v3940_v15  ;;  %8198 = vmatprep.mubr.msk.bf16.mxu0 %vm8544_vm13, %v8543_v47  ;;  %v4723_v63 = vpop.permute.xlu1 %4722  ;;  %v4345_v60 = vsel %vm8717_vm5, %v4343_v39, %v4344_v2  ;;  %v4961_v15 = vrot.slane %v11849_v53, 6  ;;  %v4960_v25 = vrot.slane %v4958_v3, 4  ;;  %v3695_v28 = vshrl.u32 %v3538_v12, 16 }
 0x328   : > { %4493 = vrot.lane.b32.xlu0 %v4452_v51, %s8540_s21  ;;  %4772 = vst.msk [vmem:[#allocation3 + $0x30] sm:$0xf] %vm1260_vm11, %v4723_v63  ;;  %v3691_v51 = vshll.u32 %v3538_v12, 16  ;;  %v4122_v63 = vor.u32 %v4121_v24, %v11847_v7  ;;  %v5334_v54 = vrot.slane %v5332_v61, 4  ;;  %v5335_v53 = vrot.slane %v11863_v33, 7 }
 0x329   : > { %5222 = vrot.lane.b32.xlu1 %v5117_v48, %s8540_s21  ;;  %4385 = vst.msk [vmem:[#allocation3 + $0x180] sm:$0xf] %vm791_vm0, %v4345_v60  ;;  %v4125_v48 = vshll.u32 %v11858_v55, 16  ;;  %v4962_v24 = vsel %vm8745_vm8, %v4960_v25, %v4961_v15  ;;  %v4959_v42 = vsel %vm8745_vm8, %v4957_v27, %v4958_v3  ;;  %v3701_v12 = vshll.u32 %v3539_v10, 16  ;;  %v4903_v22 = vld [vmem:[#allocation2 + $0x5c] sm:$0xf] }
 0x32a   : > { %v4721_v4 = vpop.permute.xlu0 %4720  ;;  %5006 = vst.msk [vmem:[#allocation3 + $0x14c] sm:$0xf] %vm791_vm0, %v4962_v24  ;;  %5005 = vst.msk [vmem:[#allocation3 + $0x130] sm:$0xf] %vm791_vm0, %v4959_v42  ;;  %v3693_v39 = vrot.slane %v3691_v51, 5  ;;  %v4647_v3 = vsel %vm9025_vm6, %v4639_v23, %v4646_v26  ;;  %v3697_v49 = vrot.slane %v3695_v28, 4 }
 0x32b   : > { %4771 = vst.msk [vmem:[#allocation3 + $0x14] sm:$0xf] %vm1260_vm11, %v4721_v4  ;;  %v4202_v32 = vpop.permute.xlu1 %4201  ;;  %v3705_v4 = vshrl.u32 %v3539_v10, 16  ;;  %v3687_v0 = vrot.slane %v3685_v21, 4  ;;  %v11907_v52 = vld [vmem:[#allocation2 + $0x60] sm:$0xf] }
 0x32c   : > { %5220 = vrot.lane.b32.xlu0 %v5107_v29, %s8540_s21  ;;  %4251 = vst.msk [vmem:[#allocation3 + $0x2c] sm:$0xf] %vm1420_vm12, %v4202_v32  ;;  %v11882_v29 = vrot.slane %v4109_v14, 4  ;;  %v11893_v14 = vld [vmem:[#allocation2 + $0x60] sm:$0xf]  ;;  %v5331_v32 = vrot.slane %v5329_v41, 4  ;;  %v3698_v26 = vor.u32 %v3697_v49, %v3693_v39 }
 0x32d   : > { %3957 = vrot.lane.b32.xlu1 %v3914_v46, %s8541_s22  ;;  %v4123_v25 = vrot.slane %v4122_v63, 4  ;;  %v11910_v27 = vrot.slane %v4125_v48, 5  ;;  %v4347_v20 = vrot.slane %v11893_v14, 5  ;;  %v3688_v9 = vor.u32 %v3687_v0, %v11578_v56  ;;  %v5021_v42 = vld [vmem:[#allocation2 + $0x4c] sm:$0xf] }
 0x32e   : > { %v4200_v1 = vpop.permute.xlu0 %4199  ;;  %v4112_v10 = vor.u32 %v11882_v29, %v11767_v8  ;;  %v4346_v41 = vrot.slane %v4344_v2, 4  ;;  %v4964_v21 = vrot.slane %v4903_v22, 6  ;;  %v3703_v51 = vrot.slane %v3701_v12, 5  ;;  %v3540_v2 = vld [vmem:[#allocation2 + $0x5c] sm:$0x1] }
 0x32f   : > { %4250 = vst.msk [vmem:[#allocation3 + $0x10] sm:$0xf] %vm1420_vm12, %v4200_v1  ;;  %v4825_v60 = vpop.permute.xlu1 %4824  ;;  %v4967_v46 = vrot.slane %v11907_v52, 6  ;;  %v4963_v63 = vrot.slane %v4961_v15, 4  ;;  %v3707_v48 = vrot.slane %v3705_v4, 4  ;;  %v3699_v29 = vrot.slane %v3698_v26, 4 }
 0x330   : > { %3955 = vrot.lane.b32.xlu0 %v3913_v30, %s8541_s22  ;;  %4874 = vst.msk [vmem:[#allocation3 + $0x30] sm:$0xf] %vm1420_vm12, %v4825_v60  ;;  %v3689_v28 = vrot.slane %v3688_v9, 4  ;;  %v4348_v56 = vsel %vm8717_vm5, %v4346_v41, %v4347_v20  ;;  %v4966_v43 = vrot.slane %v4964_v21, 4  ;;  %v5336_v15 = vsel %vm8756_vm9, %v5334_v54, %v5335_v53  ;;  %v11931_v1 = vld [vmem:[#allocation2 + $0x44] sm:$0xf] }
 0x331   : > { %4738 = vrot.lane.b32.xlu1 %v4656_v17, %s8541_s22  ;;  %4386 = vst.msk [vmem:[#allocation3 + $0x19c] sm:$0xf] %vm791_vm0, %v4348_v56  ;;  %v5333_v24 = vsel %vm8756_vm9, %v5331_v32, %v5332_v61  ;;  %v8545_v17 = vmov 0   ;;  %v3704_v12 = vsel %vm8838_vm15, %v3699_v29, %v3703_v51  ;;  %v4113_v22 = vrot.slane %v4112_v10, 4  ;;  %v5026_v14 = vld [vmem:[#allocation2 + $0x60] sm:$0xf] }
 0x332   : > { %v4823_v23 = vpop.permute.xlu0 %4822  ;;  %819 = vst.msk [vmem:[#allocation2 + $0x6c] sm:$0xf] %vm791_vm0, %v8545_v17  ;;  %v3694_v54 = vsel %vm8838_vm15, %v3689_v28, %v3693_v39  ;;  %v4968_v4 = vsel %vm8745_vm8, %v4966_v43, %v4967_v46  ;;  %3747 = vst.msk [vmem:[#allocation3 + $0x1b4] sm:$0xf] %vm791_vm0, %v3704_v12  ;;  %v4965_v61 = vsel %vm8745_vm8, %v4963_v63, %v4964_v21  ;;  %v3711_v39 = vshll.u32 %v3540_v2, 16 }
 0x333   : > { %4873 = vst.msk [vmem:[#allocation3 + $0x14] sm:$0xf] %vm1420_vm12, %v4823_v23  ;;  %v3844_v8 = vpop.permute.xlu1 %3843  ;;  %v3708_v60 = vor.u32 %v3707_v48, %v3703_v51  ;;  %v4128_v32 = vsel %vm8838_vm15, %v4123_v25, %v11910_v27  ;;  %v3817_v49 = vrot.slane %v11931_v1, 5  ;;  %v5022_v23 = vld [vmem:[#allocation2 + $0x50] sm:$0xf]  ;;  %v5120_v26 = vshrl.u32 %v5021_v42, 16 }
 0x334   : > { %4736 = vrot.lane.b32.xlu0 %v4647_v3, %s8541_s22  ;;  %3891 = vst.msk [vmem:[#allocation3 + $0x64] sm:$0xf] %vm1100_vm10, %v3844_v8  ;;  %v5123_v9 = vshll.u32 %v5021_v42, 16  ;;  %v3713_v21 = vrot.slane %v3711_v39, 5  ;;  %v6322_v51 = vadd.f32 %v11584_v31, %v11537_v37  ;;  %v4118_v28 = vsel %vm8838_vm15, %v4113_v22, %v11847_v7  ;;  %v11968_v43 = vld [vmem:[#allocation2 + $0x48] sm:$0xf] }
 0x335   : > { %5378 = vrot.lane.b32.xlu1 %v5336_v15, %s8541_s22  ;;  %3746 = vst.msk [vmem:[#allocation3 + $0x198] sm:$0xf] %vm791_vm0, %v3694_v54  ;;  %5008 = vst.msk [vmem:[#allocation3 + $0x184] sm:$0xf] %vm791_vm0, %v4968_v4  ;;  %v3709_v41 = vrot.slane %v3708_v60, 4  ;;  %v3819_v15 = vrot.slane %v3817_v49, 4 }
 0x336   : > { %v3842_v30 = vpop.permute.xlu0 %3841  ;;  %v7984_v50 = vpop.f32.mrf.mxu0  ;;  %5007 = vst.msk [vmem:[#allocation3 + $0x168] sm:$0xf] %vm791_vm0, %v4965_v61  ;;  %v8415_v48 = vld [vmem:[#allocation3 + $0x10] ss:$28 sps:$4 sm:$0xff]   ;;  %v4797_v7 = vld [vmem:[#allocation2 + $0x4c] sm:$0xf] }
 0x337   : > { %3890 = vst.msk [vmem:[#allocation3 + $0x48] sm:$0xf] %vm1100_vm10, %v3842_v30  ;;  %v4484_v3 = vpop.permute.xlu1 %4483  ;;  %v3714_v2 = vsel %vm8838_vm15, %v3709_v41, %v3713_v21  ;;  %v4400_v30 = vld [vmem:[#allocation2 + $0x50] sm:$0xf]  ;;  %v5122_v17 = vrot.slane %v5120_v26, 6  ;;  %v5125_v12 = vrot.slane %v5123_v9, 7 }
 0x338   : > { %5376 = vrot.lane.b32.xlu0 %v5333_v24, %s8541_s22  ;;  %4531 = vst.msk [vmem:[#allocation3 + $0x68] sm:$0xf] %vm1100_vm10, %v4484_v3  ;;  %v7985_v0 = vpop.f32.mrf.mxu0  ;;  %v5130_v54 = vshrl.u32 %v5022_v23, 16  ;;  %v5133_v4 = vshll.u32 %v5022_v23, 16  ;;  %v3820_v39 = vrot.slane %v11968_v43, 5 }
 0x339   : > { %v7926_v10 = vpop.f32.mrf.mxu1  ;;  %4217 = vrot.lane.b32.xlu1 %v4128_v32, %s8542_s23  ;;  %v7986_v63 = vadd.f32 %v7985_v0, %v7984_v50  ;;  %3748 = vst.msk [vmem:[#allocation3 + $0x1d0] sm:$0xf] %vm791_vm0, %v3714_v2  ;;  %v11982_v50 = vld [vmem:[%s12688_s4] ss:$0 sm:$0xff]  ;;  %v4796_v3 = vld [vmem:[#allocation2 + $0x48] sm:$0xf]  ;;  %v5126_v36 = vor.u32 %v5125_v12, %v5122_v17 }
 0x33a   : > { %v4482_v25 = vpop.permute.xlu0 %4481  ;;  %v8417_v8 = vld [vmem:[#allocation3 + $0x14] ss:$28 sps:$4 sm:$0xff]   ;;  %v7987_v29 = vpop.f32.mrf.mxu0  ;;  %v6325_v22 = vadd.f32 %v11982_v50, %v11612_v19  ;;  %v3816_v0 = vrot.slane %v3814_v11, 4  ;;  %v4457_v10 = vrot.slane %v4400_v30, 7  ;;  %v3821_v9 = vsel %vm8717_vm5, %v3819_v15, %v3820_v39  ;;  %v12000_v41 = vld [vmem:[#allocation2 + $0x54] sm:$0xf] }
 0x33b   : > { %4530 = vst.msk [vmem:[#allocation3 + $0x4c] sm:$0xf] %vm1100_vm10, %v4482_v25  ;;  %v7927_v56 = vpop.f32.mrf.mxu1  ;;  %v11972_v37 = vadd.f32 %v7986_v63, %v6322_v51  ;;  %v5211_v31 = vpop.permute.xlu1 %5210  ;;  %6511 = vmatprep.mubr.bf16.mxu1 %v8417_v8  ;;  %v5132_v11 = vrot.slane %v5130_v54, 6  ;;  %v5135_v51 = vrot.slane %v5133_v4, 7  ;;  %v4557_v25 = vld [vmem:[#allocation2 + $0x54] sm:$0xf] }
 0x33c   : > { %4215 = vrot.lane.b32.xlu0 %v4118_v28, %s8542_s23  ;;  %5260 = vst.msk [vmem:[#allocation3 + $0x34] sm:$0xf] %vm1100_vm10, %v5211_v31  ;;  %v7988_v24 = vpop.f32.mrf.mxu0  ;;  %6512 = vmatmul.mubr.bf16.vlgmr.msra.gmra.mxu1 %v8415_v48  ;;  %v4459_v21 = vrot.slane %v4457_v10, 4  ;;  %v3818_v48 = vsel %vm8717_vm5, %v3816_v0, %v3817_v49  ;;  %v4460_v8 = vrot.slane %v12000_v41, 7  ;;  %v4556_v56 = vld [vmem:[#allocation2 + $0x50] sm:$0xf] }
 0x33d   : > { %v7929_v42 = vpop.f32.mrf.mxu1  ;;  %4840 = vrot.lane.b32.xlu1 %v4797_v7, %s8542_s23  ;;  %v7989_v61 = vadd.f32 %v7988_v24, %v7987_v29  ;;  %v4456_v29 = vrot.slane %v4454_v38, 4  ;;  %v5128_v1 = vrot.slane %v5126_v36, 4  ;;  %v12018_v31 = vor.u32 %v5135_v51, %v5132_v11  ;;  %v4018_v24 = vld [vmem:[#allocation2 + $0x50] sm:$0xf]  ;;  %v4020_v41 = vld [vmem:[#allocation2 + $0x58] sm:$0xf] }
 0x33e   : > { %v5209_v60 = vpop.permute.xlu0 %5208  ;;  %v4461_v2 = vsel %vm8756_vm9, %v4459_v21, %v4460_v8  ;;  %v4668_v49 = vshrl.u32 %v4557_v25, 16  ;;  %v5118_v38 = vrot.slane %v11821_v16, 4  ;;  %v4659_v30 = vshrl.u32 %v4556_v56, 16 }
 0x33f   : > { %5259 = vst.msk [vmem:[#allocation3 + $0x18] sm:$0xf] %vm1100_vm10, %v5209_v60  ;;  %v7930_v32 = vpop.f32.mrf.mxu1  ;;  %v11991_v23 = vadd.f32 %v7989_v61, %v6325_v22  ;;  %v3946_v26 = vpop.permute.xlu1 %3945  ;;  %v4458_v57 = vsel %vm8756_vm9, %v4456_v29, %v4457_v10  ;;  %v4671_v12 = vshll.u32 %v4557_v25, 16  ;;  %v4139_v54 = vshrl.u32 %v4018_v24, 16  ;;  %v12034_v22 = vld [vmem:[#allocation2 + $0x4c] sm:$0xf] }
 0x340   : > { %4838 = vrot.lane.b32.xlu0 %v4796_v3, %s8542_s23  ;;  %v11994_v19 = vadd.f32 %v7930_v32, %v7929_v42  ;;  %3993 = vst.msk [vmem:[#allocation3 + $0x64] sm:$0xf] %vm1260_vm11, %v3946_v26  ;;  %v5137_v42 = vsel %vm8825_vm14, %v5128_v1, %v12018_v31  ;;  %v12030_v17 = vrot.slane %v4668_v49, 7  ;;  %v4129_v4 = vshrl.u32 %v11858_v55, 16  ;;  %v12040_v10 = vld [vmem:[#allocation2 + $0x50] sm:$0xf] }
 0x341   : > { %3859 = vrot.lane.b32.xlu1 %v3821_v9, %s8540_s21  ;;  %v5127_v61 = vsel %vm8825_vm14, %v5118_v38, %v5126_v36  ;;  %v4661_v60 = vrot.slane %v4659_v30, 7  ;;  %v4662_v3 = vshll.u32 %v4556_v56, 16  ;;  %v4135_v32 = vshll.u32 %v4018_v24, 16  ;;  %v3916_v55 = vld [vmem:[#allocation2 + $0x50] sm:$0xf] }
 0x342   : > { %v3944_v63 = vpop.permute.xlu0 %3943  ;;  %v4673_v21 = vor.u32 %v4671_v12, %v12030_v17  ;;  %v5338_v11 = vrot.slane %v12034_v22, 7  ;;  %v4141_v51 = vrot.slane %v4139_v54, 4  ;;  %v3915_v25 = vld [vmem:[#allocation2 + $0x4c] sm:$0xf]  ;;  %v4657_v29 = vrot.slane %v11825_v6, 4 }
 0x343   : > { %3992 = vst.msk [vmem:[#allocation3 + $0x48] sm:$0xf] %vm1260_vm11, %v3944_v63  ;;  %v4727_v28 = vpop.permute.xlu1 %4726  ;;  %v4666_v9 = vrot.slane %v4661_v60, 4  ;;  %v12048_v56 = vrot.slane %v4135_v32, 5  ;;  %v6330_v1 = vadd.f32 %v11982_v50, %v11736_v35  ;;  %v12054_v38 = vld [vmem:[#allocation2 + $0x54] sm:$0xf] }
 0x344   : > { %3857 = vrot.lane.b32.xlu0 %v3818_v48, %s8540_s21  ;;  %4774 = vst.msk [vmem:[#allocation3 + $0x68] sm:$0xf] %vm1260_vm11, %v4727_v28  ;;  %v4664_v28 = vor.u32 %v4662_v3, %v4661_v60  ;;  %v5340_v24 = vrot.slane %v5338_v11, 4  ;;  %v5337_v60 = vrot.slane %v5335_v53, 4  ;;  %v4145_v3 = vshll.u32 %v12054_v38, 16 }
 0x345   : > { %4499 = vrot.lane.b32.xlu1 %v4461_v2, %s8540_s21  ;;  %v4131_v2 = vrot.slane %v4129_v4, 4  ;;  %v4674_v6 = vsel %vm9025_vm6, %v4666_v9, %v4673_v21  ;;  %v5023_v21 = vld [vmem:[#allocation2 + $0x54] sm:$0xf] }
 0x346   : > { %v4725_v15 = vpop.permute.xlu0 %4724  ;;  %v4665_v22 = vsel %vm9025_vm6, %v4657_v29, %v4664_v28  ;;  %v5140_v28 = vshrl.u32 %v5023_v21, 16 }
 0x347   : > { %4773 = vst.msk [vmem:[#allocation3 + $0x4c] sm:$0xf] %vm1260_vm11, %v4725_v15  ;;  %v5367_v7 = vpop.permute.xlu1 %5366  ;;  %v4132_v32 = vor.u32 %v4131_v2, %v11910_v27  ;;  %v5143_v2 = vshll.u32 %v5023_v21, 16 }
 0x348   : > { %4497 = vrot.lane.b32.xlu0 %v4458_v57, %s8540_s21  ;;  %5416 = vst.msk [vmem:[#allocation3 + $0x34] sm:$0xf] %vm1260_vm11, %v5367_v7  ;;  %v5341_v57 = vrot.slane %v12040_v10, 7  ;;  %v12191_v10 = vld [vmem:[#allocation2 + $0x54] sm:$0xf] }
 0x349   : > { %5226 = vrot.lane.b32.xlu1 %v5137_v42, %s8540_s21  ;;  %v4142_v42 = vor.u32 %v4141_v51, %v12048_v56 }
 0x34a   : > { %v5365_v16 = vpop.permute.xlu0 %5364  ;;  %v5342_v33 = vsel %vm8756_vm9, %v5340_v24, %v5341_v57 }
 0x34b   : > { %5415 = vst.msk [vmem:[#allocation3 + $0x18] sm:$0xf] %vm1260_vm11, %v5365_v16  ;;  %v4206_v0 = vpop.permute.xlu1 %4205  ;;  %v7990_v26 = vpop.f32.mrf.mxu0  ;;  %v4143_v9 = vrot.slane %v4142_v42, 4 }
 0x34c   : > { %5224 = vrot.lane.b32.xlu0 %v5127_v61, %s8540_s21  ;;  %4253 = vst.msk [vmem:[#allocation3 + $0x64] sm:$0xf] %vm1420_vm12, %v4206_v0  ;;  %v6333_v0 = vadd.f32 %v11982_v50, %v11748_v58 }
 0x34d   : > { %3961 = vrot.lane.b32.xlu1 %v3916_v55, %s8541_s22  ;;  %v7991_v63 = vpop.f32.mrf.mxu0  ;;  %v7932_v48 = vpop.f32.mrf.mxu1 }
 0x34e   : > { %v4204_v36 = vpop.permute.xlu0 %4203  ;;  %v7992_v15 = vadd.f32 %v7991_v63, %v7990_v26  ;;  %v5339_v63 = vsel %vm8756_vm9, %v5337_v60, %v5338_v11  ;;  %v4799_v60 = vld [vmem:[#allocation2 + $0x54] sm:$0xf] }
 0x34f   : > { %4252 = vst.msk [vmem:[#allocation3 + $0x48] sm:$0xf] %vm1420_vm12, %v4204_v36  ;;  %v4829_v49 = vpop.permute.xlu1 %4828  ;;  %v7993_v30 = vpop.f32.mrf.mxu0  ;;  %v3762_v36 = vld [vmem:[#allocation2 + $0x4c] sm:$0xf] }
 0x350   : > { %3959 = vrot.lane.b32.xlu0 %v3915_v25, %s8541_s22  ;;  %4876 = vst.msk [vmem:[#allocation3 + $0x68] sm:$0xf] %vm1420_vm12, %v4829_v49  ;;  %v7933_v7 = vpop.f32.mrf.mxu1  ;;  %v12060_v35 = vadd.f32 %v7992_v15, %v6330_v1  ;;  %v12091_v25 = vrot.slane %v4145_v3, 5  ;;  %v12098_v49 = vld [vmem:[#allocation2 + $0x50] sm:$0xf]  ;;  %v3823_v15 = vrot.slane %v3762_v36, 5 }
 0x351   : > { %4742 = vrot.lane.b32.xlu1 %v4674_v6, %s8541_s22  ;;  %v12063_v54 = vadd.f32 %v7933_v7, %v7932_v48  ;;  %v7994_v16 = vpop.f32.mrf.mxu0  ;;  %v4133_v48 = vrot.slane %v4132_v32, 4  ;;  %v4402_v6 = vld [vmem:[#allocation2 + $0x58] sm:$0xf]  ;;  %v3826_v32 = vrot.slane %v12098_v49, 5 }
 0x352   : > { %v4827_v12 = vpop.permute.xlu0 %4826  ;;  %v8424_v4 = vld [vmem:[#allocation3 + $0x18] ss:$28 sps:$4 sm:$0xff]   ;;  %v7935_v61 = vpop.f32.mrf.mxu1  ;;  %v7995_v26 = vadd.f32 %v7994_v16, %v7993_v30  ;;  %v4148_v1 = vsel %vm8838_vm15, %v4143_v9, %v12091_v25  ;;  %v3825_v3 = vrot.slane %v3823_v15, 4  ;;  %v3822_v9 = vrot.slane %v3820_v39, 4 }
 0x353   : > { %4875 = vst.msk [vmem:[#allocation3 + $0x4c] sm:$0xf] %vm1420_vm12, %v4827_v12  ;;  %v3848_v55 = vpop.permute.xlu1 %3847  ;;  %8199 = vmatmul.mubr.msk.bf16.vlgmr.msra.gmra.mxu0 %vm6243_vm1, %v8424_v4  ;;  %v4138_v42 = vsel %vm8838_vm15, %v4133_v48, %v12048_v56  ;;  %v5024_v4 = vld [vmem:[#allocation2 + $0x58] sm:$0xf]  ;;  %v12109_v56 = vld [vmem:[#allocation2 + $0x5c] sm:$0xf] }
 0x354   : > { %4740 = vrot.lane.b32.xlu0 %v4665_v22, %s8541_s22  ;;  %3893 = vst.msk [vmem:[#allocation3 + $0x9c] sm:$0xf] %vm1100_vm10, %v3848_v55  ;;  %v7936_v53 = vpop.f32.mrf.mxu1  ;;  %8202 = vmatprep.mubr.msk.bf16.mxu0 %vm8544_vm13, %v8543_v47  ;;  %v12083_v58 = vadd.f32 %v7995_v26, %v6333_v0  ;;  %v5142_v22 = vrot.slane %v5140_v28, 6  ;;  %v4463_v0 = vrot.slane %v4402_v6, 7  ;;  %v5150_v26 = vshrl.u32 %v5024_v4, 16 }
 0x355   : > { %5382 = vrot.lane.b32.xlu1 %v5342_v33, %s8541_s22  ;;  %v12086_v51 = vadd.f32 %v7936_v53, %v7935_v61  ;;  %v5145_v61 = vrot.slane %v5143_v2, 7  ;;  %v5153_v33 = vshll.u32 %v5024_v4, 16  ;;  %v4798_v53 = vld [vmem:[#allocation2 + $0x50] sm:$0xf]  ;;  %v3827_v36 = vsel %vm8717_vm5, %v3825_v3, %v3826_v32  ;;  %v4559_v2 = vld [vmem:[#allocation2 + $0x5c] sm:$0xf] }
 0x356   : > { %v3846_v27 = vpop.permute.xlu0 %3845  ;;  %v4466_v48 = vrot.slane %v12109_v56, 7  ;;  %v5152_v43 = vrot.slane %v5150_v26, 6  ;;  %v4462_v6 = vrot.slane %v4460_v8, 4  ;;  %v4689_v26 = vshll.u32 %v4559_v2, 16 }
 0x357   : > { %3892 = vst.msk [vmem:[#allocation3 + $0x80] sm:$0xf] %vm1100_vm10, %v3846_v27  ;;  %v4488_v29 = vpop.permute.xlu1 %4487  ;;  %v5446_v7 = vld [vmem:[#allocation3 + $0x64] sm:$0xff]  ;;  %v5146_v27 = vor.u32 %v5145_v61, %v5142_v22  ;;  %v5155_v39 = vrot.slane %v5153_v33, 7  ;;  %v4155_v33 = vshll.u32 %v4020_v41, 16 }
 0x358   : > { %5380 = vrot.lane.b32.xlu0 %v5339_v63, %s8541_s22  ;;  %4533 = vst.msk [vmem:[#allocation3 + $0xa0] sm:$0xf] %vm1100_vm10, %v4488_v29  ;;  %v4465_v63 = vrot.slane %v4463_v0, 4  ;;  %v4558_v29 = vld [vmem:[#allocation2 + $0x58] sm:$0xf]  ;;  %v4464_v4 = vsel %vm8756_vm9, %v4462_v6, %v4463_v0 }
 0x359   : > { %4221 = vrot.lane.b32.xlu1 %v4148_v1, %s8542_s23  ;;  %v3824_v1 = vsel %vm8717_vm5, %v3822_v9, %v3823_v15  ;;  %v12134_v15 = vor.u32 %v5155_v39, %v5152_v43  ;;  %v4149_v9 = vshrl.u32 %v12054_v38, 16  ;;  %v3918_v39 = vld [vmem:[#allocation2 + $0x58] sm:$0xf] }
 0x35a   : > { %v4486_v11 = vpop.permute.xlu0 %4485  ;;  %v5442_v30 = vld [vmem:[#allocation3 + $0x48] sm:$0xff] }
 0x35b   : > { %v8425_v24 = vld [vmem:[#allocation3 + $0x4c] ss:$28 sps:$4 sm:$0xff]   ;;  %4532 = vst.msk [vmem:[#allocation3 + $0x84] sm:$0xf] %vm1100_vm10, %v4486_v11  ;;  %v7623_v12 = vcombine.low %v5442_v30, %v5446_v7  ;;  %v5215_v16 = vpop.permute.xlu1 %5214  ;;  %v5148_v30 = vrot.slane %v5146_v27, 4  ;;  %v4677_v7 = vshrl.u32 %v4558_v29, 16 }
 0x35c   : > { %4219 = vrot.lane.b32.xlu0 %v4138_v42, %s8542_s23  ;;  %6519 = vmatprep.mubr.bf16.mxu1 %v8425_v24  ;;  %5262 = vst.msk [vmem:[#allocation3 + $0x6c] sm:$0xf] %vm1100_vm10, %v5215_v16  ;;  %v4467_v24 = vsel %vm8756_vm9, %v4465_v63, %v4466_v48  ;;  %v4686_v42 = vshrl.u32 %v4559_v2, 16  ;;  %v5138_v16 = vrot.slane %v12018_v31, 4  ;;  %v5287_v31 = vld [vmem:[#allocation2 + $0x54] sm:$0xf] }
 0x35d   : > { %6520 = vmatmul.mubr.bf16.gmra.mxu1 %v7623_v12  ;;  %4844 = vrot.lane.b32.xlu1 %v4799_v60, %s8542_s23  ;;  %v5157_v61 = vsel %vm8825_vm14, %v5148_v30, %v12134_v15  ;;  %v4679_v60 = vrot.slane %v4677_v7, 7  ;;  %v4680_v63 = vshll.u32 %v4558_v29, 16  ;;  %v5344_v6 = vrot.slane %v5287_v31, 7  ;;  %v12160_v7 = vld [vmem:[#allocation2 + $0x5c] sm:$0xf] }
 0x35e   : > { %v5213_v55 = vpop.permute.xlu0 %5212  ;;  %v6341_v30 = vadd.f32 %v11982_v50, %v11994_v19 }
 0x35f   : > { %5261 = vst.msk [vmem:[#allocation3 + $0x50] sm:$0xf] %vm1100_vm10, %v5213_v55  ;;  %v3950_v21 = vpop.permute.xlu1 %3949  ;;  %v12145_v55 = vrot.slane %v4686_v42, 7  ;;  %v4684_v43 = vrot.slane %v4679_v60, 4  ;;  %v4675_v42 = vrot.slane %v12030_v17, 4 }
 0x360   : > { %4842 = vrot.lane.b32.xlu0 %v4798_v53, %s8542_s23  ;;  %3995 = vst.msk [vmem:[#allocation3 + $0x9c] sm:$0xf] %vm1260_vm11, %v3950_v21  ;;  %v4159_v53 = vshrl.u32 %v4020_v41, 16  ;;  %v4151_v41 = vrot.slane %v4149_v9, 4 }
 0x361   : > { %3863 = vrot.lane.b32.xlu1 %v3827_v36, %s8540_s21  ;;  %v5147_v36 = vsel %vm8825_vm14, %v5138_v16, %v5146_v27  ;;  %v12167_v16 = vld [vmem:[#allocation2 + $0x58] sm:$0xf] }
 0x362   : > { %v3948_v28 = vpop.permute.xlu0 %3947  ;;  %v4161_v38 = vrot.slane %v4159_v53, 4  ;;  %v5343_v53 = vrot.slane %v5341_v57, 4 }
 0x363   : > { %3994 = vst.msk [vmem:[#allocation3 + $0x80] sm:$0xf] %vm1260_vm11, %v3948_v28  ;;  %v4731_v11 = vpop.permute.xlu1 %4730  ;;  %v7996_v8 = vpop.f32.mrf.mxu0 }
 0x364   : > { %3861 = vrot.lane.b32.xlu0 %v3824_v1, %s8540_s21  ;;  %4776 = vst.msk [vmem:[#allocation3 + $0xa0] sm:$0xf] %vm1260_vm11, %v4731_v11  ;;  %v4691_v1 = vor.u32 %v4689_v26, %v12145_v55  ;;  %v12155_v11 = vrot.slane %v4155_v33, 5  ;;  %v5347_v33 = vrot.slane %v12167_v16, 7 }
 0x365   : > { %4503 = vrot.lane.b32.xlu1 %v4467_v24, %s8540_s21  ;;  %v7997_v3 = vpop.f32.mrf.mxu0  ;;  %v3917_v24 = vld [vmem:[#allocation2 + $0x54] sm:$0xf] }
 0x366   : > { %v4729_v12 = vpop.permute.xlu0 %4728  ;;  %v4692_v19 = vsel %vm9025_vm6, %v4684_v43, %v4691_v1  ;;  %v4165_v3 = vshll.u32 %v12160_v7, 16  ;;  %v5345_v43 = vsel %vm8756_vm9, %v5343_v53, %v5344_v6  ;;  %v4349_v1 = vrot.slane %v4347_v20, 4 }
 0x367   : > { %4775 = vst.msk [vmem:[#allocation3 + $0x84] sm:$0xf] %vm1260_vm11, %v4729_v12  ;;  %v5371_v22 = vpop.permute.xlu1 %5370  ;;  %v7999_v21 = vpop.f32.mrf.mxu0  ;;  %v4682_v12 = vor.u32 %v4680_v63, %v4679_v60  ;;  %v6349_v53 = vadd.f32 %v11982_v50, %v12086_v51 }
 0x368   : > { %4501 = vrot.lane.b32.xlu0 %v4464_v4, %s8540_s21  ;;  %5418 = vst.msk [vmem:[#allocation3 + $0x6c] sm:$0xf] %vm1260_vm11, %v5371_v22  ;;  %v5346_v22 = vrot.slane %v5344_v6, 4  ;;  %v12189_v63 = vrot.slane %v4165_v3, 5 }
 0x369   : > { %5230 = vrot.lane.b32.xlu1 %v5157_v61, %s8540_s21  ;;  %v8000_v2 = vpop.f32.mrf.mxu0  ;;  %v4162_v61 = vor.u32 %v4161_v38, %v12155_v11  ;;  %v4683_v26 = vsel %vm9025_vm6, %v4675_v42, %v4682_v12  ;;  %v6346_v38 = vadd.f32 %v11982_v50, %v12063_v54 }
 0x36a   : > { %v5369_v0 = vpop.permute.xlu0 %5368  ;;  %v8001_v27 = vadd.f32 %v8000_v2, %v7999_v21  ;;  %v5348_v9 = vsel %vm8756_vm9, %v5346_v22, %v5347_v33  ;;  %v12199_v2 = vld [vmem:[#allocation2 + $0x64] sm:$0xf] }
 0x36b   : > { %5417 = vst.msk [vmem:[#allocation3 + $0x50] sm:$0xf] %vm1260_vm11, %v5369_v0  ;;  %v4210_v28 = vpop.permute.xlu1 %4209  ;;  %v4152_v0 = vor.u32 %v4151_v41, %v12091_v25  ;;  %v5025_v25 = vld [vmem:[#allocation2 + $0x5c] sm:$0xf] }
 0x36c   : > { %5228 = vrot.lane.b32.xlu0 %v5147_v36, %s8540_s21  ;;  %4255 = vst.msk [vmem:[#allocation3 + $0x9c] sm:$0xf] %vm1420_vm12, %v4210_v28  ;;  %v12164_v8 = vadd.f32 %v8001_v27, %v6341_v30  ;;  %v4163_v36 = vrot.slane %v4162_v61, 4  ;;  %v5160_v20 = vshrl.u32 %v5025_v25, 16  ;;  %v5163_v12 = vshll.u32 %v5025_v25, 16 }
 0x36d   : > { %3965 = vrot.lane.b32.xlu1 %v3918_v39, %s8541_s22  ;;  %v4153_v39 = vrot.slane %v4152_v0, 4  ;;  %v5173_v25 = vshll.u32 %v5026_v14, 16 }
 0x36e   : > { %v4208_v29 = vpop.permute.xlu0 %4207  ;;  %v4168_v6 = vsel %vm8838_vm15, %v4163_v36, %v12189_v63  ;;  %v4801_v36 = vld [vmem:[#allocation2 + $0x5c] sm:$0xf] }
 0x36f   : > { %4254 = vst.msk [vmem:[#allocation3 + $0x80] sm:$0xf] %vm1420_vm12, %v4208_v29  ;;  %v4833_v4 = vpop.permute.xlu1 %4832  ;;  %v3829_v29 = vrot.slane %v12191_v10, 5  ;;  %v5165_v10 = vrot.slane %v5163_v12, 7 }
 0x370   : > { %3963 = vrot.lane.b32.xlu0 %v3917_v24, %s8541_s22  ;;  %4878 = vst.msk [vmem:[#allocation3 + $0xa0] sm:$0xf] %vm1420_vm12, %v4833_v4  ;;  %v8002_v21 = vpop.f32.mrf.mxu0  ;;  %v4350_v24 = vrot.slane %v12199_v2, 5  ;;  %v5291_v2 = vld [vmem:[#allocation2 + $0x64] sm:$0xf] }
 0x371   : > { %4746 = vrot.lane.b32.xlu1 %v4692_v19, %s8541_s22 }
 0x372   : > { %v4831_v17 = vpop.permute.xlu0 %4830  ;;  %v8427_v60 = vld [vmem:[#allocation3 + $0x50] ss:$28 sps:$4 sm:$0xff]   ;;  %v8003_v28 = vpop.f32.mrf.mxu0  ;;  %v4351_v61 = vsel %vm8717_vm5, %v4349_v1, %v4350_v24 }
 0x373   : > { %4877 = vst.msk [vmem:[#allocation3 + $0x84] sm:$0xf] %vm1420_vm12, %v4831_v17  ;;  %v3852_v31 = vpop.permute.xlu1 %3851  ;;  %8203 = vmatmul.mubr.msk.bf16.gmra.mxu0 %vm6243_vm1, %v8427_v60  ;;  %v8004_v27 = vadd.f32 %v8003_v28, %v8002_v21  ;;  %v4158_v17 = vsel %vm8838_vm15, %v4153_v39, %v12155_v11  ;;  %v4404_v21 = vld [vmem:[#allocation2 + $0x60] sm:$0xf]  ;;  %v5162_v11 = vrot.slane %v5160_v20, 6  ;;  %v3828_v39 = vrot.slane %v3826_v32, 4 }
 0x374   : > { %4744 = vrot.lane.b32.xlu0 %v4683_v26, %s8541_s22  ;;  %3895 = vst.msk [vmem:[#allocation3 + $0xd4] sm:$0xf] %vm1100_vm10, %v3852_v31  ;;  %8206 = vmatprep.mubr.msk.bf16.mxu0 %vm8544_vm13, %v8543_v47  ;;  %v8005_v42 = vpop.f32.mrf.mxu0  ;;  %v12223_v26 = vld [vmem:[#allocation2 + $0x58] sm:$0xf]  ;;  %v4469_v1 = vrot.slane %v4404_v21, 7  ;;  %v5175_v20 = vrot.slane %v5173_v25, 7 }
 0x375   : > { %5386 = vrot.lane.b32.xlu1 %v5348_v9, %s8541_s22  ;;  %v12212_v41 = vadd.f32 %v8004_v27, %v6346_v38  ;;  %4387 = vst.msk [vmem:[#allocation3 + $0x1b8] sm:$0xf] %vm791_vm0, %v4351_v61  ;;  %v3831_v9 = vrot.slane %v3829_v29, 4  ;;  %v3832_v51 = vrot.slane %v12223_v26, 5  ;;  %v12242_v27 = vld [vmem:[#allocation2 + $0x64] sm:$0xf]  ;;  %v3830_v12 = vsel %vm8717_vm5, %v3828_v39, %v3829_v29 }
 0x376   : > { %v3850_v57 = vpop.permute.xlu0 %3849  ;;  %v8006_v3 = vpop.f32.mrf.mxu0  ;;  %v4561_v32 = vld [vmem:[#allocation2 + $0x64] sm:$0xf]  ;;  %v4169_v39 = vshrl.u32 %v12160_v7, 16 }
 0x377   : > { %3894 = vst.msk [vmem:[#allocation3 + $0xb8] sm:$0xf] %vm1100_vm10, %v3850_v57  ;;  %v4492_v30 = vpop.permute.xlu1 %4491  ;;  %v5454_v19 = vld [vmem:[#allocation3 + $0x9c] sm:$0xff]  ;;  %v8007_v31 = vadd.f32 %v8006_v3, %v8005_v42  ;;  %v5170_v57 = vshrl.u32 %v5026_v14, 16  ;;  %v5166_v42 = vor.u32 %v5165_v10, %v5162_v11  ;;  %v4704_v29 = vshrl.u32 %v4561_v32, 16 }
 0x378   : > { %5384 = vrot.lane.b32.xlu0 %v5345_v43, %s8541_s22  ;;  %4535 = vst.msk [vmem:[#allocation3 + $0xd8] sm:$0xf] %vm1100_vm10, %v4492_v30  ;;  %v4800_v43 = vld [vmem:[#allocation2 + $0x58] sm:$0xf]  ;;  %v3833_v30 = vsel %vm8717_vm5, %v3831_v9, %v3832_v51  ;;  %v4022_v9 = vld [vmem:[#allocation2 + $0x60] sm:$0xf] }
 0x379   : > { %4225 = vrot.lane.b32.xlu1 %v4168_v6, %s8542_s23  ;;  %v12230_v28 = vadd.f32 %v8007_v31, %v6349_v53  ;;  %v4471_v6 = vrot.slane %v4469_v1, 4  ;;  %v5172_v14 = vrot.slane %v5170_v57, 6  ;;  %v12270_v57 = vrot.slane %v4704_v29, 7 }
 0x37a   : > { %v4490_v54 = vpop.permute.xlu0 %4489  ;;  %v5450_v4 = vld [vmem:[#allocation3 + $0x80] sm:$0xff]  ;;  %v4707_v25 = vshll.u32 %v4561_v32, 16 }
 0x37b   : > { %v8428_v22 = vld [vmem:[#allocation3 + $0x84] ss:$28 sps:$4 sm:$0xff]   ;;  %4534 = vst.msk [vmem:[#allocation3 + $0xbc] sm:$0xf] %vm1100_vm10, %v4490_v54  ;;  %v7630_v60 = vcombine.low %v5450_v4, %v5454_v19  ;;  %v5219_v0 = vpop.permute.xlu1 %5218  ;;  %v4472_v54 = vrot.slane %v12242_v27, 7  ;;  %v4468_v4 = vrot.slane %v4466_v48, 4 }
 0x37c   : > { %4223 = vrot.lane.b32.xlu0 %v4158_v17, %s8542_s23  ;;  %6527 = vmatprep.mubr.bf16.mxu1 %v8428_v22  ;;  %5264 = vst.msk [vmem:[#allocation3 + $0xa4] sm:$0xf] %vm1100_vm10, %v5219_v0  ;;  %v4560_v22 = vld [vmem:[#allocation2 + $0x60] sm:$0xf]  ;;  %v5168_v17 = vrot.slane %v5166_v42, 4  ;;  %v5158_v0 = vrot.slane %v12134_v15, 4 }
 0x37d   : > { %6528 = vmatmul.mubr.bf16.gmra.mxu1 %v7630_v60  ;;  %4848 = vrot.lane.b32.xlu1 %v4801_v36, %s8542_s23  ;;  %v4473_v61 = vsel %vm8756_vm9, %v4471_v6, %v4472_v54  ;;  %v12258_v60 = vor.u32 %v5175_v20, %v5172_v14  ;;  %v4470_v48 = vsel %vm8756_vm9, %v4468_v4, %v4469_v1  ;;  %v4695_v31 = vshrl.u32 %v4560_v22, 16 }
 0x37e   : > { %v5217_v50 = vpop.permute.xlu0 %5216  ;;  %v4179_v36 = vshrl.u32 %v4022_v9, 16  ;;  %v5167_v1 = vsel %vm8825_vm14, %v5158_v0, %v5166_v42  ;;  %v4698_v6 = vshll.u32 %v4560_v22, 16  ;;  %v4709_v4 = vor.u32 %v4707_v25, %v12270_v57  ;;  %v5028_v25 = vld [vmem:[#allocation2 + $0x68] sm:$0xf] }
 0x37f   : > { %5263 = vst.msk [vmem:[#allocation3 + $0x88] sm:$0xf] %vm1100_vm10, %v5217_v50  ;;  %v3954_v38 = vpop.permute.xlu1 %3953  ;;  %v5177_v11 = vsel %vm8825_vm14, %v5168_v17, %v12258_v60  ;;  %v12272_v50 = vld [vmem:[#allocation2 + $0x5c] sm:$0xf]  ;;  %v4693_v17 = vrot.slane %v12145_v55, 4 }
 0x380   : > { %4846 = vrot.lane.b32.xlu0 %v4800_v43, %s8542_s23  ;;  %3997 = vst.msk [vmem:[#allocation3 + $0xd4] sm:$0xf] %vm1260_vm11, %v3954_v38  ;;  %v4175_v43 = vshll.u32 %v4022_v9, 16  ;;  %v4181_v32 = vrot.slane %v4179_v36, 4 }
 0x381   : > { %3867 = vrot.lane.b32.xlu1 %v3833_v30, %s8540_s21  ;;  %v7938_v3 = vpop.f32.mrf.mxu1  ;;  %v4697_v30 = vrot.slane %v4695_v31, 7  ;;  %v12294_v31 = vld [vmem:[#allocation2 + $0x64] sm:$0xf] }
 0x382   : > { %v3952_v49 = vpop.permute.xlu0 %3951  ;;  %v12288_v22 = vrot.slane %v4175_v43, 5  ;;  %v3919_v3 = vld [vmem:[#allocation2 + $0x5c] sm:$0xf]  ;;  %v4185_v43 = vshll.u32 %v12294_v31, 16 }
 0x383   : > { %3996 = vst.msk [vmem:[#allocation3 + $0xb8] sm:$0xf] %vm1260_vm11, %v3952_v49  ;;  %v4735_v19 = vpop.permute.xlu1 %4734  ;;  %v7939_v53 = vpop.f32.mrf.mxu1  ;;  %v5350_v49 = vrot.slane %v12272_v50, 7  ;;  %v4702_v7 = vrot.slane %v4697_v30, 4  ;;  %v4700_v29 = vor.u32 %v4698_v6, %v4697_v30 }
 0x384   : > { %3865 = vrot.lane.b32.xlu0 %v3830_v12, %s8540_s21  ;;  %4778 = vst.msk [vmem:[#allocation3 + $0xd8] sm:$0xf] %vm1260_vm11, %v4735_v19  ;;  %v3920_v12 = vld [vmem:[#allocation2 + $0x60] sm:$0xf]  ;;  %v4182_v9 = vor.u32 %v4181_v32, %v12288_v22 }
 0x385   : > { %4507 = vrot.lane.b32.xlu1 %v4473_v61, %s8540_s21  ;;  %v7941_v10 = vpop.f32.mrf.mxu1  ;;  %v12285_v19 = vld [vmem:[#allocation2 + $0x60] sm:$0xf]  ;;  %v5027_v61 = vld [vmem:[#allocation2 + $0x64] sm:$0xf]  ;;  %v5352_v53 = vrot.slane %v5350_v49, 4  ;;  %v4701_v50 = vsel %vm9025_vm6, %v4693_v17, %v4700_v29 }
 0x386   : > { %v4733_v56 = vpop.permute.xlu0 %4732  ;;  %v5353_v0 = vrot.slane %v12285_v19, 7  ;;  %v5180_v36 = vshrl.u32 %v5027_v61, 16 }
 0x387   : > { %4777 = vst.msk [vmem:[#allocation3 + $0xbc] sm:$0xf] %vm1260_vm11, %v4733_v56  ;;  %v5375_v21 = vpop.permute.xlu1 %5374  ;;  %v7942_v38 = vpop.f32.mrf.mxu1  ;;  %v4171_v56 = vrot.slane %v4169_v39, 4 }
 0x388   : > { %4505 = vrot.lane.b32.xlu0 %v4470_v48, %s8540_s21  ;;  %5420 = vst.msk [vmem:[#allocation3 + $0xa4] sm:$0xf] %vm1260_vm11, %v5375_v21  ;;  %v12280_v20 = vadd.f32 %v7942_v38, %v7941_v10  ;;  %v4710_v21 = vsel %vm9025_vm6, %v4702_v7, %v4709_v4  ;;  %v12308_v38 = vld [vmem:[#allocation2 + $0x68] sm:$0xf]  ;;  %v5354_v6 = vsel %vm8756_vm9, %v5352_v53, %v5353_v0  ;;  %v5193_v7 = vshll.u32 %v5028_v25, 16 }
 0x389   : > { %5234 = vrot.lane.b32.xlu1 %v5177_v11, %s8540_s21  ;;  %v5183_v11 = vshll.u32 %v5027_v61, 16  ;;  %v4172_v39 = vor.u32 %v4171_v56, %v12189_v63  ;;  %v5182_v63 = vrot.slane %v5180_v36, 6  ;;  %v5355_v26 = vrot.slane %v5353_v0, 4 }
 0x38a   : > { %v5373_v15 = vpop.permute.xlu0 %5372 }
 0x38b   : > { %5419 = vst.msk [vmem:[#allocation3 + $0x88] sm:$0xf] %vm1260_vm11, %v5373_v15  ;;  %v4214_v14 = vpop.permute.xlu1 %4213  ;;  %v5349_v15 = vrot.slane %v5347_v33, 4  ;;  %v4973_v33 = vrot.slane %v12308_v38, 6  ;;  %v5185_v32 = vrot.slane %v5183_v11, 7  ;;  %v4173_v17 = vrot.slane %v4172_v39, 4 }
 0x38c   : > { %5232 = vrot.lane.b32.xlu0 %v5167_v1, %s8540_s21  ;;  %4257 = vst.msk [vmem:[#allocation3 + $0xd4] sm:$0xf] %vm1420_vm12, %v4214_v14  ;;  %v4905_v1 = vld [vmem:[#allocation2 + $0x64] sm:$0xf]  ;;  %v4183_v14 = vrot.slane %v4182_v9, 4 }
 0x38d   : > { %3969 = vrot.lane.b32.xlu1 %v3920_v12, %s8541_s22  ;;  %v4970_v16 = vrot.slane %v4905_v1, 6  ;;  %v5190_v12 = vshrl.u32 %v5028_v25, 16  ;;  %v5351_v61 = vsel %vm8756_vm9, %v5349_v15, %v5350_v49  ;;  %v5186_v53 = vor.u32 %v5185_v32, %v5182_v63  ;;  %v4284_v15 = vld [vmem:[#allocation2 + $0x68] sm:$0x1]  ;;  %v4802_v32 = vld [vmem:[#allocation2 + $0x60] sm:$0xf] }
 0x38e   : > { %v4212_v42 = vpop.permute.xlu0 %4211  ;;  %v5195_v49 = vrot.slane %v5193_v7, 7  ;;  %v4353_v1 = vrot.slane %v4284_v15, 5 }
 0x38f   : > { %4256 = vst.msk [vmem:[#allocation3 + $0xb8] sm:$0xf] %vm1420_vm12, %v4212_v42  ;;  %v4837_v48 = vpop.permute.xlu1 %4836  ;;  %v4972_v42 = vrot.slane %v4970_v16, 4  ;;  %v5192_v9 = vrot.slane %v5190_v12, 6  ;;  %v5178_v12 = vrot.slane %v12258_v60, 4 }
 0x390   : > { %3967 = vrot.lane.b32.xlu0 %v3919_v3, %s8541_s22  ;;  %4880 = vst.msk [vmem:[#allocation3 + $0xd8] sm:$0xf] %vm1420_vm12, %v4837_v48  ;;  %v12324_v3 = vrot.slane %v4185_v43, 5  ;;  %v4352_v43 = vrot.slane %v4350_v24, 4  ;;  %v4562_v24 = vld [vmem:[#allocation2 + $0x68] sm:$0xf] }
 0x391   : > { %4750 = vrot.lane.b32.xlu1 %v4710_v21, %s8541_s22  ;;  %v4974_v56 = vsel %vm8745_vm8, %v4972_v42, %v4973_v33  ;;  %v3766_v42 = vld [vmem:[#allocation2 + $0x5c] sm:$0x1]  ;;  %v5187_v27 = vsel %vm8825_vm14, %v5178_v12, %v5186_v53 }
 0x392   : > { %v4835_v55 = vpop.permute.xlu0 %4834  ;;  %v8430_v10 = vld [vmem:[#allocation3 + $0x88] ss:$28 sps:$4 sm:$0xff]   ;;  %v4188_v48 = vsel %vm8838_vm15, %v4183_v14, %v12324_v3  ;;  %5010 = vst.msk [vmem:[#allocation3 + $0x1bc] sm:$0xf] %vm791_vm0, %v4974_v56  ;;  %v12347_v14 = vor.u32 %v5195_v49, %v5192_v9  ;;  %v4354_v63 = vsel %vm8717_vm5, %v4352_v43, %v4353_v1  ;;  %v12366_v56 = vld [vmem:[#allocation2 + $0x68] sm:$0xf] }
 0x393   : > { %4879 = vst.msk [vmem:[#allocation3 + $0xbc] sm:$0xf] %vm1420_vm12, %v4835_v55  ;;  %v3856_v30 = vpop.permute.xlu1 %3855  ;;  %8207 = vmatmul.mubr.msk.bf16.gmra.mxu0 %vm6243_vm1, %v8430_v10  ;;  %v4178_v10 = vsel %vm8838_vm15, %v4173_v17, %v12288_v22  ;;  %v4406_v22 = vld [vmem:[#allocation2 + $0x68] sm:$0x7]  ;;  %v5356_v17 = vrot.slane %v5291_v2, 7  ;;  %v3835_v9 = vrot.slane %v3766_v42, 5 }
 0x394   : > { %4748 = vrot.lane.b32.xlu0 %v4701_v50, %s8541_s22  ;;  %3897 = vst.msk [vmem:[#allocation3 + $0x10c] sm:$0xf] %vm1100_vm10, %v3856_v30  ;;  %8210 = vmatprep.mubr.msk.bf16.mxu0 %vm8544_vm13, %v8543_v47  ;;  %v4969_v50 = vrot.slane %v4967_v46, 4  ;;  %v4803_v30 = vld [vmem:[#allocation2 + $0x64] sm:$0xf] }
 0x395   : > { %5390 = vrot.lane.b32.xlu1 %v5354_v6, %s8541_s22  ;;  %v5188_v6 = vrot.slane %v5186_v53, 4  ;;  %4388 = vst.msk [vmem:[#allocation3 + $0x1d4] sm:$0xf] %vm791_vm0, %v4354_v63  ;;  %v4907_v1 = vld [vmem:[#allocation2 + $0x6c] sm:$0x3] }
 0x396   : > { %v3854_v4 = vpop.permute.xlu0 %3853  ;;  %v4971_v52 = vsel %vm8745_vm8, %v4969_v50, %v4970_v16  ;;  %v4474_v16 = vrot.slane %v4472_v54, 4  ;;  %v3834_v54 = vrot.slane %v3832_v51, 4  ;;  %v4024_v50 = vld [vmem:[#allocation2 + $0x68] sm:$0x1]  ;;  %v5293_v42 = vld [vmem:[#allocation2 + $0x6c] sm:$0x7] }
 0x397   : > { %3896 = vst.msk [vmem:[#allocation3 + $0xf0] sm:$0xf] %vm1100_vm10, %v3854_v4  ;;  %v4496_v29 = vpop.permute.xlu1 %4495  ;;  %v5462_v11 = vld [vmem:[#allocation3 + $0xd4] sm:$0xff]  ;;  %v4475_v4 = vrot.slane %v4406_v22, 7  ;;  %v4976_v22 = vrot.slane %v4907_v1, 6  ;;  %v4195_v2 = vshll.u32 %v4024_v50, 16 }
 0x398   : > { %5388 = vrot.lane.b32.xlu0 %v5351_v61, %s8541_s22  ;;  %4537 = vst.msk [vmem:[#allocation3 + $0x110] sm:$0xf] %vm1100_vm10, %v4496_v29  ;;  %v5197_v61 = vsel %vm8825_vm14, %v5188_v6, %v12347_v14  ;;  %v4713_v29 = vshrl.u32 %v4562_v24, 16  ;;  %v4711_v6 = vrot.slane %v12270_v57, 4  ;;  %v12402_v57 = vld [vmem:[%s12688_s4] ss:$0 sm:$0xff] }
 0x399   : > { %4229 = vrot.lane.b32.xlu1 %v4188_v48, %s8542_s23  ;;  %5009 = vst.msk [vmem:[#allocation3 + $0x1a0] sm:$0xf] %vm791_vm0, %v4971_v52  ;;  %v4189_v48 = vshrl.u32 %v12294_v31, 16  ;;  %v5359_v31 = vrot.slane %v12366_v56, 7  ;;  %v6357_v12 = vadd.f32 %v12402_v57, %v12280_v20  ;;  %v3921_v20 = vld [vmem:[#allocation2 + $0x64] sm:$0xf] }
 0x39a   : > { %v4494_v21 = vpop.permute.xlu0 %4493  ;;  %v5458_v36 = vld [vmem:[#allocation3 + $0xb8] sm:$0xff] }
 0x39b   : > { %v8431_v55 = vld [vmem:[#allocation3 + $0xbc] ss:$28 sps:$4 sm:$0xff]   ;;  %4536 = vst.msk [vmem:[#allocation3 + $0xf4] sm:$0xf] %vm1100_vm10, %v4494_v21  ;;  %v7637_v25 = vcombine.low %v5458_v36, %v5462_v11  ;;  %v5223_v39 = vpop.permute.xlu1 %5222  ;;  %v4476_v21 = vsel %vm8756_vm9, %v4474_v16, %v4475_v4  ;;  %v5358_v11 = vrot.slane %v5356_v17, 4  ;;  %v4191_v15 = vrot.slane %v4189_v48, 4 }
 0x39c   : > { %4227 = vrot.lane.b32.xlu0 %v4178_v10, %s8542_s23  ;;  %6535 = vmatprep.mubr.bf16.mxu1 %v8431_v55  ;;  %5266 = vst.msk [vmem:[#allocation3 + $0xdc] sm:$0xf] %vm1100_vm10, %v5223_v39  ;;  %v4715_v55 = vrot.slane %v4713_v29, 7  ;;  %v4716_v10 = vshll.u32 %v4562_v24, 16  ;;  %v5029_v39 = vld [vmem:[#allocation2 + $0x6c] sm:$0x7] }
 0x39d   : > { %6536 = vmatmul.mubr.bf16.gmra.mxu1 %v7637_v25  ;;  %4852 = vrot.lane.b32.xlu1 %v4803_v30, %s8542_s23  ;;  %v3836_v25 = vsel %vm8717_vm5, %v3834_v54, %v3835_v9  ;;  %v4975_v30 = vrot.slane %v4973_v33, 4  ;;  %v5360_v19 = vsel %vm8756_vm9, %v5358_v11, %v5359_v31  ;;  %v4192_v33 = vor.u32 %v4191_v15, %v12324_v3 }
 0x39e   : > { %v5221_v46 = vpop.permute.xlu0 %5220  ;;  %v4718_v59 = vor.u32 %v4716_v10, %v4715_v55  ;;  %v5200_v24 = vshrl.u32 %v5029_v39, 16  ;;  %v5203_v63 = vshll.u32 %v5029_v39, 16  ;;  %v5361_v48 = vrot.slane %v5359_v31, 4 }
 0x39f   : > { %5265 = vst.msk [vmem:[#allocation3 + $0xc0] sm:$0xf] %vm1100_vm10, %v5221_v46  ;;  %v3958_v7 = vpop.permute.xlu1 %3957  ;;  %v5357_v46 = vsel %vm8756_vm9, %v5355_v26, %v5356_v17  ;;  %v4197_v17 = vrot.slane %v4195_v2, 5  ;;  %vm7182_vm5 = vcmask 523264  }
 0x3a0   : > { %4850 = vrot.lane.b32.xlu0 %v4802_v32, %s8542_s23  ;;  %3999 = vst.msk [vmem:[#allocation3 + $0x10c] sm:$0xf] %vm1260_vm11, %v3958_v7  ;;  %v8008_v36 = vpop.f32.mrf.mxu0  ;;  %v4977_v32 = vsel %vm8745_vm8, %v4975_v30, %v4976_v22  ;;  %v4719_v13 = vsel %vm9025_vm6, %v4711_v6, %v4718_v59  ;;  %v5202_v29 = vrot.slane %v5200_v24, 6 }
 0x3a1   : > { %5238 = vrot.lane.b32.xlu1 %v5197_v61, %s8540_s21  ;;  %5011 = vst.msk [vmem:[#allocation3 + $0x1d8] sm:$0xf] %vm791_vm0, %v4977_v32  ;;  %v4193_v61 = vrot.slane %v4192_v33, 4 }
 0x3a2   : > { %v3956_v60 = vpop.permute.xlu0 %3955  ;;  %v8009_v51 = vpop.f32.mrf.mxu0 }
 0x3a3   : > { %3998 = vst.msk [vmem:[#allocation3 + $0xf0] sm:$0xf] %vm1260_vm11, %v3956_v60  ;;  %v4739_v49 = vpop.permute.xlu1 %4738  ;;  %v5205_v60 = vrot.slane %v5203_v63, 7 }
 0x3a4   : > { %5236 = vrot.lane.b32.xlu0 %v5187_v27, %s8540_s21  ;;  %4780 = vst.msk [vmem:[#allocation3 + $0x110] sm:$0xf] %vm1260_vm11, %v4739_v49  ;;  %v8011_v0 = vpop.f32.mrf.mxu0  ;;  %v5362_v27 = vrot.slane %v5293_v42, 7  ;;  %v4198_v49 = vsel %vm8838_vm15, %v4193_v61, %v4197_v17 }
 0x3a5   : > { %4509 = vrot.lane.b32.xlu1 %v4476_v21, %s8540_s21  ;;  %v5198_v21 = vrot.slane %v12347_v14, 4  ;;  %v5206_v36 = vor.u32 %v5205_v60, %v5202_v29 }
 0x3a6   : > { %v4737_v53 = vpop.permute.xlu0 %4736  ;;  %v8012_v38 = vpop.f32.mrf.mxu0  ;;  %v5363_v31 = vsel %vm8756_vm9, %v5361_v48, %v5362_v27 }
 0x3a7   : > { %4779 = vst.msk [vmem:[#allocation3 + $0xf4] sm:$0xf] %vm1260_vm11, %v4737_v53  ;;  %v5379_v43 = vpop.permute.xlu1 %5378  ;;  %v8013_v16 = vadd.f32 %v8012_v38, %v8011_v0  ;;  %v5207_v14 = vsel %vm8825_vm14, %v5198_v21, %v5206_v36 }
 0x3a8   : > { %3869 = vrot.lane.b32.xlu0 %v3836_v25, %s8540_s21  ;;  %5422 = vst.msk [vmem:[#allocation3 + $0xdc] sm:$0xf] %vm1260_vm11, %v5379_v43 }
 0x3a9   : > { %5394 = vrot.lane.b32.xlu1 %v5360_v19, %s8541_s22  ;;  %v12411_v3 = vadd.f32 %v8013_v16, %v6357_v12 }
 0x3aa   : > { %v5377_v52 = vpop.permute.xlu0 %5376 }
 0x3ab   : > { %5421 = vst.msk [vmem:[#allocation3 + $0xc0] sm:$0xf] %vm1260_vm11, %v5377_v52  ;;  %v4218_v7 = vpop.permute.xlu1 %4217 }
 0x3ac   : > { %5392 = vrot.lane.b32.xlu0 %v5357_v46, %s8541_s22  ;;  %4259 = vst.msk [vmem:[#allocation3 + $0x10c] sm:$0xf] %vm1420_vm12, %v4218_v7 }
 0x3ad   : > { %4752 = vrot.lane.b32.xlu1 %v4719_v13, %s8541_s22 }
 0x3ae   : > { %v4216_v4 = vpop.permute.xlu0 %4215 }
 0x3af   : > { %4258 = vst.msk [vmem:[#allocation3 + $0xf0] sm:$0xf] %vm1420_vm12, %v4216_v4  ;;  %v4841_v56 = vpop.permute.xlu1 %4840 }
 0x3b0   : > { %3971 = vrot.lane.b32.xlu0 %v3921_v20, %s8541_s22  ;;  %4882 = vst.msk [vmem:[#allocation3 + $0x110] sm:$0xf] %vm1420_vm12, %v4841_v56 }
 0x3b1   : > { %4854 = vrot.lane.b32.xlu1 %v4804_v44, %s8542_s23  ;;  %v7944_v55 = vpop.f32.mrf.mxu1 }
 0x3b2   : > { %v4839_v54 = vpop.permute.xlu0 %4838  ;;  %v8433_v9 = vld [vmem:[#allocation3 + $0xc0] ss:$28 sps:$4 sm:$0xff]  }
 0x3b3   : > { %4881 = vst.msk [vmem:[#allocation3 + $0xf4] sm:$0xf] %vm1420_vm12, %v4839_v54  ;;  %v3860_v11 = vpop.permute.xlu1 %3859  ;;  %8211 = vmatmul.mubr.msk.bf16.gmra.mxu0 %vm6243_vm1, %v8433_v9  ;;  %v7945_v10 = vpop.f32.mrf.mxu1 }
 0x3b4   : > { %4231 = vrot.lane.b32.xlu0 %v4198_v49, %s8542_s23  ;;  %3899 = vst.msk [vmem:[#allocation3 + $0x144] sm:$0xf] %vm1100_vm10, %v3860_v11  ;;  %8214 = vmatprep.mubr.msk.bf16.mxu0 %vm8544_vm13, %v8543_v47  ;;  %v7946_v26 = vadd.f32 %v7945_v10, %v7944_v55 }
 0x3b5   : > { %5396 = vrot.lane.b32.xlu1 %v5363_v31, %s8541_s22  ;;  %v7947_v18 = vpop.f32.mrf.mxu1 }
 0x3b6   : > { %v3858_v40 = vpop.permute.xlu0 %3857  ;;  %v6362_v12 = vadd.f32 %v12402_v57, %v7946_v26 }
 0x3b7   : > { %3898 = vst.msk [vmem:[#allocation3 + $0x128] sm:$0xf] %vm1100_vm10, %v3858_v40  ;;  %v4500_v53 = vpop.permute.xlu1 %4499  ;;  %v5470_v50 = vld [vmem:[#allocation3 + $0x10c] sm:$0xff]  ;;  %v7948_v43 = vpop.f32.mrf.mxu1 }
 0x3b8   : > { %5240 = vrot.lane.b32.xlu0 %v5207_v14, %s8540_s21  ;;  %4539 = vst.msk [vmem:[#allocation3 + $0x148] sm:$0xf] %vm1100_vm10, %v4500_v53  ;;  %v7949_v30 = vadd.f32 %v7948_v43, %v7947_v18 }
 0x3ba   : > { %v4498_v51 = vpop.permute.xlu0 %4497  ;;  %v5466_v25 = vld [vmem:[#allocation3 + $0xf0] sm:$0xff]  ;;  %v6365_v61 = vadd.f32 %v12402_v57, %v7949_v30 }
 0x3bb   : > { %v8434_v15 = vld [vmem:[#allocation3 + $0xf4] ss:$28 sps:$4 sm:$0xff]   ;;  %4538 = vst.msk [vmem:[#allocation3 + $0x12c] sm:$0xf] %vm1100_vm10, %v4498_v51  ;;  %v7644_v39 = vcombine.low %v5466_v25, %v5470_v50  ;;  %v5227_v1 = vpop.permute.xlu1 %5226 }
 0x3bc   : > { %6543 = vmatprep.mubr.bf16.mxu1 %v8434_v15  ;;  %5268 = vst.msk [vmem:[#allocation3 + $0x114] sm:$0xf] %vm1100_vm10, %v5227_v1 }
 0x3bd   : > { %6544 = vmatmul.mubr.bf16.gmra.mxu1 %v7644_v39 }
 0x3be   : > { %v5225_v5 = vpop.permute.xlu0 %5224 }
 0x3bf   : > { %5267 = vst.msk [vmem:[#allocation3 + $0xf8] sm:$0xf] %vm1100_vm10, %v5225_v5  ;;  %v3962_v19 = vpop.permute.xlu1 %3961 }
 0x3c0   : > { %4001 = vst.msk [vmem:[#allocation3 + $0x144] sm:$0xf] %vm1260_vm11, %v3962_v19 }
 0x3c2   : > { %v3960_v0 = vpop.permute.xlu0 %3959 }
 0x3c3   : > { %4000 = vst.msk [vmem:[#allocation3 + $0x128] sm:$0xf] %vm1260_vm11, %v3960_v0  ;;  %v4743_v6 = vpop.permute.xlu1 %4742 }
 0x3c4   : > { %4782 = vst.msk [vmem:[#allocation3 + $0x148] sm:$0xf] %vm1260_vm11, %v4743_v6 }
 0x3c6   : > { %v4741_v59 = vpop.permute.xlu0 %4740 }
 0x3c7   : > { %4781 = vst.msk [vmem:[#allocation3 + $0x12c] sm:$0xf] %vm1260_vm11, %v4741_v59  ;;  %v5383_v22 = vpop.permute.xlu1 %5382 }
 0x3c8   : > { %5424 = vst.msk [vmem:[#allocation3 + $0x114] sm:$0xf] %vm1260_vm11, %v5383_v22 }
 0x3ca   : > { %v5381_v52 = vpop.permute.xlu0 %5380 }
 0x3cb   : > { %5423 = vst.msk [vmem:[#allocation3 + $0xf8] sm:$0xf] %vm1260_vm11, %v5381_v52  ;;  %v4222_v46 = vpop.permute.xlu1 %4221 }
 0x3cc   : > { %4261 = vst.msk [vmem:[#allocation3 + $0x144] sm:$0xf] %vm1420_vm12, %v4222_v46 }
 0x3ce   : > { %v4220_v2 = vpop.permute.xlu0 %4219 }
 0x3cf   : > { %4260 = vst.msk [vmem:[#allocation3 + $0x128] sm:$0xf] %vm1420_vm12, %v4220_v2  ;;  %v4845_v38 = vpop.permute.xlu1 %4844 }
 0x3d0   : > { %4884 = vst.msk [vmem:[#allocation3 + $0x148] sm:$0xf] %vm1420_vm12, %v4845_v38  ;;  %v8014_v33 = vpop.f32.mrf.mxu0 }
 0x3d2   : > { %v4843_v24 = vpop.permute.xlu0 %4842  ;;  %v8436_v63 = vld [vmem:[#allocation3 + $0xf8] ss:$28 sps:$4 sm:$0xff]   ;;  %v8015_v32 = vpop.f32.mrf.mxu0 }
 0x3d3   : > { %4883 = vst.msk [vmem:[#allocation3 + $0x12c] sm:$0xf] %vm1420_vm12, %v4843_v24  ;;  %v3864_v7 = vpop.permute.xlu1 %3863  ;;  %v8016_v16 = vadd.f32 %v8015_v32, %v8014_v33  ;;  %8215 = vmatmul.mubr.msk.bf16.gmra.mxu0 %vm6243_vm1, %v8436_v63 }
 0x3d4   : > { %3901 = vst.msk [vmem:[#allocation3 + $0x17c] sm:$0xf] %vm1100_vm10, %v3864_v7  ;;  %v8017_v13 = vpop.f32.mrf.mxu0  ;;  %8218 = vmatprep.mubr.msk.bf16.mxu0 %vm8544_vm13, %v8543_v47 }
 0x3d5   : > { %v12453_v4 = vadd.f32 %v8016_v16, %v6362_v12 }
 0x3d6   : > { %v3862_v42 = vpop.permute.xlu0 %3861  ;;  %v8018_v20 = vpop.f32.mrf.mxu0 }
 0x3d7   : > { %3900 = vst.msk [vmem:[#allocation3 + $0x160] sm:$0xf] %vm1100_vm10, %v3862_v42  ;;  %v4504_v17 = vpop.permute.xlu1 %4503  ;;  %v8019_v29 = vadd.f32 %v8018_v20, %v8017_v13  ;;  %v5478_v27 = vld [vmem:[#allocation3 + $0x144] sm:$0xff] }
 0x3d8   : > { %4541 = vst.msk [vmem:[#allocation3 + $0x180] sm:$0xf] %vm1100_vm10, %v4504_v17 }
 0x3d9   : > { %v12458_v60 = vadd.f32 %v8019_v29, %v6365_v61 }
 0x3da   : > { %v4502_v56 = vpop.permute.xlu0 %4501  ;;  %v7950_v44 = vpop.f32.mrf.mxu1  ;;  %v5474_v48 = vld [vmem:[#allocation3 + $0x128] sm:$0xff] }
 0x3db   : > { %v8437_v54 = vld [vmem:[#allocation3 + $0x12c] ss:$28 sps:$4 sm:$0xff]   ;;  %4540 = vst.msk [vmem:[#allocation3 + $0x164] sm:$0xf] %vm1100_vm10, %v4502_v56  ;;  %v7651_v9 = vcombine.low %v5474_v48, %v5478_v27  ;;  %v5231_v49 = vpop.permute.xlu1 %5230 }
 0x3dc   : > { %v7951_v21 = vpop.f32.mrf.mxu1  ;;  %6551 = vmatprep.mubr.bf16.mxu1 %v8437_v54  ;;  %5270 = vst.msk [vmem:[#allocation3 + $0x14c] sm:$0xf] %vm1100_vm10, %v5231_v49 }
 0x3dd   : > { %v7952_v36 = vadd.f32 %v7951_v21, %v7950_v44  ;;  %6552 = vmatmul.mubr.bf16.gmra.mxu1 %v7651_v9 }
 0x3de   : > { %v5229_v11 = vpop.permute.xlu0 %5228  ;;  %v7953_v31 = vpop.f32.mrf.mxu1 }
 0x3df   : > { %5269 = vst.msk [vmem:[#allocation3 + $0x130] sm:$0xf] %vm1100_vm10, %v5229_v11  ;;  %v3966_v55 = vpop.permute.xlu1 %3965  ;;  %v6370_v25 = vadd.f32 %v12402_v57, %v7952_v36 }
 0x3e0   : > { %v7954_v40 = vpop.f32.mrf.mxu1  ;;  %4003 = vst.msk [vmem:[#allocation3 + $0x17c] sm:$0xf] %vm1260_vm11, %v3966_v55 }
 0x3e2   : > { %v3964_v14 = vpop.permute.xlu0 %3963 }
 0x3e3   : > { %4002 = vst.msk [vmem:[#allocation3 + $0x160] sm:$0xf] %vm1260_vm11, %v3964_v14  ;;  %v4747_v10 = vpop.permute.xlu1 %4746 }
 0x3e4   : > { %4784 = vst.msk [vmem:[#allocation3 + $0x180] sm:$0xf] %vm1260_vm11, %v4747_v10 }
 0x3e6   : > { %v8020_v53 = vpop.f32.mrf.mxu0  ;;  %v4745_v26 = vpop.permute.xlu0 %4744 }
 0x3e7   : > { %4783 = vst.msk [vmem:[#allocation3 + $0x164] sm:$0xf] %vm1260_vm11, %v4745_v26  ;;  %v5387_v18 = vpop.permute.xlu1 %5386 }
 0x3e8   : > { %v8021_v51 = vpop.f32.mrf.mxu0  ;;  %5426 = vst.msk [vmem:[#allocation3 + $0x14c] sm:$0xf] %vm1260_vm11, %v5387_v18 }
 0x3e9   : > { %v8022_v50 = vadd.f32 %v8021_v51, %v8020_v53 }
 0x3ea   : > { %v8023_v15 = vpop.f32.mrf.mxu0  ;;  %v5385_v43 = vpop.permute.xlu0 %5384 }
 0x3eb   : > { %v12469_v39 = vadd.f32 %v8022_v50, %v6370_v25  ;;  %5425 = vst.msk [vmem:[#allocation3 + $0x130] sm:$0xf] %vm1260_vm11, %v5385_v43  ;;  %v4226_v1 = vpop.permute.xlu1 %4225 }
 0x3ec   : > { %v8024_v30 = vpop.f32.mrf.mxu0  ;;  %4263 = vst.msk [vmem:[#allocation3 + $0x17c] sm:$0xf] %vm1420_vm12, %v4226_v1 }
 0x3ee   : > { %v4224_v5 = vpop.permute.xlu0 %4223 }
 0x3ef   : > { %4262 = vst.msk [vmem:[#allocation3 + $0x160] sm:$0xf] %vm1420_vm12, %v4224_v5  ;;  %v4849_v19 = vpop.permute.xlu1 %4848 }
 0x3f0   : > { %4886 = vst.msk [vmem:[#allocation3 + $0x180] sm:$0xf] %vm1420_vm12, %v4849_v19 }
 0x3f2   : > { %v4847_v57 = vpop.permute.xlu0 %4846  ;;  %v8439_v0 = vld [vmem:[#allocation3 + $0x130] ss:$28 sps:$4 sm:$0xff]  }
 0x3f3   : > { %4885 = vst.msk [vmem:[#allocation3 + $0x164] sm:$0xf] %vm1420_vm12, %v4847_v57  ;;  %v3868_v6 = vpop.permute.xlu1 %3867  ;;  %8219 = vmatmul.mubr.msk.bf16.gmra.mxu0 %vm6243_vm1, %v8439_v0 }
 0x3f4   : > { %3903 = vst.msk [vmem:[#allocation3 + $0x1b4] sm:$0xf] %vm1100_vm10, %v3868_v6  ;;  %8222 = vmatprep.mubr.msk.bf16.mxu0 %vm8544_vm13, %v8543_v47 }
 0x3f6   : > { %v3866_v59 = vpop.permute.xlu0 %3865 }
 0x3f7   : > { %3902 = vst.msk [vmem:[#allocation3 + $0x198] sm:$0xf] %vm1100_vm10, %v3866_v59  ;;  %v4508_v22 = vpop.permute.xlu1 %4507  ;;  %v5486_v2 = vld [vmem:[#allocation3 + $0x17c] sm:$0xff] }
 0x3f8   : > { %4543 = vst.msk [vmem:[#allocation3 + $0x1b8] sm:$0xf] %vm1100_vm10, %v4508_v22 }
 0x3fa   : > { %v4506_v52 = vpop.permute.xlu0 %4505  ;;  %v5482_v46 = vld [vmem:[#allocation3 + $0x160] sm:$0xff] }
 0x3fb   : > { %v8440_v38 = vld [vmem:[#allocation3 + $0x164] ss:$28 sps:$4 sm:$0xff]   ;;  %4542 = vst.msk [vmem:[#allocation3 + $0x19c] sm:$0xf] %vm1100_vm10, %v4506_v52  ;;  %v7658_v33 = vcombine.low %v5482_v46, %v5486_v2  ;;  %v5235_v24 = vpop.permute.xlu1 %5234 }
 0x3fc   : > { %6559 = vmatprep.mubr.bf16.mxu1 %v8440_v38  ;;  %5272 = vst.msk [vmem:[#allocation3 + $0x184] sm:$0xf] %vm1100_vm10, %v5235_v24  ;;  %v8042_v7 = vpop.f32.mrf.mxu1 }
 0x3fd   : > { %6560 = vmatmul.mubr.bf16.gmra.mxu1 %v7658_v33 }
 0x3fe   : > { %v5233_v63 = vpop.permute.xlu0 %5232  ;;  %v8043_v42 = vpop.f32.mrf.mxu1 }
 0x3ff   : > { %5271 = vst.msk [vmem:[#allocation3 + $0x168] sm:$0xf] %vm1100_vm10, %v5233_v63  ;;  %v3970_v32 = vpop.permute.xlu1 %3969  ;;  %v8044_v44 = vadd.f32 %v8043_v42, %v8042_v7 }
 0x400   : > { %4005 = vst.msk [vmem:[#allocation3 + $0x1b4] sm:$0xf] %vm1260_vm11, %v3970_v32  ;;  %v8045_v17 = vpop.f32.mrf.mxu1 }
 0x401   : > { %v6514_v21 = vadd.f32 %v8044_v44, %v11580_v45 }
 0x402   : > { %v3968_v12 = vpop.permute.xlu0 %3967  ;;  %v8046_v48 = vpop.f32.mrf.mxu1 }
 0x403   : > { %4004 = vst.msk [vmem:[#allocation3 + $0x198] sm:$0xf] %vm1260_vm11, %v3968_v12  ;;  %v4751_v16 = vpop.permute.xlu1 %4750  ;;  %v8047_v49 = vadd.f32 %v8046_v48, %v8045_v17 }
 0x404   : > { %4786 = vst.msk [vmem:[#allocation3 + $0x1b8] sm:$0xf] %vm1260_vm11, %v4751_v16 }
 0x405   : > { %v6517_v10 = vadd.f32 %v8047_v49, %v11609_v34 }
 0x406   : > { %v4749_v13 = vpop.permute.xlu0 %4748 }
 0x407   : > { %4785 = vst.msk [vmem:[#allocation3 + $0x19c] sm:$0xf] %vm1260_vm11, %v4749_v13  ;;  %v5391_v20 = vpop.permute.xlu1 %5390 }
 0x408   : > { %5428 = vst.msk [vmem:[#allocation3 + $0x184] sm:$0xf] %vm1260_vm11, %v5391_v20 }
 0x40a   : > { %v5389_v61 = vpop.permute.xlu0 %5388 }
 0x40b   : > { %5427 = vst.msk [vmem:[#allocation3 + $0x168] sm:$0xf] %vm1260_vm11, %v5389_v61  ;;  %v4230_v29 = vpop.permute.xlu1 %4229 }
 0x40c   : > { %4265 = vst.msk [vmem:[#allocation3 + $0x1b4] sm:$0xf] %vm1420_vm12, %v4230_v29 }
 0x40e   : > { %v4228_v56 = vpop.permute.xlu0 %4227 }
 0x40f   : > { %4264 = vst.msk [vmem:[#allocation3 + $0x198] sm:$0xf] %vm1420_vm12, %v4228_v56  ;;  %v4853_v27 = vpop.permute.xlu1 %4852 }
 0x410   : > { %4888 = vst.msk [vmem:[#allocation3 + $0x1b8] sm:$0xf] %vm1420_vm12, %v4853_v27 }
 0x412   : > { %v4851_v54 = vpop.permute.xlu0 %4850  ;;  %v8442_v9 = vld [vmem:[#allocation3 + $0x168] ss:$28 sps:$4 sm:$0xff]  }
 0x413   : > { %4887 = vst.msk [vmem:[#allocation3 + $0x19c] sm:$0xf] %vm1420_vm12, %v4851_v54  ;;  %v5239_v36 = vpop.permute.xlu1 %5238  ;;  %v6617_v11 = vpop.f32.mrf.mxu0  ;;  %8223 = vmatmul.mubr.msk.bf16.gmra.mxu0 %vm6243_vm1, %v8442_v9 }
 0x414   : > { %5274 = vst.msk [vmem:[#allocation3 + $0x1bc] sm:$0xf] %vm1100_vm10, %v5239_v36  ;;  %v6618_v31 = vadd.f32 %v6617_v11, %v6514_v21  ;;  %8226 = vmatprep.mubr.msk.bf16.mxu0 %vm8544_vm13, %v8543_v47 }
 0x415   : > { %v8200_v40 = vpop.f32.mrf.mxu0 }
 0x416   : > { %v5237_v55 = vpop.permute.xlu0 %5236  ;;  %v6687_v14 = vmax.f32 %v6618_v31, 0.0 }
 0x417   : > { %5273 = vst.msk [vmem:[#allocation3 + $0x1a0] sm:$0xf] %vm1100_vm10, %v5237_v55  ;;  %v4510_v53 = vpop.permute.xlu1 %4509  ;;  %v6620_v26 = vpop.f32.mrf.mxu0  ;;  %v5494_v15 = vld [vmem:[#allocation3 + $0x1b4] sm:$0xff] }
 0x418   : > { %v7847_v45 = vpack.c.bf16 %v6687_v14, %v6687_v14  ;;  %4544 = vst.msk [vmem:[#allocation3 + $0x1d4] sm:$0xf] %vm1100_vm10, %v4510_v53  ;;  %v6621_v18 = vadd.f32 %v6620_v26, %v6517_v10 }
 0x419   : > { %v8201_v25 = vpop.f32.mrf.mxu0 }
 0x41a   : > { %v3870_v51 = vpop.permute.xlu0 %3869  ;;  %v5490_v50 = vld [vmem:[#allocation3 + $0x198] sm:$0xff]  ;;  %6773 = vst.msk [vmem:[#allocation4] sm:$0xf] %vm791_vm0, %v7847_v45  ;;  %v6688_v1 = vmax.f32 %v6621_v18, 0.0 }
 0x41b   : > { %v8443_v43 = vld [vmem:[#allocation3 + $0x19c] ss:$28 sps:$4 sm:$0xff]   ;;  %3904 = vst.msk [vmem:[#allocation3 + $0x1d0] sm:$0xf] %vm1100_vm10, %v3870_v51  ;;  %v7665_v30 = vcombine.low %v5490_v50, %v5494_v15  ;;  %v5395_v5 = vpop.permute.xlu1 %5394 }
 0x41c   : > { %6567 = vmatprep.mubr.bf16.mxu1 %v8443_v43  ;;  %v7848_v34 = vpack.c.bf16 %v6688_v1, %v6688_v1  ;;  %5430 = vst.msk [vmem:[#allocation3 + $0x1bc] sm:$0xf] %vm1260_vm11, %v5395_v5 }
 0x41d   : > { %6568 = vmatmul.mubr.bf16.gmra.mxu1 %v7665_v30  ;;  %v8048_v6 = vpop.f32.mrf.mxu1 }
 0x41e   : > { %v5393_v19 = vpop.permute.xlu0 %5392  ;;  %6774 = vst.msk [vmem:[#allocation4 + $0x4] sm:$0xf] %vm791_vm0, %v7848_v34 }
 0x41f   : > { %5429 = vst.msk [vmem:[#allocation3 + $0x1a0] sm:$0xf] %vm1260_vm11, %v5393_v19  ;;  %v4753_v57 = vpop.permute.xlu1 %4752  ;;  %v8049_v46 = vpop.f32.mrf.mxu1 }
 0x420   : > { %4787 = vst.msk [vmem:[#allocation3 + $0x1d4] sm:$0xf] %vm1260_vm11, %v4753_v57  ;;  %v8050_v63 = vadd.f32 %v8049_v46, %v8048_v6 }
 0x421   : > { %v8051_v33 = vpop.f32.mrf.mxu1  ;;  %v6837_v55 = vld [vmem:[#allocation4] sm:$0x2] }
 0x422   : > { %v3972_v0 = vpop.permute.xlu0 %3971  ;;  %v6522_v16 = vadd.f32 %v8050_v63, %v11733_v62  ;;  %v6839_v18 = vshrl.u32 %v6837_v55, 16 }
 0x423   : > { %4006 = vst.msk [vmem:[#allocation3 + $0x1d0] sm:$0xf] %vm1260_vm11, %v3972_v0  ;;  %v4855_v59 = vpop.permute.xlu1 %4854  ;;  %v8052_v7 = vpop.f32.mrf.mxu1 }
 0x424   : > { %4889 = vst.msk [vmem:[#allocation3 + $0x1d4] sm:$0xf] %vm1420_vm12, %v4855_v59 }
 0x425   : > { %v6845_v53 = vld [vmem:[#allocation4 + $0x4] sm:$0x1] }
 0x426   : > { %v4232_v22 = vpop.permute.xlu0 %4231  ;;  %v8445_v52 = vld [vmem:[#allocation3 + $0x1a0] ss:$28 sps:$4 sm:$0xff]   ;;  %v6847_v50 = vrot.slane %v6845_v53, 7  ;;  %v6851_v15 = vshrl.u32 %v6845_v53, 16 }
 0x427   : > { %4266 = vst.msk [vmem:[#allocation3 + $0x1d0] sm:$0xf] %vm1420_vm12, %v4232_v22  ;;  %8227 = vmatmul.mubr.msk.bf16.gmra.mxu0 %vm6243_vm1, %v8445_v52  ;;  %v5397_v38 = vpop.permute.xlu1 %5396 }
 0x428   : > { %8230 = vmatprep.mubr.msk.bf16.mxu0 %vm8544_vm13, %v8543_v47  ;;  %v6853_v30 = vrot.slane %v6851_v15, 7 }
 0x42a   : > { %v5241_v2 = vpop.permute.xlu0 %5240 }
 0x42b   : > { %5275 = vst.msk [vmem:[#allocation3 + $0x1d8] sm:$0xf] %vm1100_vm10, %v5241_v2 }
 0x42c   : > { %5431 = vst.msk [vmem:[#allocation3 + $0x1d8] sm:$0xf] %vm1260_vm11, %v5397_v38 }
 0x42e   : > { %v5498_v24 = vld [vmem:[#allocation3 + $0x1d0] sm:$0xff] }
 0x42f   : > { %v7673_v32 = vcombine.high %v5498_v24, %v5498_v24  ;;  %v7672_v12 = vcombine.low %v5498_v24, %v5498_v24 }
 0x431   : > { %6575 = vmatprep.mubr.bf16.mxu1 %v7673_v32 }
 0x432   : > { %6576 = vmatmul.mubr.bf16.gmra.mxu1 %v7672_v12 }
 0x433   : > { %v8448_v13 = vld [vmem:[#allocation3 + $0x1d8] ss:$0 sps:$4 sm:$0xff]   ;;  %v6625_v42 = vpop.f32.mrf.mxu0 }
 0x434   : > { %v6626_v20 = vadd.f32 %v6625_v42, %v6522_v16  ;;  %8231 = vmatmul.mubr.msk.bf16.gmra.mxu0 %vm6243_vm1, %v8448_v13 }
 0x435   : > { %v8204_v61 = vpop.f32.mrf.mxu0 }
 0x436   : > { %v6689_v17 = vmax.f32 %v6626_v20, 0.0 }
 0x437   : > { %v6628_v29 = vpop.f32.mrf.mxu0 }
 0x438   : > { %v7849_v56 = vpack.c.bf16 %v6689_v17, %v6689_v17  ;;  %v6882_v29 = vld [vmem:[#allocation4 + $0x4] sm:$0x4] }
 0x439   : > { %v8205_v44 = vpop.f32.mrf.mxu0 }
 0x43a   : > { %6775 = vst.msk [vmem:[#allocation4 + $0x8] sm:$0xf] %vm791_vm0, %v7849_v56 }
 0x43d   : > { %v8054_v48 = vpop.f32.mrf.mxu1 }
 0x43f   : > { %v8055_v27 = vpop.f32.mrf.mxu1 }
 0x440   : > { %v8056_v9 = vadd.f32 %v8055_v27, %v8054_v48  ;;  %v6925_v48 = vld [vmem:[#allocation4 + $0x4] sm:$0x8] }
 0x441   : > { %v8057_v54 = vpop.f32.mrf.mxu1 }
 0x442   : > { %v6530_v62 = vadd.f32 %v8056_v9, %v11972_v37  ;;  %v6844_v37 = vmax.bf16 %v6839_v18, %v6837_v55 }
 0x443   : > { %v8058_v49 = vpop.f32.mrf.mxu1 }
 0x444   : > { %v8059_v21 = vadd.f32 %v8058_v49, %v8057_v54  ;;  %v6849_v1 = vmax.bf16 %v6847_v50, %v6844_v37  ;;  %v6890_v54 = vld [vmem:[#allocation4 + $0x8] sm:$0x2] }
 0x445   : > { %v6896_v55 = vshrl.u32 %v6890_v54, 16 }
 0x446   : > { %v6533_v14 = vadd.f32 %v8059_v21, %v11991_v23  ;;  %v6855_v34 = vmax.bf16 %v6853_v30, %v6849_v1  ;;  %v6884_v21 = vshrl.u32 %v6882_v29, 16 }
 0x448   : > { %v6889_v53 = vmax.bf16 %v6884_v21, %v6882_v29  ;;  %v8453_v21 = vld [vmem:[%s12689_s5 + $0x68] sm:$0xff]  }
 0x453   : > { %v6633_v36 = vpop.f32.mrf.mxu0 }
 0x454   : > { %v6634_v11 = vadd.f32 %v6633_v36, %v6530_v62  ;;  %v6933_v62 = vld [vmem:[#allocation4 + $0x8] sm:$0x4] }
 0x455   : > { %v8208_v31 = vpop.f32.mrf.mxu0 }
 0x456   : > { %v6691_v40 = vmax.f32 %v6634_v11, 0.0  ;;  %v6927_v11 = vshrl.u32 %v6925_v48, 16 }
 0x457   : > { %v6636_v10 = vpop.f32.mrf.mxu0 }
 0x458   : > { %v7851_v26 = vpack.c.bf16 %v6691_v40, %v6691_v40  ;;  %v6637_v45 = vadd.f32 %v6636_v10, %v6533_v14  ;;  %v6935_v40 = vrot.slane %v6933_v62, 7  ;;  %v6939_v14 = vshrl.u32 %v6933_v62, 16 }
 0x459   : > { %v8209_v51 = vpop.f32.mrf.mxu0 }
 0x45a   : > { %6777 = vst.msk [vmem:[#allocation4 + $0x10] sm:$0xf] %vm791_vm0, %v7851_v26  ;;  %v6692_v25 = vmax.f32 %v6637_v45, 0.0  ;;  %v6932_v26 = vmax.bf16 %v6927_v11, %v6925_v48  ;;  %v6898_v45 = vrot.slane %v6896_v55, 7  ;;  %v6941_v51 = vrot.slane %v6939_v14, 7  ;;  %v8451_v48 = vld [vmem:[%s12689_s5 + $0x70] sm:$0xff]  }
 0x45b   : > { %v8455_v55 = vld [vmem:[%s12689_s5 + $0x60] sm:$0xff]  }
 0x45c   : > { %v7852_v43 = vpack.c.bf16 %v6692_v25, %v6692_v25  ;;  %v6937_v18 = vmax.bf16 %v6935_v40, %v6932_v26  ;;  %v8458_v26 = vld [vmem:[%s12689_s5 + $0x18] sm:$0xff]  }
 0x45d   : > { %v8060_v57 = vpop.f32.mrf.mxu1 }
 0x45e   : > { %6778 = vst.msk [vmem:[#allocation4 + $0x14] sm:$0xf] %vm791_vm0, %v7852_v43 }
 0x45f   : > { %v8061_v2 = vpop.f32.mrf.mxu1 }
 0x460   : > { %v8062_v12 = vadd.f32 %v8061_v2, %v8060_v57 }
 0x461   : > { %v6856_v5 = vld [vmem:[#allocation4 + $0x10] sm:$0x8]  ;;  %v8063_v63 = vpop.f32.mrf.mxu1 }
 0x462   : > { %v7763_v23 = vrot.slane %v6856_v5, 10  ;;  %v6863_v19 = vshrl.u32 %v6856_v5, 16  ;;  %v6538_v42 = vadd.f32 %v8062_v12, %v12060_v35  ;;  %v6892_v35 = vrot.slane %v6890_v54, 7 }
 0x463   : > { %v8064_v16 = vpop.f32.mrf.mxu1  ;;  %v6943_v5 = vmax.bf16 %v6941_v51, %v6937_v18  ;;  %v8460_v18 = vld [vmem:[%s12689_s5 + $0x10] sm:$0xff]   ;;  %v8461_v51 = vld [vmem:[%s12689_s5 + $0x48] sm:$0xff]  }
 0x464   : > { %v6861_v0 = vmax.bf16 %v7763_v23, %v6855_v34  ;;  %v7764_v6 = vrot.slane %v6863_v19, 10  ;;  %v8065_v13 = vadd.f32 %v8064_v16, %v8063_v63 }
 0x465   : > { %v6869_v59 = vld [vmem:[#allocation4 + $0x14] sm:$0x4] }
 0x466   : > { %v6868_v22 = vmax.bf16 %v7764_v6, %v6861_v0  ;;  %v7765_v52 = vrot.slane %v6869_v59, 9  ;;  %v6876_v46 = vshrl.u32 %v6869_v59, 16  ;;  %v6541_v44 = vadd.f32 %v8065_v13, %v12083_v58 }
 0x467   : > { %v6894_v58 = vmax.bf16 %v6892_v35, %v6889_v53  ;;  %v8457_v53 = vld [vmem:[%s12689_s5 + $0x58] sm:$0xff]  }
 0x468   : > { %v6874_v38 = vmax.bf16 %v7765_v52, %v6868_v22  ;;  %v7766_v33 = vrot.slane %v6876_v46, 9 }
 0x469   : > { %v6900_v43 = vmax.bf16 %v6898_v45, %v6894_v58  ;;  %v8459_v58 = vld [vmem:[%s12689_s5 + $0x50] sm:$0xff]  }
 0x46a   : > { %v6881_v24 = vmax.bf16 %v7766_v33, %v6874_v38 }
 0x46c   : > { %v7787_v32 = vcombine.low %v6881_v24, %v6881_v24 }
 0x46e   : > { %v7145_v7 = vrot.slane %v7787_v32, 1 }
 0x470   : > { %7146 = vrot.lane.b32.xlu1 %v7145_v7, %s8540_s21 }
 0x473   : > { %v6641_v20 = vpop.f32.mrf.mxu0 }
 0x474   : > { %v6642_v61 = vadd.f32 %v6641_v20, %v6538_v42 }
 0x475   : > { %v8212_v17 = vpop.f32.mrf.mxu0 }
 0x476   : > { %v6693_v56 = vmax.f32 %v6642_v61, 0.0 }
 0x477   : > { %v6644_v27 = vpop.f32.mrf.mxu0 }
 0x478   : > { %v7853_v9 = vpack.c.bf16 %v6693_v56, %v6693_v56  ;;  %v6645_v49 = vadd.f32 %v6644_v27, %v6541_v44  ;;  %v8449_v56 = vld [vmem:[%s12689_s5 + $0x78] sm:$0xff]  }
 0x479   : > { %v8213_v36 = vpop.f32.mrf.mxu0  ;;  %v8450_v44 = vld [vmem:[%s12689_s5 + $0x38] sm:$0xff]   ;;  %8111 = vmatprep.subr.bf16.mxu1 %v8449_v56 }
 0x47a   : > { %6779 = vst.msk [vmem:[#allocation4 + $0x18] sm:$0xf] %vm791_vm0, %v7853_v9  ;;  %v6694_v31 = vmax.f32 %v6645_v49, 0.0  ;;  %8112 = vmatpush3.bf16.msra.mxu1 %v8450_v44  ;;  %v8452_v49 = vld [vmem:[%s12689_s5 + $0x30] sm:$0xff]  }
 0x47b   : > { %8113 = vmatprep.subr.bf16.mxu1 %v8451_v48 }
 0x47c   : > { %v7854_v10 = vpack.c.bf16 %v6694_v31, %v6694_v31  ;;  %v8454_v31 = vld [vmem:[%s12689_s5 + $0x28] sm:$0xff]  }
 0x47d   : > { %v8066_v30 = vpop.f32.mrf.mxu1 }
 0x47e   : > { %6780 = vst.msk [vmem:[#allocation4 + $0x1c] sm:$0xf] %vm791_vm0, %v7854_v10  ;;  %8114 = vmatpush3.bf16.msra.mxu1 %v8452_v49  ;;  %v8456_v10 = vld [vmem:[%s12689_s5 + $0x20] sm:$0xff]  }
 0x47f   : > { %v8067_v33 = vpop.f32.mrf.mxu1  ;;  %8115 = vmatprep.subr.bf16.mxu1 %v8453_v21 }
 0x481   : > { %v6901_v25 = vld [vmem:[#allocation4 + $0x18] sm:$0x1]  ;;  %v6912_v50 = vld [vmem:[#allocation4 + $0x18] sm:$0x8]  ;;  %v6944_v15 = vld [vmem:[#allocation4 + $0x18] sm:$0x2]  ;;  %v8069_v13 = vpop.f32.mrf.mxu1 }
 0x482   : > { %v6903_v37 = vrot.slane %v6901_v25, 6  ;;  %v6907_v1 = vshrl.u32 %v6901_v25, 16  ;;  %v6946_v34 = vrot.slane %v6944_v15, 6  ;;  %v6950_v23 = vshrl.u32 %v6944_v15, 16  ;;  %8116 = vmatpush3.bf16.msra.mxu1 %v8454_v31 }
 0x483   : > { %v6919_v0 = vshrl.u32 %v6912_v50, 16  ;;  %v7768_v46 = vrot.slane %v6912_v50, 9  ;;  %v8070_v29 = vpop.f32.mrf.mxu1  ;;  %8117 = vmatprep.subr.bf16.mxu1 %v8455_v55  ;;  %v8462_v50 = vld [vmem:[%s12689_s5 + $0x8] sm:$0xff]  }
 0x484   : > { %v6905_v19 = vmax.bf16 %v6903_v37, %v6900_v43  ;;  %v6909_v57 = vrot.slane %v6907_v1, 6  ;;  %v6948_v6 = vmax.bf16 %v6946_v34, %v6943_v5  ;;  %v6952_v59 = vrot.slane %v6950_v23, 6 }
 0x485   : > { %v6955_v22 = vld [vmem:[#allocation4 + $0x1c] sm:$0x1]  ;;  %v7769_v32 = vrot.slane %v6919_v0, 9  ;;  %v8071_v27 = vadd.f32 %v8070_v29, %v8069_v13 }
 0x486   : > { %v6911_v52 = vmax.bf16 %v6909_v57, %v6905_v19  ;;  %v6957_v2 = vrot.slane %v6955_v22, 5  ;;  %v6961_v38 = vshrl.u32 %v6955_v22, 16  ;;  %v6954_v24 = vmax.bf16 %v6952_v59, %v6948_v6  ;;  %8118 = vmatpush3.bf16.msra.mxu1 %v8456_v10 }
 0x487   : > { %v6549_v36 = vadd.f32 %v8071_v27, %v12164_v8  ;;  %8119 = vmatprep.subr.bf16.mxu1 %v8457_v53 }
 0x488   : > { %v6917_v63 = vmax.bf16 %v7768_v46, %v6911_v52  ;;  %v6963_v12 = vrot.slane %v6961_v38, 5  ;;  %v6959_v7 = vmax.bf16 %v6957_v2, %v6954_v24 }
 0x48a   : > { %v6924_v16 = vmax.bf16 %v7769_v32, %v6917_v63  ;;  %v6965_v42 = vmax.bf16 %v6963_v12, %v6959_v7  ;;  %8120 = vmatpush3.bf16.msra.mxu1 %v8458_v26 }
 0x48b   : > { %8121 = vmatprep.subr.bf16.mxu1 %v8459_v58 }
 0x48c   : > { %v7788_v20 = vcombine.low %v6924_v16, %v6924_v16  ;;  %v7789_v17 = vcombine.low %v6965_v42, %v6965_v42 }
 0x48e   : > { %v7151_v61 = vrot.slane %v7788_v20, 2  ;;  %v7157_v54 = vrot.slane %v7789_v17, 3  ;;  %8122 = vmatpush3.bf16.msra.mxu1 %v8460_v18 }
 0x48f   : > { %8123 = vmatprep.subr.bf16.mxu1 %v8461_v51 }
 0x490   : > { %7152 = vrot.lane.b32.xlu1 %v7151_v61, %s8541_s22 }
 0x492   : > { %8124 = vmatpush3.bf16.msra.mxu1 %v8462_v50 }
 0x493   : > { %v6649_v9 = vpop.f32.mrf.mxu0 }
 0x494   : > { %7158 = vrot.lane.b32.xlu1 %v7157_v54, %s8542_s23 }
 0x495   : > { %v8216_v62 = vpop.f32.mrf.mxu0 }
 0x497   : > { %v6652_v11 = vpop.f32.mrf.mxu0 }
 0x498   : > { %v6653_v35 = vadd.f32 %v6652_v11, %v6549_v36 }
 0x499   : > { %v8217_v40 = vpop.f32.mrf.mxu0 }
 0x49a   : > { %v6696_v14 = vmax.f32 %v6653_v35, 0.0 }
 0x49c   : > { %v7856_v8 = vpack.c.bf16 %v6696_v14, %v6696_v14 }
 0x49d   : > { %v8072_v45 = vpop.f32.mrf.mxu1 }
 0x49e   : > { %6782 = vst.msk [vmem:[#allocation4 + $0x24] sm:$0xf] %vm791_vm0, %v7856_v8 }
 0x49f   : > { %v8073_v25 = vpop.f32.mrf.mxu1 }
 0x4a0   : > { %v8074_v43 = vadd.f32 %v8073_v25, %v8072_v45 }
 0x4a1   : > { %v8075_v15 = vpop.f32.mrf.mxu1 }
 0x4a2   : > { %v6554_v30 = vadd.f32 %v8074_v43, %v12212_v41 }
 0x4a3   : > { %v8076_v37 = vpop.f32.mrf.mxu1 }
 0x4a4   : > { %v8077_v1 = vadd.f32 %v8076_v37, %v8075_v15 }
 0x4a5   : > { %v7013_v44 = vld [vmem:[#allocation4 + $0x24] sm:$0x2] }
 0x4a6   : > { %v6557_v57 = vadd.f32 %v8077_v1, %v12230_v28  ;;  %v7015_v9 = vshrl.u32 %v7013_v44, 16 }
 0x4a8   : > { %v7020_v35 = vmax.bf16 %v7015_v9, %v7013_v44 }
 0x4b3   : > { %v6657_v5 = vpop.f32.mrf.mxu0 }
 0x4b4   : > { %v6658_v34 = vadd.f32 %v6657_v5, %v6554_v30 }
 0x4b5   : > { %v8220_v23 = vpop.f32.mrf.mxu0 }
 0x4b6   : > { %v6697_v19 = vmax.f32 %v6658_v34, 0.0 }
 0x4b7   : > { %v6660_v0 = vpop.f32.mrf.mxu0 }
 0x4b8   : > { %v7857_v6 = vpack.c.bf16 %v6697_v19, %v6697_v19  ;;  %v6661_v59 = vadd.f32 %v6660_v0, %v6557_v57  ;;  %v8463_v19 = vld [vmem:[%s12689_s5 + $0x40] sm:$0xff]  }
 0x4b9   : > { %v8221_v22 = vpop.f32.mrf.mxu0  ;;  %8125 = vmatprep.subr.bf16.mxu1 %v8463_v19 }
 0x4ba   : > { %6783 = vst.msk [vmem:[#allocation4 + $0x28] sm:$0xf] %vm791_vm0, %v7857_v6  ;;  %v6698_v52 = vmax.f32 %v6661_v59, 0.0 }
 0x4bc   : > { %v7858_v46 = vpack.c.bf16 %v6698_v52, %v6698_v52 }
 0x4bd   : > { %v8078_v2 = vpop.f32.mrf.mxu1 }
 0x4be   : > { %6784 = vst.msk [vmem:[#allocation4 + $0x2c] sm:$0xf] %vm791_vm0, %v7858_v46 }
 0x4bf   : > { %v8079_v38 = vpop.f32.mrf.mxu1 }
 0x4c1   : > { %v8081_v33 = vpop.f32.mrf.mxu1  ;;  %v7021_v48 = vld [vmem:[#allocation4 + $0x28] sm:$0x1]  ;;  %v7058_v26 = vld [vmem:[#allocation4 + $0x28] sm:$0x4]  ;;  %v7101_v5 = vld [vmem:[#allocation4 + $0x28] sm:$0x8] }
 0x4c2   : > { %v7023_v21 = vrot.slane %v7021_v48, 7  ;;  %v7027_v62 = vshrl.u32 %v7021_v48, 16  ;;  %v7060_v25 = vshrl.u32 %v7058_v26, 16  ;;  %v7103_v2 = vshrl.u32 %v7101_v5, 16 }
 0x4c3   : > { %v8082_v41 = vpop.f32.mrf.mxu1 }
 0x4c4   : > { %v8083_v24 = vadd.f32 %v8082_v41, %v8081_v33  ;;  %v7025_v8 = vmax.bf16 %v7023_v21, %v7020_v35  ;;  %v7029_v53 = vrot.slane %v7027_v62, 7  ;;  %v7065_v23 = vmax.bf16 %v7060_v25, %v7058_v26  ;;  %v8464_v21 = vld [vmem:[%s12689_s5] sm:$0xff]  }
 0x4c5   : > { %v7066_v51 = vld [vmem:[#allocation4 + $0x2c] sm:$0x2]  ;;  %v7109_v6 = vld [vmem:[#allocation4 + $0x2c] sm:$0x4]  ;;  %8126 = vmatpush3.bf16.msra.mxu1 %v8464_v21 }
 0x4c6   : > { %v6565_v12 = vadd.f32 %v8083_v24, %v12411_v3  ;;  %v7031_v15 = vmax.bf16 %v7029_v53, %v7025_v8  ;;  %v7072_v37 = vshrl.u32 %v7066_v51, 16  ;;  %8234 = vmatprep.subr.bf16.mxu1 %v8543_v47 }
 0x4c8   : > { %v7074_v46 = vrot.slane %v7072_v37, 7 }
 0x4d3   : > { %v6665_v63 = vpop.f32.mrf.mxu0 }
 0x4d5   : > { %v8224_v32 = vpop.f32.mrf.mxu0 }
 0x4d7   : > { %v6668_v28 = vpop.f32.mrf.mxu0 }
 0x4d8   : > { %v6669_v7 = vadd.f32 %v6668_v28, %v6565_v12  ;;  %v7111_v12 = vrot.slane %v7109_v6, 7  ;;  %v7115_v28 = vshrl.u32 %v7109_v6, 16 }
 0x4d9   : > { %v8225_v16 = vpop.f32.mrf.mxu0 }
 0x4da   : > { %v6700_v13 = vmax.f32 %v6669_v7, 0.0 }
 0x4dc   : > { %v7860_v42 = vpack.c.bf16 %v6700_v13, %v6700_v13 }
 0x4dd   : > { %v8084_v20 = vpop.f32.mrf.mxu1 }
 0x4de   : > { %6786 = vst.msk [vmem:[#allocation4 + $0x34] sm:$0xf] %vm791_vm0, %v7860_v42 }
 0x4df   : > { %v8085_v61 = vpop.f32.mrf.mxu1 }
 0x4e0   : > { %v8086_v29 = vadd.f32 %v8085_v61, %v8084_v20 }
 0x4e1   : > { %v8087_v17 = vpop.f32.mrf.mxu1 }
 0x4e2   : > { %v6570_v54 = vadd.f32 %v8086_v29, %v12453_v4  ;;  %v7108_v29 = vmax.bf16 %v7103_v2, %v7101_v5  ;;  %v6811_v2 = vld [vmem:[#allocation4 + $0x10] sm:$0x4] }
 0x4e3   : > { %v8088_v56 = vpop.f32.mrf.mxu1 }
 0x4e4   : > { %v8089_v27 = vadd.f32 %v8088_v56, %v8087_v17  ;;  %v7113_v9 = vmax.bf16 %v7111_v12, %v7108_v29  ;;  %v6818_v12 = vshrl.u32 %v6811_v2, 16 }
 0x4e5   : > { %v7032_v40 = vld [vmem:[#allocation4 + $0x34] sm:$0x8] }
 0x4e6   : > { %v6573_v31 = vadd.f32 %v8089_v27, %v12458_v60  ;;  %v7779_v45 = vrot.slane %v7032_v40, 10  ;;  %v7039_v18 = vshrl.u32 %v7032_v40, 16  ;;  %v7068_v60 = vrot.slane %v7066_v51, 7 }
 0x4e7   : > { %v6673_v49 = vpop.f32.mrf.mxu0 }
 0x4e8   : > { %v6674_v3 = vadd.f32 %v6673_v49, %v6570_v54  ;;  %v7037_v1 = vmax.bf16 %v7779_v45, %v7031_v15  ;;  %v7780_v30 = vrot.slane %v7039_v18, 10  ;;  %v7070_v52 = vmax.bf16 %v7068_v60, %v7065_v23  ;;  %v6966_v23 = vld [vmem:[#allocation4 + $0x24] sm:$0x1] }
 0x4e9   : > { %v8228_v36 = vpop.f32.mrf.mxu0  ;;  %v7117_v49 = vrot.slane %v7115_v28, 7 }
 0x4ea   : > { %v6701_v11 = vmax.f32 %v6674_v3, 0.0  ;;  %v7044_v41 = vmax.bf16 %v7780_v30, %v7037_v1  ;;  %v7076_v20 = vmax.bf16 %v7074_v46, %v7070_v52 }
 0x4eb   : > { %v6676_v55 = vpop.f32.mrf.mxu0  ;;  %v7119_v26 = vmax.bf16 %v7117_v49, %v7113_v9 }
 0x4ec   : > { %v7861_v14 = vpack.c.bf16 %v6701_v11, %v6701_v11  ;;  %v6677_v10 = vadd.f32 %v6676_v55, %v6573_v31 }
 0x4ed   : > { %v8229_v58 = vpop.f32.mrf.mxu0 }
 0x4ee   : > { %6787 = vst.msk [vmem:[#allocation4 + $0x38] sm:$0xf] %vm791_vm0, %v7861_v14  ;;  %v6702_v4 = vmax.f32 %v6677_v10, 0.0 }
 0x4f0   : > { %v7862_v50 = vpack.c.bf16 %v6702_v4, %v6702_v4 }
 0x4f2   : > { %v8090_v43 = vpop.f32.mrf.mxu1  ;;  %6788 = vst.msk [vmem:[#allocation4 + $0x3c] sm:$0xf] %vm791_vm0, %v7862_v50 }
 0x4f4   : > { %v8091_v34 = vpop.f32.mrf.mxu1  ;;  %v6681_v0 = vpop.f32.mrf.mxu0 }
 0x4f5   : > { %v8092_v57 = vadd.f32 %v8091_v34, %v8090_v43  ;;  %v7045_v22 = vld [vmem:[#allocation4 + $0x38] sm:$0x4]  ;;  %v6790_v34 = vld [vmem:[#allocation4] sm:$0x1]  ;;  %v7000_v29 = vld [vmem:[#allocation4 + $0x38] sm:$0x2] }
 0x4f6   : > { %v8093_v59 = vpop.f32.mrf.mxu1  ;;  %v8232_v33 = vpop.f32.mrf.mxu0  ;;  %v7781_v24 = vrot.slane %v7045_v22, 9  ;;  %v7052_v63 = vshrl.u32 %v7045_v22, 16  ;;  %v6792_v19 = vshrl.u32 %v6790_v34, 16 }
 0x4f7   : > { %v6578_v38 = vadd.f32 %v8092_v57, %v12469_v39  ;;  %v6968_v57 = vshrl.u32 %v6966_v23, 16  ;;  %v6974_v59 = vld [vmem:[#allocation4 + $0x24] sm:$0x8] }
 0x4f8   : > { %v8094_v32 = vpop.f32.mrf.mxu1  ;;  %v6684_v16 = vpop.f32.mrf.mxu0  ;;  %v7050_v13 = vmax.bf16 %v7781_v24, %v7044_v41  ;;  %v7782_v42 = vrot.slane %v7052_v63, 9  ;;  %v6797_v6 = vmax.bf16 %v6792_v19, %v6790_v34  ;;  %v6981_v33 = vshrl.u32 %v6974_v59, 16  ;;  %v6987_v24 = vld [vmem:[#allocation4 + $0x34] sm:$0x4]  ;;  %v7228_v34 = vld [vmem:[%s12690_s6] sm:$0x1] }
 0x4f9   : > { %v6682_v7 = vadd.f32 %v6681_v0, %v6578_v38  ;;  %v7077_v61 = vld [vmem:[#allocation4 + $0x3c] sm:$0x1]  ;;  %v7088_v17 = vld [vmem:[#allocation4 + $0x3c] sm:$0x8]  ;;  %v7120_v3 = vld [vmem:[#allocation4 + $0x3c] sm:$0x2]  ;;  %v6973_v22 = vmax.bf16 %v6968_v57, %v6966_v23 }
 0x4fa   : > { %v8233_v44 = vpop.f32.mrf.mxu0  ;;  %v7057_v48 = vmax.bf16 %v7782_v42, %v7050_v13  ;;  %v7079_v27 = vrot.slane %v7077_v61, 6  ;;  %v7083_v39 = vshrl.u32 %v7077_v61, 16  ;;  %v7095_v54 = vshrl.u32 %v7088_v17, 16  ;;  %v6798_v0 = vld [vmem:[#allocation4] sm:$0x8] }
 0x4fb   : > { %v6703_v56 = vmax.f32 %v6682_v7, 0.0  ;;  %v7784_v35 = vrot.slane %v7088_v17, 9  ;;  %v7122_v14 = vrot.slane %v7120_v3, 6  ;;  %v7126_v10 = vshrl.u32 %v7120_v3, 16 }
 0x4fc   : > { %v7790_v36 = vcombine.low %v7057_v48, %v7057_v48  ;;  %v7081_v11 = vmax.bf16 %v7079_v27, %v7076_v20  ;;  %v7085_v31 = vrot.slane %v7083_v39, 6  ;;  %v7785_v53 = vrot.slane %v7095_v54, 9  ;;  %v7147_v27 = vpop.permute.xlu1 %7146 }
 0x4fd   : > { %v7863_v62 = vpack.c.bf16 %v6703_v56, %v6703_v56  ;;  %v7124_v4 = vmax.bf16 %v7122_v14, %v7119_v26  ;;  %v7128_v45 = vrot.slane %v7126_v10, 6  ;;  %v7756_v52 = vrot.slane %v6798_v0, 11  ;;  %v6824_v56 = vld [vmem:[#allocation4 + $0x14] sm:$0x2] }
 0x4fe   : > { %v7163_v55 = vrot.slane %v7790_v36, 1  ;;  %v7087_v40 = vmax.bf16 %v7085_v31, %v7081_v11  ;;  %v6805_v46 = vshrl.u32 %v6798_v0, 16  ;;  %v7772_v38 = vrot.slane %v6974_v59, 11 }
 0x4ff   : > { %6789 = vst.msk [vmem:[#allocation4 + $0x40] sm:$0xf] %vm791_vm0, %v7863_v62  ;;  %v7130_v50 = vmax.bf16 %v7128_v45, %v7124_v4  ;;  %v6803_v41 = vmax.bf16 %v7756_v52, %v6797_v6  ;;  %v7758_v32 = vrot.slane %v6811_v2, 10  ;;  %v7774_v7 = vrot.slane %v6987_v24, 10  ;;  %v8465_v45 = vld [vmem:[%s12691_s7 + $0x38] sm:$0xff]  }
 0x500   : > { %7164 = vrot.lane.b32.xlu0 %v7163_v55, %s8540_s21  ;;  %v7093_v8 = vmax.bf16 %v7784_v35, %v7087_v40  ;;  %v6979_v63 = vmax.bf16 %v7772_v38, %v6973_v22  ;;  %v7757_v28 = vrot.slane %v6805_v46, 11  ;;  %v6994_v16 = vshrl.u32 %v6987_v24, 16 }
 0x501   : > { %v7773_v13 = vrot.slane %v6981_v33, 11  ;;  %v7759_v61 = vrot.slane %v6818_v12, 10  ;;  %v7776_v39 = vrot.slane %v7000_v29, 9  ;;  %v7007_v54 = vshrl.u32 %v7000_v29, 16 }
 0x502   : > { %v7100_v58 = vmax.bf16 %v7785_v53, %v7093_v8  ;;  %v6810_v42 = vmax.bf16 %v7757_v28, %v6803_v41  ;;  %v7775_v44 = vrot.slane %v6994_v16, 10  ;;  %v7760_v9 = vrot.slane %v6824_v56, 9  ;;  %v7153_v36 = vpop.permute.xlu1 %7152 }
 0x503   : > { %v6986_v20 = vmax.bf16 %v7773_v13, %v6979_v63  ;;  %v6831_v49 = vshrl.u32 %v6824_v56, 16  ;;  %v7777_v11 = vrot.slane %v7007_v54, 9  ;;  %vm7178_vm0 = vcmask 261120  }
 0x504   : > { %v7791_v18 = vcombine.low %v7100_v58, %v7100_v58  ;;  %v6816_v17 = vmax.bf16 %v7758_v32, %v6810_v42 }
 0x505   : > { %v6992_v48 = vmax.bf16 %v7774_v7, %v6986_v20  ;;  %v7761_v35 = vrot.slane %v6831_v49, 9 }
 0x506   : > { %v7131_v51 = vld [vmem:[#allocation4 + $0x40] sm:$0x1]  ;;  %v7169_v25 = vrot.slane %v7791_v18, 2  ;;  %v6823_v3 = vmax.bf16 %v7759_v61, %v6816_v17  ;;  %v7159_v8 = vpop.permute.xlu1 %7158 }
 0x507   : > { %v7133_v15 = vrot.slane %v7131_v51, 5  ;;  %v7137_v43 = vshrl.u32 %v7131_v51, 16  ;;  %v6999_v21 = vmax.bf16 %v7775_v44, %v6992_v48 }
 0x508   : > { %7170 = vrot.lane.b32.xlu0 %v7169_v25, %s8541_s22  ;;  %v6829_v55 = vmax.bf16 %v7760_v9, %v6823_v3 }
 0x509   : > { %v7135_v60 = vmax.bf16 %v7133_v15, %v7130_v50  ;;  %v7139_v37 = vrot.slane %v7137_v43, 5  ;;  %v7005_v31 = vmax.bf16 %v7776_v39, %v6999_v21  ;;  %v8466_v50 = vld [vmem:[%s12691_s7 + $0x30] sm:$0xff]   ;;  %v8467_v15 = vld [vmem:[%s12691_s7 + $0x28] sm:$0xff]   ;;  %v8468_v43 = vld [vmem:[%s12691_s7 + $0x20] sm:$0xff]  }
 0x50a   : > { %v6836_v10 = vmax.bf16 %v7761_v35, %v6829_v55 }
 0x50b   : > { %v7141_v1 = vmax.bf16 %v7139_v37, %v7135_v60  ;;  %v7012_v14 = vmax.bf16 %v7777_v11, %v7005_v31  ;;  %v8469_v60 = vld [vmem:[%s12691_s7 + $0x18] sm:$0xff]   ;;  %v8470_v37 = vld [vmem:[%s12691_s7 + $0x10] sm:$0xff]  }
 0x50c   : > { %v7181_v26 = vsel %vm7178_vm0, %v6836_v10, %v7147_v27 }
 0x50d   : > { %v7792_v30 = vcombine.low %v7141_v1, %v7141_v1  ;;  %v7184_v18 = vsel %vm7182_vm5, %v7181_v26, %v7153_v36  ;;  %v8471_v1 = vld [vmem:[%s12691_s7 + $0x8] sm:$0xff]  }
 0x50e   : > { %v7186_v25 = vsel %vm6243_vm1, %v7184_v18, %v7159_v8 }
 0x50f   : > { %v7175_v5 = vrot.slane %v7792_v30, 3  ;;  %v8472_v30 = vld [vmem:[%s12691_s7] sm:$0xff]  }
 0x511   : > { %7176 = vrot.lane.b32.xlu0 %v7175_v5, %s8542_s23  ;;  %s12643_s23 = scalar_lea.hbm %s12693_s9, %s7817_s14 }
 0x572   : > { %v7165_v62 = vpop.permute.xlu0 %7164 }
 0x573   : > { %v7190_v53 = vsel %vm7178_vm0, %v7012_v14, %v7165_v62 }
 0x57a   : > { %v7171_v40 = vpop.permute.xlu0 %7170 }
 0x57b   : > { %v7192_v58 = vsel %vm7182_vm5, %v7190_v53, %v7171_v40 }
 0x583   : > { %v7177_v4 = vpop.permute.xlu0 %7176 }
 0x584   : > { %v7194_v51 = vsel %vm6243_vm1, %v7192_v58, %v7177_v4 }
 0x585   : > { %7357 = vmatprep.mubr.bf16.mxu1 %v7194_v51 }
 0x586   : > { %7358 = vmatmul.mubr.bf16.vlgmr.msra.gmra.mxu1 %v7186_v25 }
 0x587   : > { %8235 = vmatpush3.bf16.msra.mxu1 %v8465_v45  ;;  %8250 = vmatprep.mubr.msk.bf16.mxu1 %vm8544_vm13, %v8543_v47 }
 0x588   : > { %8236 = vmatprep.subr.bf16.mxu1 %v8543_v47 }
 0x58b   : > { %8237 = vmatpush3.bf16.msra.mxu1 %v8466_v50 }
 0x58c   : > { %8238 = vmatprep.subr.bf16.mxu1 %v8543_v47 }
 0x58f   : > { %8239 = vmatpush3.bf16.msra.mxu1 %v8467_v15 }
 0x590   : > { %8240 = vmatprep.subr.bf16.mxu1 %v8543_v47 }
 0x593   : > { %8241 = vmatpush3.bf16.msra.mxu1 %v8468_v43 }
 0x594   : > { %8242 = vmatprep.subr.bf16.mxu1 %v8543_v47 }
 0x597   : > { %8243 = vmatpush3.bf16.msra.mxu1 %v8469_v60 }
 0x598   : > { %8244 = vmatprep.subr.bf16.mxu1 %v8543_v47 }
 0x59b   : > { %8245 = vmatpush3.bf16.msra.mxu1 %v8470_v37 }
 0x59c   : > { %8246 = vmatprep.subr.bf16.mxu1 %v8543_v47 }
 0x59f   : > { %8247 = vmatpush3.bf16.msra.mxu1 %v8471_v1 }
 0x5a0   : > { %8248 = vmatprep.subr.bf16.mxu1 %v8543_v47  ;;  %v7383_v47 = vld [vmem:[%s12692_s8] sm:$0x1] }
 0x5a3   : > { %8249 = vmatpush3.bf16.msra.mxu1 %v8472_v30 }
 0x646   : > { %v8127_v5 = vpop.f32.mrf.mxu1 }
 0x648   : > { %v8128_v23 = vpop.f32.mrf.mxu1 }
 0x649   : > { %v8129_v19 = vadd.f32 %v8128_v23, %v8127_v5 }
 0x64a   : > { %v8130_v57 = vpop.f32.mrf.mxu1 }
 0x64b   : > { %v7360_v0 = vadd.f32 %v8129_v19, %v7228_v34 }
 0x64c   : > { %v8131_v6 = vpop.f32.mrf.mxu1 }
 0x64d   : > { %v7365_v59 = vmax.f32 %v7360_v0, 0.0 }
 0x64f   : > { %v7366_v22 = vpack.c.bf16 %v7365_v59, %v7365_v59 }
 0x651   : > { %8251 = vmatmul.mubr.bf16.vlgmr.msra.gmra.mxu1 %v7366_v22 }
 0x711   : > { %v7466_v52 = vpop.f32.mrf.mxu1 }
 0x712   : > { %v7467_v46 = vadd.f32 %v7466_v52, %v7383_v47 }
 0x713   : > { %v8252_v2 = vpop.f32.mrf.mxu1 }
 0x714   : > { %7472 = vst [vmem:[%s324_s17] sm:$0x1] %v7467_v46 }
 0x715   : > { %v7469_v38 = vpop.f32.mrf.mxu1 }
 0x716   : > { %8491 = shalt.err (!%p8488_p3)
}
 0x717   : > { %s8492_s29 = scalar_lea.hbm %s12643_s23, 16  ;;  %s8496_s17 = scalar_lea.hbm %s12693_s9, 32 }
 0x718   : > { %p8493_p4 = scmp.ne.s32.totalorder %s12643_s23, %s8492_s29  ;;  %p8497_p9 = scmp.lt.s32.totalorder %s12643_s23, %s12693_s9 }
 0x719   : > { %p8498_p10 = scmp.lt.s32.totalorder %s8496_s17, %s8492_s29 }
 0x71a   : > { %p8494_p7 = pnand %p8493_p4, %p8635_p5 }
 0x71b   : > { %p8499_p11 = por %p8498_p10, %p8497_p9 }
 0x71c   : > { %p8495_p8 = pneg %p8494_p7 }
 0x71e   : > { %p8500_p12 = pnand %p8499_p11, %p8495_p8 }
 0x720   : > { %8503 = shalt.err (!%p8500_p12)
}
 0x721   : > { %8255 = dma.vmem_to_hbm [thread:$0]  (%p8635_p5), %s12645_s16, 16, %s12643_s23, %s7474_s24   ;;  %v8253_v33 = vpop.f32.mrf.mxu1 }
 0x722 PF: > { %p8261_p13 = scmp.ge.s32.totalorder %s8538_s12, 2  ;;  %s7498_s25 = sand.u32 1, %s8526_s30  }
 0x723   : > { %s7499_s13 = scalar_lea.sflag [#allocation6], %s7498_s25 }
 0x724   : > { %p8258_p0 = pnand %p8261_p13, %p8639_p6 }
 0x726   : > { %p8259_p1 = pneg %p8258_p0 }
 0x728   : > { %8521 = dma.done.wait (%p8259_p1), %s7499_s13, 16  }
 0x729   : > { %8523 = vsyncadd (%p8259_p1), %s7499_s13, 4294967280  ;;  %p19_p2 = scmp.ge.s32.totalorder %s8622_s15, 4   ;;  %s12910_s30 = smov %s8530_s10 }
 0x72a   : > { %s12911_s10 = smov %s8534_s11  ;;  %s12912_s11 = smov %s8633_s18 }
 0x72b   : > { %s12913_s12 = smov %s8622_s15  ;;  %21 = sbr.rel (!%p19_p2) target bundleno = 3 (0x3), region = 91 }
 0x730   :  { %7503 = vsyncpa [#allocation6], 1 }
 0x731   :  { %7505 = vsyncpa [#allocation6 + $0x1], 1 }

</bundles_post_ra>
